<compile_context>
chip_gen: v7x
topology: tpu7x:2x2x1
jax: 0.10.0
libtpu: 0.0.40
codegen_flags: <defaults>
</compile_context>

<pallas_src>
import math
import functools

import jax
import jax.numpy as jnp
from jax.experimental import pallas as pl
from jax.experimental.pallas import tpu as pltpu


# ----------------------------- elementwise helpers -----------------------------
def _erf(x):
    # Abramowitz & Stegun 7.1.26 polynomial erf approximation (|err| < 1.5e-7),
    # built only from exp + arithmetic so it lowers cleanly on Mosaic.
    a1, a2, a3, a4, a5 = 0.254829592, -0.284496736, 1.421413741, -1.453152027, 1.061405429
    p = 0.3275911
    s = jnp.where(x >= 0.0, 1.0, -1.0)
    z = jnp.abs(x)
    t = 1.0 / (1.0 + p * z)
    poly = ((((a5 * t + a4) * t + a3) * t + a2) * t + a1) * t
    return s * (1.0 - poly * jnp.exp(-z * z))


def _gelu(x):
    # exact (erf) GELU, matching torch.nn.GELU() default
    return 0.5 * x * (1.0 + _erf(x * (1.0 / math.sqrt(2.0))))


def _layernorm(x, g, b, eps=1e-5):
    mu = jnp.mean(x, axis=-1, keepdims=True)
    var = jnp.mean((x - mu) * (x - mu), axis=-1, keepdims=True)
    return (x - mu) * jax.lax.rsqrt(var + eps) * g + b


# --------------------------------- the kernel ----------------------------------
def _encoder_kernel(n_head, use_bf16,
                    x_ref,                       # (TB, L, D)
                    ln_g, ln_b,                  # (1, D), (1, D)              f32
                    wqkv, bqkv,                  # (2, D, 3D) bf16, (2, 1, 3D) f32   [k|q|v]
                    wproj, bproj,                # (2, D, D)  bf16, (2, 1, D)  f32
                    mw, mb,                      # (2, D, D)  bf16, (2, 1, D)  f32
                    hw1, hb1,                    # (D, D)     bf16, (1, D)     f32
                    hw2r, hb2,                   # (1, D)     bf16, (1, 1)     f32  (hw2^T)
                    ow, ob,                      # (D, 3)     bf16, (1, 3)     f32
                    out_ref):                    # (TB, 4L)   [v | m0 | m1 | m2] per token
    TB, L, D = x_ref.shape
    N = TB * L
    Dh = D // n_head

    def cast(a):                                  # activations -> bf16 MXU operands
        return a.astype(jnp.bfloat16) if use_bf16 else a

    def mm(a, w):                                 # MXU matmul, f32 accumulation
        return jnp.dot(cast(a), w[...] if hasattr(w, 'shape') else w,
                       preferred_element_type=jnp.float32)

    def softmax_last(s):
        m = jnp.max(s, axis=-1, keepdims=True)
        e = jnp.exp(s - m)
        denom = jnp.sum(e, axis=-1, keepdims=True)
        return e * pl.reciprocal(denom, approx=True)   # EUP reciprocal, VALU stays free

    def attn(x2d, bi):
        # fused K|Q|V projection (scale already folded into the Q columns/bias)
        qkv = mm(x2d, wqkv[bi]) + bqkv[bi]             # (N, 3D) f32
        qkv3 = cast(qkv).reshape(TB, L, 3 * D)         # heads live in lanes

        def stack_heads(base):                         # -> (H*TB, L, Dh), head-major batch
            return jnp.concatenate(
                [qkv3[:, :, base + h * Dh: base + (h + 1) * Dh] for h in range(n_head)],
                axis=0)

        k_hb = stack_heads(0)
        q_hb = stack_heads(D)
        v_hb = stack_heads(2 * D)

        # one score einsum / one softmax / one att@V einsum for ALL heads and samples
        att = jnp.einsum('bld,bmd->blm', q_hb, k_hb,
                         preferred_element_type=jnp.float32)       # (H*TB, L, L)
        att = softmax_last(att)
        y = jnp.einsum('blm,bmd->bld', cast(att), v_hb,
                       preferred_element_type=jnp.float32)         # (H*TB, L, Dh)

        # heads back to lanes (== torch transpose(1,2).view(B,L,D)), then ONE K=D projection
        y_cat = jnp.concatenate(
            [y[h * TB:(h + 1) * TB].reshape(N, Dh) for h in range(n_head)], axis=-1)
        return mm(y_cat, wproj[bi]) + bproj[bi]

    def encode_block(x2d, bi):
        x2d = x2d + attn(x2d, bi)                                  # residual + attention
        x2d = x2d + _gelu(mm(x2d, mw[bi]) + mb[bi])                # residual + mlp
        return x2d

    x = x_ref[...].reshape(N, D)                                   # (TB*L, D) f32
    x = _gelu(_layernorm(x, ln_g[...], ln_b[...]))                 # obs_encoder
    x = encode_block(x, 0)                                         # blocks1
    h = _gelu(mm(x, hw1[...]) + hb1[...])                          # head MLP
    # D -> 1 projection as a VPU reduction (f32 products of bf16-rounded inputs == MXU path)
    v_loc = jnp.sum(cast(h).astype(jnp.float32) * hw2r[...].astype(jnp.float32),
                    axis=-1, keepdims=True) + hb2[...]             # (N, 1)
    x = encode_block(x, 1)                                         # blocks2
    means = mm(x, ow[...]) + ob[...]                               # (N, 3)

    # lane-dense output assembly: (N,4) -> (TB, L, 4) (free split) -> (TB, 4L) via lane concat
    out4 = jnp.concatenate([v_loc, means], axis=-1).reshape(TB, L, 4)
    out_ref[...] = jnp.concatenate([out4[:, l, :] for l in range(L)], axis=-1)


# --------------------------------- wrapper --------------------------------------
def _pick_batch_tile(B, target):
    """Largest divisor TB of B with TB<=target that keeps the (TB, 4L) output block legal
    (TB % 8 == 0, or TB == B), preferring an even grid >= 2 (v7x: 2 TCs share the grid axis)."""
    target = max(1, min(target, B))
    legal = [t for t in range(1, target + 1) if B % t == 0 and (t % 8 == 0 or t == B)]
    if not legal:
        return B                              # degenerate odd batch: single full tile
    even = [t for t in legal if (B // t) % 2 == 0]
    pool = even if even else legal
    return max(pool)


def _pack_params(params, n_head, use_bf16):
    (ln_g, ln_b, aw, ab, mw, mb, hw1, hb1, hw2, hb2, ow, ob) = params
    D = aw.shape[-1]
    scale = 1.0 / math.sqrt(D // n_head)
    wq = aw[:, 1] * scale                                             # fold 1/sqrt(Dh) into Q
    bq = ab[:, 1] * scale
    wqkv = jnp.concatenate([aw[:, 0], wq, aw[:, 2]], axis=-1)         # (2, D, 3D)  [k|q|v]
    bqkv = jnp.concatenate([ab[:, 0], bq, ab[:, 2]], axis=-1)         # (2, 1, 3D)
    wproj, bproj = aw[:, 3], ab[:, 3]                                 # (2, D, D), (2, 1, D)
    hw2r = hw2.T                                                      # (1, D)
    mw_, hw1_, ow_ = mw, hw1, ow
    if use_bf16:                                                      # pre-cast matmul weights
        bf = lambda a: a.astype(jnp.bfloat16)
        wqkv, wproj, mw_, hw1_, hw2r, ow_ = map(bf, (wqkv, wproj, mw_, hw1_, hw2r, ow_))
    return (ln_g, ln_b, wqkv, bqkv, wproj, bproj, mw_, mb, hw1_, hb1, hw2r, hb2, ow_, ob)


def transformer_encoder_forward(obs, params, n_head, *, batch_tile=512, use_bf16=True):
    """Returns (v_loc (B,L,1), means[:, :6]) exactly as the torch forward does."""
    B, L, D = obs.shape
    assert params[2].shape[-1] == D and D % n_head == 0
    packed = _pack_params(params, n_head, use_bf16)

    TB = _pick_batch_tile(B, batch_tile)
    grid = (B // TB,)

    in_specs = [pl.BlockSpec((TB, L, D), lambda b: (b, 0, 0))]
    for p in packed:   # weights: full-shape blocks, constant index -> stay resident
        nd = p.ndim
        in_specs.append(pl.BlockSpec(p.shape, (lambda nd_: (lambda b: (0,) * nd_))(nd)))

    out_shape = jax.ShapeDtypeStruct((B, 4 * L), jnp.float32)          # lane-dense output
    out_specs = pl.BlockSpec((TB, 4 * L), lambda b: (b, 0))

    kernel = functools.partial(_encoder_kernel, n_head, use_bf16)
    out = pl.pallas_call(
        kernel,
        grid=grid,
        in_specs=in_specs,
        out_specs=out_specs,
        out_shape=out_shape,
        compiler_params=pltpu.CompilerParams(
            dimension_semantics=("parallel",),
            vmem_limit_bytes=48 * 1024 * 1024),
    )(obs, *packed)

    out = out.reshape(B, L, 4)
    v_loc = out[..., 0:1]
    means = out[..., 1:4]
    return v_loc, means[:, :6]     # torch slices the first 6 tokens


# ---------------------------- deterministic params -------------------------------
def init_params(key, D):
    ks = jax.random.split(key, 10)

    def w(k, shape):
        return jax.random.normal(k, shape, jnp.float32) * 0.1

    ln_g = 1.0 + 0.1 * jax.random.normal(ks[0], (1, D), jnp.float32)
    ln_b = 0.1 * jax.random.normal(ks[1], (1, D), jnp.float32)
    aw = w(ks[2], (2, 4, D, D))        # per block: [key, query, value, proj], (in, out)
    ab = w(ks[3], (2, 4, 1, D))
    mw = w(ks[4], (2, D, D))           # mlp Linear(n_embd, n_embd)
    mb = w(ks[5], (2, 1, D))
    hw1, hb1 = w(ks[6], (D, D)), w(ks[7], (1, D))
    hw2, hb2 = w(ks[8], (D, 1)), jnp.zeros((1, 1), jnp.float32)
    ow, ob = w(ks[9], (D, 3)), jnp.zeros((1, 3), jnp.float32)
    return (ln_g, ln_b, aw, ab, mw, mb, hw1, hb1, hw2, hb2, ow, ob)


# ------------------------------ pure-JAX reference -------------------------------
def reference_forward(obs, params, n_head, bf16_mm=False):
    ln_g, ln_b, aw, ab, mw, mb, hw1, hb1, hw2, hb2, ow, ob = params
    B, L, D = obs.shape
    Dh = D // n_head
    c = (lambda a: a.astype(jnp.bfloat16)) if bf16_mm else (lambda a: a)

    def mm(a, b):
        return jnp.dot(c(a), c(b), preferred_element_type=jnp.float32)

    def ein(s, a, b):
        return jnp.einsum(s, c(a), c(b), preferred_element_type=jnp.float32)

    def attn(x, bi):
        k = mm(x, aw[bi, 0]) + ab[bi, 0]
        q = mm(x, aw[bi, 1]) + ab[bi, 1]
        v = mm(x, aw[bi, 2]) + ab[bi, 2]
        split = lambda t: t.reshape(B, L, n_head, Dh).transpose(0, 2, 1, 3)
        qh, kh, vh = split(q), split(k), split(v)
        att = ein('bhld,bhmd->bhlm', qh, kh) / math.sqrt(Dh)
        att = jax.nn.softmax(att, axis=-1)
        y = ein('bhlm,bhmd->bhld', att, vh).transpose(0, 2, 1, 3).reshape(B, L, D)
        return mm(y, aw[bi, 3]) + ab[bi, 3]

    def block(x, bi):
        x = x + attn(x, bi)
        x = x + _gelu(mm(x, mw[bi]) + mb[bi])
        return x

    x = _gelu(_layernorm(obs, ln_g, ln_b))
    x = block(x, 0)
    v_loc = mm(_gelu(mm(x, hw1) + hb1), hw2) + hb2
    x = block(x, 1)
    means = mm(x, ow) + ob
    return v_loc, means[:, :6]


if __name__ == "__main__":
    B, L, D, H = 16, 8, 32, 4          # batch, n_tokens, n_embd == obs_dim, n_head
    key = jax.random.PRNGKey(0)
    kx, kp = jax.random.split(key)
    obs = jax.random.normal(kx, (B, L, D), jnp.float32)
    params = init_params(kp, D)

    v_loc, means = transformer_encoder_forward(obs, params, H)   # bf16 MXU path, grid=(2,)
    jax.block_until_ready((v_loc, means))
    assert v_loc.shape == (B, L, 1) and means.shape == (B, 6, 3)

    # (1) semantics check vs. pure f32 reference — tolerance sized for bf16 MXU operands
    v_ref, m_ref = reference_forward(obs, params, H, bf16_mm=False)
    assert jnp.allclose(v_loc, v_ref, atol=3e-2, rtol=3e-2)
    assert jnp.allclose(means, m_ref, atol=3e-2, rtol=3e-2)

    # (2) tighter check vs. a reference that applies the same bf16 operand rounding
    #     (residual differences: folded Q scale, approx softmax reciprocal, VPU hw2 path)
    v_bref, m_bref = reference_forward(obs, params, H, bf16_mm=True)
    assert jnp.allclose(v_loc, v_bref, atol=1e-2, rtol=1e-2)
    assert jnp.allclose(means, m_bref, atol=1e-2, rtol=1e-2)

    print("KERNEL_OK")
</pallas_src>

<mosaic_0001>
module attributes {stable_mosaic.version = 11 : i64} {
  func.func @_encoder_kernel(%arg0: i32, %arg1: memref<8x8x32xf32, #tpu.memory_space<vmem>>, %arg2: memref<1x32xf32, #tpu.memory_space<vmem>>, %arg3: memref<1x32xf32, #tpu.memory_space<vmem>>, %arg4: memref<2x32x96xbf16, #tpu.memory_space<vmem>>, %arg5: memref<2x1x96xf32, #tpu.memory_space<vmem>>, %arg6: memref<2x32x32xbf16, #tpu.memory_space<vmem>>, %arg7: memref<2x1x32xf32, #tpu.memory_space<vmem>>, %arg8: memref<2x32x32xbf16, #tpu.memory_space<vmem>>, %arg9: memref<2x1x32xf32, #tpu.memory_space<vmem>>, %arg10: memref<32x32xbf16, #tpu.memory_space<vmem>>, %arg11: memref<1x32xf32, #tpu.memory_space<vmem>>, %arg12: memref<1x32xbf16, #tpu.memory_space<vmem>>, %arg13: memref<1x1xf32, #tpu.memory_space<vmem>>, %arg14: memref<32x3xbf16, #tpu.memory_space<vmem>>, %arg15: memref<1x3xf32, #tpu.memory_space<vmem>>, %arg16: memref<8x32xf32, #tpu.memory_space<vmem>>) attributes {dimension_semantics = [#tpu.dimension_semantics<parallel>], iteration_bounds = array<i64: 2>, scalar_prefetch = 0 : i64, scratch_operands = 0 : i64, tpu.core_type = #tpu.core_type<tc>, window_params = [{transform_indices = @transform_0, window_bounds = array<i64: 8, 8, 32>}, {pipeline_mode = #tpu.pipeline_mode<synchronous>, transform_indices = @transform_1, window_bounds = array<i64: 1, 32>}, {pipeline_mode = #tpu.pipeline_mode<synchronous>, transform_indices = @transform_2, window_bounds = array<i64: 1, 32>}, {pipeline_mode = #tpu.pipeline_mode<synchronous>, transform_indices = @transform_3, window_bounds = array<i64: 2, 32, 96>}, {pipeline_mode = #tpu.pipeline_mode<synchronous>, transform_indices = @transform_4, window_bounds = array<i64: 2, 1, 96>}, {pipeline_mode = #tpu.pipeline_mode<synchronous>, transform_indices = @transform_5, window_bounds = array<i64: 2, 32, 32>}, {pipeline_mode = #tpu.pipeline_mode<synchronous>, transform_indices = @transform_6, window_bounds = array<i64: 2, 1, 32>}, {pipeline_mode = #tpu.pipeline_mode<synchronous>, transform_indices = @transform_7, window_bounds = array<i64: 2, 32, 32>}, {pipeline_mode = #tpu.pipeline_mode<synchronous>, transform_indices = @transform_8, window_bounds = array<i64: 2, 1, 32>}, {pipeline_mode = #tpu.pipeline_mode<synchronous>, transform_indices = @transform_9, window_bounds = array<i64: 32, 32>}, {pipeline_mode = #tpu.pipeline_mode<synchronous>, transform_indices = @transform_10, window_bounds = array<i64: 1, 32>}, {pipeline_mode = #tpu.pipeline_mode<synchronous>, transform_indices = @transform_11, window_bounds = array<i64: 1, 32>}, {pipeline_mode = #tpu.pipeline_mode<synchronous>, transform_indices = @transform_12, window_bounds = array<i64: 1, 1>}, {pipeline_mode = #tpu.pipeline_mode<synchronous>, transform_indices = @transform_13, window_bounds = array<i64: 32, 3>}, {pipeline_mode = #tpu.pipeline_mode<synchronous>, transform_indices = @transform_14, window_bounds = array<i64: 1, 3>}, {transform_indices = @transform_15, window_bounds = array<i64: 8, 32>}]} {
    %c0 = arith.constant 0 : index
    %c0_0 = arith.constant 0 : index
    %c0_1 = arith.constant 0 : index
    %0 = vector.load %arg1[%c0, %c0_0, %c0_1] : memref<8x8x32xf32, #tpu.memory_space<vmem>>, vector<8x8x32xf32>
    %1 = vector.shape_cast %0 : vector<8x8x32xf32> to vector<64x32xf32>
    %c0_2 = arith.constant 0 : index
    %c0_3 = arith.constant 0 : index
    %2 = vector.load %arg2[%c0_2, %c0_3] : memref<1x32xf32, #tpu.memory_space<vmem>>, vector<1x32xf32>
    %c0_4 = arith.constant 0 : index
    %c0_5 = arith.constant 0 : index
    %3 = vector.load %arg3[%c0_4, %c0_5] : memref<1x32xf32, #tpu.memory_space<vmem>>, vector<1x32xf32>
    %cst = arith.constant dense<0.000000e+00> : vector<64xf32>
    %4 = vector.multi_reduction <add>, %1, %cst [1] : vector<64x32xf32> to vector<64xf32>
    %5 = vector.shape_cast %4 : vector<64xf32> to vector<64x1xf32>
    %cst_6 = arith.constant 3.200000e+01 : f32
    %6 = vector.broadcast %cst_6 : f32 to vector<64x1xf32>
    %7 = arith.divf %5, %6 : vector<64x1xf32>
    %8 = vector.broadcast %7 : vector<64x1xf32> to vector<64x32xf32>
    %9 = arith.subf %1, %8 : vector<64x32xf32>
    %10 = vector.broadcast %7 : vector<64x1xf32> to vector<64x32xf32>
    %11 = arith.subf %1, %10 : vector<64x32xf32>
    %12 = arith.mulf %9, %11 : vector<64x32xf32>
    %cst_7 = arith.constant dense<0.000000e+00> : vector<64xf32>
    %13 = vector.multi_reduction <add>, %12, %cst_7 [1] : vector<64x32xf32> to vector<64xf32>
    %14 = vector.shape_cast %13 : vector<64xf32> to vector<64x1xf32>
    %cst_8 = arith.constant 3.200000e+01 : f32
    %15 = vector.broadcast %cst_8 : f32 to vector<64x1xf32>
    %16 = arith.divf %14, %15 : vector<64x1xf32>
    %17 = vector.broadcast %7 : vector<64x1xf32> to vector<64x32xf32>
    %18 = arith.subf %1, %17 : vector<64x32xf32>
    %cst_9 = arith.constant 9.99999974E-6 : f32
    %19 = vector.broadcast %cst_9 : f32 to vector<64x1xf32>
    %20 = arith.addf %16, %19 : vector<64x1xf32>
    %21 = math.rsqrt %20 : vector<64x1xf32>
    %22 = vector.broadcast %21 : vector<64x1xf32> to vector<64x32xf32>
    %23 = arith.mulf %18, %22 : vector<64x32xf32>
    %24 = vector.broadcast %2 : vector<1x32xf32> to vector<64x32xf32>
    %25 = arith.mulf %23, %24 : vector<64x32xf32>
    %26 = vector.broadcast %3 : vector<1x32xf32> to vector<64x32xf32>
    %27 = arith.addf %25, %26 : vector<64x32xf32>
    %cst_10 = arith.constant 5.000000e-01 : f32
    %28 = vector.broadcast %cst_10 : f32 to vector<64x32xf32>
    %29 = arith.mulf %28, %27 : vector<64x32xf32>
    %cst_11 = arith.constant 0.707106769 : f32
    %30 = vector.broadcast %cst_11 : f32 to vector<64x32xf32>
    %31 = arith.mulf %27, %30 : vector<64x32xf32>
    %cst_12 = arith.constant 0.000000e+00 : f32
    %32 = vector.broadcast %cst_12 : f32 to vector<64x32xf32>
    %33 = arith.cmpf oge, %31, %32 : vector<64x32xf32>
    %cst_13 = arith.constant 1.000000e+00 : f32
    %cst_14 = arith.constant -1.000000e+00 : f32
    %34 = vector.broadcast %cst_13 : f32 to vector<64x32xf32>
    %35 = vector.broadcast %cst_14 : f32 to vector<64x32xf32>
    %36 = arith.select %33, %34, %35 : vector<64x32xi1>, vector<64x32xf32>
    %37 = math.absf %31 : vector<64x32xf32>
    %cst_15 = arith.constant 0.327591091 : f32
    %38 = vector.broadcast %cst_15 : f32 to vector<64x32xf32>
    %39 = arith.mulf %38, %37 : vector<64x32xf32>
    %cst_16 = arith.constant 1.000000e+00 : f32
    %40 = vector.broadcast %cst_16 : f32 to vector<64x32xf32>
    %41 = arith.addf %40, %39 : vector<64x32xf32>
    %cst_17 = arith.constant 1.000000e+00 : f32
    %42 = vector.broadcast %cst_17 : f32 to vector<64x32xf32>
    %43 = arith.divf %42, %41 : vector<64x32xf32>
    %cst_18 = arith.constant 1.06140542 : f32
    %44 = vector.broadcast %cst_18 : f32 to vector<64x32xf32>
    %45 = arith.mulf %44, %43 : vector<64x32xf32>
    %cst_19 = arith.constant -1.45315206 : f32
    %46 = vector.broadcast %cst_19 : f32 to vector<64x32xf32>
    %47 = arith.addf %45, %46 : vector<64x32xf32>
    %48 = arith.mulf %47, %43 : vector<64x32xf32>
    %cst_20 = arith.constant 1.42141378 : f32
    %49 = vector.broadcast %cst_20 : f32 to vector<64x32xf32>
    %50 = arith.addf %48, %49 : vector<64x32xf32>
    %51 = arith.mulf %50, %43 : vector<64x32xf32>
    %cst_21 = arith.constant -0.284496725 : f32
    %52 = vector.broadcast %cst_21 : f32 to vector<64x32xf32>
    %53 = arith.addf %51, %52 : vector<64x32xf32>
    %54 = arith.mulf %53, %43 : vector<64x32xf32>
    %cst_22 = arith.constant 0.254829586 : f32
    %55 = vector.broadcast %cst_22 : f32 to vector<64x32xf32>
    %56 = arith.addf %54, %55 : vector<64x32xf32>
    %57 = arith.mulf %56, %43 : vector<64x32xf32>
    %cst_23 = arith.constant 0.000000e+00 : f32
    %58 = vector.broadcast %cst_23 : f32 to vector<64x32xf32>
    %59 = arith.subf %58, %37 : vector<64x32xf32>
    %60 = arith.mulf %59, %37 : vector<64x32xf32>
    %61 = math.exp %60 : vector<64x32xf32>
    %62 = arith.mulf %57, %61 : vector<64x32xf32>
    %cst_24 = arith.constant 1.000000e+00 : f32
    %63 = vector.broadcast %cst_24 : f32 to vector<64x32xf32>
    %64 = arith.subf %63, %62 : vector<64x32xf32>
    %65 = arith.mulf %36, %64 : vector<64x32xf32>
    %cst_25 = arith.constant 1.000000e+00 : f32
    %66 = vector.broadcast %cst_25 : f32 to vector<64x32xf32>
    %67 = arith.addf %66, %65 : vector<64x32xf32>
    %68 = arith.mulf %29, %67 : vector<64x32xf32>
    %c0_26 = arith.constant 0 : index
    %c0_27 = arith.constant 0 : index
    %c0_28 = arith.constant 0 : index
    %69 = vector.load %arg4[%c0_26, %c0_27, %c0_28] : memref<2x32x96xbf16, #tpu.memory_space<vmem>>, vector<1x32x96xbf16>
    %70 = vector.shape_cast %69 : vector<1x32x96xbf16> to vector<32x96xbf16>
    %71 = arith.truncf %68 : vector<64x32xf32> to vector<64x32xbf16>
    %cst_29 = arith.constant dense<0.000000e+00> : vector<64x96xf32>
    %72 = tpu.matmul %71, %70, %cst_29 {dimension_numbers = #tpu.dot_dimension_numbers<[1], [0], [0], [1], [0, 0, 1, 1], [], []>} : vector<64x32xbf16>, vector<32x96xbf16>, vector<64x96xf32> -> vector<64x96xf32>
    %c0_30 = arith.constant 0 : index
    %c0_31 = arith.constant 0 : index
    %c0_32 = arith.constant 0 : index
    %73 = vector.load %arg5[%c0_30, %c0_31, %c0_32] : memref<2x1x96xf32, #tpu.memory_space<vmem>>, vector<1x1x96xf32>
    %74 = vector.shape_cast %73 : vector<1x1x96xf32> to vector<1x96xf32>
    %75 = vector.broadcast %74 : vector<1x96xf32> to vector<64x96xf32>
    %76 = arith.addf %72, %75 : vector<64x96xf32>
    %77 = arith.truncf %76 : vector<64x96xf32> to vector<64x96xbf16>
    %78 = vector.shape_cast %77 : vector<64x96xbf16> to vector<8x8x96xbf16>
    %79 = vector.extract_strided_slice %78 {offsets = [0, 0, 0], sizes = [8, 8, 8], strides = [1, 1, 1]} : vector<8x8x96xbf16> to vector<8x8x8xbf16>
    %80 = vector.extract_strided_slice %78 {offsets = [0, 0, 8], sizes = [8, 8, 8], strides = [1, 1, 1]} : vector<8x8x96xbf16> to vector<8x8x8xbf16>
    %81 = vector.extract_strided_slice %78 {offsets = [0, 0, 16], sizes = [8, 8, 8], strides = [1, 1, 1]} : vector<8x8x96xbf16> to vector<8x8x8xbf16>
    %82 = vector.extract_strided_slice %78 {offsets = [0, 0, 24], sizes = [8, 8, 8], strides = [1, 1, 1]} : vector<8x8x96xbf16> to vector<8x8x8xbf16>
    %83 = tpu.concatenate %79, %80, %81, %82 in 0 : vector<8x8x8xbf16>, vector<8x8x8xbf16>, vector<8x8x8xbf16>, vector<8x8x8xbf16> -> vector<32x8x8xbf16>
    %84 = vector.extract_strided_slice %78 {offsets = [0, 0, 32], sizes = [8, 8, 8], strides = [1, 1, 1]} : vector<8x8x96xbf16> to vector<8x8x8xbf16>
    %85 = vector.extract_strided_slice %78 {offsets = [0, 0, 40], sizes = [8, 8, 8], strides = [1, 1, 1]} : vector<8x8x96xbf16> to vector<8x8x8xbf16>
    %86 = vector.extract_strided_slice %78 {offsets = [0, 0, 48], sizes = [8, 8, 8], strides = [1, 1, 1]} : vector<8x8x96xbf16> to vector<8x8x8xbf16>
    %87 = vector.extract_strided_slice %78 {offsets = [0, 0, 56], sizes = [8, 8, 8], strides = [1, 1, 1]} : vector<8x8x96xbf16> to vector<8x8x8xbf16>
    %88 = tpu.concatenate %84, %85, %86, %87 in 0 : vector<8x8x8xbf16>, vector<8x8x8xbf16>, vector<8x8x8xbf16>, vector<8x8x8xbf16> -> vector<32x8x8xbf16>
    %89 = vector.extract_strided_slice %78 {offsets = [0, 0, 64], sizes = [8, 8, 8], strides = [1, 1, 1]} : vector<8x8x96xbf16> to vector<8x8x8xbf16>
    %90 = vector.extract_strided_slice %78 {offsets = [0, 0, 72], sizes = [8, 8, 8], strides = [1, 1, 1]} : vector<8x8x96xbf16> to vector<8x8x8xbf16>
    %91 = vector.extract_strided_slice %78 {offsets = [0, 0, 80], sizes = [8, 8, 8], strides = [1, 1, 1]} : vector<8x8x96xbf16> to vector<8x8x8xbf16>
    %92 = vector.extract_strided_slice %78 {offsets = [0, 0, 88], sizes = [8, 8, 8], strides = [1, 1, 1]} : vector<8x8x96xbf16> to vector<8x8x8xbf16>
    %93 = tpu.concatenate %89, %90, %91, %92 in 0 : vector<8x8x8xbf16>, vector<8x8x8xbf16>, vector<8x8x8xbf16>, vector<8x8x8xbf16> -> vector<32x8x8xbf16>
    "tpu.trace_start"() <{level = 10 : i32, message = "bld,bmd->blm"}> : () -> ()
    %cst_33 = arith.constant dense<0.000000e+00> : vector<32x8x8xf32>
    %94 = tpu.matmul %88, %83, %cst_33 {dimension_numbers = #tpu.dot_dimension_numbers<[2], [2], [1], [1], [0, 0, 0, 1, 1, 1], [0], [0]>} : vector<32x8x8xbf16>, vector<32x8x8xbf16>, vector<32x8x8xf32> -> vector<32x8x8xf32>
    "tpu.trace_stop"() : () -> ()
    %cst_34 = arith.constant dense<0xFF800000> : vector<32x8xf32>
    %95 = vector.multi_reduction <maximumf>, %94, %cst_34 [2] : vector<32x8x8xf32> to vector<32x8xf32>
    %96 = vector.shape_cast %95 : vector<32x8xf32> to vector<32x8x1xf32>
    %97 = vector.broadcast %96 : vector<32x8x1xf32> to vector<32x8x8xf32>
    %98 = arith.subf %94, %97 : vector<32x8x8xf32>
    %99 = math.exp %98 : vector<32x8x8xf32>
    %cst_35 = arith.constant dense<0.000000e+00> : vector<32x8xf32>
    %100 = vector.multi_reduction <add>, %99, %cst_35 [2] : vector<32x8x8xf32> to vector<32x8xf32>
    %101 = vector.shape_cast %100 : vector<32x8xf32> to vector<32x8x1xf32>
    %102 = tpu.reciprocal %101 {approx = true} : vector<32x8x1xf32> -> vector<32x8x1xf32>
    %103 = vector.broadcast %102 : vector<32x8x1xf32> to vector<32x8x8xf32>
    %104 = arith.mulf %99, %103 : vector<32x8x8xf32>
    %105 = arith.truncf %104 : vector<32x8x8xf32> to vector<32x8x8xbf16>
    "tpu.trace_start"() <{level = 10 : i32, message = "blm,bmd->bld"}> : () -> ()
    %cst_36 = arith.constant dense<0.000000e+00> : vector<32x8x8xf32>
    %106 = tpu.matmul %105, %93, %cst_36 {dimension_numbers = #tpu.dot_dimension_numbers<[2], [1], [1], [2], [0, 0, 0, 1, 1, 2], [0], [0]>} : vector<32x8x8xbf16>, vector<32x8x8xbf16>, vector<32x8x8xf32> -> vector<32x8x8xf32>
    "tpu.trace_stop"() : () -> ()
    %107 = vector.extract_strided_slice %106 {offsets = [0, 0, 0], sizes = [8, 8, 8], strides = [1, 1, 1]} : vector<32x8x8xf32> to vector<8x8x8xf32>
    %108 = vector.shape_cast %107 : vector<8x8x8xf32> to vector<64x8xf32>
    %109 = vector.extract_strided_slice %106 {offsets = [8, 0, 0], sizes = [8, 8, 8], strides = [1, 1, 1]} : vector<32x8x8xf32> to vector<8x8x8xf32>
    %110 = vector.shape_cast %109 : vector<8x8x8xf32> to vector<64x8xf32>
    %111 = vector.extract_strided_slice %106 {offsets = [16, 0, 0], sizes = [8, 8, 8], strides = [1, 1, 1]} : vector<32x8x8xf32> to vector<8x8x8xf32>
    %112 = vector.shape_cast %111 : vector<8x8x8xf32> to vector<64x8xf32>
    %113 = vector.extract_strided_slice %106 {offsets = [24, 0, 0], sizes = [8, 8, 8], strides = [1, 1, 1]} : vector<32x8x8xf32> to vector<8x8x8xf32>
    %114 = vector.shape_cast %113 : vector<8x8x8xf32> to vector<64x8xf32>
    %115 = tpu.concatenate %108, %110, %112, %114 in 1 : vector<64x8xf32>, vector<64x8xf32>, vector<64x8xf32>, vector<64x8xf32> -> vector<64x32xf32>
    %c0_37 = arith.constant 0 : index
    %c0_38 = arith.constant 0 : index
    %c0_39 = arith.constant 0 : index
    %116 = vector.load %arg6[%c0_37, %c0_38, %c0_39] : memref<2x32x32xbf16, #tpu.memory_space<vmem>>, vector<1x32x32xbf16>
    %117 = vector.shape_cast %116 : vector<1x32x32xbf16> to vector<32x32xbf16>
    %118 = arith.truncf %115 : vector<64x32xf32> to vector<64x32xbf16>
    %cst_40 = arith.constant dense<0.000000e+00> : vector<64x32xf32>
    %119 = tpu.matmul %118, %117, %cst_40 {dimension_numbers = #tpu.dot_dimension_numbers<[1], [0], [0], [1], [0, 0, 1, 1], [], []>} : vector<64x32xbf16>, vector<32x32xbf16>, vector<64x32xf32> -> vector<64x32xf32>
    %c0_41 = arith.constant 0 : index
    %c0_42 = arith.constant 0 : index
    %c0_43 = arith.constant 0 : index
    %120 = vector.load %arg7[%c0_41, %c0_42, %c0_43] : memref<2x1x32xf32, #tpu.memory_space<vmem>>, vector<1x1x32xf32>
    %121 = vector.shape_cast %120 : vector<1x1x32xf32> to vector<1x32xf32>
    %122 = vector.broadcast %121 : vector<1x32xf32> to vector<64x32xf32>
    %123 = arith.addf %119, %122 : vector<64x32xf32>
    %124 = arith.addf %68, %123 : vector<64x32xf32>
    %c0_44 = arith.constant 0 : index
    %c0_45 = arith.constant 0 : index
    %c0_46 = arith.constant 0 : index
    %125 = vector.load %arg8[%c0_44, %c0_45, %c0_46] : memref<2x32x32xbf16, #tpu.memory_space<vmem>>, vector<1x32x32xbf16>
    %126 = vector.shape_cast %125 : vector<1x32x32xbf16> to vector<32x32xbf16>
    %127 = arith.truncf %124 : vector<64x32xf32> to vector<64x32xbf16>
    %cst_47 = arith.constant dense<0.000000e+00> : vector<64x32xf32>
    %128 = tpu.matmul %127, %126, %cst_47 {dimension_numbers = #tpu.dot_dimension_numbers<[1], [0], [0], [1], [0, 0, 1, 1], [], []>} : vector<64x32xbf16>, vector<32x32xbf16>, vector<64x32xf32> -> vector<64x32xf32>
    %c0_48 = arith.constant 0 : index
    %c0_49 = arith.constant 0 : index
    %c0_50 = arith.constant 0 : index
    %129 = vector.load %arg9[%c0_48, %c0_49, %c0_50] : memref<2x1x32xf32, #tpu.memory_space<vmem>>, vector<1x1x32xf32>
    %130 = vector.shape_cast %129 : vector<1x1x32xf32> to vector<1x32xf32>
    %131 = vector.broadcast %130 : vector<1x32xf32> to vector<64x32xf32>
    %132 = arith.addf %128, %131 : vector<64x32xf32>
    %cst_51 = arith.constant 5.000000e-01 : f32
    %133 = vector.broadcast %cst_51 : f32 to vector<64x32xf32>
    %134 = arith.mulf %133, %132 : vector<64x32xf32>
    %cst_52 = arith.constant 0.707106769 : f32
    %135 = vector.broadcast %cst_52 : f32 to vector<64x32xf32>
    %136 = arith.mulf %132, %135 : vector<64x32xf32>
    %cst_53 = arith.constant 0.000000e+00 : f32
    %137 = vector.broadcast %cst_53 : f32 to vector<64x32xf32>
    %138 = arith.cmpf oge, %136, %137 : vector<64x32xf32>
    %cst_54 = arith.constant 1.000000e+00 : f32
    %cst_55 = arith.constant -1.000000e+00 : f32
    %139 = vector.broadcast %cst_54 : f32 to vector<64x32xf32>
    %140 = vector.broadcast %cst_55 : f32 to vector<64x32xf32>
    %141 = arith.select %138, %139, %140 : vector<64x32xi1>, vector<64x32xf32>
    %142 = math.absf %136 : vector<64x32xf32>
    %cst_56 = arith.constant 0.327591091 : f32
    %143 = vector.broadcast %cst_56 : f32 to vector<64x32xf32>
    %144 = arith.mulf %143, %142 : vector<64x32xf32>
    %cst_57 = arith.constant 1.000000e+00 : f32
    %145 = vector.broadcast %cst_57 : f32 to vector<64x32xf32>
    %146 = arith.addf %145, %144 : vector<64x32xf32>
    %cst_58 = arith.constant 1.000000e+00 : f32
    %147 = vector.broadcast %cst_58 : f32 to vector<64x32xf32>
    %148 = arith.divf %147, %146 : vector<64x32xf32>
    %cst_59 = arith.constant 1.06140542 : f32
    %149 = vector.broadcast %cst_59 : f32 to vector<64x32xf32>
    %150 = arith.mulf %149, %148 : vector<64x32xf32>
    %cst_60 = arith.constant -1.45315206 : f32
    %151 = vector.broadcast %cst_60 : f32 to vector<64x32xf32>
    %152 = arith.addf %150, %151 : vector<64x32xf32>
    %153 = arith.mulf %152, %148 : vector<64x32xf32>
    %cst_61 = arith.constant 1.42141378 : f32
    %154 = vector.broadcast %cst_61 : f32 to vector<64x32xf32>
    %155 = arith.addf %153, %154 : vector<64x32xf32>
    %156 = arith.mulf %155, %148 : vector<64x32xf32>
    %cst_62 = arith.constant -0.284496725 : f32
    %157 = vector.broadcast %cst_62 : f32 to vector<64x32xf32>
    %158 = arith.addf %156, %157 : vector<64x32xf32>
    %159 = arith.mulf %158, %148 : vector<64x32xf32>
    %cst_63 = arith.constant 0.254829586 : f32
    %160 = vector.broadcast %cst_63 : f32 to vector<64x32xf32>
    %161 = arith.addf %159, %160 : vector<64x32xf32>
    %162 = arith.mulf %161, %148 : vector<64x32xf32>
    %cst_64 = arith.constant 0.000000e+00 : f32
    %163 = vector.broadcast %cst_64 : f32 to vector<64x32xf32>
    %164 = arith.subf %163, %142 : vector<64x32xf32>
    %165 = arith.mulf %164, %142 : vector<64x32xf32>
    %166 = math.exp %165 : vector<64x32xf32>
    %167 = arith.mulf %162, %166 : vector<64x32xf32>
    %cst_65 = arith.constant 1.000000e+00 : f32
    %168 = vector.broadcast %cst_65 : f32 to vector<64x32xf32>
    %169 = arith.subf %168, %167 : vector<64x32xf32>
    %170 = arith.mulf %141, %169 : vector<64x32xf32>
    %cst_66 = arith.constant 1.000000e+00 : f32
    %171 = vector.broadcast %cst_66 : f32 to vector<64x32xf32>
    %172 = arith.addf %171, %170 : vector<64x32xf32>
    %173 = arith.mulf %134, %172 : vector<64x32xf32>
    %174 = arith.addf %124, %173 : vector<64x32xf32>
    %c0_67 = arith.constant 0 : index
    %c0_68 = arith.constant 0 : index
    %175 = vector.load %arg10[%c0_67, %c0_68] : memref<32x32xbf16, #tpu.memory_space<vmem>>, vector<32x32xbf16>
    %176 = arith.truncf %174 : vector<64x32xf32> to vector<64x32xbf16>
    %cst_69 = arith.constant dense<0.000000e+00> : vector<64x32xf32>
    %177 = tpu.matmul %176, %175, %cst_69 {dimension_numbers = #tpu.dot_dimension_numbers<[1], [0], [0], [1], [0, 0, 1, 1], [], []>} : vector<64x32xbf16>, vector<32x32xbf16>, vector<64x32xf32> -> vector<64x32xf32>
    %c0_70 = arith.constant 0 : index
    %c0_71 = arith.constant 0 : index
    %178 = vector.load %arg11[%c0_70, %c0_71] : memref<1x32xf32, #tpu.memory_space<vmem>>, vector<1x32xf32>
    %179 = vector.broadcast %178 : vector<1x32xf32> to vector<64x32xf32>
    %180 = arith.addf %177, %179 : vector<64x32xf32>
    %cst_72 = arith.constant 5.000000e-01 : f32
    %181 = vector.broadcast %cst_72 : f32 to vector<64x32xf32>
    %182 = arith.mulf %181, %180 : vector<64x32xf32>
    %cst_73 = arith.constant 0.707106769 : f32
    %183 = vector.broadcast %cst_73 : f32 to vector<64x32xf32>
    %184 = arith.mulf %180, %183 : vector<64x32xf32>
    %cst_74 = arith.constant 0.000000e+00 : f32
    %185 = vector.broadcast %cst_74 : f32 to vector<64x32xf32>
    %186 = arith.cmpf oge, %184, %185 : vector<64x32xf32>
    %cst_75 = arith.constant 1.000000e+00 : f32
    %cst_76 = arith.constant -1.000000e+00 : f32
    %187 = vector.broadcast %cst_75 : f32 to vector<64x32xf32>
    %188 = vector.broadcast %cst_76 : f32 to vector<64x32xf32>
    %189 = arith.select %186, %187, %188 : vector<64x32xi1>, vector<64x32xf32>
    %190 = math.absf %184 : vector<64x32xf32>
    %cst_77 = arith.constant 0.327591091 : f32
    %191 = vector.broadcast %cst_77 : f32 to vector<64x32xf32>
    %192 = arith.mulf %191, %190 : vector<64x32xf32>
    %cst_78 = arith.constant 1.000000e+00 : f32
    %193 = vector.broadcast %cst_78 : f32 to vector<64x32xf32>
    %194 = arith.addf %193, %192 : vector<64x32xf32>
    %cst_79 = arith.constant 1.000000e+00 : f32
    %195 = vector.broadcast %cst_79 : f32 to vector<64x32xf32>
    %196 = arith.divf %195, %194 : vector<64x32xf32>
    %cst_80 = arith.constant 1.06140542 : f32
    %197 = vector.broadcast %cst_80 : f32 to vector<64x32xf32>
    %198 = arith.mulf %197, %196 : vector<64x32xf32>
    %cst_81 = arith.constant -1.45315206 : f32
    %199 = vector.broadcast %cst_81 : f32 to vector<64x32xf32>
    %200 = arith.addf %198, %199 : vector<64x32xf32>
    %201 = arith.mulf %200, %196 : vector<64x32xf32>
    %cst_82 = arith.constant 1.42141378 : f32
    %202 = vector.broadcast %cst_82 : f32 to vector<64x32xf32>
    %203 = arith.addf %201, %202 : vector<64x32xf32>
    %204 = arith.mulf %203, %196 : vector<64x32xf32>
    %cst_83 = arith.constant -0.284496725 : f32
    %205 = vector.broadcast %cst_83 : f32 to vector<64x32xf32>
    %206 = arith.addf %204, %205 : vector<64x32xf32>
    %207 = arith.mulf %206, %196 : vector<64x32xf32>
    %cst_84 = arith.constant 0.254829586 : f32
    %208 = vector.broadcast %cst_84 : f32 to vector<64x32xf32>
    %209 = arith.addf %207, %208 : vector<64x32xf32>
    %210 = arith.mulf %209, %196 : vector<64x32xf32>
    %cst_85 = arith.constant 0.000000e+00 : f32
    %211 = vector.broadcast %cst_85 : f32 to vector<64x32xf32>
    %212 = arith.subf %211, %190 : vector<64x32xf32>
    %213 = arith.mulf %212, %190 : vector<64x32xf32>
    %214 = math.exp %213 : vector<64x32xf32>
    %215 = arith.mulf %210, %214 : vector<64x32xf32>
    %cst_86 = arith.constant 1.000000e+00 : f32
    %216 = vector.broadcast %cst_86 : f32 to vector<64x32xf32>
    %217 = arith.subf %216, %215 : vector<64x32xf32>
    %218 = arith.mulf %189, %217 : vector<64x32xf32>
    %cst_87 = arith.constant 1.000000e+00 : f32
    %219 = vector.broadcast %cst_87 : f32 to vector<64x32xf32>
    %220 = arith.addf %219, %218 : vector<64x32xf32>
    %221 = arith.mulf %182, %220 : vector<64x32xf32>
    %222 = arith.truncf %221 : vector<64x32xf32> to vector<64x32xbf16>
    %223 = arith.extf %222 : vector<64x32xbf16> to vector<64x32xf32>
    %c0_88 = arith.constant 0 : index
    %c0_89 = arith.constant 0 : index
    %224 = vector.load %arg12[%c0_88, %c0_89] : memref<1x32xbf16, #tpu.memory_space<vmem>>, vector<1x32xbf16>
    %225 = arith.extf %224 : vector<1x32xbf16> to vector<1x32xf32>
    %226 = vector.broadcast %225 : vector<1x32xf32> to vector<64x32xf32>
    %227 = arith.mulf %223, %226 : vector<64x32xf32>
    %cst_90 = arith.constant dense<0.000000e+00> : vector<64xf32>
    %228 = vector.multi_reduction <add>, %227, %cst_90 [1] : vector<64x32xf32> to vector<64xf32>
    %229 = vector.shape_cast %228 : vector<64xf32> to vector<64x1xf32>
    %c0_91 = arith.constant 0 : index
    %c0_92 = arith.constant 0 : index
    %230 = vector.load %arg13[%c0_91, %c0_92] : memref<1x1xf32, #tpu.memory_space<vmem>>, vector<1x1xf32>
    %231 = vector.broadcast %230 : vector<1x1xf32> to vector<64x1xf32>
    %232 = arith.addf %229, %231 : vector<64x1xf32>
    %c1 = arith.constant 1 : index
    %c0_93 = arith.constant 0 : index
    %c0_94 = arith.constant 0 : index
    %233 = vector.load %arg4[%c1, %c0_93, %c0_94] : memref<2x32x96xbf16, #tpu.memory_space<vmem>>, vector<1x32x96xbf16>
    %234 = vector.shape_cast %233 : vector<1x32x96xbf16> to vector<32x96xbf16>
    %235 = arith.truncf %174 : vector<64x32xf32> to vector<64x32xbf16>
    %cst_95 = arith.constant dense<0.000000e+00> : vector<64x96xf32>
    %236 = tpu.matmul %235, %234, %cst_95 {dimension_numbers = #tpu.dot_dimension_numbers<[1], [0], [0], [1], [0, 0, 1, 1], [], []>} : vector<64x32xbf16>, vector<32x96xbf16>, vector<64x96xf32> -> vector<64x96xf32>
    %c1_96 = arith.constant 1 : index
    %c0_97 = arith.constant 0 : index
    %c0_98 = arith.constant 0 : index
    %237 = vector.load %arg5[%c1_96, %c0_97, %c0_98] : memref<2x1x96xf32, #tpu.memory_space<vmem>>, vector<1x1x96xf32>
    %238 = vector.shape_cast %237 : vector<1x1x96xf32> to vector<1x96xf32>
    %239 = vector.broadcast %238 : vector<1x96xf32> to vector<64x96xf32>
    %240 = arith.addf %236, %239 : vector<64x96xf32>
    %241 = arith.truncf %240 : vector<64x96xf32> to vector<64x96xbf16>
    %242 = vector.shape_cast %241 : vector<64x96xbf16> to vector<8x8x96xbf16>
    %243 = vector.extract_strided_slice %242 {offsets = [0, 0, 0], sizes = [8, 8, 8], strides = [1, 1, 1]} : vector<8x8x96xbf16> to vector<8x8x8xbf16>
    %244 = vector.extract_strided_slice %242 {offsets = [0, 0, 8], sizes = [8, 8, 8], strides = [1, 1, 1]} : vector<8x8x96xbf16> to vector<8x8x8xbf16>
    %245 = vector.extract_strided_slice %242 {offsets = [0, 0, 16], sizes = [8, 8, 8], strides = [1, 1, 1]} : vector<8x8x96xbf16> to vector<8x8x8xbf16>
    %246 = vector.extract_strided_slice %242 {offsets = [0, 0, 24], sizes = [8, 8, 8], strides = [1, 1, 1]} : vector<8x8x96xbf16> to vector<8x8x8xbf16>
    %247 = tpu.concatenate %243, %244, %245, %246 in 0 : vector<8x8x8xbf16>, vector<8x8x8xbf16>, vector<8x8x8xbf16>, vector<8x8x8xbf16> -> vector<32x8x8xbf16>
    %248 = vector.extract_strided_slice %242 {offsets = [0, 0, 32], sizes = [8, 8, 8], strides = [1, 1, 1]} : vector<8x8x96xbf16> to vector<8x8x8xbf16>
    %249 = vector.extract_strided_slice %242 {offsets = [0, 0, 40], sizes = [8, 8, 8], strides = [1, 1, 1]} : vector<8x8x96xbf16> to vector<8x8x8xbf16>
    %250 = vector.extract_strided_slice %242 {offsets = [0, 0, 48], sizes = [8, 8, 8], strides = [1, 1, 1]} : vector<8x8x96xbf16> to vector<8x8x8xbf16>
    %251 = vector.extract_strided_slice %242 {offsets = [0, 0, 56], sizes = [8, 8, 8], strides = [1, 1, 1]} : vector<8x8x96xbf16> to vector<8x8x8xbf16>
    %252 = tpu.concatenate %248, %249, %250, %251 in 0 : vector<8x8x8xbf16>, vector<8x8x8xbf16>, vector<8x8x8xbf16>, vector<8x8x8xbf16> -> vector<32x8x8xbf16>
    %253 = vector.extract_strided_slice %242 {offsets = [0, 0, 64], sizes = [8, 8, 8], strides = [1, 1, 1]} : vector<8x8x96xbf16> to vector<8x8x8xbf16>
    %254 = vector.extract_strided_slice %242 {offsets = [0, 0, 72], sizes = [8, 8, 8], strides = [1, 1, 1]} : vector<8x8x96xbf16> to vector<8x8x8xbf16>
    %255 = vector.extract_strided_slice %242 {offsets = [0, 0, 80], sizes = [8, 8, 8], strides = [1, 1, 1]} : vector<8x8x96xbf16> to vector<8x8x8xbf16>
    %256 = vector.extract_strided_slice %242 {offsets = [0, 0, 88], sizes = [8, 8, 8], strides = [1, 1, 1]} : vector<8x8x96xbf16> to vector<8x8x8xbf16>
    %257 = tpu.concatenate %253, %254, %255, %256 in 0 : vector<8x8x8xbf16>, vector<8x8x8xbf16>, vector<8x8x8xbf16>, vector<8x8x8xbf16> -> vector<32x8x8xbf16>
    "tpu.trace_start"() <{level = 10 : i32, message = "bld,bmd->blm"}> : () -> ()
    %cst_99 = arith.constant dense<0.000000e+00> : vector<32x8x8xf32>
    %258 = tpu.matmul %252, %247, %cst_99 {dimension_numbers = #tpu.dot_dimension_numbers<[2], [2], [1], [1], [0, 0, 0, 1, 1, 1], [0], [0]>} : vector<32x8x8xbf16>, vector<32x8x8xbf16>, vector<32x8x8xf32> -> vector<32x8x8xf32>
    "tpu.trace_stop"() : () -> ()
    %cst_100 = arith.constant dense<0xFF800000> : vector<32x8xf32>
    %259 = vector.multi_reduction <maximumf>, %258, %cst_100 [2] : vector<32x8x8xf32> to vector<32x8xf32>
    %260 = vector.shape_cast %259 : vector<32x8xf32> to vector<32x8x1xf32>
    %261 = vector.broadcast %260 : vector<32x8x1xf32> to vector<32x8x8xf32>
    %262 = arith.subf %258, %261 : vector<32x8x8xf32>
    %263 = math.exp %262 : vector<32x8x8xf32>
    %cst_101 = arith.constant dense<0.000000e+00> : vector<32x8xf32>
    %264 = vector.multi_reduction <add>, %263, %cst_101 [2] : vector<32x8x8xf32> to vector<32x8xf32>
    %265 = vector.shape_cast %264 : vector<32x8xf32> to vector<32x8x1xf32>
    %266 = tpu.reciprocal %265 {approx = true} : vector<32x8x1xf32> -> vector<32x8x1xf32>
    %267 = vector.broadcast %266 : vector<32x8x1xf32> to vector<32x8x8xf32>
    %268 = arith.mulf %263, %267 : vector<32x8x8xf32>
    %269 = arith.truncf %268 : vector<32x8x8xf32> to vector<32x8x8xbf16>
    "tpu.trace_start"() <{level = 10 : i32, message = "blm,bmd->bld"}> : () -> ()
    %cst_102 = arith.constant dense<0.000000e+00> : vector<32x8x8xf32>
    %270 = tpu.matmul %269, %257, %cst_102 {dimension_numbers = #tpu.dot_dimension_numbers<[2], [1], [1], [2], [0, 0, 0, 1, 1, 2], [0], [0]>} : vector<32x8x8xbf16>, vector<32x8x8xbf16>, vector<32x8x8xf32> -> vector<32x8x8xf32>
    "tpu.trace_stop"() : () -> ()
    %271 = vector.extract_strided_slice %270 {offsets = [0, 0, 0], sizes = [8, 8, 8], strides = [1, 1, 1]} : vector<32x8x8xf32> to vector<8x8x8xf32>
    %272 = vector.shape_cast %271 : vector<8x8x8xf32> to vector<64x8xf32>
    %273 = vector.extract_strided_slice %270 {offsets = [8, 0, 0], sizes = [8, 8, 8], strides = [1, 1, 1]} : vector<32x8x8xf32> to vector<8x8x8xf32>
    %274 = vector.shape_cast %273 : vector<8x8x8xf32> to vector<64x8xf32>
    %275 = vector.extract_strided_slice %270 {offsets = [16, 0, 0], sizes = [8, 8, 8], strides = [1, 1, 1]} : vector<32x8x8xf32> to vector<8x8x8xf32>
    %276 = vector.shape_cast %275 : vector<8x8x8xf32> to vector<64x8xf32>
    %277 = vector.extract_strided_slice %270 {offsets = [24, 0, 0], sizes = [8, 8, 8], strides = [1, 1, 1]} : vector<32x8x8xf32> to vector<8x8x8xf32>
    %278 = vector.shape_cast %277 : vector<8x8x8xf32> to vector<64x8xf32>
    %279 = tpu.concatenate %272, %274, %276, %278 in 1 : vector<64x8xf32>, vector<64x8xf32>, vector<64x8xf32>, vector<64x8xf32> -> vector<64x32xf32>
    %c1_103 = arith.constant 1 : index
    %c0_104 = arith.constant 0 : index
    %c0_105 = arith.constant 0 : index
    %280 = vector.load %arg6[%c1_103, %c0_104, %c0_105] : memref<2x32x32xbf16, #tpu.memory_space<vmem>>, vector<1x32x32xbf16>
    %281 = vector.shape_cast %280 : vector<1x32x32xbf16> to vector<32x32xbf16>
    %282 = arith.truncf %279 : vector<64x32xf32> to vector<64x32xbf16>
    %cst_106 = arith.constant dense<0.000000e+00> : vector<64x32xf32>
    %283 = tpu.matmul %282, %281, %cst_106 {dimension_numbers = #tpu.dot_dimension_numbers<[1], [0], [0], [1], [0, 0, 1, 1], [], []>} : vector<64x32xbf16>, vector<32x32xbf16>, vector<64x32xf32> -> vector<64x32xf32>
    %c1_107 = arith.constant 1 : index
    %c0_108 = arith.constant 0 : index
    %c0_109 = arith.constant 0 : index
    %284 = vector.load %arg7[%c1_107, %c0_108, %c0_109] : memref<2x1x32xf32, #tpu.memory_space<vmem>>, vector<1x1x32xf32>
    %285 = vector.shape_cast %284 : vector<1x1x32xf32> to vector<1x32xf32>
    %286 = vector.broadcast %285 : vector<1x32xf32> to vector<64x32xf32>
    %287 = arith.addf %283, %286 : vector<64x32xf32>
    %288 = arith.addf %174, %287 : vector<64x32xf32>
    %c1_110 = arith.constant 1 : index
    %c0_111 = arith.constant 0 : index
    %c0_112 = arith.constant 0 : index
    %289 = vector.load %arg8[%c1_110, %c0_111, %c0_112] : memref<2x32x32xbf16, #tpu.memory_space<vmem>>, vector<1x32x32xbf16>
    %290 = vector.shape_cast %289 : vector<1x32x32xbf16> to vector<32x32xbf16>
    %291 = arith.truncf %288 : vector<64x32xf32> to vector<64x32xbf16>
    %cst_113 = arith.constant dense<0.000000e+00> : vector<64x32xf32>
    %292 = tpu.matmul %291, %290, %cst_113 {dimension_numbers = #tpu.dot_dimension_numbers<[1], [0], [0], [1], [0, 0, 1, 1], [], []>} : vector<64x32xbf16>, vector<32x32xbf16>, vector<64x32xf32> -> vector<64x32xf32>
    %c1_114 = arith.constant 1 : index
    %c0_115 = arith.constant 0 : index
    %c0_116 = arith.constant 0 : index
    %293 = vector.load %arg9[%c1_114, %c0_115, %c0_116] : memref<2x1x32xf32, #tpu.memory_space<vmem>>, vector<1x1x32xf32>
    %294 = vector.shape_cast %293 : vector<1x1x32xf32> to vector<1x32xf32>
    %295 = vector.broadcast %294 : vector<1x32xf32> to vector<64x32xf32>
    %296 = arith.addf %292, %295 : vector<64x32xf32>
    %cst_117 = arith.constant 5.000000e-01 : f32
    %297 = vector.broadcast %cst_117 : f32 to vector<64x32xf32>
    %298 = arith.mulf %297, %296 : vector<64x32xf32>
    %cst_118 = arith.constant 0.707106769 : f32
    %299 = vector.broadcast %cst_118 : f32 to vector<64x32xf32>
    %300 = arith.mulf %296, %299 : vector<64x32xf32>
    %cst_119 = arith.constant 0.000000e+00 : f32
    %301 = vector.broadcast %cst_119 : f32 to vector<64x32xf32>
    %302 = arith.cmpf oge, %300, %301 : vector<64x32xf32>
    %cst_120 = arith.constant 1.000000e+00 : f32
    %cst_121 = arith.constant -1.000000e+00 : f32
    %303 = vector.broadcast %cst_120 : f32 to vector<64x32xf32>
    %304 = vector.broadcast %cst_121 : f32 to vector<64x32xf32>
    %305 = arith.select %302, %303, %304 : vector<64x32xi1>, vector<64x32xf32>
    %306 = math.absf %300 : vector<64x32xf32>
    %cst_122 = arith.constant 0.327591091 : f32
    %307 = vector.broadcast %cst_122 : f32 to vector<64x32xf32>
    %308 = arith.mulf %307, %306 : vector<64x32xf32>
    %cst_123 = arith.constant 1.000000e+00 : f32
    %309 = vector.broadcast %cst_123 : f32 to vector<64x32xf32>
    %310 = arith.addf %309, %308 : vector<64x32xf32>
    %cst_124 = arith.constant 1.000000e+00 : f32
    %311 = vector.broadcast %cst_124 : f32 to vector<64x32xf32>
    %312 = arith.divf %311, %310 : vector<64x32xf32>
    %cst_125 = arith.constant 1.06140542 : f32
    %313 = vector.broadcast %cst_125 : f32 to vector<64x32xf32>
    %314 = arith.mulf %313, %312 : vector<64x32xf32>
    %cst_126 = arith.constant -1.45315206 : f32
    %315 = vector.broadcast %cst_126 : f32 to vector<64x32xf32>
    %316 = arith.addf %314, %315 : vector<64x32xf32>
    %317 = arith.mulf %316, %312 : vector<64x32xf32>
    %cst_127 = arith.constant 1.42141378 : f32
    %318 = vector.broadcast %cst_127 : f32 to vector<64x32xf32>
    %319 = arith.addf %317, %318 : vector<64x32xf32>
    %320 = arith.mulf %319, %312 : vector<64x32xf32>
    %cst_128 = arith.constant -0.284496725 : f32
    %321 = vector.broadcast %cst_128 : f32 to vector<64x32xf32>
    %322 = arith.addf %320, %321 : vector<64x32xf32>
    %323 = arith.mulf %322, %312 : vector<64x32xf32>
    %cst_129 = arith.constant 0.254829586 : f32
    %324 = vector.broadcast %cst_129 : f32 to vector<64x32xf32>
    %325 = arith.addf %323, %324 : vector<64x32xf32>
    %326 = arith.mulf %325, %312 : vector<64x32xf32>
    %cst_130 = arith.constant 0.000000e+00 : f32
    %327 = vector.broadcast %cst_130 : f32 to vector<64x32xf32>
    %328 = arith.subf %327, %306 : vector<64x32xf32>
    %329 = arith.mulf %328, %306 : vector<64x32xf32>
    %330 = math.exp %329 : vector<64x32xf32>
    %331 = arith.mulf %326, %330 : vector<64x32xf32>
    %cst_131 = arith.constant 1.000000e+00 : f32
    %332 = vector.broadcast %cst_131 : f32 to vector<64x32xf32>
    %333 = arith.subf %332, %331 : vector<64x32xf32>
    %334 = arith.mulf %305, %333 : vector<64x32xf32>
    %cst_132 = arith.constant 1.000000e+00 : f32
    %335 = vector.broadcast %cst_132 : f32 to vector<64x32xf32>
    %336 = arith.addf %335, %334 : vector<64x32xf32>
    %337 = arith.mulf %298, %336 : vector<64x32xf32>
    %338 = arith.addf %288, %337 : vector<64x32xf32>
    %c0_133 = arith.constant 0 : index
    %c0_134 = arith.constant 0 : index
    %339 = vector.load %arg14[%c0_133, %c0_134] : memref<32x3xbf16, #tpu.memory_space<vmem>>, vector<32x3xbf16>
    %340 = arith.truncf %338 : vector<64x32xf32> to vector<64x32xbf16>
    %cst_135 = arith.constant dense<0.000000e+00> : vector<64x3xf32>
    %341 = tpu.matmul %340, %339, %cst_135 {dimension_numbers = #tpu.dot_dimension_numbers<[1], [0], [0], [1], [0, 0, 1, 1], [], []>} : vector<64x32xbf16>, vector<32x3xbf16>, vector<64x3xf32> -> vector<64x3xf32>
    %c0_136 = arith.constant 0 : index
    %c0_137 = arith.constant 0 : index
    %342 = vector.load %arg15[%c0_136, %c0_137] : memref<1x3xf32, #tpu.memory_space<vmem>>, vector<1x3xf32>
    %343 = vector.broadcast %342 : vector<1x3xf32> to vector<64x3xf32>
    %344 = arith.addf %341, %343 : vector<64x3xf32>
    %345 = tpu.concatenate %232, %344 in 1 : vector<64x1xf32>, vector<64x3xf32> -> vector<64x4xf32>
    %346 = vector.shape_cast %345 : vector<64x4xf32> to vector<8x8x4xf32>
    %347 = vector.extract_strided_slice %346 {offsets = [0, 0, 0], sizes = [8, 1, 4], strides = [1, 1, 1]} : vector<8x8x4xf32> to vector<8x1x4xf32>
    %348 = vector.shape_cast %347 : vector<8x1x4xf32> to vector<8x4xf32>
    %349 = vector.extract_strided_slice %346 {offsets = [0, 1, 0], sizes = [8, 1, 4], strides = [1, 1, 1]} : vector<8x8x4xf32> to vector<8x1x4xf32>
    %350 = vector.shape_cast %349 : vector<8x1x4xf32> to vector<8x4xf32>
    %351 = vector.extract_strided_slice %346 {offsets = [0, 2, 0], sizes = [8, 1, 4], strides = [1, 1, 1]} : vector<8x8x4xf32> to vector<8x1x4xf32>
    %352 = vector.shape_cast %351 : vector<8x1x4xf32> to vector<8x4xf32>
    %353 = vector.extract_strided_slice %346 {offsets = [0, 3, 0], sizes = [8, 1, 4], strides = [1, 1, 1]} : vector<8x8x4xf32> to vector<8x1x4xf32>
    %354 = vector.shape_cast %353 : vector<8x1x4xf32> to vector<8x4xf32>
    %355 = vector.extract_strided_slice %346 {offsets = [0, 4, 0], sizes = [8, 1, 4], strides = [1, 1, 1]} : vector<8x8x4xf32> to vector<8x1x4xf32>
    %356 = vector.shape_cast %355 : vector<8x1x4xf32> to vector<8x4xf32>
    %357 = vector.extract_strided_slice %346 {offsets = [0, 5, 0], sizes = [8, 1, 4], strides = [1, 1, 1]} : vector<8x8x4xf32> to vector<8x1x4xf32>
    %358 = vector.shape_cast %357 : vector<8x1x4xf32> to vector<8x4xf32>
    %359 = vector.extract_strided_slice %346 {offsets = [0, 6, 0], sizes = [8, 1, 4], strides = [1, 1, 1]} : vector<8x8x4xf32> to vector<8x1x4xf32>
    %360 = vector.shape_cast %359 : vector<8x1x4xf32> to vector<8x4xf32>
    %361 = vector.extract_strided_slice %346 {offsets = [0, 7, 0], sizes = [8, 1, 4], strides = [1, 1, 1]} : vector<8x8x4xf32> to vector<8x1x4xf32>
    %362 = vector.shape_cast %361 : vector<8x1x4xf32> to vector<8x4xf32>
    %363 = tpu.concatenate %348, %350, %352, %354, %356, %358, %360, %362 in 1 : vector<8x4xf32>, vector<8x4xf32>, vector<8x4xf32>, vector<8x4xf32>, vector<8x4xf32>, vector<8x4xf32>, vector<8x4xf32>, vector<8x4xf32> -> vector<8x32xf32>
    %c0_138 = arith.constant 0 : index
    %c0_139 = arith.constant 0 : index
    %364 = vector.load %arg16[%c0_138, %c0_139] : memref<8x32xf32, #tpu.memory_space<vmem>>, vector<8x32xf32>
    tpu.vector_store %arg16[%c0_138, %c0_139], %363 {strides = array<i32>} : memref<8x32xf32, #tpu.memory_space<vmem>>, vector<8x32xf32>,
    return
  }
  func.func @transform_0(%arg0: i32) -> (i32, i32, i32) {
    %c0_i32 = arith.constant 0 : i32
    %c0_i32_0 = arith.constant 0 : i32
    %c0_i32_1 = arith.constant 0 : i32
    return %arg0, %c0_i32, %c0_i32_0 : i32, i32, i32
  }
  func.func @transform_1(%arg0: i32) -> (i32, i32) {
    %c0_i32 = arith.constant 0 : i32
    %c0_i32_0 = arith.constant 0 : i32
    %c0_i32_1 = arith.constant 0 : i32
    return %c0_i32, %c0_i32_0 : i32, i32
  }
  func.func @transform_2(%arg0: i32) -> (i32, i32) {
    %c0_i32 = arith.constant 0 : i32
    %c0_i32_0 = arith.constant 0 : i32
    %c0_i32_1 = arith.constant 0 : i32
    return %c0_i32, %c0_i32_0 : i32, i32
  }
  func.func @transform_3(%arg0: i32) -> (i32, i32, i32) {
    %c0_i32 = arith.constant 0 : i32
    %c0_i32_0 = arith.constant 0 : i32
    %c0_i32_1 = arith.constant 0 : i32
    %c0_i32_2 = arith.constant 0 : i32
    return %c0_i32, %c0_i32_0, %c0_i32_1 : i32, i32, i32
  }
  func.func @transform_4(%arg0: i32) -> (i32, i32, i32) {
    %c0_i32 = arith.constant 0 : i32
    %c0_i32_0 = arith.constant 0 : i32
    %c0_i32_1 = arith.constant 0 : i32
    %c0_i32_2 = arith.constant 0 : i32
    return %c0_i32, %c0_i32_0, %c0_i32_1 : i32, i32, i32
  }
  func.func @transform_5(%arg0: i32) -> (i32, i32, i32) {
    %c0_i32 = arith.constant 0 : i32
    %c0_i32_0 = arith.constant 0 : i32
    %c0_i32_1 = arith.constant 0 : i32
    %c0_i32_2 = arith.constant 0 : i32
    return %c0_i32, %c0_i32_0, %c0_i32_1 : i32, i32, i32
  }
  func.func @transform_6(%arg0: i32) -> (i32, i32, i32) {
    %c0_i32 = arith.constant 0 : i32
    %c0_i32_0 = arith.constant 0 : i32
    %c0_i32_1 = arith.constant 0 : i32
    %c0_i32_2 = arith.constant 0 : i32
    return %c0_i32, %c0_i32_0, %c0_i32_1 : i32, i32, i32
  }
  func.func @transform_7(%arg0: i32) -> (i32, i32, i32) {
    %c0_i32 = arith.constant 0 : i32
    %c0_i32_0 = arith.constant 0 : i32
    %c0_i32_1 = arith.constant 0 : i32
    %c0_i32_2 = arith.constant 0 : i32
    return %c0_i32, %c0_i32_0, %c0_i32_1 : i32, i32, i32
  }
  func.func @transform_8(%arg0: i32) -> (i32, i32, i32) {
    %c0_i32 = arith.constant 0 : i32
    %c0_i32_0 = arith.constant 0 : i32
    %c0_i32_1 = arith.constant 0 : i32
    %c0_i32_2 = arith.constant 0 : i32
    return %c0_i32, %c0_i32_0, %c0_i32_1 : i32, i32, i32
  }
  func.func @transform_9(%arg0: i32) -> (i32, i32) {
    %c0_i32 = arith.constant 0 : i32
    %c0_i32_0 = arith.constant 0 : i32
    %c0_i32_1 = arith.constant 0 : i32
    return %c0_i32, %c0_i32_0 : i32, i32
  }
  func.func @transform_10(%arg0: i32) -> (i32, i32) {
    %c0_i32 = arith.constant 0 : i32
    %c0_i32_0 = arith.constant 0 : i32
    %c0_i32_1 = arith.constant 0 : i32
    return %c0_i32, %c0_i32_0 : i32, i32
  }
  func.func @transform_11(%arg0: i32) -> (i32, i32) {
    %c0_i32 = arith.constant 0 : i32
    %c0_i32_0 = arith.constant 0 : i32
    %c0_i32_1 = arith.constant 0 : i32
    return %c0_i32, %c0_i32_0 : i32, i32
  }
  func.func @transform_12(%arg0: i32) -> (i32, i32) {
    %c0_i32 = arith.constant 0 : i32
    %c0_i32_0 = arith.constant 0 : i32
    %c0_i32_1 = arith.constant 0 : i32
    return %c0_i32, %c0_i32_0 : i32, i32
  }
  func.func @transform_13(%arg0: i32) -> (i32, i32) {
    %c0_i32 = arith.constant 0 : i32
    %c0_i32_0 = arith.constant 0 : i32
    %c0_i32_1 = arith.constant 0 : i32
    return %c0_i32, %c0_i32_0 : i32, i32
  }
  func.func @transform_14(%arg0: i32) -> (i32, i32) {
    %c0_i32 = arith.constant 0 : i32
    %c0_i32_0 = arith.constant 0 : i32
    %c0_i32_1 = arith.constant 0 : i32
    return %c0_i32, %c0_i32_0 : i32, i32
  }
  func.func @transform_15(%arg0: i32) -> (i32, i32) {
    %c0_i32 = arith.constant 0 : i32
    %c0_i32_0 = arith.constant 0 : i32
    return %arg0, %c0_i32 : i32, i32
  }
}

</mosaic_0001>

<bundles_post_ra>
// kernel: tpu_custom_call.1
= control target key start
LH: loop header
LB: loop body
LE: loop exit
PB: predicated region body
PF: predicated region fallthrough
CT: control target
= control target key end

     0   :  { %s16238_s0 = inlined_call_operand.hbm [shape: f32[16,8,32], index: 0, kind: input, shape index: {}]   ;;  %s16239_s1 = inlined_call_operand.hbm [shape: f32[1,32], index: 1, kind: input, shape index: {}]   ;;  %s16240_s2 = inlined_call_operand.hbm [shape: f32[1,32], index: 2, kind: input, shape index: {}]   ;;  %s16241_s3 = inlined_call_operand.vmem [shape: bf16[2,32,96], index: 3, kind: input, shape index: {}]   ;;  %s16242_s4 = inlined_call_operand.hbm [shape: f32[2,1,96], index: 4, kind: input, shape index: {}]   ;;  %s16243_s5 = inlined_call_operand.hbm [shape: bf16[2,32,32], index: 5, kind: input, shape index: {}]   ;;  %s16244_s6 = inlined_call_operand.hbm [shape: f32[2,1,32], index: 6, kind: input, shape index: {}]   ;;  %s16245_s7 = inlined_call_operand.hbm [shape: bf16[2,32,32], index: 7, kind: input, shape index: {}]   ;;  %s16246_s8 = inlined_call_operand.vmem [shape: f32[2,1,32], index: 8, kind: input, shape index: {}]   ;;  %s16247_s9 = inlined_call_operand.vmem [shape: bf16[32,32], index: 9, kind: input, shape index: {}]   ;;  %s16248_s10 = inlined_call_operand.vmem [shape: f32[1,32], index: 10, kind: input, shape index: {}]   ;;  %s16249_s11 = inlined_call_operand.vmem [shape: bf16[1,32], index: 11, kind: input, shape index: {}]   ;;  %s16250_s12 = inlined_call_operand.<no memory space> [shape: f32[1,1], index: 12, kind: input, shape index: {}]   ;;  %s16251_s13 = inlined_call_operand.vmem [shape: bf16[32,3], index: 13, kind: input, shape index: {}]   ;;  %s16252_s14 = inlined_call_operand.vmem [shape: f32[1,3], index: 14, kind: input, shape index: {}]   ;;  %s16253_s15 = inlined_call_operand.hbm [shape: f32[16,32], index: 15, kind: output, shape index: {}]  }
   0x1   :  { %16293 = sst [smem:[#allocation45_spill]] %s16239_s1  ;;  %v20_v0 = vstv %s16250_s12 }
   0x2   :  { %16294 = sst [smem:[#allocation46_spill]] %s16242_s4  ;;  %21 = vst [vmem:[#allocation2] sm:$0x1] %v20_v0 }
   0x3   :  { %16295 = sst [smem:[#allocation47_spill]] %s16248_s10 }
   0x4   :  { %16296 = sst [smem:[#allocation48_spill]] %s16249_s11 }
   0x5   :  { %16297 = sst [smem:[#allocation49_spill]] %s16251_s13 }
   0x6   :  { %16298 = sst [smem:[#allocation50_spill]] %s16252_s14 }
   0x7   :  { %16299 = sst [smem:[#allocation51_spill]] %s16253_s15 }
   0x8   :  { %22 = vsyncpa [#allocation4], 0 }
   0x9   :  { %24 = vsyncpa [#allocation4 + $0x1], 0 }
   0xa   :  { %25 = vsyncpa [#allocation7], 0 }
   0xb   :  { %26 = vsyncpa [#allocation10], 0 }
   0xc   :  { %27 = vsyncpa [#allocation13], 0 }
   0xd   :  { %28 = vsyncpa [#allocation5], 0 }
   0xe   :  { %30 = vsyncpa [#allocation5 + $0x1], 0  ;;  %s12792_s20 = smov 0   ;;  %s12794_s21 = smov 0  }
   0xf   :  { %s12796_s22 = smov 0   ;;  %s12798_s23 = smov 0  }
  0x10 LB: > { %s12679_s12 = smov [#allocation6]   ;;  %s12813_s25 = sadd.s32 4294967295, %s12677_s23   ;;  %s12677_s23 = sphi %s12798_s23, %s16423_s23   ;;  %s12673_s22 = sphi %s12796_s22, %s16422_s22   ;;  %s12669_s21 = sphi %s12794_s21, %s16421_s21   ;;  %s12665_s20 = sphi %s12792_s20, %s16420_s20  }
  0x11   : > { %s400_s24 = sshll.u32 %s12679_s12, 4  ;;  %p10267_p0 = scmp.ge.s32.totalorder %s12677_s23, 1  ;;  %s12818_s24 = int_to_ptr.vmem [resolvable:$true] %s400_s24 }
  0x12   : > { %p16256_p1 = scmp.eq.s32.totalorder %s12813_s25, 0  ;;  %p387_p2 = scmp.lt.s32.totalorder %s12677_s23, 3 }
  0x13   : > { %s12680_s27 = smov [#allocation9]   ;;  %s12681_s30 = smov [#allocation12]  }
  0x14   : > { %p12820_p3 = pnand %p10267_p0, %p387_p2  ;;  %s424_s28 = sshll.u32 %s12680_s27, 4  ;;  %s12827_s28 = int_to_ptr.vmem [resolvable:$true] %s424_s28 }
  0x15   : > { %s450_s16 = sshll.u32 %s12681_s30, 4  ;;  %s16302_s1 = sld [smem:[#allocation45_spill]]  ;;  %s12835_s16 = int_to_ptr.vmem [resolvable:$true] %s450_s16 }
  0x16   : > { %s16300_s26 = scalar_select %p12820_p3, 1, 0 }
  0x17   : > { %p11764_p5 = pneg %p12820_p3 }
  0x19   : > { %p12831_p6 = pnand %p11764_p5, %p16256_p1 }
  0x1b   : > { %s12401_s19 = scalar_lea.hbm %s16302_s1, 16  ;;  %p12845_p8 = pneg %p12831_p6 }
  0x1c   : > { %p12402_p7 = scmp.ne.s32.totalorder %s16302_s1, %s12401_s19  ;;  %p12408_p11 = scmp.lt.u32.totalorder %s12401_s19, %s16302_s1 }
  0x1e   : > { %p12404_p9 = pnand %p12845_p8, %p12402_p7 }
  0x20   : > { %p12405_p10 = pneg %p12404_p9 }
  0x22   : > { %p12410_p12 = pnand %p12408_p11, %p12405_p10 }
  0x24   : > { %12413 = shalt.err (!%p12410_p12)
}
  0x25   : > { %s12414_s15 = scalar_lea.vmem %s12818_s24, 16  ;;  %s12421_s17 = scalar_lea.vmem %s12818_s24, 32 }
  0x26   : > { %p12415_p13 = scmp.ne.s32.totalorder %s12818_s24, %s12414_s15  ;;  %p12422_p5 = scmp.lt.s32.totalorder %s12818_s24, %s12818_s24 }
  0x27   : > { %p12423_p7 = scmp.lt.s32.totalorder %s12421_s17, %s12414_s15 }
  0x28   : > { %p12417_p0 = pnand %p12415_p13, %p12845_p8 }
  0x29   : > { %p12424_p9 = por %p12423_p7, %p12422_p5 }
  0x2a   : > { %p12418_p2 = pneg %p12417_p0 }
  0x2c   : > { %p12425_p4 = pnand %p12424_p9, %p12418_p2 }
  0x2e   : > { %12428 = shalt.err (!%p12425_p4)
}
  0x2f   : > { %11767 = dma.hbm_to_vmem [thread:$0]  (!%p12831_p6), %s16302_s1, 16, %s12818_s24, [#allocation7]  }
  0x30   : > { %s16304_s4 = sld [smem:[#allocation46_spill]] }
  0x36   : > { %s12429_s30 = scalar_lea.hbm %s16304_s4, 32 }
  0x37   : > { %p12430_p10 = scmp.ne.s32.totalorder %s16304_s4, %s12429_s30  ;;  %p12436_p4 = scmp.lt.u32.totalorder %s12429_s30, %s16304_s4 }
  0x39   : > { %p12432_p11 = pnand %p12430_p10, %p12845_p8 }
  0x3b   : > { %p12433_p12 = pneg %p12432_p11 }
  0x3d   : > { %p12438_p13 = pnand %p12436_p4, %p12433_p12 }
  0x3f   : > { %12441 = shalt.err (!%p12438_p13)
}
  0x40   : > { %s12442_s24 = scalar_lea.vmem %s12827_s28, 32  ;;  %p12450_p7 = scmp.lt.s32.totalorder %s12827_s28, %s12827_s28 }
  0x41   : > { %p12443_p0 = scmp.ne.s32.totalorder %s12827_s28, %s12442_s24  ;;  %p12451_p9 = scmp.lt.s32.totalorder %s12442_s24, %s12442_s24 }
  0x43   : > { %p12445_p2 = pnand %p12443_p0, %p12845_p8  ;;  %p12452_p10 = por %p12451_p9, %p12450_p7 }
  0x45   : > { %p12446_p5 = pneg %p12445_p2 }
  0x47   : > { %p12453_p11 = pnand %p12452_p10, %p12446_p5 }
  0x49   : > { %12456 = shalt.err (!%p12453_p11)
}
  0x4a   : > { %s12682_s11 = smov 16   ;;  %s12683_s13 = smov 1  }
  0x4b   : > { %11773 = dma.hbm_to_vmem [thread:$0]  (!%p12831_p6), %s16304_s4, 32, %s12827_s28, [#allocation10], %s12682_s11, %s12682_s11, %s12683_s13  }
  0x4c   : > { %s12457_s30 = scalar_lea.hbm %s16244_s6, 32 }
  0x4d   : > { %p12458_p12 = scmp.ne.s32.totalorder %s16244_s6, %s12457_s30  ;;  %p12464_p0 = scmp.lt.u32.totalorder %s12457_s30, %s16244_s6 }
  0x4f   : > { %p12460_p4 = pnand %p12458_p12, %p12845_p8 }
  0x51   : > { %p12461_p13 = pneg %p12460_p4 }
  0x53   : > { %p12466_p2 = pnand %p12464_p0, %p12461_p13 }
  0x55   : > { %12469 = shalt.err (!%p12466_p2)
}
  0x56   : > { %s12470_s28 = scalar_lea.vmem %s12835_s16, 32  ;;  %p12478_p10 = scmp.lt.s32.totalorder %s12835_s16, %s12835_s16 }
  0x57   : > { %p12471_p5 = scmp.ne.s32.totalorder %s12835_s16, %s12470_s28  ;;  %p12479_p11 = scmp.lt.s32.totalorder %s12470_s28, %s12470_s28 }
  0x59   : > { %p12473_p7 = pnand %p12471_p5, %p12845_p8  ;;  %p12480_p12 = por %p12479_p11, %p12478_p10 }
  0x5b   : > { %p12474_p9 = pneg %p12473_p7 }
  0x5d   : > { %p12481_p4 = pnand %p12480_p12, %p12474_p9 }
  0x5f   : > { %12484 = shalt.err (!%p12481_p4)
}
  0x60   : > { %11779 = dma.hbm_to_vmem [thread:$0]  (!%p12831_p6), %s16244_s6, 32, %s12835_s16, [#allocation13], %s12682_s11, %s12682_s11, %s12683_s13  }
  0x61   : > { %s12684_s18 = smov [#allocation8]   ;;  %s12685_s12 = smov [#allocation11]  }
  0x62   : > { %s411_s19 = sshll.u32 %s12684_s18, 4  ;;  %s437_s30 = sshll.u32 %s12685_s12, 4  ;;  %s412_s19 = int_to_ptr.vmem [resolvable:$true] %s411_s19  ;;  %s438_s30 = int_to_ptr.vmem [resolvable:$true] %s437_s30 }
  0x63   : > { %s12485_s24 = scalar_lea.hbm %s16240_s2, 16 }
  0x64   : > { %p12486_p13 = scmp.ne.s32.totalorder %s16240_s2, %s12485_s24  ;;  %p12492_p5 = scmp.lt.u32.totalorder %s12485_s24, %s16240_s2 }
  0x66   : > { %p12488_p0 = pnand %p12486_p13, %p12845_p8 }
  0x68   : > { %p12489_p2 = pneg %p12488_p0 }
  0x6a   : > { %p12494_p7 = pnand %p12492_p5, %p12489_p2 }
  0x6c   : > { %12497 = shalt.err (!%p12494_p7)
}
  0x6d   : > { %s12498_s16 = scalar_lea.vmem %s412_s19, 16  ;;  %s12505_s11 = scalar_lea.vmem %s412_s19, 32 }
  0x6e   : > { %p12499_p9 = scmp.ne.s32.totalorder %s412_s19, %s12498_s16  ;;  %p12506_p12 = scmp.lt.s32.totalorder %s412_s19, %s412_s19 }
  0x6f   : > { %p12507_p4 = scmp.lt.s32.totalorder %s12505_s11, %s12498_s16 }
  0x70   : > { %p12501_p10 = pnand %p12499_p9, %p12845_p8 }
  0x71   : > { %p12508_p1 = por %p12507_p4, %p12506_p12 }
  0x72   : > { %p12502_p11 = pneg %p12501_p10 }
  0x74   : > { %p12509_p3 = pnand %p12508_p1, %p12502_p11 }
  0x76   : > { %12512 = shalt.err (!%p12509_p3)
}
  0x77   : > { %11770 = dma.hbm_to_vmem [thread:$0]  (!%p12831_p6), %s16240_s2, 16, %s412_s19, [#allocation7]  }
  0x78   : > { %s12513_s18 = scalar_lea.hbm %s16243_s5, 512 }
  0x79   : > { %p12514_p13 = scmp.ne.s32.totalorder %s16243_s5, %s12513_s18  ;;  %p12520_p3 = scmp.lt.u32.totalorder %s12513_s18, %s16243_s5 }
  0x7b   : > { %p12516_p0 = pnand %p12514_p13, %p12845_p8 }
  0x7d   : > { %p12517_p1 = pneg %p12516_p0 }
  0x7f   : > { %p12522_p2 = pnand %p12520_p3, %p12517_p1 }
  0x81   : > { %12525 = shalt.err (!%p12522_p2)
}
  0x82   : > { %s12526_s28 = scalar_lea.vmem %s438_s30, 512  ;;  %p12534_p10 = scmp.lt.s32.totalorder %s438_s30, %s438_s30 }
  0x83   : > { %p12527_p5 = scmp.ne.s32.totalorder %s438_s30, %s12526_s28  ;;  %p12535_p11 = scmp.lt.s32.totalorder %s12526_s28, %s12526_s28 }
  0x85   : > { %p12529_p7 = pnand %p12527_p5, %p12845_p8  ;;  %p12536_p12 = por %p12535_p11, %p12534_p10 }
  0x87   : > { %p12530_p9 = pneg %p12529_p7 }
  0x89   : > { %p12537_p4 = pnand %p12536_p12, %p12530_p9 }
  0x8b   : > { %12540 = shalt.err (!%p12537_p4)
}
  0x8c   : > { %s12686_s19 = smov 64   ;;  %s12687_s1 = smov 4  }
  0x8d   : > { %11776 = dma.hbm_to_vmem [thread:$0]  (!%p12831_p6), %s16243_s5, 512, %s438_s30, [#allocation10], %s12686_s19, %s12686_s19, %s12687_s1  }
  0x8e   : > { %s12688_s4 = smov [#allocation14]   ;;  %s12541_s18 = scalar_lea.hbm %s16245_s7, 512 }
  0x8f   : > { %s463_s13 = sshll.u32 %s12688_s4, 4  ;;  %p12542_p13 = scmp.ne.s32.totalorder %s16245_s7, %s12541_s18  ;;  %s464_s13 = int_to_ptr.vmem [resolvable:$true] %s463_s13 }
  0x90   : > { %p12548_p3 = scmp.lt.u32.totalorder %s12541_s18, %s16245_s7 }
  0x91   : > { %p12544_p0 = pnand %p12542_p13, %p12845_p8 }
  0x93   : > { %p12545_p1 = pneg %p12544_p0 }
  0x95   : > { %p12550_p2 = pnand %p12548_p3, %p12545_p1 }
  0x97   : > { %12553 = shalt.err (!%p12550_p2)
}
  0x98   : > { %s12554_s30 = scalar_lea.vmem %s464_s13, 512  ;;  %p12562_p10 = scmp.lt.s32.totalorder %s464_s13, %s464_s13 }
  0x99   : > { %p12555_p5 = scmp.ne.s32.totalorder %s464_s13, %s12554_s30  ;;  %p12563_p11 = scmp.lt.s32.totalorder %s12554_s30, %s12554_s30 }
  0x9b   : > { %p12557_p7 = pnand %p12555_p5, %p12845_p8  ;;  %p12564_p12 = por %p12563_p11, %p12562_p10 }
  0x9d   : > { %p12558_p9 = pneg %p12557_p7 }
  0x9f   : > { %p12565_p4 = pnand %p12564_p12, %p12558_p9 }
  0xa1   : > { %12568 = shalt.err (!%p12565_p4)
}
  0xa2   : > { %11782 = dma.hbm_to_vmem [thread:$0]  (!%p12831_p6), %s16245_s7, 512, %s464_s13, [#allocation13], %s12686_s19, %s12686_s19, %s12687_s1  }
  0xa3   : > { %s10266_s27 = sadd.s32 4294967294, %s12677_s23   ;;  %s12969_s29 = sadd.s32 1, %s12677_s23  }
  0xa4   : > { %s40_s11 = ssub.s32 %s12677_s23, %s12969_s29  ;;  %s43_s4 = sadd.s32 1, %s12673_s22 }
  0xa5   : > { %p41_p8 = scmp.eq.s32.totalorder %s40_s11, 0  ;;  %p50_p13 = scmp.ne.s32.totalorder %s12673_s22, %s12669_s21 }
  0xa6   : > { %p51_p0 = scmp.eq.s32.totalorder %s12677_s23, 0  ;;  %p56_p1 = scmp.ne.s32.totalorder %s12669_s21, %s12665_s20 }
  0xa7   : > { %s12980_s10 = scalar_select %p41_p8, %s12673_s22, %s43_s4  }
  0xa8   : > { %p12982_p3 = por %p51_p0, %p50_p13  ;;  %p16306_p2 = scmp.eq.s32.totalorder %s12813_s25, 0 }
  0xa9   : > { %p374_p5 = scmp.eq.s32.totalorder %s12813_s25, 1  ;;  %p380_p7 = scmp.eq.s32.totalorder %s10266_s27, 1 }
  0xaa   : > { %p12988_p6 = por %p16306_p2, %p56_p1  ;;  %p11797_p9 = scmp.lt.s32.totalorder %s12677_s23, 2 }
  0xab   : > { %s498_s1 = sand.u32 1, %s12673_s22   ;;  %p12995_p10 = por %p374_p5, %p50_p13 }
  0xac   : > { %p12999_p11 = por %p380_p7, %p56_p1  ;;  %s10275_s12 = sshll.u32 %s498_s1, 6 }
  0xad   : > { %s16308_s13 = scalar_select %p12995_p10, 1, 0 }
  0xae   : > { %s16309_s18 = scalar_select %p12999_p11, 1, 0 }
  0xaf   : > { %s10547_s15 = sshll.u32 %s12677_s23, 10  ;;  %s502_s28 = scalar_lea.vmem [#allocation3], %s10275_s12 }
  0xb0   : > { %s13007_s30 = scalar_lea.hbm %s16238_s0, %s10547_s15  ;;  %s509_s16 = sshll.u32 %s502_s28, 4  ;;  %s13009_s16 = int_to_ptr.vmem [resolvable:$true] %s509_s16 }
  0xb1   : > { %p13013_p12 = pnand %p11797_p9, %p12982_p3  ;;  %s13017_s11 = scalar_lea.sflag [#allocation4], %s498_s1 }
  0xb2   : > { %s12569_s4 = scalar_lea.hbm %s13007_s30, 1024  ;;  %s12574_s14 = scalar_lea.hbm %s16238_s0, 2048 }
  0xb3   : > { %p12570_p4 = scmp.ne.s32.totalorder %s13007_s30, %s12569_s4  ;;  %p12571_p8 = pneg %p13013_p12 }
  0xb4   : > { %p12575_p1 = scmp.lt.u32.totalorder %s13007_s30, %s16238_s0  ;;  %p12576_p3 = scmp.lt.u32.totalorder %s12574_s14, %s12569_s4 }
  0xb5   : > { %p12572_p13 = pnand %p12571_p8, %p12570_p4  ;;  %p12578_p5 = scmp.lt.u32.totalorder %s12569_s4, %s13007_s30 }
  0xb6   : > { %p12577_p2 = por %p12576_p3, %p12575_p1 }
  0xb7   : > { %p12573_p0 = pneg %p12572_p13 }
  0xb8   : > { %p12579_p7 = por %p12578_p5, %p12577_p2 }
  0xba   : > { %p12580_p9 = pnand %p12579_p7, %p12573_p0 }
  0xbc   : > { %12583 = shalt.err (!%p12580_p9)
}
  0xbd   : > { %s12584_s1 = scalar_lea.vmem %s13009_s16, 1024  ;;  %s12689_s28 = smov [#allocation3]  }
  0xbe   : > { %p12585_p4 = scmp.ne.s32.totalorder %s13009_s16, %s12584_s1  ;;  %s12589_s12 = sshll.u32 %s12689_s28, 4  ;;  %s12590_s12 = int_to_ptr.vmem [resolvable:$false] %s12589_s12 }
  0xbf   : > { %s12591_s15 = scalar_lea.vmem %s12590_s12, 2048  ;;  %p12592_p10 = scmp.lt.s32.totalorder %s13009_s16, %s12590_s12 }
  0xc0   : > { %p12587_p13 = pnand %p12585_p4, %p12571_p8  ;;  %p12593_p1 = scmp.lt.s32.totalorder %s12591_s15, %s12584_s1 }
  0xc2   : > { %p12588_p11 = pneg %p12587_p13  ;;  %p12594_p3 = por %p12593_p1, %p12592_p10 }
  0xc4   : > { %p12595_p2 = pnand %p12594_p3, %p12588_p11 }
  0xc6   : > { %12598 = shalt.err (!%p12595_p2)
}
  0xc7   : > { %s12690_s4 = smov 128   ;;  %s12691_s14 = smov 8  }
  0xc8   : > { %11786 = dma.hbm_to_vmem [thread:$0]  (!%p13013_p12), %s13007_s30, 1024, %s13009_s16, %s13017_s11, %s12690_s4, %s12690_s4, %s12691_s14  }
  0xc9   : > { %p16311_p8 = scmp.ne.s32.totalorder %s16300_s26, 0 }
  0xcb   : > { %521 = sbr.rel (%p16311_p8) target bundleno = 5041 (0x13b1), region = 80 }
  0xd2   : > { %s13048_s17 = sand.u32 1, %s12669_s21  }
  0xd3   : > { %s10279_s24 = sshll.u32 %s13048_s17, 6  ;;  %s524_s1 = scalar_lea.sflag [#allocation4], %s13048_s17 }
  0xd4   : > { %s527_s28 = scalar_lea.vmem [#allocation3], %s10279_s24 }
  0xd5   : > { %12644 = dma.done.wait (%p12988_p6), %s524_s1, 1024  }
  0xd6   : > { %12646 = vsyncadd (%p12988_p6), %s524_s1, 4294966272  ;;  %p16312_p10 = scmp.eq.s32.totalorder %s12813_s25, 0 }
  0xd8   : > { %12648 = dma.done.wait (%p16312_p10), [#allocation7], 32   ;;  %p16313_p11 = pmov %p16312_p10 }
  0xd9   : > { %p16314_p12 = pmov %p16312_p10 }
  0xda   : > { %12650 = vsyncadd (%p16313_p11), [#allocation7], 4294967264 }
  0xdb   : > { %12652 = dma.done.wait (%p16314_p12), [#allocation10], 544   ;;  %p16315_p0 = pmov %p16312_p10 }
  0xdd   : > { %12654 = vsyncadd (%p16315_p0), [#allocation10], 4294966752  ;;  %p16316_p5 = pmov %p16315_p0 }
  0xde   : > { %p16317_p7 = pmov %p16315_p0 }
  0xdf   : > { %12656 = dma.done.wait (%p16316_p5), [#allocation13], 544  }
  0xe0   : > { %12658 = vsyncadd (%p16317_p7), [#allocation13], 4294966752  ;;  %vm610_vm0 = vcmask 261120   ;;  %v600_v1 = vld [vmem:[%s527_s28] sm:$0xff]  ;;  %v602_v2 = vld [vmem:[%s527_s28 + $0x10] sm:$0xff]  ;;  %vm1138_vm9 = vcmask 64512  }
  0xe1   : > { %v601_v3 = vld [vmem:[%s527_s28 + $0x8] sm:$0xff]  ;;  %v611_v4 = vsel %vm610_vm0, %v600_v1, 0.0  ;;  %v617_v5 = vsel %vm610_vm0, %v602_v2, 0.0  ;;  %v603_v6 = vld [vmem:[%s527_s28 + $0x18] sm:$0xff]  ;;  %v604_v7 = vld [vmem:[%s527_s28 + $0x20] sm:$0xff]  ;;  %s12694_s27 = smov 120  }
  0xe2   : > { %v605_v8 = vld [vmem:[%s527_s28 + $0x28] sm:$0xff]  ;;  %612 = vadd.xlane.f32.xlu0 %v611_v4  ;;  %618 = vadd.xlane.f32.xlu1 %v617_v5  ;;  %v614_v9 = vsel %vm610_vm0, %v601_v3, 0.0  ;;  %v620_v10 = vsel %vm610_vm0, %v603_v6, 0.0  ;;  %v623_v11 = vsel %vm610_vm0, %v604_v7, 0.0  ;;  %v606_v13 = vld [vmem:[%s527_s28 + $0x30] sm:$0xff]  ;;  %v607_v14 = vld [vmem:[%s527_s28 + $0x38] sm:$0xff] }
  0xe3   : > { %v626_v12 = vsel %vm610_vm0, %v605_v8, 0.0  ;;  %v629_v15 = vsel %vm610_vm0, %v606_v13, 0.0  ;;  %v632_v16 = vsel %vm610_vm0, %v607_v14, 0.0  ;;  %v11985_v57 = vld [vmem:[%s16241_s3] sm:$0xff]   ;;  %v11986_v58 = vld [vmem:[%s16241_s3 + $0x8] sm:$0xff]   ;;  %vm12695_vm10 = vmmov 0  }
  0xe4   : > { %10868 = vmatprep.subr.bf16.mxu0 %v11985_v57  ;;  %11732 = vmatprep.subr.bf16.mxu1 %v11985_v57  ;;  %s12696_s11 = smov 96   ;;  %s12697_s12 = smov 112   ;;  %vm3110_vm11 = vcmask 1043456   ;;  %vm4746_vm12 = vcmask 130048   ;;  %vm4755_vm13 = vcmask 195584  }
  0xe5   : > { %10869 = vmatpush3.bf16.msra.mxu0 %v11985_v57  ;;  %11734 = vmatpush3.bf16.msra.mxu1 %v11985_v57  ;;  %s12698_s15 = smov 104   ;;  %s12699_s4 = smov 64  }
  0xe6   : > { %615 = vadd.xlane.f32.xlu0 %v614_v9  ;;  %621 = vadd.xlane.f32.xlu1 %v620_v10  ;;  %s16276_s14 = smov 8   ;;  %s16274_s24 = smov 16  }
  0xe7   : > { %10870 = vmatprep.subr.bf16.mxu0 %v11986_v58  ;;  %11733 = vmatprep.subr.bf16.mxu1 %v11986_v58  ;;  %s16272_s1 = smov 24   ;;  %s16400_s19 = sld [smem:[#allocation48_spill]] }
  0xe8   : > { %s16413_s28 = sld [smem:[#allocation49_spill]]  ;;  %s12703_s30 = smov 1  }
  0xe9   : > { %10871 = vmatpush3.bf16.msra.mxu0 %v11986_v58  ;;  %11735 = vmatpush3.bf16.msra.mxu1 %v11986_v58  ;;  %s12704_s16 = smov 20   ;;  %s12707_s26 = smov 28  }
  0xea   : > { %624 = vadd.xlane.f32.xlu0 %v623_v11  ;;  %627 = vadd.xlane.f32.xlu1 %v626_v12  ;;  %p16417_p9 = scmp.ne.s32.totalorder %s16308_s13, 0 }
  0xee   : > { %630 = vadd.xlane.f32.xlu0 %v629_v15  ;;  %633 = vadd.xlane.f32.xlu1 %v632_v16  ;;  %v13122_v15 = vld [vmem:[#allocation6] ss:$0 sm:$0xff] }
 0x16f   : > { %v613_v17 = vpop.xlane.xlu0 %612  ;;  %v619_v18 = vpop.xlane.xlu1 %618 }
 0x170   : > { %v636_v19 = vmul.f32 0.03125, %v613_v17  ;;  %v638_v20 = vmul.f32 0.03125, %v619_v18 }
 0x172   : > { %v13076_v21 = vsub.f32 %v600_v1, %v636_v19  ;;  %v13078_v22 = vsub.f32 %v602_v2, %v638_v20  ;;  %v13125_v20 = vld [vmem:[#allocation8] ss:$0 sm:$0xff] }
 0x173   : > { %v616_v23 = vpop.xlane.xlu0 %615  ;;  %v622_v24 = vpop.xlane.xlu1 %621 }
 0x174   : > { %v637_v25 = vmul.f32 0.03125, %v616_v23  ;;  %v639_v26 = vmul.f32 0.03125, %v622_v24  ;;  %v652_v27 = vmul.f32 %v13076_v21, %v13076_v21  ;;  %v654_v28 = vmul.f32 %v13078_v22, %v13078_v22 }
 0x176   : > { %v13084_v29 = vsub.f32 %v601_v3, %v637_v25  ;;  %v13086_v30 = vsub.f32 %v603_v6, %v639_v26  ;;  %v660_v31 = vsel %vm610_vm0, %v652_v27, 0.0  ;;  %v666_v34 = vsel %vm610_vm0, %v654_v28, 0.0 }
 0x177   : > { %661 = vadd.xlane.f32.xlu0 %v660_v31  ;;  %v625_v32 = vpop.xlane.xlu0 %624  ;;  %v628_v33 = vpop.xlane.xlu1 %627 }
 0x178   : > { %v640_v35 = vmul.f32 0.03125, %v625_v32  ;;  %v641_v36 = vmul.f32 0.03125, %v628_v33  ;;  %v653_v37 = vmul.f32 %v13084_v29, %v13084_v29  ;;  %v655_v38 = vmul.f32 %v13086_v30, %v13086_v30 }
 0x17a   : > { %v13094_v39 = vsub.f32 %v604_v7, %v640_v35  ;;  %v13096_v40 = vsub.f32 %v605_v8, %v641_v36  ;;  %v663_v41 = vsel %vm610_vm0, %v653_v37, 0.0  ;;  %v669_v44 = vsel %vm610_vm0, %v655_v38, 0.0 }
 0x17b   : > { %667 = vadd.xlane.f32.xlu0 %v666_v34  ;;  %664 = vadd.xlane.f32.xlu1 %v663_v41  ;;  %v631_v42 = vpop.xlane.xlu0 %630  ;;  %v634_v43 = vpop.xlane.xlu1 %633 }
 0x17c   : > { %v642_v45 = vmul.f32 0.03125, %v631_v42  ;;  %v643_v46 = vmul.f32 0.03125, %v634_v43  ;;  %v656_v47 = vmul.f32 %v13094_v39, %v13094_v39  ;;  %v657_v48 = vmul.f32 %v13096_v40, %v13096_v40 }
 0x17e   : > { %v13104_v49 = vsub.f32 %v606_v13, %v642_v45  ;;  %v13106_v50 = vsub.f32 %v607_v14, %v643_v46  ;;  %v672_v51 = vsel %vm610_vm0, %v656_v47, 0.0  ;;  %v675_v52 = vsel %vm610_vm0, %v657_v48, 0.0 }
 0x17f   : > { %670 = vadd.xlane.f32.xlu1 %v669_v44  ;;  %673 = vadd.xlane.f32.xlu0 %v672_v51 }
 0x180   : > { %v658_v53 = vmul.f32 %v13104_v49, %v13104_v49  ;;  %v659_v54 = vmul.f32 %v13106_v50, %v13106_v50 }
 0x182   : > { %v678_v55 = vsel %vm610_vm0, %v658_v53, 0.0  ;;  %v681_v56 = vsel %vm610_vm0, %v659_v54, 0.0 }
 0x183   : > { %676 = vadd.xlane.f32.xlu1 %v675_v52  ;;  %679 = vadd.xlane.f32.xlu0 %v678_v55 }
 0x187   : > { %682 = vadd.xlane.f32.xlu1 %v681_v56 }
 0x204   : > { %v662_v59 = vpop.xlane.xlu0 %661 }
 0x205   : > { %v684_v60 = vmul.f32 0.03125, %v662_v59 }
 0x207   : > { %v692_v61 = vadd.f32 1e-05, %v684_v60 }
 0x208   : > { %v665_v62 = vpop.xlane.xlu1 %664  ;;  %v668_v63 = vpop.xlane.xlu0 %667 }
 0x209   : > { %12001 = vrsqrt.f32 %v692_v61  ;;  %v685_v0 = vmul.f32 0.03125, %v665_v62  ;;  %v686_v1 = vmul.f32 0.03125, %v668_v63 }
 0x20b   : > { %v693_v2 = vadd.f32 1e-05, %v685_v0  ;;  %v694_v3 = vadd.f32 1e-05, %v686_v1 }
 0x20c   : > { %v671_v4 = vpop.xlane.xlu1 %670  ;;  %v674_v5 = vpop.xlane.xlu0 %673 }
 0x20d   : > { %12003 = vrsqrt.f32 %v693_v2  ;;  %v687_v6 = vmul.f32 0.03125, %v671_v4  ;;  %v688_v7 = vmul.f32 0.03125, %v674_v5 }
 0x20e   : > { %12005 = vrsqrt.f32 %v694_v3 }
 0x20f   : > { %v695_v8 = vadd.f32 1e-05, %v687_v6  ;;  %v696_v9 = vadd.f32 1e-05, %v688_v7 }
 0x210   : > { %v677_v10 = vpop.xlane.xlu1 %676  ;;  %v680_v11 = vpop.xlane.xlu0 %679 }
 0x211   : > { %12007 = vrsqrt.f32 %v695_v8  ;;  %v689_v12 = vmul.f32 0.03125, %v677_v10  ;;  %v690_v13 = vmul.f32 0.03125, %v680_v11  ;;  %v16259_v11 = vmov -1.0  }
 0x212   : > { %12009 = vrsqrt.f32 %v696_v9 }
 0x213   : > { %v12002_v14 = vpop.eup %12001  ;;  %v697_v18 = vadd.f32 1e-05, %v689_v12  ;;  %v698_v23 = vadd.f32 1e-05, %v690_v13 }
 0x214   : > { %v683_v16 = vpop.xlane.xlu1 %682  ;;  %v708_v17 = vmul.f32 %v12002_v14, %v13076_v21 }
 0x215   : > { %v691_v19 = vmul.f32 0.03125, %v683_v16  ;;  %12011 = vrsqrt.f32 %v697_v18 }
 0x216   : > { %v722_v24 = vmul.f32 %v13122_v15, %v708_v17  ;;  %12013 = vrsqrt.f32 %v698_v23 }
 0x217   : > { %v12004_v25 = vpop.eup %12003  ;;  %v699_v26 = vadd.f32 1e-05, %v691_v19 }
 0x218   : > { %v12006_v27 = vpop.eup %12005  ;;  %v709_v28 = vmul.f32 %v12004_v25, %v13084_v29  ;;  %v736_v31 = vadd.f32 %v13125_v20, %v722_v24 }
 0x219   : > { %v710_v32 = vmul.f32 %v12006_v27, %v13078_v22  ;;  %12015 = vrsqrt.f32 %v699_v26 }
 0x21a   : > { %v723_v21 = vmul.f32 %v13122_v15, %v709_v28  ;;  %v752_v33 = vmul.f32 0.70710677, %v736_v31  ;;  %v13168_v7 = vmul.f32 0.5, %v736_v31 }
 0x21b   : > { %v12008_v34 = vpop.eup %12007  ;;  %v724_v35 = vmul.f32 %v13122_v15, %v710_v32 }
 0x21c   : > { %v711_v36 = vmul.f32 %v12008_v34, %v13086_v30  ;;  %v737_v37 = vadd.f32 %v13125_v20, %v723_v21  ;;  %v776_v38 = vand.u32 2147483647, %v752_v33  ;;  %v12010_v41 = vpop.eup %12009  ;;  %vm760_vm1 = vcmp.ge.f32.partialorder %v752_v33, 0.0 }
 0x21d   : > { %v738_v29 = vadd.f32 %v13125_v20, %v724_v35  ;;  %v712_v47 = vmul.f32 %v12010_v41, %v13094_v39  ;;  %v13175_v12 = vsel %vm760_vm1, 1.0, %v16259_v11 }
 0x21e   : > { %v13136_v42 = vmul.f32 0.70710677, %v737_v37  ;;  %v784_v22 = vmul.f32 0.3275911, %v776_v38  ;;  %v725_v43 = vmul.f32 %v13122_v15, %v711_v36  ;;  %v888_v39 = vsub.f32 0.0, %v776_v38 }
 0x21f   : > { %v13139_v44 = vmul.f32 0.70710677, %v738_v29  ;;  %v12012_v51 = vpop.eup %12011  ;;  %v726_v56 = vmul.f32 %v13122_v15, %v712_v47  ;;  %v13179_v17 = vmul.f32 0.5, %v737_v37  ;;  %v13182_v25 = vmul.f32 0.5, %v738_v29 }
 0x220   : > { %v777_v45 = vand.u32 2147483647, %v13136_v42  ;;  %v792_v46 = vadd.f32 1.0, %v784_v22  ;;  %v13144_v30 = vadd.f32 %v13125_v20, %v725_v43  ;;  %v12014_v54 = vpop.eup %12013  ;;  %v713_v60 = vmul.f32 %v12012_v51, %v13096_v40 }
 0x221   : > { %v778_v53 = vand.u32 2147483647, %v13139_v44  ;;  %v714_v61 = vmul.f32 %v12014_v54, %v13104_v49  ;;  %v13157_v2 = vadd.f32 %v13125_v20, %v726_v56  ;;  %v896_v5 = vmul.f32 %v888_v39, %v776_v38 }
 0x222   : > { %v785_v48 = vmul.f32 0.3275911, %v777_v45  ;;  %12017 = vrcp.f32 %v792_v46  ;;  %v13147_v52 = vmul.f32 0.70710677, %v13144_v30  ;;  %v727_v1 = vmul.f32 %v13122_v15, %v713_v60 }
 0x223   : > { %v12016_v57 = vpop.eup %12015  ;;  %v786_v59 = vmul.f32 0.3275911, %v778_v53  ;;  %v889_v4 = vsub.f32 0.0, %v777_v45  ;;  %v13163_v40 = vmul.f32 0.70710677, %v13157_v2  ;;  %v728_v49 = vmul.f32 %v13122_v15, %v714_v61 }
 0x224   : > { %v793_v55 = vadd.f32 1.0, %v785_v48  ;;  %v779_v58 = vand.u32 2147483647, %v13147_v52  ;;  %v715_v0 = vmul.f32 %v12016_v57, %v13106_v50  ;;  %v13160_v6 = vadd.f32 %v13125_v20, %v727_v1 }
 0x225   : > { %v794_v63 = vadd.f32 1.0, %v786_v59  ;;  %v890_v8 = vsub.f32 0.0, %v778_v53  ;;  %v780_v16 = vand.u32 2147483647, %v13163_v40  ;;  %v897_v18 = vmul.f32 %v889_v4, %v777_v45 }
 0x226   : > { %12019 = vrcp.f32 %v793_v55  ;;  %v787_v62 = vmul.f32 0.3275911, %v779_v58  ;;  %v13171_v9 = vmul.f32 0.70710677, %v13160_v6  ;;  %v729_v10 = vmul.f32 %v13122_v15, %v715_v0 }
 0x227   : > { %12021 = vrcp.f32 %v794_v63  ;;  %v891_v14 = vsub.f32 0.0, %v779_v58  ;;  %v904_v19 = vmul.f32 1.442695, %v896_v5  ;;  %v788_v26 = vmul.f32 0.3275911, %v780_v16 }
 0x228   : > { %v795_v3 = vadd.f32 1.0, %v787_v62  ;;  %v781_v23 = vand.u32 2147483647, %v13171_v9  ;;  %v13185_v15 = vadd.f32 %v13125_v20, %v728_v49  ;;  %vm761_vm2 = vcmp.ge.f32.partialorder %v13136_v42, 0.0 }
 0x229   : > { %v898_v28 = vmul.f32 %v890_v8, %v778_v53  ;;  %v13191_v32 = vadd.f32 %v13125_v20, %v729_v10  ;;  %v899_v34 = vmul.f32 %v891_v14, %v779_v58  ;;  %v796_v35 = vadd.f32 1.0, %v788_v26 }
 0x22a   : > { %12023 = vrcp.f32 %v795_v3  ;;  %v789_v31 = vmul.f32 0.3275911, %v781_v23  ;;  %v906_v36 = vmul.f32 1.442695, %v897_v18  ;;  %vm762_vm3 = vcmp.ge.f32.partialorder %v13139_v44, 0.0 }
 0x22b   : > { %12025 = vpow2.f32 %v904_v19  ;;  %v13199_v22 = vmul.f32 0.70710677, %v13185_v15  ;;  %v13204_v20 = vsel %vm761_vm2, 1.0, %v16259_v11  ;;  %v13208_v45 = vmul.f32 0.70710677, %v13191_v32 }
 0x22c   : > { %v13166_v50 = vpop.eup %12017  ;;  %v797_v37 = vadd.f32 1.0, %v789_v31  ;;  %12027 = vrcp.f32 %v796_v35  ;;  %v908_v51 = vmul.f32 1.442695, %v898_v28  ;;  %v910_v53 = vmul.f32 1.442695, %v899_v34 }
 0x22d   : > { %v816_v13 = vmul.f32 1.0614054, %v13166_v50  ;;  %v13217_v42 = vsel %vm762_vm3, 1.0, %v16259_v11  ;;  %v892_v56 = vsub.f32 0.0, %v780_v16  ;;  %v782_v59 = vand.u32 2147483647, %v13199_v22 }
 0x22e   : > { %12029 = vrcp.f32 %v797_v37  ;;  %v893_v61 = vsub.f32 0.0, %v781_v23  ;;  %v783_v62 = vand.u32 2147483647, %v13208_v45  ;;  %vm763_vm4 = vcmp.ge.f32.partialorder %v13147_v52, 0.0 }
 0x22f   : > { %v824_v24 = vadd.f32 -1.4531521, %v816_v13  ;;  %12031 = vpow2.f32 %v906_v36  ;;  %v790_v0 = vmul.f32 0.3275911, %v782_v59  ;;  %v900_v8 = vmul.f32 %v892_v56, %v780_v16 }
 0x230   : > { %v13187_v27 = vpop.eup %12019  ;;  %12033 = vpow2.f32 %v908_v51  ;;  %v791_v4 = vmul.f32 0.3275911, %v783_v62  ;;  %v901_v19 = vmul.f32 %v893_v61, %v781_v23  ;;  %vm764_vm5 = vcmp.ge.f32.partialorder %v13163_v40, 0.0 }
 0x231   : > { %v817_v21 = vmul.f32 1.0614054, %v13187_v27  ;;  %v832_v33 = vmul.f32 %v13166_v50, %v824_v24  ;;  %v13196_v38 = vpop.eup %12021  ;;  %12035 = vpow2.f32 %v910_v53  ;;  %v798_v10 = vadd.f32 1.0, %v790_v0 }
 0x232   : > { %v818_v43 = vmul.f32 1.0614054, %v13196_v38  ;;  %v799_v24 = vadd.f32 1.0, %v791_v4  ;;  %vm765_vm6 = vcmp.ge.f32.partialorder %v13171_v9, 0.0  ;;  %vm766_vm7 = vcmp.ge.f32.partialorder %v13199_v22, 0.0 }
 0x233   : > { %v825_v41 = vadd.f32 -1.4531521, %v817_v21  ;;  %v840_v29 = vadd.f32 1.4214138, %v832_v33  ;;  %12037 = vrcp.f32 %v798_v10  ;;  %v894_v21 = vsub.f32 0.0, %v782_v59 }
 0x234   : > { %v13210_v46 = vpop.eup %12023  ;;  %v826_v55 = vadd.f32 -1.4531521, %v818_v43  ;;  %12039 = vrcp.f32 %v799_v24  ;;  %vm767_vm8 = vcmp.ge.f32.partialorder %v13208_v45, 0.0  ;;  %v750_v22 = vmul.f32 0.5, %v13185_v15 }
 0x235   : > { %v833_v47 = vmul.f32 %v13187_v27, %v825_v41  ;;  %v848_v48 = vmul.f32 %v13166_v50, %v840_v29  ;;  %v819_v54 = vmul.f32 1.0614054, %v13210_v46  ;;  %v12026_v13 = vpop.eup %12025  ;;  %v895_v41 = vsub.f32 0.0, %v783_v62 }
 0x236   : > { %v834_v60 = vmul.f32 %v13196_v38, %v826_v55  ;;  %v13227_v26 = vpop.eup %12027  ;;  %v914_v55 = vmul.f32 1.442695, %v901_v19 }
 0x237   : > { %v841_v57 = vadd.f32 1.4214138, %v833_v47  ;;  %v856_v58 = vadd.f32 -0.28449672, %v848_v48  ;;  %v827_v39 = vadd.f32 -1.4531521, %v819_v54  ;;  %v903_v0 = vmul.f32 %v895_v41, %v783_v62 }
 0x238   : > { %v842_v3 = vadd.f32 1.4214138, %v834_v60  ;;  %v13231_v33 = vpop.eup %12029  ;;  %v820_v35 = vmul.f32 1.0614054, %v13227_v26 }
 0x239   : > { %v849_v63 = vmul.f32 %v13187_v27, %v841_v57  ;;  %v864_v44 = vmul.f32 %v13166_v50, %v856_v58  ;;  %v835_v1 = vmul.f32 %v13210_v46, %v827_v39  ;;  %v821_v23 = vmul.f32 1.0614054, %v13231_v33  ;;  %v12032_v48 = vpop.eup %12031 }
 0x23a   : > { %v850_v18 = vmul.f32 %v13196_v38, %v842_v3  ;;  %v828_v47 = vadd.f32 -1.4531521, %v820_v35  ;;  %v902_v39 = vmul.f32 %v894_v21, %v782_v59  ;;  %v12034_v60 = vpop.eup %12033 }
 0x23b   : > { %v857_v5 = vadd.f32 -0.28449672, %v849_v63  ;;  %v872_v49 = vadd.f32 0.2548296, %v864_v44  ;;  %v843_v14 = vadd.f32 1.4214138, %v835_v1  ;;  %v12036_v1 = vpop.eup %12035 }
 0x23c   : > { %v858_v16 = vadd.f32 -0.28449672, %v850_v18  ;;  %v829_v54 = vadd.f32 -1.4531521, %v821_v23  ;;  %v836_v58 = vmul.f32 %v13227_v26, %v828_v47  ;;  %v918_v18 = vmul.f32 1.442695, %v903_v0 }
 0x23d   : > { %v865_v28 = vmul.f32 %v13187_v27, %v857_v5  ;;  %v880_v31 = vmul.f32 %v13166_v50, %v872_v49  ;;  %v851_v34 = vmul.f32 %v13210_v46, %v843_v14  ;;  %v912_v50 = vmul.f32 1.442695, %v900_v8 }
 0x23e   : > { %v866_v43 = vmul.f32 %v13196_v38, %v858_v16  ;;  %v837_v44 = vmul.f32 %v13231_v33, %v829_v54  ;;  %v844_v4 = vadd.f32 1.4214138, %v836_v58 }
 0x23f   : > { %v873_v36 = vadd.f32 0.2548296, %v865_v28  ;;  %v920_v37 = vmul.f32 %v12026_v13, %v880_v31  ;;  %v859_v29 = vadd.f32 -0.28449672, %v851_v34  ;;  %12041 = vpow2.f32 %v912_v50  ;;  %v13246_v13 = vpop.eup %12037 }
 0x240   : > { %v874_v57 = vadd.f32 0.2548296, %v866_v43  ;;  %v845_v49 = vadd.f32 1.4214138, %v837_v44  ;;  %12043 = vpow2.f32 %v914_v55  ;;  %v852_v10 = vmul.f32 %v13227_v26, %v844_v4  ;;  %v13250_v19 = vpop.eup %12039 }
 0x241   : > { %v881_v51 = vmul.f32 %v13187_v27, %v873_v36  ;;  %v928_v53 = vsub.f32 1.0, %v920_v37  ;;  %v867_v56 = vmul.f32 %v13210_v46, %v859_v29  ;;  %v822_v21 = vmul.f32 1.0614054, %v13246_v13 }
 0x242   : > { %v882_v27 = vmul.f32 %v13196_v38, %v874_v57  ;;  %v853_v38 = vmul.f32 %v13231_v33, %v845_v49  ;;  %v860_v31 = vadd.f32 -0.28449672, %v852_v10  ;;  %v771_v34 = vsel %vm763_vm4, 1.0, %v16259_v11 }
 0x243   : > { %v921_v61 = vmul.f32 %v12032_v48, %v881_v51  ;;  %v936_v63 = vmul.f32 %v928_v53, %v13175_v12  ;;  %v875_v3 = vadd.f32 0.2548296, %v867_v56  ;;  %v916_v12 = vmul.f32 1.442695, %v902_v39 }
 0x244   : > { %v922_v8 = vmul.f32 %v12034_v60, %v882_v27  ;;  %v861_v16 = vadd.f32 -0.28449672, %v853_v38  ;;  %v823_v35 = vmul.f32 1.0614054, %v13250_v19  ;;  %v868_v37 = vmul.f32 %v13227_v26, %v860_v31 }
 0x245   : > { %v929_v5 = vsub.f32 1.0, %v921_v61  ;;  %v883_v59 = vmul.f32 %v13210_v46, %v875_v3  ;;  %v944_v14 = vadd.f32 1.0, %v936_v63  ;;  %v830_v23 = vadd.f32 -1.4531521, %v822_v21 }
 0x246   : > { %v930_v28 = vsub.f32 1.0, %v922_v8  ;;  %v869_v43 = vmul.f32 %v13231_v33, %v861_v16  ;;  %v831_v47 = vadd.f32 -1.4531521, %v823_v35  ;;  %v876_v48 = vadd.f32 0.2548296, %v868_v37 }
 0x247   : > { %v937_v62 = vmul.f32 %v929_v5, %v13204_v20  ;;  %v923_v24 = vmul.f32 %v12036_v1, %v883_v59  ;;  %v13260_v41 = vmul.f32 %v944_v14, %v13168_v7  ;;  %v838_v51 = vmul.f32 %v13246_v13, %v830_v23 }
 0x248   : > { %v938_v36 = vmul.f32 %v930_v28, %v13217_v42  ;;  %v747_v53 = vmul.f32 0.5, %v13144_v30  ;;  %v877_v54 = vadd.f32 0.2548296, %v869_v43  ;;  %v839_v7 = vmul.f32 %v13250_v19, %v831_v47 }
 0x249   : > { %v945_v46 = vadd.f32 1.0, %v937_v62  ;;  %v931_v20 = vsub.f32 1.0, %v923_v24  ;;  %16318 = vst [vmem:[#allocation21_spill] sm:$0xff] %v13260_v41  ;;  %v12042_v55 = vpop.eup %12041  ;;  %v846_v57 = vadd.f32 1.4214138, %v838_v51  ;;  %12045 = vpow2.f32 %v916_v12 }
 0x24a   : > { %v946_v50 = vadd.f32 1.0, %v938_v36  ;;  %v12044_v58 = vpop.eup %12043  ;;  %v885_v39 = vmul.f32 %v13231_v33, %v877_v54  ;;  %v847_v60 = vadd.f32 1.4214138, %v839_v7  ;;  %12047 = vpow2.f32 %v918_v18 }
 0x24b   : > { %v13263_v29 = vmul.f32 %v945_v46, %v13179_v17  ;;  %v939_v52 = vmul.f32 %v931_v20, %v771_v34  ;;  %v884_v17 = vmul.f32 %v13227_v26, %v876_v48  ;;  %v854_v44 = vmul.f32 %v13246_v13, %v846_v57  ;;  %v10289_v48 = vld [vmem:[#allocation9] ss:$0 sm:$0xff] }
 0x24c   : > { %v13276_v30 = vmul.f32 %v946_v50, %v13182_v25  ;;  %v925_v26 = vmul.f32 %v12044_v58, %v885_v39  ;;  %v855_v0 = vmul.f32 %v13250_v19, %v847_v60  ;;  %v772_v3 = vsel %vm764_vm5, 1.0, %v16259_v11 }
 0x24d   : > { %16319 = vst [vmem:[#allocation22_spill] sm:$0xff] %v13263_v29  ;;  %v964_v42 = vpack.c.bf16 %v13263_v29, %v13260_v41  ;;  %v947_v56 = vadd.f32 1.0, %v939_v52  ;;  %v924_v63 = vmul.f32 %v12042_v55, %v884_v17  ;;  %v862_v33 = vadd.f32 -0.28449672, %v854_v44 }
 0x24e   : > { %16320 = vst [vmem:[#allocation23_spill] sm:$0xff] %v13276_v30  ;;  %v933_v27 = vsub.f32 1.0, %v925_v26  ;;  %v863_v25 = vadd.f32 -0.28449672, %v855_v0  ;;  %v773_v4 = vsel %vm765_vm6, 1.0, %v16259_v11  ;;  %v748_v12 = vmul.f32 0.5, %v13157_v2 }
 0x24f   : > { %10872 = vmatprep.mubr.msk.bf16.mxu0 %vm610_vm0, %v964_v42  ;;  %v13278_v61 = vmul.f32 %v947_v56, %v747_v53  ;;  %v932_v1 = vsub.f32 1.0, %v924_v63  ;;  %v870_v49 = vmul.f32 %v13246_v13, %v862_v33  ;;  %v749_v62 = vmul.f32 0.5, %v13160_v6 }
 0x250   : > { %v941_v9 = vmul.f32 %v933_v27, %v773_v4  ;;  %v871_v59 = vmul.f32 %v13250_v19, %v863_v25  ;;  %v775_v20 = vsel %vm767_vm8, 1.0, %v16259_v11  ;;  %v751_v23 = vmul.f32 0.5, %v13191_v32 }
 0x251   : > { %16321 = vst [vmem:[#allocation24_spill] sm:$0xff] %v13278_v61  ;;  %v965_v40 = vpack.c.bf16 %v13278_v61, %v13276_v30  ;;  %v940_v5 = vmul.f32 %v932_v1, %v772_v3  ;;  %v878_v10 = vadd.f32 0.2548296, %v870_v49  ;;  %v16261_v50 = vmov 0.0  }
 0x252   : > { %v949_v14 = vadd.f32 1.0, %v941_v9  ;;  %v879_v38 = vadd.f32 0.2548296, %v871_v59  ;;  %10892 = vmatprep.subr.bf16.mxu0 %v16261_v50  ;;  %10880 = vmatprep.subr.bf16.mxu1 %v16261_v50 }
 0x253   : > { %10873 = vmatmul.mubr.msk.bf16.vlgmr.msra.gmra.mrb[0].mxu0 %vm610_vm0, %v965_v40  ;;  %v948_v8 = vadd.f32 1.0, %v940_v5  ;;  %v12046_v18 = vpop.eup %12045  ;;  %v886_v24 = vmul.f32 %v13246_v13, %v878_v10  ;;  %v774_v13 = vsel %vm766_vm7, 1.0, %v16259_v11 }
 0x254   : > { %v12048_v28 = vpop.eup %12047  ;;  %v13295_v21 = vmul.f32 %v949_v14, %v749_v62  ;;  %v887_v46 = vmul.f32 %v13250_v19, %v879_v38  ;;  %10894 = vmatprep.mubr.msk.bf16.mxu0 %vm12695_vm10, %v16261_v50 }
 0x255   : > { %v13293_v31 = vmul.f32 %v948_v8, %v748_v12  ;;  %v926_v34 = vmul.f32 %v12046_v18, %v886_v24 }
 0x256   : > { %16323 = vst [vmem:[#allocation26_spill] sm:$0xff] %v13295_v21  ;;  %v927_v6 = vmul.f32 %v12048_v28, %v887_v46 }
 0x257   : > { %16322 = vst [vmem:[#allocation25_spill] sm:$0xff] %v13293_v31  ;;  %v966_v2 = vpack.c.bf16 %v13295_v21, %v13293_v31  ;;  %v934_v16 = vsub.f32 1.0, %v926_v34 }
 0x258   : > { %v935_v35 = vsub.f32 1.0, %v927_v6 }
 0x259   : > { %10876 = vmatprep.mubr.msk.bf16.mxu1 %vm610_vm0, %v966_v2  ;;  %v942_v36 = vmul.f32 %v934_v16, %v774_v13 }
 0x25a   : > { %v943_v37 = vmul.f32 %v935_v35, %v775_v20 }
 0x25b   : > { %v950_v19 = vadd.f32 1.0, %v942_v36 }
 0x25c   : > { %v951_v43 = vadd.f32 1.0, %v943_v37 }
 0x25d   : > { %v13307_v47 = vmul.f32 %v950_v19, %v750_v22 }
 0x25e   : > { %v13309_v45 = vmul.f32 %v951_v43, %v751_v23 }
 0x25f   : > { %16324 = vst [vmem:[#allocation27_spill] sm:$0xff] %v13307_v47 }
 0x260   : > { %16325 = vst [vmem:[#allocation28_spill] sm:$0xff] %v13309_v45  ;;  %v967_v52 = vpack.c.bf16 %v13309_v45, %v13307_v47 }
 0x262   : > { %10877 = vmatmul.mubr.msk.bf16.vlgmr.msra.gmra.mrb[0].mxu1 %vm610_vm0, %v967_v52 }
 0x263   : > { %10882 = vmatprep.mubr.msk.bf16.mxu1 %vm12695_vm10, %v16261_v50 }
 0x326   : > { %v10874_v51 = vpop.f32.mrb[0].mxu0 }
 0x327   : > { %v1042_v15 = vadd.f32 %v10874_v51, %v10289_v48  ;;  %v1033_v42 = vpop.f32.mrb[1].mxu0 }
 0x328   : > { %v1034_v32 = vadd.f32 %v10289_v48, %v1033_v42  ;;  %v10875_v53 = vpop.f32.mrb[2].mxu0 }
 0x329   : > { %v13316_v54 = vpack.c.bf16 %v1042_v15, %v1042_v15  ;;  %v1036_v7 = vpop.f32.mrb[3].mxu0  ;;  %v1045_v39 = vadd.f32 %v10875_v53, %v10289_v48 }
 0x32a   : > { %v13318_v55 = vpack.c.bf16 %v1034_v32, %v1034_v32  ;;  %v1037_v56 = vadd.f32 %v10289_v48, %v1036_v7 }
 0x32b   : > { %v1239_v17 = vsel %vm1138_vm9, %v13316_v54, 0  ;;  %v13338_v60 = vpack.c.bf16 %v1045_v39, %v1045_v39 }
 0x32c   : > { %v13322_v57 = vpack.c.bf16 %v1037_v56, %v1037_v56  ;;  %10893 = vmatpush3.bf16.xpose.msra.mxu0 %v1239_v17  ;;  %1088 = vrot.lane.b32.xlu0 %v13318_v55, %s12694_s27  ;;  %v1143_v58 = vsel %vm1138_vm9, %v13318_v55, 0 }
 0x32d   : > { %10881 = vmatpush3.bf16.xpose.msra.mxu1 %v1143_v58  ;;  %10904 = vmatprep.subr.bf16.mxu0 %v16261_v50  ;;  %v1287_v36 = vsel %vm1138_vm9, %v13338_v60, 0 }
 0x32e   : > { %1090 = vrot.lane.b32.xlu1 %v13322_v57, %s12694_s27  ;;  %10886 = vmatprep.subr.bf16.mxu1 %v16261_v50  ;;  %v1191_v34 = vsel %vm1138_vm9, %v13322_v57, 0 }
 0x332   : > { %1092 = vrot.lane.b32.xlu1 %v13316_v54, %s12694_s27 }
 0x335   : > { %v10878_v63 = vpop.f32.mrb[0].mxu1 }
 0x336   : > { %1094 = vrot.lane.b32.xlu1 %v13338_v60, %s12694_s27  ;;  %v1049_v44 = vpop.f32.mrb[1].mxu1  ;;  %v1058_v3 = vadd.f32 %v10878_v63, %v10289_v48 }
 0x337   : > { %v1050_v26 = vadd.f32 %v10289_v48, %v1049_v44  ;;  %v10879_v0 = vpop.f32.mrb[2].mxu1 }
 0x338   : > { %v1052_v40 = vpop.f32.mrb[3].mxu1  ;;  %v1061_v25 = vadd.f32 %v10879_v0, %v10289_v48  ;;  %v13350_v4 = vpack.c.bf16 %v1058_v3, %v1058_v3 }
 0x339   : > { %v13342_v1 = vpack.c.bf16 %v1050_v26, %v1050_v26  ;;  %v1053_v33 = vadd.f32 %v10289_v48, %v1052_v40 }
 0x33a   : > { %v13354_v5 = vpack.c.bf16 %v1061_v25, %v1061_v25  ;;  %v1431_v7 = vsel %vm1138_vm9, %v13350_v4, 0 }
 0x33b   : > { %v13344_v27 = vpack.c.bf16 %v1053_v33, %v1053_v33  ;;  %1096 = vrot.lane.b32.xlu0 %v13342_v1, %s12694_s27  ;;  %v1335_v23 = vsel %vm1138_vm9, %v13342_v1, 0 }
 0x33c   : > { %v1479_v39 = vsel %vm1138_vm9, %v13354_v5, 0 }
 0x33d   : > { %1098 = vrot.lane.b32.xlu1 %v13344_v27, %s12694_s27  ;;  %v1383_v15 = vsel %vm1138_vm9, %v13344_v27, 0 }
 0x33f   : > { %1136 = vrot.lane.b32.xlu0 %v13318_v55, %s12696_s11 }
 0x341   : > { %1100 = vrot.lane.b32.xlu1 %v13350_v4, %s12694_s27 }
 0x343   : > { %1102 = vrot.lane.b32.xlu0 %v13354_v5, %s12694_s27 }
 0x345   : > { %1185 = vrot.lane.b32.xlu1 %v13322_v57, %s12696_s11 }
 0x347   : > { %1104 = vrot.lane.b32.xlu0 %v13318_v55, %s12697_s12 }
 0x349   : > { %1106 = vrot.lane.b32.xlu1 %v13322_v57, %s12697_s12 }
 0x34b   : > { %1233 = vrot.lane.b32.xlu0 %v13316_v54, %s12696_s11 }
 0x34d   : > { %1281 = vrot.lane.b32.xlu1 %v13338_v60, %s12696_s11 }
 0x34f   : > { %1108 = vrot.lane.b32.xlu0 %v13316_v54, %s12697_s12 }
 0x351   : > { %1110 = vrot.lane.b32.xlu1 %v13338_v60, %s12697_s12 }
 0x353   : > { %1329 = vrot.lane.b32.xlu0 %v13342_v1, %s12696_s11 }
 0x355   : > { %1377 = vrot.lane.b32.xlu1 %v13344_v27, %s12696_s11 }
 0x357   : > { %1112 = vrot.lane.b32.xlu0 %v13342_v1, %s12697_s12 }
 0x359   : > { %1114 = vrot.lane.b32.xlu1 %v13344_v27, %s12697_s12 }
 0x35b   : > { %1425 = vrot.lane.b32.xlu0 %v13350_v4, %s12696_s11 }
 0x35d   : > { %1473 = vrot.lane.b32.xlu1 %v13354_v5, %s12696_s11 }
 0x35f   : > { %1116 = vrot.lane.b32.xlu0 %v13350_v4, %s12697_s12 }
 0x361   : > { %1118 = vrot.lane.b32.xlu1 %v13354_v5, %s12697_s12 }
 0x39e   : > { %v13390_v49 = vpop.permute.xlu0 %1088 }
 0x39f   : > { %v13394_v9 = vcombine.low %v13390_v49, %v13390_v49  ;;  %v1529_v0 = vsel %vm1138_vm9, %v13390_v49, 0 }
 0x3a0   : > { %v13396_v59 = vpop.permute.xlu1 %1090 }
 0x3a1   : > { %v13400_v8 = vcombine.low %v13396_v59, %v13396_v59  ;;  %1523 = vrot.lane.b32.xlu0 %v13394_v9, %s12696_s11  ;;  %v1579_v25 = vsel %vm1138_vm9, %v13396_v59, 0 }
 0x3a3   : > { %1573 = vrot.lane.b32.xlu1 %v13400_v8, %s12696_s11 }
 0x3a4   : > { %v13406_v10 = vpop.permute.xlu1 %1092 }
 0x3a5   : > { %1120 = vrot.lane.b32.xlu0 %v13318_v55, %s12698_s15  ;;  %v13412_v12 = vcombine.low %v13406_v10, %v13406_v10  ;;  %v1629_v59 = vsel %vm1138_vm9, %v13406_v10, 0 }
 0x3a7   : > { %1122 = vrot.lane.b32.xlu1 %v13322_v57, %s12698_s15 }
 0x3a8   : > { %v13416_v62 = vpop.permute.xlu1 %1094 }
 0x3a9   : > { %v13420_v14 = vcombine.low %v13416_v62, %v13416_v62  ;;  %1623 = vrot.lane.b32.xlu0 %v13412_v12, %s12696_s11 }
 0x3ab   : > { %1673 = vrot.lane.b32.xlu1 %v13420_v14, %s12696_s11 }
 0x3ad   : > { %1124 = vrot.lane.b32.xlu0 %v13316_v54, %s12698_s15  ;;  %v13430_v38 = vpop.permute.xlu0 %1096 }
 0x3ae   : > { %v13434_v18 = vcombine.low %v13430_v38, %v13430_v38 }
 0x3af   : > { %1126 = vrot.lane.b32.xlu1 %v13338_v60, %s12698_s15  ;;  %v13436_v24 = vpop.permute.xlu1 %1098 }
 0x3b0   : > { %v13440_v28 = vcombine.low %v13436_v24, %v13436_v24 }
 0x3b1   : > { %1723 = vrot.lane.b32.xlu0 %v13434_v18, %s12696_s11  ;;  %v1137_v46 = vpop.permute.xlu0 %1136 }
 0x3b2   : > { %10883 = vmatmul.mubr.msk.bf16.vlgmr.msra.gmra.mrb[4].mxu1 %vm1138_vm9, %v1137_v46 }
 0x3b3   : > { %1773 = vrot.lane.b32.xlu1 %v13440_v28, %s12696_s11  ;;  %10887 = vmatpush3.bf16.xpose.msra.mxu1 %v1191_v34  ;;  %v13449_v2 = vpop.permute.xlu1 %1100 }
 0x3b4   : > { %10888 = vmatprep.mubr.msk.bf16.mxu1 %vm12695_vm10, %v16261_v50  ;;  %10898 = vmatprep.subr.bf16.mxu1 %v16261_v50  ;;  %v13460_v16 = vcombine.low %v13449_v2, %v13449_v2 }
 0x3b5   : > { %1128 = vrot.lane.b32.xlu0 %v13342_v1, %s12698_s15  ;;  %v13456_v6 = vpop.permute.xlu0 %1102 }
 0x3b6   : > { %v13466_v35 = vcombine.low %v13456_v6, %v13456_v6 }
 0x3b7   : > { %1130 = vrot.lane.b32.xlu1 %v13344_v27, %s12698_s15  ;;  %v1186_v13 = vpop.permute.xlu1 %1185 }
 0x3b9   : > { %1823 = vrot.lane.b32.xlu0 %v13460_v16, %s12696_s11  ;;  %v13470_v20 = vpop.permute.xlu0 %1104 }
 0x3ba   : > { %10889 = vmatmul.mubr.msk.bf16.vlgmr.msra.gmra.mrb[8].mxu1 %vm1138_vm9, %v1186_v13  ;;  %v13486_v22 = vcombine.low %v13470_v20, %v13470_v20 }
 0x3bb   : > { %1873 = vrot.lane.b32.xlu1 %v13466_v35, %s12696_s11  ;;  %10899 = vmatpush3.bf16.xpose.msra.mxu1 %v1287_v36  ;;  %v13477_v37 = vpop.permute.xlu1 %1106  ;;  %v1679_v36 = vsel %vm1138_vm9, %v13416_v62, 0 }
 0x3bc   : > { %10900 = vmatprep.mubr.msk.bf16.mxu1 %vm12695_vm10, %v16261_v50  ;;  %10910 = vmatprep.subr.bf16.mxu1 %v16261_v50  ;;  %v13497_v52 = vcombine.low %v13477_v37, %v13477_v37 }
 0x3bd   : > { %1132 = vrot.lane.b32.xlu0 %v13350_v4, %s12698_s15  ;;  %v1234_v19 = vpop.permute.xlu0 %1233 }
 0x3be   : > { %10895 = vmatmul.mubr.msk.bf16.vlgmr.msra.gmra.mrb[4].mxu0 %vm1138_vm9, %v1234_v19 }
 0x3bf   : > { %1134 = vrot.lane.b32.xlu1 %v13354_v5, %s12698_s15  ;;  %10905 = vmatpush3.bf16.xpose.msra.mxu0 %v1335_v23  ;;  %v1282_v43 = vpop.permute.xlu1 %1281 }
 0x3c0   : > { %10906 = vmatprep.mubr.msk.bf16.mxu0 %vm12695_vm10, %v16261_v50  ;;  %10916 = vmatprep.subr.bf16.mxu0 %v16261_v50 }
 0x3c1   : > { %1923 = vrot.lane.b32.xlu0 %v13486_v22, %s12696_s11  ;;  %v13502_v48 = vpop.permute.xlu0 %1108 }
 0x3c2   : > { %v13506_v51 = vcombine.low %v13502_v48, %v13502_v48  ;;  %10901 = vmatmul.mubr.msk.bf16.vlgmr.msra.gmra.mrb[12].mxu1 %vm1138_vm9, %v1282_v43 }
 0x3c3   : > { %1973 = vrot.lane.b32.xlu1 %v13497_v52, %s12696_s11  ;;  %10911 = vmatpush3.bf16.xpose.msra.mxu1 %v1383_v15  ;;  %v13513_v42 = vpop.permute.xlu1 %1110  ;;  %v1729_v15 = vsel %vm1138_vm9, %v13430_v38, 0 }
 0x3c4   : > { %10912 = vmatprep.mubr.msk.bf16.mxu1 %vm12695_vm10, %v16261_v50  ;;  %v13519_v32 = vcombine.low %v13513_v42, %v13513_v42  ;;  %10922 = vmatprep.subr.bf16.mxu1 %v16261_v50 }
 0x3c5   : > { %2023 = vrot.lane.b32.xlu0 %v13506_v51, %s12696_s11  ;;  %v1330_v53 = vpop.permute.xlu0 %1329 }
 0x3c6   : > { %10907 = vmatmul.mubr.msk.bf16.vlgmr.msra.gmra.mrb[8].mxu0 %vm1138_vm9, %v1330_v53 }
 0x3c7   : > { %2073 = vrot.lane.b32.xlu1 %v13519_v32, %s12696_s11  ;;  %10917 = vmatpush3.bf16.xpose.msra.mxu0 %v1431_v7  ;;  %v1378_v56 = vpop.permute.xlu1 %1377  ;;  %v1779_v7 = vsel %vm1138_vm9, %v13436_v24, 0 }
 0x3c8   : > { %10918 = vmatprep.mubr.msk.bf16.mxu0 %vm12695_vm10, %v16261_v50  ;;  %10928 = vmatprep.subr.bf16.mxu0 %v16261_v50 }
 0x3c9   : > { %v13532_v17 = vpop.permute.xlu0 %1112 }
 0x3ca   : > { %v13536_v58 = vcombine.low %v13532_v17, %v13532_v17  ;;  %10913 = vmatmul.mubr.msk.bf16.vlgmr.msra.gmra.mrb[16].mxu1 %vm1138_vm9, %v1378_v56 }
 0x3cb   : > { %10923 = vmatpush3.bf16.xpose.msra.mxu1 %v1479_v39  ;;  %v13541_v63 = vpop.permute.xlu1 %1114  ;;  %10924 = vmatprep.mubr.msk.bf16.mxu1 %vm12695_vm10, %v16261_v50 }
 0x3cc   : > { %v13547_v44 = vcombine.low %v13541_v63, %v13541_v63  ;;  %2123 = vrot.lane.b32.xlu0 %v13536_v58, %s12696_s11  ;;  %10934 = vmatprep.subr.bf16.mxu1 %v16261_v50 }
 0x3cd   : > { %v1426_v26 = vpop.permute.xlu0 %1425 }
 0x3ce   : > { %10919 = vmatmul.mubr.msk.bf16.vlgmr.msra.gmra.mrb[12].mxu0 %vm1138_vm9, %v1426_v26  ;;  %2173 = vrot.lane.b32.xlu1 %v13547_v44, %s12696_s11 }
 0x3cf   : > { %10929 = vmatpush3.bf16.xpose.msra.mxu0 %v1529_v0  ;;  %v1474_v40 = vpop.permute.xlu1 %1473  ;;  %10930 = vmatprep.mubr.msk.bf16.mxu0 %vm12695_vm10, %v16261_v50  ;;  %v1829_v0 = vsel %vm1138_vm9, %v13449_v2, 0 }
 0x3d0   : > { %10940 = vmatprep.subr.bf16.mxu0 %v16261_v50 }
 0x3d1   : > { %v13560_v33 = vpop.permute.xlu0 %1116 }
 0x3d2   : > { %v13564_v3 = vcombine.low %v13560_v33, %v13560_v33  ;;  %10925 = vmatmul.mubr.msk.bf16.vlgmr.msra.gmra.mrb[20].mxu1 %vm1138_vm9, %v1474_v40 }
 0x3d3   : > { %10935 = vmatpush3.bf16.xpose.msra.mxu1 %v1579_v25  ;;  %v13569_v49 = vpop.permute.xlu1 %1118  ;;  %10936 = vmatprep.mubr.msk.bf16.mxu1 %vm12695_vm10, %v16261_v50  ;;  %v1879_v25 = vsel %vm1138_vm9, %v13456_v6, 0 }
 0x3d4   : > { %2223 = vrot.lane.b32.xlu0 %v13564_v3, %s12696_s11  ;;  %v13577_v46 = vcombine.low %v13569_v49, %v13569_v49  ;;  %10946 = vmatprep.subr.bf16.mxu1 %v16261_v50 }
 0x3d6   : > { %2273 = vrot.lane.b32.xlu1 %v13577_v46, %s12696_s11 }
 0x413   : > { %v1524_v34 = vpop.permute.xlu0 %1523 }
 0x414   : > { %10931 = vmatmul.mubr.msk.bf16.vlgmr.msra.gmra.mrb[16].mxu0 %vm1138_vm9, %v1524_v34 }
 0x415   : > { %10941 = vmatpush3.bf16.xpose.msra.mxu0 %v1629_v59  ;;  %v1574_v13 = vpop.permute.xlu1 %1573  ;;  %10942 = vmatprep.mubr.msk.bf16.mxu0 %vm12695_vm10, %v16261_v50 }
 0x416   : > { %10937 = vmatmul.mubr.msk.bf16.vlgmr.msra.gmra.mrb[24].mxu1 %vm1138_vm9, %v1574_v13  ;;  %10952 = vmatprep.subr.bf16.mxu0 %v16261_v50 }
 0x417   : > { %10947 = vmatpush3.bf16.xpose.msra.mxu1 %v1679_v36  ;;  %v13591_v19 = vpop.permute.xlu0 %1120  ;;  %10948 = vmatprep.mubr.msk.bf16.mxu1 %vm12695_vm10, %v16261_v50  ;;  %v1929_v36 = vsel %vm1138_vm9, %v13470_v20, 0 }
 0x418   : > { %v13597_v10 = vcombine.low %v13591_v19, %v13591_v19  ;;  %10958 = vmatprep.subr.bf16.mxu1 %v16261_v50 }
 0x419   : > { %v13600_v23 = vpop.permute.xlu1 %1122 }
 0x41a   : > { %v13604_v43 = vcombine.low %v13600_v23, %v13600_v23  ;;  %2323 = vrot.lane.b32.xlu0 %v13597_v10, %s12696_s11 }
 0x41b   : > { %v1624_v62 = vpop.permute.xlu0 %1623 }
 0x41c   : > { %2373 = vrot.lane.b32.xlu1 %v13604_v43, %s12696_s11  ;;  %10943 = vmatmul.mubr.msk.bf16.vlgmr.msra.gmra.mrb[20].mxu0 %vm1138_vm9, %v1624_v62 }
 0x41d   : > { %10953 = vmatpush3.bf16.xpose.msra.mxu0 %v1729_v15  ;;  %v1674_v53 = vpop.permute.xlu1 %1673  ;;  %10954 = vmatprep.mubr.msk.bf16.mxu0 %vm12695_vm10, %v16261_v50  ;;  %v1979_v15 = vsel %vm1138_vm9, %v13477_v37, 0 }
 0x41e   : > { %10949 = vmatmul.mubr.msk.bf16.vlgmr.msra.gmra.mrb[28].mxu1 %vm1138_vm9, %v1674_v53  ;;  %10964 = vmatprep.subr.bf16.mxu0 %v16261_v50 }
 0x41f   : > { %10959 = vmatpush3.bf16.xpose.msra.mxu1 %v1779_v7  ;;  %v13619_v56 = vpop.permute.xlu0 %1124  ;;  %10960 = vmatprep.mubr.msk.bf16.mxu1 %vm12695_vm10, %v16261_v50 }
 0x420   : > { %v13625_v38 = vcombine.low %v13619_v56, %v13619_v56  ;;  %10970 = vmatprep.subr.bf16.mxu1 %v16261_v50 }
 0x421   : > { %v13628_v39 = vpop.permute.xlu1 %1126 }
 0x422   : > { %v13632_v26 = vcombine.low %v13628_v39, %v13628_v39  ;;  %2423 = vrot.lane.b32.xlu0 %v13625_v38, %s12696_s11 }
 0x423   : > { %v1724_v24 = vpop.permute.xlu0 %1723 }
 0x424   : > { %2473 = vrot.lane.b32.xlu1 %v13632_v26, %s12696_s11  ;;  %10955 = vmatmul.mubr.msk.bf16.vlgmr.msra.gmra.mrb[24].mxu0 %vm1138_vm9, %v1724_v24 }
 0x425   : > { %10965 = vmatpush3.bf16.xpose.msra.mxu0 %v1829_v0  ;;  %v1774_v40 = vpop.permute.xlu1 %1773  ;;  %10966 = vmatprep.mubr.msk.bf16.mxu0 %vm12695_vm10, %v16261_v50  ;;  %v2029_v0 = vsel %vm1138_vm9, %v13502_v48, 0 }
 0x426   : > { %10961 = vmatmul.mubr.msk.bf16.vlgmr.msra.gmra.mrb[32].mxu1 %vm1138_vm9, %v1774_v40  ;;  %10976 = vmatprep.subr.bf16.mxu0 %v16261_v50 }
 0x427   : > { %10971 = vmatpush3.bf16.xpose.msra.mxu1 %v1879_v25  ;;  %v13647_v34 = vpop.permute.xlu0 %1128  ;;  %10972 = vmatprep.mubr.msk.bf16.mxu1 %vm12695_vm10, %v16261_v50  ;;  %v2079_v25 = vsel %vm1138_vm9, %v13513_v42, 0 }
 0x428   : > { %v13653_v2 = vcombine.low %v13647_v34, %v13647_v34  ;;  %10982 = vmatprep.subr.bf16.mxu1 %v16261_v50 }
 0x429   : > { %v13656_v59 = vpop.permute.xlu1 %1130 }
 0x42a   : > { %v13660_v13 = vcombine.low %v13656_v59, %v13656_v59  ;;  %2523 = vrot.lane.b32.xlu0 %v13653_v2, %s12696_s11 }
 0x42b   : > { %v1824_v6 = vpop.permute.xlu0 %1823 }
 0x42c   : > { %2573 = vrot.lane.b32.xlu1 %v13660_v13, %s12696_s11  ;;  %10967 = vmatmul.mubr.msk.bf16.vlgmr.msra.gmra.mrb[28].mxu0 %vm1138_vm9, %v1824_v6 }
 0x42d   : > { %10977 = vmatpush3.bf16.xpose.msra.mxu0 %v1929_v36  ;;  %v1874_v62 = vpop.permute.xlu1 %1873  ;;  %10978 = vmatprep.mubr.msk.bf16.mxu0 %vm12695_vm10, %v16261_v50 }
 0x42e   : > { %10973 = vmatmul.mubr.msk.bf16.vlgmr.msra.gmra.mrb[36].mxu1 %vm1138_vm9, %v1874_v62  ;;  %10988 = vmatprep.subr.bf16.mxu0 %v16261_v50 }
 0x42f   : > { %10983 = vmatpush3.bf16.xpose.msra.mxu1 %v1979_v15  ;;  %v13675_v53 = vpop.permute.xlu0 %1132  ;;  %10984 = vmatprep.mubr.msk.bf16.mxu1 %vm12695_vm10, %v16261_v50 }
 0x430   : > { %v13681_v20 = vcombine.low %v13675_v53, %v13675_v53  ;;  %10994 = vmatprep.subr.bf16.mxu1 %v16261_v50 }
 0x431   : > { %v13684_v7 = vpop.permute.xlu1 %1134 }
 0x432   : > { %16326 = vst [vmem:[#allocation29_spill] sm:$0xff] %v13681_v20  ;;  %v13688_v24 = vcombine.low %v13684_v7, %v13684_v7  ;;  %2623 = vrot.lane.b32.xlu0 %v13681_v20, %s12696_s11 }
 0x433   : > { %v1924_v37 = vpop.permute.xlu0 %1923 }
 0x434   : > { %2673 = vrot.lane.b32.xlu1 %v13688_v24, %s12696_s11  ;;  %10979 = vmatmul.mubr.msk.bf16.vlgmr.msra.gmra.mrb[32].mxu0 %vm1138_vm9, %v1924_v37 }
 0x435   : > { %10989 = vmatpush3.bf16.xpose.msra.mxu0 %v2029_v0  ;;  %v1974_v40 = vpop.permute.xlu1 %1973  ;;  %10990 = vmatprep.mubr.msk.bf16.mxu0 %vm12695_vm10, %v16261_v50 }
 0x436   : > { %10985 = vmatmul.mubr.msk.bf16.vlgmr.msra.gmra.mrb[40].mxu1 %vm1138_vm9, %v1974_v40  ;;  %3105 = vrot.lane.b32.xlu0 %v13318_v55, %s12699_s4  ;;  %v2129_v55 = vsel %vm1138_vm9, %v13532_v17, 0 }
 0x437   : > { %10995 = vmatpush3.bf16.xpose.msra.mxu1 %v2079_v25  ;;  %11000 = vmatprep.subr.bf16.mxu0 %v16261_v50  ;;  %v2024_v48 = vpop.permute.xlu0 %2023 }
 0x438   : > { %3154 = vrot.lane.b32.xlu1 %v13322_v57, %s12699_s4  ;;  %10996 = vmatprep.mubr.msk.bf16.mxu1 %vm12695_vm10, %v16261_v50  ;;  %v2179_v57 = vsel %vm1138_vm9, %v13541_v63, 0 }
 0x439   : > { %11006 = vmatprep.subr.bf16.mxu1 %v16261_v50  ;;  %v2074_v42 = vpop.permute.xlu1 %2073 }
 0x43a   : > { %3202 = vrot.lane.b32.xlu0 %v13316_v54, %s12699_s4 }
 0x43c   : > { %3250 = vrot.lane.b32.xlu1 %v13338_v60, %s12699_s4  ;;  %10991 = vmatmul.mubr.msk.bf16.vlgmr.msra.gmra.mrb[36].mxu0 %vm1138_vm9, %v2024_v48  ;;  %v2229_v60 = vsel %vm1138_vm9, %v13560_v33, 0 }
 0x43d   : > { %11001 = vmatpush3.bf16.xpose.msra.mxu0 %v2129_v55  ;;  %11002 = vmatprep.mubr.msk.bf16.mxu0 %vm12695_vm10, %v16261_v50  ;;  %v2629_v55 = vsel %vm1138_vm9, %v13675_v53, 0 }
 0x43e   : > { %10997 = vmatmul.mubr.msk.bf16.vlgmr.msra.gmra.mrb[44].mxu1 %vm1138_vm9, %v2074_v42  ;;  %3298 = vrot.lane.b32.xlu0 %v13342_v1, %s12699_s4  ;;  %v2124_v54 = vpop.permute.xlu0 %2123 }
 0x43f   : > { %11007 = vmatpush3.bf16.xpose.msra.mxu1 %v2179_v57  ;;  %11012 = vmatprep.subr.bf16.mxu0 %v16261_v50 }
 0x440   : > { %3346 = vrot.lane.b32.xlu1 %v13344_v27, %s12699_s4  ;;  %11008 = vmatprep.mubr.msk.bf16.mxu1 %vm12695_vm10, %v16261_v50  ;;  %v2174_v1 = vpop.permute.xlu1 %2173  ;;  %v2279_v27 = vsel %vm1138_vm9, %v13569_v49, 0 }
 0x441   : > { %11018 = vmatprep.subr.bf16.mxu1 %v16261_v50 }
 0x442   : > { %3394 = vrot.lane.b32.xlu0 %v13350_v4, %s12699_s4 }
 0x444   : > { %3442 = vrot.lane.b32.xlu1 %v13354_v5, %s12699_s4  ;;  %11003 = vmatmul.mubr.msk.bf16.vlgmr.msra.gmra.mrb[40].mxu0 %vm1138_vm9, %v2124_v54  ;;  %v2329_v5 = vsel %vm1138_vm9, %v13591_v19, 0 }
 0x445   : > { %11013 = vmatpush3.bf16.xpose.msra.mxu0 %v2229_v60  ;;  %11014 = vmatprep.mubr.msk.bf16.mxu0 %vm12695_vm10, %v16261_v50 }
 0x446   : > { %11009 = vmatmul.mubr.msk.bf16.vlgmr.msra.gmra.mrb[48].mxu1 %vm1138_vm9, %v2174_v1  ;;  %3490 = vrot.lane.b32.xlu0 %v13394_v9, %s12699_s4  ;;  %v2224_v4 = vpop.permute.xlu0 %2223  ;;  %v2679_v1 = vsel %vm1138_vm9, %v13684_v7, 0 }
 0x447   : > { %11019 = vmatpush3.bf16.xpose.msra.mxu1 %v2279_v27  ;;  %11024 = vmatprep.subr.bf16.mxu0 %v16261_v50 }
 0x448   : > { %3634 = vrot.lane.b32.xlu1 %v13420_v14, %s12699_s4  ;;  %11020 = vmatprep.mubr.msk.bf16.mxu1 %vm12695_vm10, %v16261_v50  ;;  %v2274_v9 = vpop.permute.xlu1 %2273  ;;  %v2379_v14 = vsel %vm1138_vm9, %v13600_v23, 0 }
 0x449   : > { %11030 = vmatprep.subr.bf16.mxu1 %v16261_v50 }
 0x44a   : > { %3586 = vrot.lane.b32.xlu0 %v13412_v12, %s12699_s4 }
 0x44c   : > { %3826 = vrot.lane.b32.xlu1 %v13466_v35, %s12699_s4  ;;  %11015 = vmatmul.mubr.msk.bf16.vlgmr.msra.gmra.mrb[44].mxu0 %vm1138_vm9, %v2224_v4 }
 0x44d   : > { %11025 = vmatpush3.bf16.xpose.msra.mxu0 %v2329_v5  ;;  %11026 = vmatprep.mubr.msk.bf16.mxu0 %vm12695_vm10, %v16261_v50 }
 0x44e   : > { %11021 = vmatmul.mubr.msk.bf16.vlgmr.msra.gmra.mrb[52].mxu1 %vm1138_vm9, %v2274_v9  ;;  %3682 = vrot.lane.b32.xlu0 %v13434_v18, %s12699_s4 }
 0x44f   : > { %11031 = vmatpush3.bf16.xpose.msra.mxu1 %v2379_v14  ;;  %11036 = vmatprep.subr.bf16.mxu0 %v16261_v50 }
 0x450   : > { %4018 = vrot.lane.b32.xlu1 %v13519_v32, %s12699_s4  ;;  %11032 = vmatprep.mubr.msk.bf16.mxu1 %vm12695_vm10, %v16261_v50 }
 0x451   : > { %11042 = vmatprep.subr.bf16.mxu1 %v16261_v50 }
 0x452   : > { %3778 = vrot.lane.b32.xlu0 %v13460_v16, %s12699_s4 }
 0x454   : > { %4210 = vrot.lane.b32.xlu1 %v13577_v46, %s12699_s4 }
 0x456   : > { %3874 = vrot.lane.b32.xlu0 %v13486_v22, %s12699_s4 }
 0x458   : > { %3538 = vrot.lane.b32.xlu1 %v13400_v8, %s12699_s4 }
 0x45a   : > { %3970 = vrot.lane.b32.xlu0 %v13506_v51, %s12699_s4 }
 0x45c   : > { %3730 = vrot.lane.b32.xlu1 %v13440_v28, %s12699_s4  ;;  %v2429_v28 = vsel %vm1138_vm9, %v13619_v56, 0  ;;  %v2579_v56 = vsel %vm1138_vm9, %v13656_v59, 0 }
 0x45e   : > { %4066 = vrot.lane.b32.xlu0 %v13536_v58, %s12699_s4 }
 0x460   : > { %3922 = vrot.lane.b32.xlu1 %v13497_v52, %s12699_s4  ;;  %v2479_v52 = vsel %vm1138_vm9, %v13628_v39, 0 }
 0x462   : > { %4162 = vrot.lane.b32.xlu0 %v13564_v3, %s12699_s4  ;;  %v2529_v3 = vsel %vm1138_vm9, %v13647_v34, 0 }
 0x464   : > { %4114 = vrot.lane.b32.xlu1 %v13547_v44, %s12699_s4 }
 0x485   : > { %v13790_v12 = vpop.f32.mrb[4].mxu1 }
 0x486   : > { %v10884_v8 = vpop.f32.mrb[5].mxu1  ;;  %v2721_v6 = vsel %vm1138_vm9, %v13790_v12, -inf }
 0x487   : > { %v1182_v18 = vpop.f32.mrb[6].mxu1 }
 0x488   : > { %v10885_v16 = vpop.f32.mrb[7].mxu1 }
 0x48c   : > { %v2324_v35 = vpop.permute.xlu0 %2323 }
 0x48d   : > { %11027 = vmatmul.mubr.msk.bf16.vlgmr.msra.gmra.mrb[48].mxu0 %vm1138_vm9, %v2324_v35  ;;  %v13803_v51 = vpop.f32.mrb[8].mxu1 }
 0x48e   : > { %11037 = vmatpush3.bf16.xpose.msra.mxu0 %v2429_v28  ;;  %v2374_v22 = vpop.permute.xlu1 %2373  ;;  %11038 = vmatprep.mubr.msk.bf16.mxu0 %vm12695_vm10, %v16261_v50  ;;  %v10890_v32 = vpop.f32.mrb[9].mxu1  ;;  %v2724_v17 = vsel %vm1138_vm9, %v13803_v51, -inf }
 0x48f   : > { %11033 = vmatmul.mubr.msk.bf16.vlgmr.msra.gmra.mrb[56].mxu1 %vm1138_vm9, %v2374_v22  ;;  %11048 = vmatprep.subr.bf16.mxu0 %v16261_v50  ;;  %v1230_v58 = vpop.f32.mrb[10].mxu1 }
 0x490   : > { %11043 = vmatpush3.bf16.xpose.msra.mxu1 %v2479_v52  ;;  %11044 = vmatprep.mubr.msk.bf16.mxu1 %vm12695_vm10, %v16261_v50  ;;  %v10891_v63 = vpop.f32.mrb[11].mxu1 }
 0x491   : > { %11054 = vmatprep.subr.bf16.mxu1 %v16261_v50  ;;  %2725 = vmax.xlane.f32.xlu1 %v2724_v17  ;;  %v13808_v33 = vpop.f32.mrb[4].mxu0 }
 0x492   : > { %v10896_v49 = vpop.f32.mrb[5].mxu0  ;;  %v2727_v46 = vsel %vm1138_vm9, %v13808_v33, -inf }
 0x493   : > { %v1278_v23 = vpop.f32.mrb[6].mxu0  ;;  %2728 = vmax.xlane.f32.xlu0 %v2727_v46 }
 0x494   : > { %v2424_v44 = vpop.permute.xlu0 %2423  ;;  %v10897_v39 = vpop.f32.mrb[7].mxu0 }
 0x495   : > { %11039 = vmatmul.mubr.msk.bf16.vlgmr.msra.gmra.mrb[52].mxu0 %vm1138_vm9, %v2424_v44  ;;  %v13821_v34 = vpop.f32.mrb[12].mxu1 }
 0x496   : > { %11049 = vmatpush3.bf16.xpose.msra.mxu0 %v2529_v3  ;;  %v2474_v19 = vpop.permute.xlu1 %2473  ;;  %11050 = vmatprep.mubr.msk.bf16.mxu0 %vm12695_vm10, %v16261_v50  ;;  %v10902_v36 = vpop.f32.mrb[13].mxu1  ;;  %v2730_v35 = vsel %vm1138_vm9, %v13821_v34, -inf }
 0x497   : > { %11045 = vmatmul.mubr.msk.bf16.vlgmr.msra.gmra.mrb[60].mxu1 %vm1138_vm9, %v2474_v19  ;;  %11060 = vmatprep.subr.bf16.mxu0 %v16261_v50  ;;  %v1326_v62 = vpop.f32.mrb[14].mxu1 }
 0x498   : > { %11055 = vmatpush3.bf16.xpose.msra.mxu1 %v2579_v56  ;;  %11056 = vmatprep.mubr.msk.bf16.mxu1 %vm12695_vm10, %v16261_v50  ;;  %v10903_v15 = vpop.f32.mrb[15].mxu1 }
 0x499   : > { %11066 = vmatprep.subr.bf16.mxu1 %v16261_v50  ;;  %2722 = vmax.xlane.f32.xlu0 %v2721_v6  ;;  %v13828_v37 = vpop.f32.mrb[8].mxu0 }
 0x49a   : > { %v10908_v59 = vpop.f32.mrb[9].mxu0  ;;  %v2733_v0 = vsel %vm1138_vm9, %v13828_v37, -inf }
 0x49b   : > { %v1374_v40 = vpop.f32.mrb[10].mxu0 }
 0x49c   : > { %v2524_v25 = vpop.permute.xlu0 %2523  ;;  %v10909_v48 = vpop.f32.mrb[11].mxu0 }
 0x49d   : > { %2734 = vmax.xlane.f32.xlu0 %v2733_v0  ;;  %11051 = vmatmul.mubr.msk.bf16.vlgmr.msra.gmra.mrb[56].mxu0 %vm1138_vm9, %v2524_v25  ;;  %v13835_v42 = vpop.f32.mrb[16].mxu1 }
 0x49e   : > { %11061 = vmatpush3.bf16.xpose.msra.mxu0 %v2629_v55  ;;  %v2574_v57 = vpop.permute.xlu1 %2573  ;;  %11062 = vmatprep.mubr.msk.bf16.mxu0 %vm12695_vm10, %v16261_v50  ;;  %v10914_v54 = vpop.f32.mrb[17].mxu1  ;;  %v2736_v60 = vsel %vm1138_vm9, %v13835_v42, -inf }
 0x49f   : > { %11057 = vmatmul.mubr.msk.bf16.vlgmr.msra.gmra.mrb[64].mxu1 %vm1138_vm9, %v2574_v57  ;;  %11072 = vmatprep.subr.bf16.mxu0 %v16261_v50  ;;  %v1422_v27 = vpop.f32.mrb[18].mxu1 }
 0x4a0   : > { %2737 = vmax.xlane.f32.xlu1 %v2736_v60  ;;  %11067 = vmatpush3.bf16.xpose.msra.mxu1 %v2679_v1  ;;  %v10915_v53 = vpop.f32.mrb[19].mxu1 }
 0x4a1   : > { %11068 = vmatprep.mubr.msk.bf16.mxu1 %vm12695_vm10, %v16261_v50  ;;  %11078 = vmatprep.subr.bf16.mxu1 %v16261_v50  ;;  %v13848_v4 = vpop.f32.mrb[12].mxu0 }
 0x4a2   : > { %v10920_v5 = vpop.f32.mrb[13].mxu0  ;;  %v2739_v9 = vsel %vm1138_vm9, %v13848_v4, -inf }
 0x4a3   : > { %v1470_v14 = vpop.f32.mrb[14].mxu0  ;;  %2740 = vmax.xlane.f32.xlu0 %v2739_v9 }
 0x4a4   : > { %v2624_v7 = vpop.permute.xlu0 %2623  ;;  %v10921_v8 = vpop.f32.mrb[15].mxu0 }
 0x4a5   : > { %11063 = vmatmul.mubr.msk.bf16.vlgmr.msra.gmra.mrb[60].mxu0 %vm1138_vm9, %v2624_v7  ;;  %v13853_v18 = vpop.f32.mrb[20].mxu1 }
 0x4a6   : > { %v2674_v16 = vpop.permute.xlu1 %2673  ;;  %11074 = vmatprep.mubr.msk.bf16.mxu0 %vm12695_vm10, %v16261_v50  ;;  %v10926_v28 = vpop.f32.mrb[21].mxu1  ;;  %v2742_v22 = vsel %vm1138_vm9, %v13853_v18, -inf }
 0x4a7   : > { %11069 = vmatmul.mubr.msk.bf16.vlgmr.msra.gmra.mrb[68].mxu1 %vm1138_vm9, %v2674_v16  ;;  %2731 = vmax.xlane.f32.xlu0 %v2730_v35  ;;  %v1518_v52 = vpop.f32.mrb[22].mxu1 }
 0x4a8   : > { %2743 = vmax.xlane.f32.xlu1 %v2742_v22  ;;  %v3106_v32 = vpop.permute.xlu0 %3105  ;;  %v10927_v17 = vpop.f32.mrb[23].mxu1  ;;  %11080 = vmatprep.mubr.msk.bf16.mxu1 %vm12695_vm10, %v16261_v50 }
 0x4a9   : > { %v3112_v58 = vsel %vm3110_vm11, %v3106_v32, 0 }
 0x4aa   : > { %v3155_v63 = vpop.permute.xlu1 %3154  ;;  %11073 = vmatpush3.bf16.msra.mxu0 %v3112_v58 }
 0x4ab   : > { %v3160_v44 = vsel %vm3110_vm11, %v3155_v63, 0  ;;  %11084 = vmatprep.subr.bf16.mxu0 %v16261_v50 }
 0x4ac   : > { %11079 = vmatpush3.bf16.msra.mxu1 %v3160_v44  ;;  %v13868_v3 = vpop.permute.xlu0 %3202 }
 0x4ad   : > { %11090 = vmatprep.subr.bf16.mxu1 %v16261_v50 }
 0x4ae   : > { %v13870_v49 = vpop.permute.xlu1 %3250 }
 0x4b0   : > { %v13872_v46 = vpop.permute.xlu0 %3298 }
 0x4b2   : > { %v13874_v19 = vpop.permute.xlu1 %3346 }
 0x4b4   : > { %v13878_v56 = vpop.permute.xlu0 %3394 }
 0x4b6   : > { %v13886_v48 = vpop.permute.xlu1 %3442 }
 0x4b8   : > { %v13888_v55 = vpop.permute.xlu0 %3490 }
 0x4ba   : > { %v13898_v7 = vpop.permute.xlu1 %3634 }
 0x4bc   : > { %v13900_v16 = vpop.permute.xlu0 %3586 }
 0x4be   : > { %v13902_v35 = vpop.permute.xlu1 %3826 }
 0x4c0   : > { %v13906_v22 = vpop.permute.xlu0 %3682 }
 0x4e7   : > { %v13876_v23 = vpop.f32.mrb[16].mxu0 }
 0x4e8   : > { %v10932_v39 = vpop.f32.mrb[17].mxu0  ;;  %v2745_v6 = vsel %vm1138_vm9, %v13876_v23, -inf }
 0x4e9   : > { %v1568_v36 = vpop.f32.mrb[18].mxu0  ;;  %v13882_v62 = vpop.f32.mrb[24].mxu1  ;;  %2746 = vmax.xlane.f32.xlu0 %v2745_v6 }
 0x4ea   : > { %v10933_v15 = vpop.f32.mrb[19].mxu0  ;;  %v10938_v59 = vpop.f32.mrb[25].mxu1  ;;  %v2748_v0 = vsel %vm1138_vm9, %v13882_v62, -inf }
 0x4eb   : > { %v1618_v40 = vpop.f32.mrb[26].mxu1  ;;  %2749 = vmax.xlane.f32.xlu1 %v2748_v0  ;;  %v13914_v15 = vpop.permute.xlu1 %4018 }
 0x4ec   : > { %v10939_v25 = vpop.f32.mrb[27].mxu1  ;;  %16327 = vst [vmem:[#allocation30_spill] sm:$0xff] %v13914_v15  ;;  %v13918_v0 = vpop.permute.xlu0 %3778 }
 0x4ef   : > { %v13890_v57 = vpop.f32.mrb[20].mxu0 }
 0x4f0   : > { %v10944_v54 = vpop.f32.mrb[21].mxu0  ;;  %v2751_v60 = vsel %vm1138_vm9, %v13890_v57, -inf }
 0x4f1   : > { %v1668_v1 = vpop.f32.mrb[22].mxu0  ;;  %v13894_v27 = vpop.f32.mrb[28].mxu1  ;;  %2752 = vmax.xlane.f32.xlu0 %v2751_v60 }
 0x4f2   : > { %v10945_v53 = vpop.f32.mrb[23].mxu0  ;;  %v10950_v5 = vpop.f32.mrb[29].mxu1  ;;  %v2754_v9 = vsel %vm1138_vm9, %v13894_v27, -inf }
 0x4f3   : > { %v1718_v14 = vpop.f32.mrb[30].mxu1  ;;  %2755 = vmax.xlane.f32.xlu1 %v2754_v9 }
 0x4f4   : > { %v10951_v8 = vpop.f32.mrb[31].mxu1  ;;  %v13924_v14 = vpop.permute.xlu1 %4210 }
 0x4f5   : > { %16328 = vst [vmem:[#allocation31_spill] sm:$0xff] %v13924_v14 }
 0x4f7   : > { %v13904_v28 = vpop.f32.mrb[24].mxu0 }
 0x4f8   : > { %v10956_v52 = vpop.f32.mrb[25].mxu0  ;;  %v2757_v32 = vsel %vm1138_vm9, %v13904_v28, -inf }
 0x4f9   : > { %v1768_v17 = vpop.f32.mrb[26].mxu0  ;;  %v13910_v58 = vpop.f32.mrb[32].mxu1  ;;  %2758 = vmax.xlane.f32.xlu0 %v2757_v32 }
 0x4fa   : > { %v10957_v63 = vpop.f32.mrb[27].mxu0  ;;  %v10962_v44 = vpop.f32.mrb[33].mxu1  ;;  %v2760_v39 = vsel %vm1138_vm9, %v13910_v58, -inf }
 0x4fb   : > { %v1818_v6 = vpop.f32.mrb[34].mxu1  ;;  %2761 = vmax.xlane.f32.xlu1 %v2760_v39  ;;  %v13928_v52 = vpop.permute.xlu0 %3874 }
 0x4fc   : > { %v10963_v36 = vpop.f32.mrb[35].mxu1 }
 0x4ff   : > { %v13916_v59 = vpop.f32.mrb[28].mxu0 }
 0x500   : > { %v10968_v40 = vpop.f32.mrb[29].mxu0  ;;  %v2763_v25 = vsel %vm1138_vm9, %v13916_v59, -inf }
 0x501   : > { %v1868_v54 = vpop.f32.mrb[30].mxu0  ;;  %v13922_v60 = vpop.f32.mrb[36].mxu1  ;;  %2764 = vmax.xlane.f32.xlu0 %v2763_v25 }
 0x502   : > { %v10969_v1 = vpop.f32.mrb[31].mxu0  ;;  %v10974_v53 = vpop.f32.mrb[37].mxu1 }
 0x503   : > { %v1918_v5 = vpop.f32.mrb[38].mxu1  ;;  %v13934_v40 = vpop.permute.xlu1 %3538 }
 0x504   : > { %v10975_v9 = vpop.f32.mrb[39].mxu1  ;;  %v13938_v54 = vpop.permute.xlu0 %3970 }
 0x505   : > { %16329 = vst [vmem:[#allocation32_spill] sm:$0xff] %v13938_v54 }
 0x507   : > { %v13926_v8 = vpop.f32.mrb[32].mxu0 }
 0x508   : > { %v10980_v32 = vpop.f32.mrb[33].mxu0 }
 0x509   : > { %v1968_v17 = vpop.f32.mrb[34].mxu0  ;;  %v13930_v63 = vpop.f32.mrb[40].mxu1 }
 0x50a   : > { %v10981_v44 = vpop.f32.mrb[35].mxu0  ;;  %v10986_v39 = vpop.f32.mrb[41].mxu1 }
 0x50b   : > { %v2018_v6 = vpop.f32.mrb[42].mxu1 }
 0x50c   : > { %4306 = vrot.lane.b32.xlu1 %v13604_v43, %s12699_s4  ;;  %v10987_v36 = vpop.f32.mrb[43].mxu1  ;;  %v13946_v43 = vpop.permute.xlu0 %4066 }
 0x50d   : > { %16330 = vst [vmem:[#allocation33_spill] sm:$0xff] %v13946_v43  ;;  %v13952_v6 = vpop.permute.xlu1 %3730 }
 0x50f   : > { %v13936_v25 = vpop.f32.mrb[36].mxu0 }
 0x510   : > { %4354 = vrot.lane.b32.xlu1 %v13625_v38, %s12699_s4  ;;  %v10992_v1 = vpop.f32.mrb[37].mxu0 }
 0x511   : > { %v2068_v53 = vpop.f32.mrb[38].mxu0  ;;  %v13942_v5 = vpop.f32.mrb[44].mxu1 }
 0x512   : > { %v10993_v9 = vpop.f32.mrb[39].mxu0  ;;  %v10998_v32 = vpop.f32.mrb[45].mxu1 }
 0x513   : > { %v2118_v17 = vpop.f32.mrb[46].mxu1  ;;  %v13960_v11 = vpop.permute.xlu1 %3922 }
 0x514   : > { %v10999_v44 = vpop.f32.mrb[47].mxu1  ;;  %4402 = vrot.lane.b32.xlu1 %v13632_v26, %s12699_s4  ;;  %16332 = vst [vmem:[#allocation35_spill] sm:$0xff] %v13960_v11 }
 0x515   : > { %v13956_v44 = vpop.permute.xlu0 %4162 }
 0x516   : > { %16331 = vst [vmem:[#allocation34_spill] sm:$0xff] %v13956_v44 }
 0x517   : > { %4258 = vrot.lane.b32.xlu0 %v13597_v10, %s12699_s4  ;;  %v13950_v39 = vpop.f32.mrb[40].mxu0  ;;  %v13964_v30 = vpop.permute.xlu1 %4114 }
 0x518   : > { %v11004_v38 = vpop.f32.mrb[41].mxu0  ;;  %16333 = vst [vmem:[#allocation36_spill] sm:$0xff] %v13964_v30 }
 0x519   : > { %v2168_v36 = vpop.f32.mrb[42].mxu0  ;;  %v13954_v1 = vpop.f32.mrb[48].mxu1 }
 0x51a   : > { %v11005_v53 = vpop.f32.mrb[43].mxu0  ;;  %v11010_v9 = vpop.f32.mrb[49].mxu1 }
 0x51b   : > { %v2218_v32 = vpop.f32.mrb[50].mxu1 }
 0x51c   : > { %v11011_v17 = vpop.f32.mrb[51].mxu1 }
 0x51e   : > { %v2726_v32 = vpop.xlane.xlu1 %2725 }
 0x51f   : > { %v13958_v26 = vpop.f32.mrb[44].mxu0 }
 0x520   : > { %v11016_v50 = vpop.f32.mrb[45].mxu0  ;;  %v2729_v10 = vpop.xlane.xlu0 %2728 }
 0x521   : > { %v2268_v47 = vpop.f32.mrb[46].mxu0  ;;  %v13962_v21 = vpop.f32.mrb[52].mxu1  ;;  %v2819_v9 = vsub.f32 %v13808_v33, %v2729_v10  ;;  %v2818_v50 = vsub.f32 %v13803_v51, %v2726_v32  ;;  %v2778_v32 = vsel %vm1138_vm9, %v13942_v5, -inf }
 0x522   : > { %v11017_v31 = vpop.f32.mrb[47].mxu0  ;;  %v11022_v38 = vpop.f32.mrb[53].mxu1 }
 0x523   : > { %v2318_v36 = vpop.f32.mrb[54].mxu1  ;;  %v2853_v17 = vmul.f32 1.442695, %v2819_v9  ;;  %v2851_v14 = vmul.f32 1.442695, %v2818_v50  ;;  %v2769_v38 = vsel %vm1138_vm9, %v13926_v8, -inf }
 0x524   : > { %v11023_v45 = vpop.f32.mrb[55].mxu1 }
 0x525   : > { %12049 = vpow2.f32 %v2853_v17 }
 0x526   : > { %v2723_v53 = vpop.xlane.xlu0 %2722 }
 0x527   : > { %v2817_v29 = vsub.f32 %v13790_v12, %v2723_v53  ;;  %v2766_v12 = vsel %vm1138_vm9, %v13922_v60, -inf }
 0x529   : > { %v2849_v47 = vmul.f32 1.442695, %v2817_v29  ;;  %v2775_v29 = vsel %vm1138_vm9, %v13936_v25, -inf }
 0x52a   : > { %v2735_v41 = vpop.xlane.xlu0 %2734 }
 0x52b   : > { %12051 = vpow2.f32 %v2849_v47  ;;  %v2821_v31 = vsub.f32 %v13828_v37, %v2735_v41  ;;  %v2772_v37 = vsel %vm1138_vm9, %v13930_v63, -inf }
 0x52c   : > { %12053 = vpow2.f32 %v2851_v14 }
 0x52d   : > { %v2857_v10 = vmul.f32 1.442695, %v2821_v31  ;;  %v2738_v41 = vpop.xlane.xlu1 %2737 }
 0x52e   : > { %v2822_v9 = vsub.f32 %v13835_v42, %v2738_v41  ;;  %v2781_v42 = vsel %vm1138_vm9, %v13950_v39, -inf }
 0x52f   : > { %v13977_v51 = vpop.eup %12049  ;;  %12055 = vpow2.f32 %v2857_v10 }
 0x530   : > { %v2741_v61 = vpop.xlane.xlu0 %2740  ;;  %v2919_v14 = vsel %vm1138_vm9, %v13977_v51, 0.0 }
 0x534   : > { %v2732_v45 = vpop.xlane.xlu0 %2731 }
 0x535   : > { %v2820_v33 = vsub.f32 %v13821_v34, %v2732_v45  ;;  %v2823_v34 = vsub.f32 %v13848_v4, %v2741_v61  ;;  %v13984_v53 = vpop.eup %12051  ;;  %v2859_v4 = vmul.f32 1.442695, %v2822_v9  ;;  %v2784_v45 = vsel %vm1138_vm9, %v13954_v1, -inf  ;;  %v2744_v10 = vpop.xlane.xlu1 %2743 }
 0x536   : > { %2770 = vmax.xlane.f32.xlu0 %v2769_v38  ;;  %v13989_v17 = vpop.eup %12053  ;;  %v2913_v61 = vsel %vm1138_vm9, %v13984_v53, 0.0  ;;  %v2824_v41 = vsub.f32 %v13853_v18, %v2744_v10 }
 0x537   : > { %v2855_v36 = vmul.f32 1.442695, %v2820_v33  ;;  %v2861_v50 = vmul.f32 1.442695, %v2823_v34  ;;  %v2916_v47 = vsel %vm1138_vm9, %v13989_v17, 0.0 }
 0x538   : > { %2767 = vmax.xlane.f32.xlu1 %v2766_v12  ;;  %v2863_v9 = vmul.f32 1.442695, %v2824_v41 }
 0x539   : > { %12057 = vpow2.f32 %v2855_v36  ;;  %v13997_v31 = vpop.eup %12055 }
 0x53a   : > { %2776 = vmax.xlane.f32.xlu0 %v2775_v29  ;;  %12059 = vpow2.f32 %v2861_v50  ;;  %v2925_v33 = vsel %vm1138_vm9, %v13997_v31, 0.0  ;;  %v2787_v29 = vsel %vm1138_vm9, %v13958_v26, -inf }
 0x53b   : > { %12061 = vpow2.f32 %v2859_v4 }
 0x53c   : > { %2773 = vmax.xlane.f32.xlu1 %v2772_v37  ;;  %v2790_v37 = vsel %vm1138_vm9, %v13962_v21, -inf  ;;  %12063 = vpow2.f32 %v2863_v9 }
 0x53e   : > { %2920 = vadd.xlane.f32.xlu0 %v2919_v14 }
 0x540   : > { %2779 = vmax.xlane.f32.xlu1 %v2778_v32 }
 0x542   : > { %2914 = vadd.xlane.f32.xlu0 %v2913_v61 }
 0x543   : > { %v14001_v38 = vpop.eup %12057 }
 0x544   : > { %2917 = vadd.xlane.f32.xlu1 %v2916_v47  ;;  %v2922_v12 = vsel %vm1138_vm9, %v14001_v38, 0.0  ;;  %v14009_v36 = vpop.eup %12059 }
 0x545   : > { %v14014_v34 = vpop.eup %12061  ;;  %v2931_v14 = vsel %vm1138_vm9, %v14009_v36, 0.0 }
 0x546   : > { %2782 = vmax.xlane.f32.xlu0 %v2781_v42  ;;  %v2928_v32 = vsel %vm1138_vm9, %v14014_v34, 0.0 }
 0x548   : > { %2785 = vmax.xlane.f32.xlu1 %v2784_v45 }
 0x54a   : > { %2926 = vadd.xlane.f32.xlu0 %v2925_v33 }
 0x54c   : > { %2923 = vadd.xlane.f32.xlu1 %v2922_v12  ;;  %v14028_v12 = vpop.eup %12063 }
 0x54d   : > { %v2934_v41 = vsel %vm1138_vm9, %v14028_v12, 0.0 }
 0x54e   : > { %2788 = vmax.xlane.f32.xlu0 %v2787_v29 }
 0x550   : > { %2791 = vmax.xlane.f32.xlu1 %v2790_v37 }
 0x552   : > { %2932 = vadd.xlane.f32.xlu0 %v2931_v14 }
 0x554   : > { %2929 = vadd.xlane.f32.xlu1 %v2928_v32 }
 0x560   : > { %v14020_v50 = vpop.f32.mrb[48].mxu0 }
 0x561   : > { %v11028_v61 = vpop.f32.mrb[49].mxu0  ;;  %v2793_v18 = vsel %vm1138_vm9, %v14020_v50, -inf }
 0x562   : > { %v2368_v4 = vpop.f32.mrb[50].mxu0  ;;  %v14024_v47 = vpop.f32.mrb[56].mxu1  ;;  %2794 = vmax.xlane.f32.xlu0 %v2793_v18 }
 0x563   : > { %v11029_v42 = vpop.f32.mrb[51].mxu0  ;;  %v11034_v45 = vpop.f32.mrb[57].mxu1  ;;  %v2796_v33 = vsel %vm1138_vm9, %v14024_v47, -inf }
 0x564   : > { %v2418_v10 = vpop.f32.mrb[58].mxu1  ;;  %2797 = vmax.xlane.f32.xlu1 %v2796_v33 }
 0x565   : > { %v11035_v29 = vpop.f32.mrb[59].mxu1 }
 0x568   : > { %v14032_v37 = vpop.f32.mrb[52].mxu0  ;;  %2935 = vadd.xlane.f32.xlu1 %v2934_v41 }
 0x569   : > { %v11040_v14 = vpop.f32.mrb[53].mxu0  ;;  %v2799_v9 = vsel %vm1138_vm9, %v14032_v37, -inf }
 0x56a   : > { %v2468_v32 = vpop.f32.mrb[54].mxu0  ;;  %v14036_v61 = vpop.f32.mrb[60].mxu1  ;;  %2800 = vmax.xlane.f32.xlu0 %v2799_v9 }
 0x56b   : > { %v11041_v18 = vpop.f32.mrb[55].mxu0  ;;  %v11046_v4 = vpop.f32.mrb[61].mxu1  ;;  %v2802_v42 = vsel %vm1138_vm9, %v14036_v61, -inf }
 0x56c   : > { %v2518_v45 = vpop.f32.mrb[62].mxu1  ;;  %2803 = vmax.xlane.f32.xlu1 %v2802_v42 }
 0x56d   : > { %v11047_v33 = vpop.f32.mrb[63].mxu1 }
 0x570   : > { %v14040_v10 = vpop.f32.mrb[56].mxu0 }
 0x571   : > { %v11052_v29 = vpop.f32.mrb[57].mxu0  ;;  %v2805_v41 = vsel %vm1138_vm9, %v14040_v10, -inf }
 0x572   : > { %v2568_v14 = vpop.f32.mrb[58].mxu0  ;;  %v14044_v30 = vpop.f32.mrb[64].mxu1  ;;  %2806 = vmax.xlane.f32.xlu0 %v2805_v41 }
 0x573   : > { %v11053_v32 = vpop.f32.mrb[59].mxu0  ;;  %v11058_v9 = vpop.f32.mrb[65].mxu1  ;;  %v2808_v18 = vsel %vm1138_vm9, %v14044_v30, -inf }
 0x574   : > { %v2618_v4 = vpop.f32.mrb[66].mxu1  ;;  %2809 = vmax.xlane.f32.xlu1 %v2808_v18 }
 0x575   : > { %v11059_v42 = vpop.f32.mrb[67].mxu1 }
 0x576   : > { %v2747_v45 = vpop.xlane.xlu0 %2746 }
 0x577   : > { %v2825_v33 = vsub.f32 %v13876_v23, %v2747_v45 }
 0x578   : > { %v2750_v44 = vpop.xlane.xlu1 %2749  ;;  %v14050_v14 = vpop.f32.mrb[60].mxu0 }
 0x579   : > { %v2826_v29 = vsub.f32 %v13882_v62, %v2750_v44  ;;  %v2865_v15 = vmul.f32 1.442695, %v2825_v33  ;;  %v11064_v41 = vpop.f32.mrb[61].mxu0  ;;  %v2811_v32 = vsel %vm1138_vm9, %v14050_v14, -inf }
 0x57a   : > { %v2668_v9 = vpop.f32.mrb[62].mxu0  ;;  %v14054_v4 = vpop.f32.mrb[68].mxu1  ;;  %2812 = vmax.xlane.f32.xlu1 %v2811_v32 }
 0x57b   : > { %v2867_v43 = vmul.f32 1.442695, %v2826_v29  ;;  %12065 = vpow2.f32 %v2865_v15  ;;  %v11065_v18 = vpop.f32.mrb[63].mxu0  ;;  %v11070_v42 = vpop.f32.mrb[69].mxu1  ;;  %v2814_v23 = vsel %vm1138_vm9, %v14054_v4, -inf }
 0x57c   : > { %v2718_v62 = vpop.f32.mrb[70].mxu1  ;;  %2815 = vmax.xlane.f32.xlu0 %v2814_v23 }
 0x57d   : > { %12067 = vpow2.f32 %v2867_v43  ;;  %v11071_v45 = vpop.f32.mrb[71].mxu1 }
 0x57e   : > { %v2753_v44 = vpop.xlane.xlu0 %2752 }
 0x57f   : > { %v2827_v15 = vsub.f32 %v13890_v57, %v2753_v44 }
 0x580   : > { %v2756_v33 = vpop.xlane.xlu1 %2755 }
 0x581   : > { %v2828_v29 = vsub.f32 %v13894_v27, %v2756_v33  ;;  %v2869_v41 = vmul.f32 1.442695, %v2827_v15 }
 0x583   : > { %v2871_v43 = vmul.f32 1.442695, %v2828_v29  ;;  %12069 = vpow2.f32 %v2869_v41 }
 0x585   : > { %12071 = vpow2.f32 %v2871_v43  ;;  %v14060_v9 = vpop.eup %12065 }
 0x586   : > { %v2937_v18 = vsel %vm1138_vm9, %v14060_v9, 0.0  ;;  %v2759_v23 = vpop.xlane.xlu0 %2758 }
 0x587   : > { %v14062_v32 = vpop.eup %12067  ;;  %2938 = vadd.xlane.f32.xlu0 %v2937_v18  ;;  %v2829_v57 = vsub.f32 %v13904_v28, %v2759_v23 }
 0x588   : > { %v2940_v42 = vsel %vm1138_vm9, %v14062_v32, 0.0  ;;  %v2762_v27 = vpop.xlane.xlu1 %2761 }
 0x589   : > { %2941 = vadd.xlane.f32.xlu1 %v2940_v42  ;;  %v2873_v62 = vmul.f32 1.442695, %v2829_v57  ;;  %v2830_v44 = vsub.f32 %v13910_v58, %v2762_v27 }
 0x58b   : > { %12073 = vpow2.f32 %v2873_v62  ;;  %v2875_v15 = vmul.f32 1.442695, %v2830_v44 }
 0x58d   : > { %v14070_v45 = vpop.eup %12069  ;;  %12075 = vpow2.f32 %v2875_v15 }
 0x58e   : > { %v2943_v29 = vsel %vm1138_vm9, %v14070_v45, 0.0  ;;  %v2765_v43 = vpop.xlane.xlu0 %2764 }
 0x58f   : > { %v14072_v33 = vpop.eup %12071  ;;  %2944 = vadd.xlane.f32.xlu1 %v2943_v29  ;;  %v2831_v28 = vsub.f32 %v13916_v59, %v2765_v43  ;;  %v14091_v59 = vpop.permute.xlu1 %4306 }
 0x590   : > { %v2946_v41 = vsel %vm1138_vm9, %v14072_v33, 0.0  ;;  %16334 = vst [vmem:[#allocation37_spill] sm:$0xff] %v14091_v59 }
 0x591   : > { %2947 = vadd.xlane.f32.xlu0 %v2946_v41  ;;  %v2877_v18 = vmul.f32 1.442695, %v2831_v28 }
 0x592   : > { %v14095_v15 = vpop.permute.xlu0 %4258 }
 0x593   : > { %12077 = vpow2.f32 %v2877_v18  ;;  %v14093_v44 = vpop.permute.xlu1 %4354  ;;  %16336 = vst [vmem:[#allocation39_spill] sm:$0xff] %v14095_v15 }
 0x594   : > { %16335 = vst [vmem:[#allocation38_spill] sm:$0xff] %v14093_v44 }
 0x595   : > { %v14079_v58 = vpop.eup %12073 }
 0x596   : > { %v2949_v42 = vsel %vm1138_vm9, %v14079_v58, 0.0 }
 0x597   : > { %v14083_v23 = vpop.eup %12075  ;;  %2950 = vadd.xlane.f32.xlu1 %v2949_v42  ;;  %v14097_v29 = vpop.permute.xlu1 %4402 }
 0x598   : > { %v2952_v57 = vsel %vm1138_vm9, %v14083_v23, 0.0  ;;  %16337 = vst [vmem:[#allocation40_spill] sm:$0xff] %v14097_v29 }
 0x599   : > { %2953 = vadd.xlane.f32.xlu0 %v2952_v57 }
 0x59d   : > { %v14087_v27 = vpop.eup %12077 }
 0x59e   : > { %v2955_v62 = vsel %vm1138_vm9, %v14087_v27, 0.0 }
 0x59f   : > { %2956 = vadd.xlane.f32.xlu1 %v2955_v62 }
 0x5c3   : > { %v2771_v41 = vpop.xlane.xlu0 %2770 }
 0x5c4   : > { %v2833_v43 = vsub.f32 %v13926_v8, %v2771_v41 }
 0x5c5   : > { %v2768_v28 = vpop.xlane.xlu1 %2767 }
 0x5c6   : > { %v2881_v18 = vmul.f32 1.442695, %v2833_v43  ;;  %v2832_v42 = vsub.f32 %v13922_v60, %v2768_v28 }
 0x5c7   : > { %v2777_v57 = vpop.xlane.xlu0 %2776 }
 0x5c8   : > { %12079 = vpow2.f32 %v2881_v18  ;;  %v2879_v11 = vmul.f32 1.442695, %v2832_v42  ;;  %v2835_v62 = vsub.f32 %v13936_v25, %v2777_v57 }
 0x5c9   : > { %v2774_v54 = vpop.xlane.xlu1 %2773 }
 0x5ca   : > { %12081 = vpow2.f32 %v2879_v11  ;;  %v2885_v59 = vmul.f32 1.442695, %v2835_v62  ;;  %v2834_v44 = vsub.f32 %v13930_v63, %v2774_v54 }
 0x5cb   : > { %v2921_v15 = vpop.xlane.xlu0 %2920 }
 0x5cc   : > { %12083 = vpow2.f32 %v2885_v59  ;;  %v2883_v29 = vmul.f32 1.442695, %v2834_v44 }
 0x5cd   : > { %v2780_v20 = vpop.xlane.xlu1 %2779 }
 0x5ce   : > { %12085 = vpow2.f32 %v2883_v29  ;;  %v2836_v8 = vsub.f32 %v13942_v5, %v2780_v20 }
 0x5cf   : > { %v2915_v41 = vpop.xlane.xlu0 %2914 }
 0x5d0   : > { %v2887_v43 = vmul.f32 1.442695, %v2836_v8  ;;  %12087 = vrcp.f32 %v2915_v41 }
 0x5d1   : > { %v2918_v60 = vpop.xlane.xlu1 %2917 }
 0x5d2   : > { %v14104_v28 = vpop.eup %12079  ;;  %12089 = vpow2.f32 %v2887_v43 }
 0x5d3   : > { %12091 = vrcp.f32 %v2918_v60  ;;  %v2783_v25 = vpop.xlane.xlu0 %2782  ;;  %v2961_v11 = vsel %vm1138_vm9, %v14104_v28, 0.0 }
 0x5d4   : > { %v14108_v63 = vpop.eup %12081  ;;  %12093 = vrcp.f32 %v2921_v15  ;;  %v2837_v54 = vsub.f32 %v13950_v39, %v2783_v25  ;;  %2962 = vadd.xlane.f32.xlu1 %v2961_v11 }
 0x5d5   : > { %v2786_v59 = vpop.xlane.xlu1 %2785  ;;  %v2958_v20 = vsel %vm1138_vm9, %v14108_v63, 0.0 }
 0x5d6   : > { %v14113_v5 = vpop.eup %12083  ;;  %v2889_v44 = vmul.f32 1.442695, %v2837_v54  ;;  %v2838_v29 = vsub.f32 %v13954_v1, %v2786_v59  ;;  %2959 = vadd.xlane.f32.xlu0 %v2958_v20 }
 0x5d7   : > { %v2927_v18 = vpop.xlane.xlu0 %2926  ;;  %v2967_v42 = vsel %vm1138_vm9, %v14113_v5, 0.0 }
 0x5d8   : > { %v14118_v57 = vpop.eup %12085  ;;  %12095 = vpow2.f32 %v2889_v44  ;;  %v2891_v15 = vmul.f32 1.442695, %v2838_v29  ;;  %2968 = vadd.xlane.f32.xlu1 %v2967_v42 }
 0x5d9   : > { %v2924_v39 = vpop.xlane.xlu1 %2923  ;;  %v2964_v62 = vsel %vm1138_vm9, %v14118_v57, 0.0 }
 0x5da   : > { %v12088_v8 = vpop.eup %12087  ;;  %12097 = vpow2.f32 %v2891_v15  ;;  %2965 = vadd.xlane.f32.xlu0 %v2964_v62  ;;  %v16338_v15 = vmov 0.0  }
 0x5db   : > { %12099 = vrcp.f32 %v2924_v39  ;;  %v2789_v41 = vpop.xlane.xlu0 %2788  ;;  %v3041_v1 = vmul.f32 %v12088_v8, %v13984_v53  ;;  %v3208_v53 = vsel %vm3110_vm11, %v13868_v3, 0  ;;  %v3256_v3 = vsel %vm3110_vm11, %v13870_v49, 0 }
 0x5dc   : > { %v14123_v43 = vpop.eup %12089  ;;  %12101 = vrcp.f32 %v2927_v18  ;;  %v2839_v60 = vsub.f32 %v13958_v26, %v2789_v41 }
 0x5dd   : > { %v12092_v25 = vpop.eup %12091  ;;  %v2792_v11 = vpop.xlane.xlu1 %2791  ;;  %v2970_v54 = vsel %vm1138_vm9, %v14123_v43, 0.0  ;;  %v3073_v59 = vpack.c.bf16 %v3041_v1, %v3041_v1 }
 0x5de   : > { %v12094_v20 = vpop.eup %12093  ;;  %v2893_v44 = vmul.f32 1.442695, %v2839_v60  ;;  %v2840_v29 = vsub.f32 %v13962_v21, %v2792_v11  ;;  %2971 = vadd.xlane.f32.xlu0 %v2970_v54  ;;  %v3042_v42 = vmul.f32 %v12092_v25, %v13989_v17  ;;  %v3304_v11 = vsel %vm3110_vm11, %v13872_v46, 0 }
 0x5df   : > { %11075 = vmatmul.mubr.msk.bf16.vlgmr.msra.gmra.mrb[64].mxu0 %vm1138_vm9, %v3073_v59  ;;  %v2933_v39 = vpop.xlane.xlu0 %2932  ;;  %v3043_v21 = vmul.f32 %v12094_v20, %v13977_v51 }
 0x5e0   : > { %12103 = vpow2.f32 %v2893_v44  ;;  %v2895_v26 = vmul.f32 1.442695, %v2840_v29  ;;  %11085 = vmatpush3.bf16.msra.mxu0 %v3208_v53  ;;  %v3074_v18 = vpack.c.bf16 %v3042_v42, %v3042_v42  ;;  %11086 = vmatprep.mubr.msk.bf16.mxu0 %vm12695_vm10, %v16338_v15  ;;  %v3352_v44 = vsel %vm3110_vm11, %v13874_v19, 0 }
 0x5e1   : > { %v2930_v62 = vpop.xlane.xlu1 %2929  ;;  %11096 = vmatprep.subr.bf16.mxu0 %v16338_v15  ;;  %v3075_v1 = vpack.c.bf16 %v3043_v21, %v3043_v21 }
 0x5e2   : > { %v14137_v8 = vpop.eup %12095  ;;  %12105 = vpow2.f32 %v2895_v26  ;;  %11081 = vmatmul.mubr.msk.bf16.vlgmr.msra.gmra.mrb[72].mxu1 %vm1138_vm9, %v3074_v18 }
 0x5e3   : > { %11091 = vmatpush3.bf16.msra.mxu1 %v3256_v3  ;;  %12107 = vrcp.f32 %v2930_v62  ;;  %v2973_v17 = vsel %vm1138_vm9, %v14137_v8, 0.0  ;;  %11092 = vmatprep.mubr.msk.bf16.mxu1 %vm12695_vm10, %v16338_v15  ;;  %v3400_v62 = vsel %vm3110_vm11, %v13878_v56, 0 }
 0x5e4   : > { %v14146_v41 = vpop.eup %12097  ;;  %12109 = vrcp.f32 %v2933_v39  ;;  %2974 = vadd.xlane.f32.xlu1 %v2973_v17  ;;  %11102 = vmatprep.subr.bf16.mxu1 %v16338_v15 }
 0x5e5   : > { %v12100_v51 = vpop.eup %12099  ;;  %v2976_v49 = vsel %vm1138_vm9, %v14146_v41, 0.0 }
 0x5e6   : > { %v12102_v60 = vpop.eup %12101  ;;  %2977 = vadd.xlane.f32.xlu0 %v2976_v49  ;;  %v3044_v25 = vmul.f32 %v12100_v51, %v14001_v38  ;;  %v3448_v51 = vsel %vm3110_vm11, %v13886_v48, 0 }
 0x5e7   : > { %11087 = vmatmul.mubr.msk.bf16.vlgmr.msra.gmra.mrb[68].mxu0 %vm1138_vm9, %v3075_v1  ;;  %v3045_v59 = vmul.f32 %v12102_v60, %v13997_v31 }
 0x5e8   : > { %11097 = vmatpush3.bf16.msra.mxu0 %v3304_v11  ;;  %v3076_v54 = vpack.c.bf16 %v3044_v25, %v3044_v25  ;;  %11098 = vmatprep.mubr.msk.bf16.mxu0 %vm12695_vm10, %v16338_v15 }
 0x5e9   : > { %11108 = vmatprep.subr.bf16.mxu0 %v16338_v15  ;;  %v3077_v19 = vpack.c.bf16 %v3045_v59, %v3045_v59 }
 0x5ea   : > { %v14159_v20 = vpop.eup %12103  ;;  %11093 = vmatmul.mubr.msk.bf16.vlgmr.msra.gmra.mrb[76].mxu1 %vm1138_vm9, %v3076_v54 }
 0x5eb   : > { %11103 = vmatpush3.bf16.msra.mxu1 %v3352_v44  ;;  %v2979_v46 = vsel %vm1138_vm9, %v14159_v20, 0.0  ;;  %11104 = vmatprep.mubr.msk.bf16.mxu1 %vm12695_vm10, %v16338_v15 }
 0x5ec   : > { %v14168_v38 = vpop.eup %12105  ;;  %2980 = vadd.xlane.f32.xlu1 %v2979_v46  ;;  %11114 = vmatprep.subr.bf16.mxu1 %v16338_v15 }
 0x5ed   : > { %v12108_v31 = vpop.eup %12107  ;;  %v2982_v42 = vsel %vm1138_vm9, %v14168_v38, 0.0 }
 0x5ee   : > { %v12110_v26 = vpop.eup %12109  ;;  %2983 = vadd.xlane.f32.xlu0 %v2982_v42  ;;  %v3046_v18 = vmul.f32 %v12108_v31, %v14014_v34  ;;  %v3544_v31 = vsel %vm3110_vm11, %v13934_v40, 0 }
 0x5ef   : > { %v2795_v29 = vpop.xlane.xlu0 %2794  ;;  %11099 = vmatmul.mubr.msk.bf16.vlgmr.msra.gmra.mrb[72].mxu0 %vm1138_vm9, %v3077_v19  ;;  %v3047_v34 = vmul.f32 %v12110_v26, %v14009_v36  ;;  %v3496_v36 = vsel %vm3110_vm11, %v13888_v55, 0 }
 0x5f0   : > { %v2841_v53 = vsub.f32 %v14020_v50, %v2795_v29  ;;  %11109 = vmatpush3.bf16.msra.mxu0 %v3400_v62  ;;  %v3078_v17 = vpack.c.bf16 %v3046_v18, %v3046_v18  ;;  %11110 = vmatprep.mubr.msk.bf16.mxu0 %vm12695_vm10, %v16338_v15 }
 0x5f1   : > { %v2798_v39 = vpop.xlane.xlu1 %2797  ;;  %11120 = vmatprep.subr.bf16.mxu0 %v16338_v15  ;;  %v3079_v49 = vpack.c.bf16 %v3047_v34, %v3047_v34 }
 0x5f2   : > { %v2897_v21 = vmul.f32 1.442695, %v2841_v53  ;;  %v2842_v3 = vsub.f32 %v14024_v47, %v2798_v39  ;;  %11105 = vmatmul.mubr.msk.bf16.vlgmr.msra.gmra.mrb[80].mxu1 %vm1138_vm9, %v3078_v17 }
 0x5f3   : > { %11115 = vmatpush3.bf16.msra.mxu1 %v3448_v51  ;;  %11116 = vmatprep.mubr.msk.bf16.mxu1 %vm12695_vm10, %v16338_v15 }
 0x5f4   : > { %12111 = vpow2.f32 %v2897_v21  ;;  %v2899_v50 = vmul.f32 1.442695, %v2842_v3  ;;  %11126 = vmatprep.subr.bf16.mxu1 %v16338_v15 }
 0x5f5   : > { %v2936_v56 = vpop.xlane.xlu1 %2935 }
 0x5f6   : > { %12113 = vpow2.f32 %v2899_v50 }
 0x5f7   : > { %12115 = vrcp.f32 %v2936_v56  ;;  %v2801_v47 = vpop.xlane.xlu0 %2800  ;;  %11111 = vmatmul.mubr.msk.bf16.vlgmr.msra.gmra.mrb[76].mxu0 %vm1138_vm9, %v3079_v49  ;;  %v3592_v49 = vsel %vm3110_vm11, %v13900_v16, 0 }
 0x5f8   : > { %v2843_v1 = vsub.f32 %v14032_v37, %v2801_v47  ;;  %11121 = vmatpush3.bf16.msra.mxu0 %v3496_v36  ;;  %11122 = vmatprep.mubr.msk.bf16.mxu0 %vm12695_vm10, %v16338_v15 }
 0x5f9   : > { %v2804_v60 = vpop.xlane.xlu1 %2803  ;;  %11132 = vmatprep.subr.bf16.mxu0 %v16338_v15 }
 0x5fa   : > { %v2901_v48 = vmul.f32 1.442695, %v2843_v1  ;;  %v2844_v25 = vsub.f32 %v14036_v61, %v2804_v60 }
 0x5fc   : > { %12117 = vpow2.f32 %v2901_v48  ;;  %v2903_v11 = vmul.f32 1.442695, %v2844_v25 }
 0x5fe   : > { %v14197_v54 = vpop.eup %12111  ;;  %12119 = vpow2.f32 %v2903_v11 }
 0x5ff   : > { %v2985_v37 = vsel %vm1138_vm9, %v14197_v54, 0.0  ;;  %v2807_v53 = vpop.xlane.xlu0 %2806 }
 0x600   : > { %v14201_v55 = vpop.eup %12113  ;;  %2986 = vadd.xlane.f32.xlu1 %v2985_v37  ;;  %v3688_v37 = vsel %vm3110_vm11, %v13906_v22, 0 }
 0x601   : > { %v12116_v59 = vpop.eup %12115  ;;  %v2988_v61 = vsel %vm1138_vm9, %v14201_v55, 0.0  ;;  %v2810_v40 = vpop.xlane.xlu1 %2809 }
 0x602   : > { %2989 = vadd.xlane.f32.xlu0 %v2988_v61  ;;  %v3048_v44 = vmul.f32 %v12116_v59, %v14028_v12 }
 0x604   : > { %v3080_v46 = vpack.c.bf16 %v3048_v44, %v3048_v44 }
 0x606   : > { %v14206_v29 = vpop.eup %12117  ;;  %11117 = vmatmul.mubr.msk.bf16.vlgmr.msra.gmra.mrb[84].mxu1 %vm1138_vm9, %v3080_v46 }
 0x607   : > { %11127 = vmatpush3.bf16.msra.mxu1 %v3544_v31  ;;  %v2991_v42 = vsel %vm1138_vm9, %v14206_v29, 0.0  ;;  %11128 = vmatprep.mubr.msk.bf16.mxu1 %vm12695_vm10, %v16338_v15  ;;  %v2813_v18 = vpop.xlane.xlu1 %2812  ;;  %v3784_v31 = vsel %vm3110_vm11, %v13918_v0, 0 }
 0x608   : > { %v14215_v19 = vpop.eup %12119  ;;  %2992 = vadd.xlane.f32.xlu1 %v2991_v42  ;;  %11138 = vmatprep.subr.bf16.mxu1 %v16338_v15  ;;  %v2847_v48 = vsub.f32 %v14050_v14, %v2813_v18 }
 0x609   : > { %v2994_v12 = vsel %vm1138_vm9, %v14215_v19, 0.0  ;;  %v2816_v26 = vpop.xlane.xlu0 %2815 }
 0x60a   : > { %2995 = vadd.xlane.f32.xlu0 %v2994_v12  ;;  %v2848_v61 = vsub.f32 %v14054_v4, %v2816_v26 }
 0x60c   : > { %v2911_v22 = vmul.f32 1.442695, %v2848_v61 }
 0x614   : > { %v2939_v39 = vpop.xlane.xlu0 %2938 }
 0x615   : > { %12121 = vrcp.f32 %v2939_v39 }
 0x616   : > { %v2942_v62 = vpop.xlane.xlu1 %2941 }
 0x617   : > { %12123 = vrcp.f32 %v2942_v62  ;;  %v3880_v62 = vsel %vm3110_vm11, %v13928_v52, 0  ;;  %v16339_v52 = vld [vmem:[#allocation29_spill] sm:$0xff] }
 0x619   : > { %4498 = vrot.lane.b32.xlu1 %v13660_v13, %s12699_s4  ;;  %v3640_v13 = vsel %vm3110_vm11, %v13898_v7, 0  ;;  %v2846_v7 = vsub.f32 %v14044_v30, %v2810_v40  ;;  %v3736_v30 = vsel %vm3110_vm11, %v13952_v6, 0 }
 0x61b   : > { %v2907_v59 = vmul.f32 1.442695, %v2846_v7 }
 0x61c   : > { %v2945_v21 = vpop.xlane.xlu1 %2944 }
 0x61d   : > { %12125 = vrcp.f32 %v2945_v21 }
 0x61e   : > { %v2948_v3 = vpop.xlane.xlu0 %2947 }
 0x61f   : > { %12127 = vrcp.f32 %v2948_v3  ;;  %v12122_v17 = vpop.eup %12121 }
 0x620   : > { %4450 = vrot.lane.b32.xlu0 %v13653_v2, %s12699_s4  ;;  %v3049_v34 = vmul.f32 %v12122_v17, %v14060_v9  ;;  %v2845_v2 = vsub.f32 %v14040_v10, %v2807_v53 }
 0x621   : > { %v12124_v50 = vpop.eup %12123 }
 0x622   : > { %v3050_v51 = vmul.f32 %v12124_v50, %v14062_v32  ;;  %v3081_v56 = vpack.c.bf16 %v3049_v34, %v3049_v34  ;;  %v2905_v36 = vmul.f32 1.442695, %v2845_v2 }
 0x624   : > { %v3082_v47 = vpack.c.bf16 %v3050_v51, %v3050_v51  ;;  %11123 = vmatmul.mubr.msk.bf16.vlgmr.msra.gmra.mrb[80].mxu0 %vm1138_vm9, %v3081_v56  ;;  %v2951_v1 = vpop.xlane.xlu1 %2950 }
 0x625   : > { %11133 = vmatpush3.bf16.msra.mxu0 %v3592_v49  ;;  %11134 = vmatprep.mubr.msk.bf16.mxu0 %vm12695_vm10, %v16338_v15  ;;  %12129 = vrcp.f32 %v2951_v1  ;;  %v16340_v1 = vld [vmem:[#allocation32_spill] sm:$0xff] }
 0x626   : > { %11129 = vmatmul.mubr.msk.bf16.vlgmr.msra.gmra.mrb[88].mxu1 %vm1138_vm9, %v3082_v47  ;;  %11144 = vmatprep.subr.bf16.mxu0 %v16338_v15  ;;  %v2954_v32 = vpop.xlane.xlu0 %2953 }
 0x627   : > { %11139 = vmatpush3.bf16.msra.mxu1 %v3640_v13  ;;  %v12126_v9 = vpop.eup %12125  ;;  %11140 = vmatprep.mubr.msk.bf16.mxu1 %vm12695_vm10, %v16338_v15  ;;  %12131 = vrcp.f32 %v2954_v32 }
 0x628   : > { %v3051_v60 = vmul.f32 %v12126_v9, %v14070_v45  ;;  %11150 = vmatprep.subr.bf16.mxu1 %v16338_v15  ;;  %12133 = vpow2.f32 %v2905_v36  ;;  %v2909_v45 = vmul.f32 1.442695, %v2847_v48  ;;  %v3976_v9 = vsel %vm3110_vm11, %v16340_v1, 0  ;;  %v16350_v1 = vld [vmem:[#allocation40_spill] sm:$0xff] }
 0x629   : > { %v12128_v16 = vpop.eup %12127 }
 0x62a   : > { %v3052_v10 = vmul.f32 %v12128_v16, %v14072_v33  ;;  %v3083_v25 = vpack.c.bf16 %v3051_v60, %v3051_v60 }
 0x62c   : > { %v3084_v11 = vpack.c.bf16 %v3052_v10, %v3052_v10  ;;  %11135 = vmatmul.mubr.msk.bf16.vlgmr.msra.gmra.mrb[84].mxu0 %vm1138_vm9, %v3083_v25  ;;  %v2957_v33 = vpop.xlane.xlu1 %2956  ;;  %v16342_v25 = vld [vmem:[#allocation33_spill] sm:$0xff] }
 0x62d   : > { %11145 = vmatpush3.bf16.msra.mxu0 %v3688_v37  ;;  %11146 = vmatprep.mubr.msk.bf16.mxu0 %vm12695_vm10, %v16338_v15  ;;  %12135 = vrcp.f32 %v2957_v33 }
 0x62e   : > { %11141 = vmatmul.mubr.msk.bf16.vlgmr.msra.gmra.mrb[92].mxu1 %vm1138_vm9, %v3084_v11  ;;  %11156 = vmatprep.subr.bf16.mxu0 %v16338_v15  ;;  %12137 = vpow2.f32 %v2907_v59  ;;  %v4072_v11 = vsel %vm3110_vm11, %v16342_v25, 0 }
 0x62f   : > { %11151 = vmatpush3.bf16.msra.mxu1 %v3736_v30  ;;  %11152 = vmatprep.mubr.msk.bf16.mxu1 %vm12695_vm10, %v16338_v15  ;;  %v12130_v6 = vpop.eup %12129  ;;  %12139 = vpow2.f32 %v2909_v45 }
 0x630   : > { %11162 = vmatprep.subr.bf16.mxu1 %v16338_v15  ;;  %v3053_v14 = vmul.f32 %v12130_v6, %v14079_v58  ;;  %12141 = vpow2.f32 %v2911_v22  ;;  %v3832_v58 = vsel %vm3110_vm11, %v13902_v35, 0 }
 0x631   : > { %v12132_v4 = vpop.eup %12131 }
 0x632   : > { %v3085_v44 = vpack.c.bf16 %v3053_v14, %v3053_v14  ;;  %v3054_v46 = vmul.f32 %v12132_v4, %v14083_v23  ;;  %v14263_v12 = vpop.eup %12133  ;;  %v16344_v14 = vld [vmem:[#allocation34_spill] sm:$0xff] }
 0x633   : > { %v2997_v40 = vsel %vm1138_vm9, %v14263_v12, 0.0  ;;  %v4168_v4 = vsel %vm3110_vm11, %v16344_v14, 0 }
 0x634   : > { %11147 = vmatmul.mubr.msk.bf16.vlgmr.msra.gmra.mrb[88].mxu0 %vm1138_vm9, %v3085_v44  ;;  %v3086_v42 = vpack.c.bf16 %v3054_v46, %v3054_v46 }
 0x635   : > { %11157 = vmatpush3.bf16.msra.mxu0 %v3784_v31  ;;  %11158 = vmatprep.mubr.msk.bf16.mxu0 %vm12695_vm10, %v16338_v15  ;;  %v16345_v31 = vld [vmem:[#allocation36_spill] sm:$0xff] }
 0x636   : > { %11153 = vmatmul.mubr.msk.bf16.vlgmr.msra.gmra.mrb[96].mxu1 %vm1138_vm9, %v3086_v42  ;;  %11168 = vmatprep.subr.bf16.mxu0 %v16338_v15 }
 0x637   : > { %v12136_v23 = vpop.eup %12135  ;;  %11163 = vmatpush3.bf16.msra.mxu1 %v3832_v58  ;;  %11164 = vmatprep.mubr.msk.bf16.mxu1 %vm12695_vm10, %v16338_v15 }
 0x638   : > { %v14271_v0 = vpop.eup %12137  ;;  %v3055_v53 = vmul.f32 %v12136_v23, %v14087_v27  ;;  %11174 = vmatprep.subr.bf16.mxu1 %v16338_v15 }
 0x639   : > { %v14277_v26 = vpop.eup %12139  ;;  %v3000_v18 = vsel %vm1138_vm9, %v14271_v0, 0.0 }
 0x63a   : > { %v3087_v35 = vpack.c.bf16 %v3055_v53, %v3055_v53  ;;  %v14281_v39 = vpop.eup %12141  ;;  %v3003_v27 = vsel %vm1138_vm9, %v14277_v26, 0.0  ;;  %v16346_v53 = vld [vmem:[#allocation39_spill] sm:$0xff] }
 0x63b   : > { %v3006_v21 = vsel %vm1138_vm9, %v14281_v39, 0.0 }
 0x63c   : > { %11159 = vmatmul.mubr.msk.bf16.vlgmr.msra.gmra.mrb[92].mxu0 %vm1138_vm9, %v3087_v35 }
 0x63d   : > { %2998 = vadd.xlane.f32.xlu1 %v2997_v40  ;;  %11169 = vmatpush3.bf16.msra.mxu0 %v3880_v62  ;;  %v4264_v40 = vsel %vm3110_vm11, %v16346_v53, 0 }
 0x63e   : > { %11170 = vmatprep.mubr.msk.bf16.mxu0 %vm12695_vm10, %v16338_v15  ;;  %11180 = vmatprep.subr.bf16.mxu0 %v16338_v15 }
 0x63f   : > { %3001 = vadd.xlane.f32.xlu0 %v3000_v18 }
 0x641   : > { %3004 = vadd.xlane.f32.xlu1 %v3003_v27  ;;  %v16347_v27 = vld [vmem:[#allocation31_spill] sm:$0xff] }
 0x643   : > { %3007 = vadd.xlane.f32.xlu0 %v3006_v21 }
 0x652   : > { %4594 = vrot.lane.b32.xlu1 %v13688_v24, %s12699_s4 }
 0x659   : > { %4546 = vrot.lane.b32.xlu0 %v16339_v52, %s12699_s4 }
 0x661   : > { %v2963_v3 = vpop.xlane.xlu1 %2962 }
 0x662   : > { %12143 = vrcp.f32 %v2963_v3 }
 0x663   : > { %v2960_v17 = vpop.xlane.xlu0 %2959 }
 0x664   : > { %12145 = vrcp.f32 %v2960_v17  ;;  %v16348_v17 = vld [vmem:[#allocation37_spill] sm:$0xff] }
 0x665   : > { %v2969_v50 = vpop.xlane.xlu1 %2968 }
 0x666   : > { %12147 = vrcp.f32 %v2969_v50  ;;  %v4312_v50 = vsel %vm3110_vm11, %v16348_v17, 0 }
 0x667   : > { %v2966_v34 = vpop.xlane.xlu0 %2965 }
 0x668   : > { %12149 = vrcp.f32 %v2966_v34 }
 0x66b   : > { %v2972_v56 = vpop.xlane.xlu0 %2971 }
 0x66c   : > { %v12144_v51 = vpop.eup %12143  ;;  %12151 = vrcp.f32 %v2972_v56 }
 0x66d   : > { %v3057_v47 = vmul.f32 %v12144_v51, %v14104_v28  ;;  %v16341_v28 = vld [vmem:[#allocation35_spill] sm:$0xff] }
 0x66e   : > { %v12146_v49 = vpop.eup %12145  ;;  %v3928_v60 = vsel %vm3110_vm11, %v16341_v28, 0 }
 0x66f   : > { %v3089_v13 = vpack.c.bf16 %v3057_v47, %v3057_v47  ;;  %v3056_v2 = vmul.f32 %v12146_v49, %v14108_v63 }
 0x670   : > { %v12148_v24 = vpop.eup %12147 }
 0x671   : > { %v2975_v16 = vpop.xlane.xlu1 %2974  ;;  %11171 = vmatmul.mubr.msk.bf16.vlgmr.msra.gmra.mrb[96].mxu0 %vm1138_vm9, %v3089_v13  ;;  %v3088_v7 = vpack.c.bf16 %v3056_v2, %v3056_v2  ;;  %v3059_v63 = vmul.f32 %v12148_v24, %v14113_v5  ;;  %v16343_v5 = vld [vmem:[#allocation30_spill] sm:$0xff] }
 0x672   : > { %v12150_v32 = vpop.eup %12149  ;;  %12153 = vrcp.f32 %v2975_v16  ;;  %11181 = vmatpush3.bf16.msra.mxu0 %v3976_v9  ;;  %11182 = vmatprep.mubr.msk.bf16.mxu0 %vm12695_vm10, %v16338_v15  ;;  %v4024_v30 = vsel %vm3110_vm11, %v16343_v5, 0  ;;  %v16349_v13 = vld [vmem:[#allocation38_spill] sm:$0xff]  ;;  %v4408_v9 = vsel %vm3110_vm11, %v16350_v1, 0 }
 0x673   : > { %11165 = vmatmul.mubr.msk.bf16.vlgmr.msra.gmra.mrb[100].mxu1 %vm1138_vm9, %v3088_v7  ;;  %11192 = vmatprep.subr.bf16.mxu0 %v16338_v15  ;;  %v2978_v10 = vpop.xlane.xlu0 %2977  ;;  %v3058_v36 = vmul.f32 %v12150_v32, %v14118_v57  ;;  %v3091_v48 = vpack.c.bf16 %v3059_v63, %v3059_v63  ;;  %v4360_v2 = vsel %vm3110_vm11, %v16349_v13, 0 }
 0x674   : > { %11175 = vmatpush3.bf16.msra.mxu1 %v3928_v60  ;;  %11176 = vmatprep.mubr.msk.bf16.mxu1 %vm12695_vm10, %v16338_v15  ;;  %12155 = vrcp.f32 %v2978_v10 }
 0x675   : > { %11186 = vmatprep.subr.bf16.mxu1 %v16338_v15  ;;  %v3090_v59 = vpack.c.bf16 %v3058_v36, %v3058_v36 }
 0x676   : > { %v12152_v61 = vpop.eup %12151 }
 0x677   : > { %v3060_v22 = vmul.f32 %v12152_v61, %v14123_v43 }
 0x679   : > { %v2981_v37 = vpop.xlane.xlu1 %2980  ;;  %11183 = vmatmul.mubr.msk.bf16.vlgmr.msra.gmra.mrb[100].mxu0 %vm1138_vm9, %v3091_v48  ;;  %v3092_v44 = vpack.c.bf16 %v3060_v22, %v3060_v22 }
 0x67a   : > { %12157 = vrcp.f32 %v2981_v37  ;;  %11193 = vmatpush3.bf16.msra.mxu0 %v4072_v11  ;;  %11194 = vmatprep.mubr.msk.bf16.mxu0 %vm12695_vm10, %v16338_v15 }
 0x67b   : > { %11177 = vmatmul.mubr.msk.bf16.vlgmr.msra.gmra.mrb[104].mxu1 %vm1138_vm9, %v3090_v59  ;;  %11204 = vmatprep.subr.bf16.mxu0 %v16338_v15  ;;  %v2984_v45 = vpop.xlane.xlu0 %2983 }
 0x67c   : > { %v12154_v57 = vpop.eup %12153  ;;  %11187 = vmatpush3.bf16.msra.mxu1 %v4024_v30  ;;  %11188 = vmatprep.mubr.msk.bf16.mxu1 %vm12695_vm10, %v16338_v15  ;;  %12159 = vrcp.f32 %v2984_v45 }
 0x67d   : > { %v3061_v33 = vmul.f32 %v12154_v57, %v14137_v8  ;;  %11198 = vmatprep.subr.bf16.mxu1 %v16338_v15  ;;  %v4120_v8 = vsel %vm3110_vm11, %v16345_v31, 0 }
 0x67e   : > { %v12156_v46 = vpop.eup %12155 }
 0x67f   : > { %v3093_v6 = vpack.c.bf16 %v3061_v33, %v3061_v33  ;;  %v3062_v58 = vmul.f32 %v12156_v46, %v14146_v41 }
 0x681   : > { %11195 = vmatmul.mubr.msk.bf16.vlgmr.msra.gmra.mrb[104].mxu0 %vm1138_vm9, %v3093_v6  ;;  %v3094_v35 = vpack.c.bf16 %v3062_v58, %v3062_v58 }
 0x682   : > { %11205 = vmatpush3.bf16.msra.mxu0 %v4168_v4  ;;  %11206 = vmatprep.mubr.msk.bf16.mxu0 %vm12695_vm10, %v16338_v15 }
 0x683   : > { %11189 = vmatmul.mubr.msk.bf16.vlgmr.msra.gmra.mrb[108].mxu1 %vm1138_vm9, %v3092_v44  ;;  %11216 = vmatprep.subr.bf16.mxu0 %v16338_v15 }
 0x684   : > { %v12158_v43 = vpop.eup %12157  ;;  %11199 = vmatpush3.bf16.msra.mxu1 %v4120_v8  ;;  %11200 = vmatprep.mubr.msk.bf16.mxu1 %vm12695_vm10, %v16338_v15 }
 0x685   : > { %v3063_v42 = vmul.f32 %v12158_v43, %v14159_v20  ;;  %11210 = vmatprep.subr.bf16.mxu1 %v16338_v15  ;;  %v4216_v20 = vsel %vm3110_vm11, %v16347_v27, 0 }
 0x686   : > { %v12160_v18 = vpop.eup %12159 }
 0x687   : > { %v3095_v23 = vpack.c.bf16 %v3063_v42, %v3063_v42  ;;  %v3064_v21 = vmul.f32 %v12160_v18, %v14168_v38 }
 0x689   : > { %11207 = vmatmul.mubr.msk.bf16.vlgmr.msra.gmra.mrb[108].mxu0 %vm1138_vm9, %v3095_v23  ;;  %v3096_v52 = vpack.c.bf16 %v3064_v21, %v3064_v21 }
 0x68a   : > { %11217 = vmatpush3.bf16.msra.mxu0 %v4264_v40  ;;  %11218 = vmatprep.mubr.msk.bf16.mxu0 %vm12695_vm10, %v16338_v15 }
 0x68b   : > { %11201 = vmatmul.mubr.msk.bf16.vlgmr.msra.gmra.mrb[112].mxu1 %vm1138_vm9, %v3094_v35  ;;  %11228 = vmatprep.subr.bf16.mxu0 %v16338_v15 }
 0x68c   : > { %11211 = vmatpush3.bf16.msra.mxu1 %v4216_v20  ;;  %11212 = vmatprep.mubr.msk.bf16.mxu1 %vm12695_vm10, %v16338_v15 }
 0x68d   : > { %v2987_v62 = vpop.xlane.xlu1 %2986  ;;  %11222 = vmatprep.subr.bf16.mxu1 %v16338_v15 }
 0x68e   : > { %12161 = vrcp.f32 %v2987_v62 }
 0x68f   : > { %v2990_v41 = vpop.xlane.xlu0 %2989 }
 0x690   : > { %12163 = vrcp.f32 %v2990_v41 }
 0x693   : > { %11213 = vmatmul.mubr.msk.bf16.vlgmr.msra.gmra.mrb[116].mxu1 %vm1138_vm9, %v3096_v52 }
 0x694   : > { %11223 = vmatpush3.bf16.msra.mxu1 %v4312_v50  ;;  %11224 = vmatprep.mubr.msk.bf16.mxu1 %vm12695_vm10, %v16338_v15 }
 0x695   : > { %v2993_v3 = vpop.xlane.xlu1 %2992  ;;  %11234 = vmatprep.subr.bf16.mxu1 %v16338_v15 }
 0x696   : > { %12165 = vrcp.f32 %v2993_v3 }
 0x697   : > { %v2996_v34 = vpop.xlane.xlu0 %2995 }
 0x698   : > { %v12162_v51 = vpop.eup %12161  ;;  %12167 = vrcp.f32 %v2996_v34 }
 0x699   : > { %v3065_v56 = vmul.f32 %v12162_v51, %v14197_v54  ;;  %v4499_v60 = vpop.permute.xlu1 %4498 }
 0x69a   : > { %v12164_v38 = vpop.eup %12163  ;;  %v4504_v36 = vsel %vm3110_vm11, %v4499_v60, 0 }
 0x69b   : > { %v3097_v47 = vpack.c.bf16 %v3065_v56, %v3065_v56  ;;  %v3066_v49 = vmul.f32 %v12164_v38, %v14201_v55  ;;  %v4451_v7 = vpop.permute.xlu0 %4450 }
 0x69c   : > { %v4456_v63 = vsel %vm3110_vm11, %v4451_v7, 0 }
 0x69d   : > { %11219 = vmatmul.mubr.msk.bf16.vlgmr.msra.gmra.mrb[112].mxu0 %vm1138_vm9, %v3097_v47  ;;  %v3098_v24 = vpack.c.bf16 %v3066_v49, %v3066_v49 }
 0x69e   : > { %11229 = vmatpush3.bf16.msra.mxu0 %v4360_v2  ;;  %11230 = vmatprep.mubr.msk.bf16.mxu0 %vm12695_vm10, %v16338_v15 }
 0x69f   : > { %11225 = vmatmul.mubr.msk.bf16.vlgmr.msra.gmra.mrb[120].mxu1 %vm1138_vm9, %v3098_v24  ;;  %11240 = vmatprep.subr.bf16.mxu0 %v16338_v15 }
 0x6a0   : > { %v12166_v54 = vpop.eup %12165  ;;  %11235 = vmatpush3.bf16.msra.mxu1 %v4408_v9  ;;  %11236 = vmatprep.mubr.msk.bf16.mxu1 %vm12695_vm10, %v16338_v15 }
 0x6a1   : > { %v3067_v55 = vmul.f32 %v12166_v54, %v14206_v29  ;;  %11246 = vmatprep.subr.bf16.mxu1 %v16338_v15 }
 0x6a2   : > { %v12168_v16 = vpop.eup %12167 }
 0x6a3   : > { %v3099_v32 = vpack.c.bf16 %v3067_v55, %v3067_v55  ;;  %v3068_v28 = vmul.f32 %v12168_v16, %v14215_v19 }
 0x6a5   : > { %11231 = vmatmul.mubr.msk.bf16.vlgmr.msra.gmra.mrb[116].mxu0 %vm1138_vm9, %v3099_v32  ;;  %v3100_v10 = vpack.c.bf16 %v3068_v28, %v3068_v28 }
 0x6a6   : > { %11241 = vmatpush3.bf16.msra.mxu0 %v4456_v63  ;;  %11242 = vmatprep.mubr.msk.bf16.mxu0 %vm12695_vm10, %v16338_v15 }
 0x6a7   : > { %11237 = vmatmul.mubr.msk.bf16.vlgmr.msra.gmra.mrb[124].mxu1 %vm1138_vm9, %v3100_v10  ;;  %11252 = vmatprep.subr.bf16.mxu0 %v16338_v15 }
 0x6a8   : > { %11247 = vmatpush3.bf16.msra.mxu1 %v4504_v36  ;;  %11248 = vmatprep.mubr.msk.bf16.mxu1 %vm12695_vm10, %v16338_v15 }
 0x6a9   : > { %11258 = vmatprep.subr.bf16.mxu1 %v16338_v15 }
 0x6b2   : > { %v14386_v29 = vpop.f32.mrb[64].mxu0 }
 0x6b3   : > { %v11076_v19 = vpop.f32.mrb[65].mxu0 }
 0x6b4   : > { %v3151_v48 = vpop.f32.mrb[66].mxu0 }
 0x6b5   : > { %v14388_v25 = vpop.f32.mrb[72].mxu1  ;;  %v11077_v11 = vpop.f32.mrb[67].mxu0 }
 0x6b6   : > { %v11082_v37 = vpop.f32.mrb[73].mxu1 }
 0x6b7   : > { %v3199_v59 = vpop.f32.mrb[74].mxu1 }
 0x6b8   : > { %v11083_v61 = vpop.f32.mrb[75].mxu1 }
 0x6ba   : > { %v14390_v5 = vpop.f32.mrb[68].mxu0 }
 0x6bb   : > { %v11088_v30 = vpop.f32.mrb[69].mxu0 }
 0x6bc   : > { %v3247_v57 = vpop.f32.mrb[70].mxu0 }
 0x6bd   : > { %v14392_v45 = vpop.f32.mrb[76].mxu1  ;;  %v11089_v33 = vpop.f32.mrb[71].mxu0 }
 0x6be   : > { %v11094_v22 = vpop.f32.mrb[77].mxu1 }
 0x6bf   : > { %v3295_v6 = vpop.f32.mrb[78].mxu1 }
 0x6c0   : > { %v11095_v14 = vpop.f32.mrb[79].mxu1 }
 0x6c2   : > { %v14394_v4 = vpop.f32.mrb[72].mxu0 }
 0x6c3   : > { %v11100_v44 = vpop.f32.mrb[73].mxu0 }
 0x6c4   : > { %v3343_v46 = vpop.f32.mrb[74].mxu0 }
 0x6c5   : > { %v14396_v31 = vpop.f32.mrb[80].mxu1  ;;  %v11101_v8 = vpop.f32.mrb[75].mxu0 }
 0x6c6   : > { %v11106_v43 = vpop.f32.mrb[81].mxu1 }
 0x6c7   : > { %v3391_v42 = vpop.f32.mrb[82].mxu1 }
 0x6c8   : > { %v11107_v23 = vpop.f32.mrb[83].mxu1 }
 0x6ca   : > { %v2999_v58 = vpop.xlane.xlu1 %2998  ;;  %v14398_v40 = vpop.f32.mrb[76].mxu0 }
 0x6cb   : > { %12169 = vrcp.f32 %v2999_v58  ;;  %v11112_v35 = vpop.f32.mrb[77].mxu0 }
 0x6cc   : > { %v3002_v53 = vpop.xlane.xlu0 %3001  ;;  %v3439_v62 = vpop.f32.mrb[78].mxu0 }
 0x6cd   : > { %12171 = vrcp.f32 %v3002_v53  ;;  %v11113_v27 = vpop.f32.mrb[79].mxu0 }
 0x6ce   : > { %v3005_v18 = vpop.xlane.xlu1 %3004 }
 0x6cf   : > { %12173 = vrcp.f32 %v3005_v18 }
 0x6d0   : > { %v3008_v20 = vpop.xlane.xlu0 %3007 }
 0x6d1   : > { %12175 = vrcp.f32 %v3008_v20 }
 0x6d2   : > { %v4595_v51 = vpop.permute.xlu1 %4594 }
 0x6d4   : > { %v4547_v3 = vpop.permute.xlu0 %4546 }
 0x6d5   : > { %v12170_v41 = vpop.eup %12169  ;;  %v4552_v38 = vsel %vm3110_vm11, %v4547_v3, 0 }
 0x6d6   : > { %v3069_v21 = vmul.f32 %v12170_v41, %v14263_v12  ;;  %v4600_v12 = vsel %vm3110_vm11, %v4595_v51, 0 }
 0x6d7   : > { %v12172_v52 = vpop.eup %12171 }
 0x6d8   : > { %v3101_v17 = vpack.c.bf16 %v3069_v21, %v3069_v21  ;;  %v3070_v50 = vmul.f32 %v12172_v52, %v14271_v0 }
 0x6d9   : > { %v12174_v34 = vpop.eup %12173  ;;  %v14402_v56 = vpop.f32.mrb[84].mxu1 }
 0x6da   : > { %v11118_v47 = vpop.f32.mrb[85].mxu1  ;;  %11243 = vmatmul.mubr.msk.bf16.vlgmr.msra.gmra.mrb[120].mxu0 %vm1138_vm9, %v3101_v17  ;;  %v3102_v49 = vpack.c.bf16 %v3070_v50, %v3070_v50  ;;  %v3071_v0 = vmul.f32 %v12174_v34, %v14277_v26 }
 0x6db   : > { %v12176_v13 = vpop.eup %12175  ;;  %v3487_v2 = vpop.f32.mrb[86].mxu1  ;;  %11253 = vmatpush3.bf16.msra.mxu0 %v4552_v38  ;;  %11254 = vmatprep.mubr.msk.bf16.mxu0 %vm12695_vm10, %v16338_v15 }
 0x6dc   : > { %v11119_v24 = vpop.f32.mrb[87].mxu1  ;;  %11249 = vmatmul.mubr.msk.bf16.vlgmr.msra.gmra.mrb[128].mxu1 %vm1138_vm9, %v3102_v49  ;;  %v3072_v1 = vmul.f32 %v12176_v13, %v14281_v39  ;;  %v3103_v9 = vpack.c.bf16 %v3071_v0, %v3071_v0 }
 0x6dd   : > { %11259 = vmatpush3.bf16.msra.mxu1 %v4600_v12  ;;  %11260 = vmatprep.mubr.msk.bf16.mxu1 %vm12695_vm10, %v16338_v15 }
 0x6de   : > { %v3104_v54 = vpack.c.bf16 %v3072_v1, %v3072_v1 }
 0x6e2   : > { %11255 = vmatmul.mubr.msk.bf16.vlgmr.msra.gmra.mrb[124].mxu0 %vm1138_vm9, %v3103_v9 }
 0x6e4   : > { %11261 = vmatmul.mubr.msk.bf16.vlgmr.msra.gmra.mrb[132].mxu1 %vm1138_vm9, %v3104_v54 }
 0x6f7   : > { %v3532_v55 = vpop.f32.mrb[80].mxu0 }
 0x6f8   : > { %v11124_v16 = vpop.f32.mrb[81].mxu0 }
 0x6f9   : > { %v3580_v7 = vpop.f32.mrb[88].mxu1  ;;  %v3535_v32 = vpop.f32.mrb[82].mxu0 }
 0x6fa   : > { %v11865_v28 = vpack.i.bf16 %v3580_v7, %v3532_v55  ;;  %v11130_v60 = vpop.f32.mrb[89].mxu1  ;;  %v11125_v63 = vpop.f32.mrb[83].mxu0 }
 0x6fb   : > { %v3583_v26 = vpop.f32.mrb[90].mxu1 }
 0x6fc   : > { %v11131_v10 = vpop.f32.mrb[91].mxu1  ;;  %11866 = vrot.lane.b32.xlu0 %v11865_v28, %s16276_s14 }
 0x6ff   : > { %v3628_v36 = vpop.f32.mrb[84].mxu0 }
 0x700   : > { %v11136_v39 = vpop.f32.mrb[85].mxu0 }
 0x701   : > { %v3676_v19 = vpop.f32.mrb[92].mxu1  ;;  %v3631_v48 = vpop.f32.mrb[86].mxu0 }
 0x702   : > { %v11870_v11 = vpack.i.bf16 %v3676_v19, %v3628_v36  ;;  %v11142_v37 = vpop.f32.mrb[93].mxu1  ;;  %v11137_v59 = vpop.f32.mrb[87].mxu0 }
 0x703   : > { %v3679_v61 = vpop.f32.mrb[94].mxu1 }
 0x704   : > { %11871 = vrot.lane.b32.xlu1 %v11870_v11, %s16276_s14  ;;  %v11143_v30 = vpop.f32.mrb[95].mxu1 }
 0x705   : > { %v11987_v30 = vld [vmem:[#allocation11] sm:$0xff]  }
 0x706   : > { %11264 = vmatprep.subr.bf16.mxu0 %v11987_v30 }
 0x707   : > { %v14418_v57 = vpop.f32.mrb[88].mxu0  ;;  %11265 = vmatpush3.bf16.msra.mxu0 %v11987_v30 }
 0x708   : > { %v11148_v33 = vpop.f32.mrb[89].mxu0 }
 0x709   : > { %v3727_v22 = vpop.f32.mrb[90].mxu0  ;;  %v14420_v6 = vpop.f32.mrb[96].mxu1 }
 0x70a   : > { %v11895_v14 = vpack.i.bf16 %v14420_v6, %v14418_v57  ;;  %v11149_v44 = vpop.f32.mrb[91].mxu0  ;;  %v11154_v46 = vpop.f32.mrb[97].mxu1 }
 0x70b   : > { %v3775_v8 = vpop.f32.mrb[98].mxu1 }
 0x70c   : > { %v11155_v43 = vpop.f32.mrb[99].mxu1 }
 0x70f   : > { %v14424_v42 = vpop.f32.mrb[92].mxu0 }
 0x710   : > { %v11160_v58 = vpop.f32.mrb[93].mxu0 }
 0x711   : > { %v3823_v23 = vpop.f32.mrb[94].mxu0 }
 0x712   : > { %v11161_v53 = vpop.f32.mrb[95].mxu0  ;;  %v11988_v23 = vld [vmem:[#allocation11 + $0x8] sm:$0xff]  }
 0x713   : > { %11266 = vmatprep.subr.bf16.mxu0 %v11988_v23 }
 0x714   : > { %11267 = vmatpush3.bf16.msra.mxu0 %v11988_v23 }
 0x744   : > { %v3916_v35 = vpop.f32.mrb[96].mxu0 }
 0x745   : > { %v11172_v18 = vpop.f32.mrb[97].mxu0 }
 0x746   : > { %v14426_v62 = vpop.f32.mrb[100].mxu1  ;;  %v3919_v27 = vpop.f32.mrb[98].mxu0 }
 0x747   : > { %v11900_v20 = vpack.i.bf16 %v14426_v62, %v14424_v42  ;;  %v11166_v41 = vpop.f32.mrb[101].mxu1  ;;  %v11173_v21 = vpop.f32.mrb[99].mxu0 }
 0x748   : > { %v3871_v52 = vpop.f32.mrb[102].mxu1 }
 0x749   : > { %v11167_v3 = vpop.f32.mrb[103].mxu1 }
 0x74c   : > { %v4012_v17 = vpop.f32.mrb[100].mxu0 }
 0x74d   : > { %v11184_v50 = vpop.f32.mrb[101].mxu0 }
 0x74e   : > { %v3964_v34 = vpop.f32.mrb[104].mxu1  ;;  %v4015_v51 = vpop.f32.mrb[102].mxu0 }
 0x74f   : > { %v11875_v38 = vpack.i.bf16 %v3964_v34, %v3916_v35  ;;  %v11178_v47 = vpop.f32.mrb[105].mxu1  ;;  %v11185_v49 = vpop.f32.mrb[103].mxu0 }
 0x750   : > { %v3967_v13 = vpop.f32.mrb[106].mxu1 }
 0x751   : > { %11876 = vrot.lane.b32.xlu0 %v11875_v38, %s16274_s24  ;;  %v11179_v2 = vpop.f32.mrb[107].mxu1 }
 0x754   : > { %v4108_v12 = vpop.f32.mrb[104].mxu0 }
 0x755   : > { %v11196_v24 = vpop.f32.mrb[105].mxu0 }
 0x756   : > { %v4060_v0 = vpop.f32.mrb[108].mxu1  ;;  %v4111_v1 = vpop.f32.mrb[106].mxu0 }
 0x757   : > { %v11880_v9 = vpack.i.bf16 %v4060_v0, %v4012_v17  ;;  %v11190_v54 = vpop.f32.mrb[109].mxu1  ;;  %v11197_v55 = vpop.f32.mrb[107].mxu0 }
 0x758   : > { %v4063_v16 = vpop.f32.mrb[110].mxu1 }
 0x759   : > { %11881 = vrot.lane.b32.xlu1 %v11880_v9, %s16274_s24  ;;  %v11191_v7 = vpop.f32.mrb[111].mxu1 }
 0x75c   : > { %v4204_v32 = vpop.f32.mrb[108].mxu0 }
 0x75d   : > { %v11208_v28 = vpop.f32.mrb[109].mxu0 }
 0x75e   : > { %v4156_v60 = vpop.f32.mrb[112].mxu1  ;;  %v4207_v63 = vpop.f32.mrb[110].mxu0 }
 0x75f   : > { %v11905_v26 = vpack.i.bf16 %v4156_v60, %v4108_v12  ;;  %v11202_v10 = vpop.f32.mrb[113].mxu1  ;;  %v11209_v36 = vpop.f32.mrb[111].mxu0 }
 0x760   : > { %v4159_v39 = vpop.f32.mrb[114].mxu1 }
 0x761   : > { %v11203_v19 = vpop.f32.mrb[115].mxu1 }
 0x766   : > { %v4252_v48 = vpop.f32.mrb[116].mxu1 }
 0x767   : > { %v11910_v11 = vpack.i.bf16 %v4252_v48, %v4204_v32  ;;  %v11214_v37 = vpop.f32.mrb[117].mxu1 }
 0x768   : > { %v4255_v59 = vpop.f32.mrb[118].mxu1 }
 0x769   : > { %v11215_v61 = vpop.f32.mrb[119].mxu1 }
 0x76e   : > { %v11867_v55 = vpop.permute.xlu0 %11866 }
 0x76f   : > { %v11869_v7 = vunpack.i.h.bf16 %v11867_v55  ;;  %v11868_v32 = vunpack.i.l.bf16 %v11867_v55 }
 0x770   : > { %v4300_v33 = vpop.f32.mrb[112].mxu0 }
 0x771   : > { %v11220_v22 = vpop.f32.mrb[113].mxu0  ;;  %v4739_v10 = vsel %vm1138_vm9, %v14388_v25, %v11869_v7  ;;  %v4738_v36 = vsel %vm1138_vm9, %v14386_v29, %v11868_v32  ;;  %v11989_v32 = vld [vmem:[#allocation14] sm:$0xff]  }
 0x772   : > { %v4303_v44 = vpop.f32.mrb[114].mxu0  ;;  %v4348_v46 = vpop.f32.mrb[120].mxu1  ;;  %11276 = vmatprep.subr.bf16.mxu1 %v11989_v32 }
 0x773   : > { %v11885_v8 = vpack.i.bf16 %v4348_v46, %v4300_v33  ;;  %v11221_v43 = vpop.f32.mrb[115].mxu0  ;;  %v11226_v58 = vpop.f32.mrb[121].mxu1  ;;  %11277 = vmatpush3.bf16.msra.mxu1 %v11989_v32 }
 0x774   : > { %v4351_v53 = vpop.f32.mrb[122].mxu1 }
 0x775   : > { %11886 = vrot.lane.b32.xlu0 %v11885_v8, %s16272_s1  ;;  %v11227_v35 = vpop.f32.mrb[123].mxu1 }
 0x776   : > { %v11872_v63 = vpop.permute.xlu1 %11871 }
 0x777   : > { %v11874_v33 = vunpack.i.h.bf16 %v11872_v63  ;;  %v11873_v22 = vunpack.i.l.bf16 %v11872_v63 }
 0x778   : > { %v4396_v18 = vpop.f32.mrb[116].mxu0 }
 0x779   : > { %v11232_v27 = vpop.f32.mrb[117].mxu0  ;;  %11896 = vrot.lane.b32.xlu0 %v11895_v14, %s16276_s14  ;;  %v4741_v29 = vsel %vm1138_vm9, %v14392_v45, %v11874_v33  ;;  %v4740_v8 = vsel %vm1138_vm9, %v14390_v5, %v11873_v22  ;;  %v16354_v33 = vld [vmem:[#allocation23_spill] sm:$0xff] }
 0x77a   : > { %v4399_v41 = vpop.f32.mrb[118].mxu0  ;;  %v4444_v21 = vpop.f32.mrb[124].mxu1 }
 0x77b   : > { %v11890_v52 = vpack.i.bf16 %v4444_v21, %v4396_v18  ;;  %v11233_v3 = vpop.f32.mrb[119].mxu0  ;;  %v11238_v17 = vpop.f32.mrb[125].mxu1 }
 0x77c   : > { %v4447_v50 = vpop.f32.mrb[126].mxu1 }
 0x77d   : > { %11906 = vrot.lane.b32.xlu0 %v11905_v26, %s16274_s24  ;;  %11891 = vrot.lane.b32.xlu1 %v11890_v52, %s16272_s1  ;;  %v11239_v34 = vpop.f32.mrb[127].mxu1 }
 0x781   : > { %11901 = vrot.lane.b32.xlu1 %v11900_v20, %s16276_s14  ;;  %s10286_s14 = sshll.u32 %s13048_s17, 3 }
 0x785   : > { %11911 = vrot.lane.b32.xlu1 %v11910_v11, %s16274_s24  ;;  %s597_s24 = scalar_lea.vmem [#allocation15], %s10286_s14 }
 0x7ad   : > { %v4492_v57 = vpop.f32.mrb[120].mxu0 }
 0x7ae   : > { %v11244_v6 = vpop.f32.mrb[121].mxu0 }
 0x7af   : > { %v4495_v14 = vpop.f32.mrb[122].mxu0  ;;  %v4540_v51 = vpop.f32.mrb[128].mxu1 }
 0x7b0   : > { %v11915_v38 = vpack.i.bf16 %v4540_v51, %v4492_v57  ;;  %v11245_v47 = vpop.f32.mrb[123].mxu0  ;;  %v11250_v49 = vpop.f32.mrb[129].mxu1 }
 0x7b1   : > { %v4543_v13 = vpop.f32.mrb[130].mxu1 }
 0x7b2   : > { %11916 = vrot.lane.b32.xlu0 %v11915_v38, %s16272_s1  ;;  %v11251_v2 = vpop.f32.mrb[131].mxu1 }
 0x7b5   : > { %v4588_v12 = vpop.f32.mrb[124].mxu0 }
 0x7b6   : > { %v11256_v24 = vpop.f32.mrb[125].mxu0 }
 0x7b7   : > { %v4591_v0 = vpop.f32.mrb[126].mxu0  ;;  %v4636_v1 = vpop.f32.mrb[132].mxu1 }
 0x7b8   : > { %v11920_v9 = vpack.i.bf16 %v4636_v1, %v4588_v12  ;;  %v11257_v42 = vpop.f32.mrb[127].mxu0  ;;  %v11262_v62 = vpop.f32.mrb[133].mxu1 }
 0x7b9   : > { %v4639_v20 = vpop.f32.mrb[134].mxu1 }
 0x7ba   : > { %v11263_v54 = vpop.f32.mrb[135].mxu1  ;;  %11921 = vrot.lane.b32.xlu1 %v11920_v9, %s16272_s1  ;;  %s16368_s1 = sld [smem:[#allocation47_spill]] }
 0x7c3   : > { %v11877_v16 = vpop.permute.xlu0 %11876 }
 0x7c4   : > { %v11879_v28 = vunpack.i.h.bf16 %v11877_v16  ;;  %v11878_v60 = vunpack.i.l.bf16 %v11877_v16 }
 0x7c6   : > { %v4747_v48 = vsel %vm4746_vm12, %v4738_v36, %v11878_v60  ;;  %v4748_v11 = vsel %vm4746_vm12, %v4739_v10, %v11879_v28  ;;  %v11990_v28 = vld [vmem:[#allocation14 + $0x8] sm:$0xff]  }
 0x7c7   : > { %11278 = vmatprep.subr.bf16.mxu1 %v11990_v28 }
 0x7c8   : > { %11279 = vmatpush3.bf16.msra.mxu1 %v11990_v28 }
 0x7cb   : > { %v11882_v37 = vpop.permute.xlu1 %11881 }
 0x7cc   : > { %v11884_v44 = vunpack.i.h.bf16 %v11882_v37  ;;  %v11883_v46 = vunpack.i.l.bf16 %v11882_v37  ;;  %v16352_v37 = vld [vmem:[#allocation21_spill] sm:$0xff] }
 0x7ce   : > { %v4750_v23 = vsel %vm4746_vm12, %v4741_v29, %v11884_v44  ;;  %v4749_v53 = vsel %vm4746_vm12, %v4740_v8, %v11883_v46 }
 0x7e7   : > { %v11887_v26 = vpop.permute.xlu0 %11886 }
 0x7e8   : > { %v11889_v39 = vunpack.i.h.bf16 %v11887_v26  ;;  %v11888_v19 = vunpack.i.l.bf16 %v11887_v26 }
 0x7ea   : > { %v4756_v59 = vsel %vm4755_vm13, %v4747_v48, %v11888_v19  ;;  %v4757_v61 = vsel %vm4755_vm13, %v4748_v11, %v11889_v39  ;;  %v16351_v48 = vld [vmem:[#allocation24_spill] sm:$0xff] }
 0x7eb   : > { %v4768_v30 = vpack.c.bf16 %v4757_v61, %v4756_v59  ;;  %v11897_v41 = vpop.permute.xlu0 %11896  ;;  %v16353_v61 = vld [vmem:[#allocation22_spill] sm:$0xff] }
 0x7ec   : > { %v11899_v52 = vunpack.i.h.bf16 %v11897_v41  ;;  %v11898_v45 = vunpack.i.l.bf16 %v11897_v41  ;;  %v16356_v41 = vld [vmem:[#allocation25_spill] sm:$0xff] }
 0x7ed   : > { %11268 = vmatprep.mubr.msk.bf16.mxu0 %vm610_vm0, %v4768_v30 }
 0x7ee   : > { %v4743_v34 = vsel %vm1138_vm9, %v14396_v31, %v11899_v52  ;;  %v4742_v57 = vsel %vm1138_vm9, %v14394_v4, %v11898_v45  ;;  %v16357_v52 = vld [vmem:[#allocation26_spill] sm:$0xff] }
 0x7ef   : > { %v11892_v25 = vpop.permute.xlu1 %11891  ;;  %v11907_v21 = vpop.permute.xlu0 %11906 }
 0x7f0   : > { %v11894_v43 = vunpack.i.h.bf16 %v11892_v25  ;;  %v11893_v58 = vunpack.i.l.bf16 %v11892_v25  ;;  %v11909_v17 = vunpack.i.h.bf16 %v11907_v21  ;;  %v11908_v5 = vunpack.i.l.bf16 %v11907_v21 }
 0x7f2   : > { %v4759_v35 = vsel %vm4755_vm13, %v4750_v23, %v11894_v43  ;;  %v4758_v18 = vsel %vm4755_vm13, %v4749_v53, %v11893_v58  ;;  %v4751_v51 = vsel %vm4746_vm12, %v4742_v57, %v11908_v5  ;;  %v4752_v38 = vsel %vm4746_vm12, %v4743_v34, %v11909_v17  ;;  %v11991_v34 = vld [vmem:[%s16247_s9] sm:$0xff]   ;;  %v11992_v57 = vld [vmem:[%s16241_s3 + $0x10] sm:$0xff]  }
 0x7f3   : > { %v4769_v27 = vpack.c.bf16 %v4759_v35, %v4758_v18  ;;  %v11902_v3 = vpop.permute.xlu1 %11901  ;;  %v16355_v18 = vld [vmem:[#allocation28_spill] sm:$0xff]  ;;  %11288 = vmatprep.subr.bf16.mxu0 %v11991_v34  ;;  %11300 = vmatprep.subr.bf16.mxu1 %v11992_v57 }
 0x7f4   : > { %v11904_v12 = vunpack.i.h.bf16 %v11902_v3  ;;  %v11903_v24 = vunpack.i.l.bf16 %v11902_v3  ;;  %v16358_v3 = vld [vmem:[#allocation27_spill] sm:$0xff] }
 0x7f5   : > { %11269 = vmatmul.mubr.msk.bf16.vlgmr.msra.gmra.mrb[128].mxu0 %vm610_vm0, %v4769_v27 }
 0x7f6   : > { %v4745_v4 = vsel %vm1138_vm9, %v14402_v56, %v11904_v12  ;;  %v4744_v9 = vsel %vm1138_vm9, %v14398_v40, %v11903_v24  ;;  %v10392_v40 = vld [vmem:[#allocation12] ss:$0 sm:$0xff]  ;;  %11289 = vmatpush3.bf16.msra.mxu0 %v11991_v34 }
 0x7f7   : > { %v11912_v47 = vpop.permute.xlu1 %11911 }
 0x7f8   : > { %v11914_v0 = vunpack.i.h.bf16 %v11912_v47  ;;  %v11913_v1 = vunpack.i.l.bf16 %v11912_v47 }
 0x7fa   : > { %v4753_v20 = vsel %vm4746_vm12, %v4744_v9, %v11913_v1  ;;  %v4754_v54 = vsel %vm4746_vm12, %v4745_v4, %v11914_v0 }
 0x824   : > { %v11917_v50 = vpop.permute.xlu0 %11916 }
 0x825   : > { %v11919_v6 = vunpack.i.h.bf16 %v11917_v50  ;;  %v11918_v14 = vunpack.i.l.bf16 %v11917_v50 }
 0x827   : > { %v4760_v49 = vsel %vm4755_vm13, %v4751_v51, %v11918_v14  ;;  %v4761_v13 = vsel %vm4755_vm13, %v4752_v38, %v11919_v6  ;;  %v11993_v6 = vld [vmem:[%s16247_s9 + $0x8] sm:$0xff]   ;;  %v11994_v14 = vld [vmem:[%s16241_s3 + $0x18] sm:$0xff]   ;;  %v14535_v51 = vld [vmem:[%s16246_s8] ss:$0 sm:$0xff] }
 0x828   : > { %v4770_v2 = vpack.c.bf16 %v4761_v13, %v4760_v49  ;;  %11290 = vmatprep.subr.bf16.mxu0 %v11993_v6 }
 0x829   : > { %11291 = vmatpush3.bf16.msra.mxu0 %v11993_v6 }
 0x82a   : > { %11272 = vmatprep.mubr.msk.bf16.mxu0 %vm610_vm0, %v4770_v2  ;;  %11312 = vmatprep.subr.bf16.mxu0 %v16338_v15 }
 0x82c   : > { %v11922_v31 = vpop.permute.xlu1 %11921 }
 0x82d   : > { %v11924_v42 = vunpack.i.h.bf16 %v11922_v31  ;;  %v11923_v62 = vunpack.i.l.bf16 %v11922_v31 }
 0x82f   : > { %v4763_v55 = vsel %vm4755_vm13, %v4754_v54, %v11924_v42  ;;  %v4762_v16 = vsel %vm4755_vm13, %v4753_v20, %v11923_v62 }
 0x830   : > { %v4771_v7 = vpack.c.bf16 %v4763_v55, %v4762_v16 }
 0x832   : > { %11273 = vmatmul.mubr.msk.bf16.gmra.mrb[132].mxu0 %vm610_vm0, %v4771_v7 }
 0x8c8   : > { %v11270_v56 = vpop.f32.mrb[128].mxu0 }
 0x8c9   : > { %v4837_v60 = vpop.f32.mrb[129].mxu0  ;;  %v4846_v10 = vadd.f32 %v11270_v56, %v10392_v40 }
 0x8ca   : > { %v4838_v63 = vadd.f32 %v10392_v40, %v4837_v60  ;;  %v11271_v26 = vpop.f32.mrb[130].mxu0 }
 0x8cb   : > { %v4849_v36 = vadd.f32 %v11271_v26, %v10392_v40  ;;  %v4840_v39 = vpop.f32.mrb[131].mxu0  ;;  %v14492_v22 = vadd.f32 %v4846_v10, %v16354_v33 }
 0x8cc   : > { %v4841_v19 = vadd.f32 %v10392_v40, %v4840_v39  ;;  %v14486_v59 = vadd.f32 %v4838_v63, %v16352_v37 }
 0x8cd   : > { %v14483_v11 = vadd.f32 %v4849_v36, %v16351_v48 }
 0x8ce   : > { %v14489_v30 = vadd.f32 %v4841_v19, %v16353_v61 }
 0x8cf   : > { %v4881_v46 = vpack.c.bf16 %v14483_v11, %v14492_v22 }
 0x8d0   : > { %v4880_v44 = vpack.c.bf16 %v14489_v30, %v14486_v59 }
 0x8d2   : > { %11280 = vmatprep.mubr.msk.bf16.mxu1 %vm610_vm0, %v4880_v44 }
 0x8d3   : > { %11281 = vmatmul.mubr.msk.bf16.vlgmr.msra.gmra.mrb[136].mxu1 %vm610_vm0, %v4881_v46 }
 0x8d4   : > { %11301 = vmatpush3.bf16.msra.mxu1 %v11992_v57 }
 0x8d5   : > { %11302 = vmatprep.subr.bf16.mxu1 %v11994_v14 }
 0x8d8   : > { %11303 = vmatpush3.bf16.msra.mxu1 %v11994_v14 }
 0x8d9   : > { %11318 = vmatprep.subr.bf16.mxu1 %v16338_v15 }
 0x905   : > { %v11274_v25 = vpop.f32.mrb[132].mxu0 }
 0x906   : > { %v4853_v29 = vpop.f32.mrb[133].mxu0  ;;  %v4862_v58 = vadd.f32 %v11274_v25, %v10392_v40 }
 0x907   : > { %v4854_v8 = vadd.f32 %v10392_v40, %v4853_v29  ;;  %v11275_v43 = vpop.f32.mrb[134].mxu0 }
 0x908   : > { %v4865_v23 = vadd.f32 %v11275_v43, %v10392_v40  ;;  %v4856_v53 = vpop.f32.mrb[135].mxu0  ;;  %v14510_v17 = vadd.f32 %v4862_v58, %v16358_v3 }
 0x909   : > { %v4857_v35 = vadd.f32 %v10392_v40, %v4856_v53  ;;  %v14504_v21 = vadd.f32 %v4854_v8, %v16356_v41 }
 0x90a   : > { %v14501_v27 = vadd.f32 %v4865_v23, %v16355_v18 }
 0x90b   : > { %v14507_v45 = vadd.f32 %v4857_v35, %v16357_v52 }
 0x90c   : > { %v4883_v50 = vpack.c.bf16 %v14501_v27, %v14510_v17 }
 0x90d   : > { %v4882_v5 = vpack.c.bf16 %v14507_v45, %v14504_v21 }
 0x90f   : > { %11284 = vmatprep.mubr.msk.bf16.mxu1 %vm610_vm0, %v4882_v5 }
 0x910   : > { %11285 = vmatmul.mubr.msk.bf16.gmra.mrb[140].mxu1 %vm610_vm0, %v4883_v50 }
 0x9a6   : > { %v11282_v38 = vpop.f32.mrb[136].mxu1 }
 0x9a7   : > { %v14538_v47 = vadd.f32 %v11282_v38, %v14535_v51  ;;  %v4949_v49 = vpop.f32.mrb[137].mxu1 }
 0x9a8   : > { %v14541_v13 = vadd.f32 %v14535_v51, %v4949_v49  ;;  %v11283_v2 = vpop.f32.mrb[138].mxu1 }
 0x9a9   : > { %v14544_v12 = vmul.f32 0.70710677, %v14538_v47  ;;  %v14547_v24 = vadd.f32 %v11283_v2, %v14535_v51  ;;  %v4952_v0 = vpop.f32.mrb[139].mxu1 }
 0x9aa   : > { %v14550_v1 = vmul.f32 0.70710677, %v14541_v13  ;;  %v14557_v9 = vadd.f32 %v14535_v51, %v4952_v0 }
 0x9ab   : > { %v5014_v31 = vand.u32 2147483647, %v14544_v12  ;;  %v14554_v4 = vmul.f32 0.70710677, %v14547_v24  ;;  %vm4998_vm14 = vcmp.ge.f32.partialorder %v14544_v12, 0.0 }
 0x9ac   : > { %v5012_v42 = vand.u32 2147483647, %v14550_v1  ;;  %v14562_v16 = vmul.f32 0.70710677, %v14557_v9  ;;  %vm4996_vm15 = vcmp.ge.f32.partialorder %v14550_v1, 0.0 }
 0x9ad   : > { %v5022_v62 = vmul.f32 0.3275911, %v5014_v31  ;;  %v5015_v54 = vand.u32 2147483647, %v14554_v4  ;;  %v5126_v63 = vsub.f32 0.0, %v5014_v31  ;;  %vm4999_vm1 = vcmp.ge.f32.partialorder %v14554_v4, 0.0 }
 0x9ae   : > { %v5020_v20 = vmul.f32 0.3275911, %v5012_v42  ;;  %v5013_v28 = vand.u32 2147483647, %v14562_v16  ;;  %v5124_v26 = vsub.f32 0.0, %v5012_v42  ;;  %vm4997_vm2 = vcmp.ge.f32.partialorder %v14562_v16, 0.0 }
 0x9af   : > { %v5030_v55 = vadd.f32 1.0, %v5022_v62  ;;  %v5023_v32 = vmul.f32 0.3275911, %v5015_v54  ;;  %v5134_v36 = vmul.f32 %v5126_v63, %v5014_v31  ;;  %v5127_v39 = vsub.f32 0.0, %v5015_v54 }
 0x9b0   : > { %v5028_v7 = vadd.f32 1.0, %v5020_v20  ;;  %v5021_v56 = vmul.f32 0.3275911, %v5013_v28  ;;  %v5132_v37 = vmul.f32 %v5124_v26, %v5012_v42  ;;  %v5125_v33 = vsub.f32 0.0, %v5013_v28 }
 0x9b1   : > { %12177 = vrcp.f32 %v5030_v55  ;;  %v5031_v40 = vadd.f32 1.0, %v5023_v32  ;;  %v5144_v25 = vmul.f32 1.442695, %v5134_v36  ;;  %v5135_v8 = vmul.f32 %v5127_v39, %v5015_v54 }
 0x9b2   : > { %12179 = vrcp.f32 %v5028_v7  ;;  %v5029_v60 = vadd.f32 1.0, %v5021_v56  ;;  %v5140_v58 = vmul.f32 1.442695, %v5132_v37  ;;  %v5133_v18 = vmul.f32 %v5125_v33, %v5013_v28 }
 0x9b3   : > { %12181 = vrcp.f32 %v5031_v40  ;;  %v5146_v50 = vmul.f32 1.442695, %v5135_v8  ;;  %v16359_v8 = vmov -1.0   ;;  %v4983_v4 = vmul.f32 0.5, %v14547_v24 }
 0x9b4   : > { %12183 = vrcp.f32 %v5029_v60  ;;  %v5142_v38 = vmul.f32 1.442695, %v5133_v18  ;;  %v4981_v16 = vmul.f32 0.5, %v14557_v9 }
 0x9b5   : > { %12185 = vpow2.f32 %v5144_v25 }
 0x9b6   : > { %12187 = vpow2.f32 %v5140_v58  ;;  %v5004_v58 = vsel %vm4996_vm15, 1.0, %v16359_v8 }
 0x9b7   : > { %12189 = vpow2.f32 %v5146_v50 }
 0x9b8   : > { %12191 = vpow2.f32 %v5142_v38 }
 0x9bb   : > { %v12178_v10 = vpop.eup %12177 }
 0x9bc   : > { %v12180_v19 = vpop.eup %12179  ;;  %v5054_v48 = vmul.f32 1.0614054, %v12178_v10 }
 0x9bd   : > { %v5052_v61 = vmul.f32 1.0614054, %v12180_v19  ;;  %v12182_v46 = vpop.eup %12181 }
 0x9be   : > { %v5062_v44 = vadd.f32 -1.4531521, %v5054_v48  ;;  %v5055_v23 = vmul.f32 1.0614054, %v12182_v46  ;;  %v12184_v53 = vpop.eup %12183 }
 0x9bf   : > { %v5060_v29 = vadd.f32 -1.4531521, %v5052_v61  ;;  %v5053_v3 = vmul.f32 1.0614054, %v12184_v53  ;;  %v12186_v63 = vpop.eup %12185 }
 0x9c0   : > { %v5070_v43 = vmul.f32 %v12178_v10, %v5062_v44  ;;  %v5063_v52 = vadd.f32 -1.4531521, %v5055_v23  ;;  %v12188_v36 = vpop.eup %12187 }
 0x9c1   : > { %v5068_v35 = vmul.f32 %v12180_v19, %v5060_v29  ;;  %v5061_v6 = vadd.f32 -1.4531521, %v5053_v3  ;;  %v12190_v29 = vpop.eup %12189 }
 0x9c2   : > { %v5078_v41 = vadd.f32 1.4214138, %v5070_v43  ;;  %v5071_v57 = vmul.f32 %v12182_v46, %v5063_v52  ;;  %v5006_v43 = vsel %vm4998_vm14, 1.0, %v16359_v8  ;;  %v12192_v12 = vpop.eup %12191 }
 0x9c3   : > { %v5076_v5 = vadd.f32 1.4214138, %v5068_v35  ;;  %v5069_v0 = vmul.f32 %v12184_v53, %v5061_v6 }
 0x9c4   : > { %v5086_v34 = vmul.f32 %v12178_v10, %v5078_v41  ;;  %v5079_v2 = vadd.f32 1.4214138, %v5071_v57  ;;  %v4980_v57 = vmul.f32 0.5, %v14541_v13 }
 0x9c5   : > { %v5084_v14 = vmul.f32 %v12180_v19, %v5076_v5  ;;  %v5077_v20 = vadd.f32 1.4214138, %v5069_v0 }
 0x9c6   : > { %v5094_v49 = vadd.f32 -0.28449672, %v5086_v34  ;;  %v5087_v62 = vmul.f32 %v12182_v46, %v5079_v2  ;;  %v5005_v34 = vsel %vm4997_vm2, 1.0, %v16359_v8 }
 0x9c7   : > { %v5092_v31 = vadd.f32 -0.28449672, %v5084_v14  ;;  %v5085_v32 = vmul.f32 %v12184_v53, %v5077_v20  ;;  %v4982_v14 = vmul.f32 0.5, %v14538_v47 }
 0x9c8   : > { %v5102_v42 = vmul.f32 %v12178_v10, %v5094_v49  ;;  %v5095_v7 = vadd.f32 -0.28449672, %v5087_v62 }
 0x9c9   : > { %v5100_v54 = vmul.f32 %v12180_v19, %v5092_v31  ;;  %v5093_v60 = vadd.f32 -0.28449672, %v5085_v32 }
 0x9ca   : > { %v5110_v55 = vadd.f32 0.2548296, %v5102_v42  ;;  %v5103_v56 = vmul.f32 %v12182_v46, %v5095_v7 }
 0x9cb   : > { %v5108_v28 = vadd.f32 0.2548296, %v5100_v54  ;;  %v5101_v37 = vmul.f32 %v12184_v53, %v5093_v60 }
 0x9cc   : > { %v5118_v40 = vmul.f32 %v12178_v10, %v5110_v55  ;;  %v5111_v48 = vadd.f32 0.2548296, %v5103_v56 }
 0x9cd   : > { %v5116_v26 = vmul.f32 %v12180_v19, %v5108_v28  ;;  %v5109_v25 = vadd.f32 0.2548296, %v5101_v37 }
 0x9ce   : > { %v5158_v39 = vmul.f32 %v12186_v63, %v5118_v40  ;;  %v5119_v44 = vmul.f32 %v12182_v46, %v5111_v48  ;;  %v5007_v46 = vsel %vm4999_vm1, 1.0, %v16359_v8 }
 0x9cf   : > { %v5156_v61 = vmul.f32 %v12188_v36, %v5116_v26  ;;  %v5117_v23 = vmul.f32 %v12184_v53, %v5109_v25 }
 0x9d0   : > { %v5166_v33 = vsub.f32 1.0, %v5158_v39  ;;  %v5159_v19 = vmul.f32 %v12190_v29, %v5119_v44 }
 0x9d1   : > { %v5164_v10 = vsub.f32 1.0, %v5156_v61  ;;  %v5157_v1 = vmul.f32 %v12192_v12, %v5117_v23 }
 0x9d2   : > { %v5174_v35 = vmul.f32 %v5166_v33, %v5006_v43  ;;  %v5167_v41 = vsub.f32 1.0, %v5159_v19 }
 0x9d3   : > { %v5172_v18 = vmul.f32 %v5164_v10, %v5004_v58  ;;  %v5165_v5 = vsub.f32 1.0, %v5157_v1 }
 0x9d4   : > { %v5175_v3 = vmul.f32 %v5167_v41, %v5007_v46  ;;  %v5182_v50 = vadd.f32 1.0, %v5174_v35 }
 0x9d5   : > { %v5180_v52 = vadd.f32 1.0, %v5172_v18  ;;  %v5173_v6 = vmul.f32 %v5165_v5, %v5005_v34 }
 0x9d6   : > { %v5183_v53 = vadd.f32 1.0, %v5175_v3  ;;  %v5190_v0 = vmul.f32 %v5182_v50, %v4982_v14 }
 0x9d7   : > { %v5188_v38 = vmul.f32 %v5180_v52, %v4980_v57  ;;  %v5181_v2 = vadd.f32 1.0, %v5173_v6 }
 0x9d8   : > { %v5191_v49 = vmul.f32 %v5183_v53, %v4983_v4  ;;  %v14587_v24 = vadd.f32 %v5190_v0, %v14492_v22 }
 0x9d9   : > { %v5189_v31 = vmul.f32 %v5181_v2, %v4981_v16  ;;  %v14581_v62 = vadd.f32 %v5188_v38, %v14486_v59 }
 0x9da   : > { %v14578_v42 = vadd.f32 %v5191_v49, %v14483_v11  ;;  %16363 = vst [vmem:[#allocation33_spill] sm:$0xff] %v14587_v24 }
 0x9db   : > { %16361 = vst [vmem:[#allocation32_spill] sm:$0xff] %v14581_v62  ;;  %v14584_v13 = vadd.f32 %v5189_v31, %v14489_v30 }
 0x9dc   : > { %16360 = vst [vmem:[#allocation29_spill] sm:$0xff] %v14578_v42  ;;  %v5209_v9 = vpack.c.bf16 %v14578_v42, %v14587_v24 }
 0x9dd   : > { %16362 = vst [vmem:[#allocation35_spill] sm:$0xff] %v14584_v13  ;;  %v5208_v47 = vpack.c.bf16 %v14584_v13, %v14581_v62 }
 0x9df   : > { %11292 = vmatprep.mubr.msk.bf16.mxu0 %vm610_vm0, %v5208_v47  ;;  %11304 = vmatprep.mubr.msk.bf16.mxu1 %vm610_vm0, %v5208_v47 }
 0x9e0   : > { %11293 = vmatmul.mubr.msk.bf16.vlgmr.msra.gmra.mrb[136].mxu0 %vm610_vm0, %v5209_v9  ;;  %11305 = vmatmul.mubr.msk.bf16.vlgmr.msra.gmra.mrb[144].mxu1 %vm610_vm0, %v5209_v9 }
 0x9e3   : > { %v11286_v11 = vpop.f32.mrb[140].mxu1 }
 0x9e4   : > { %v14598_v59 = vadd.f32 %v11286_v11, %v14535_v51  ;;  %v4965_v30 = vpop.f32.mrb[141].mxu1 }
 0x9e5   : > { %v14601_v22 = vadd.f32 %v14535_v51, %v4965_v30  ;;  %v11287_v20 = vpop.f32.mrb[142].mxu1 }
 0x9e6   : > { %v14604_v54 = vmul.f32 0.70710677, %v14598_v59  ;;  %v14607_v55 = vadd.f32 %v11287_v20, %v14535_v51  ;;  %v4968_v7 = vpop.f32.mrb[143].mxu1 }
 0x9e7   : > { %v14610_v32 = vmul.f32 0.70710677, %v14601_v22  ;;  %v14617_v56 = vadd.f32 %v14535_v51, %v4968_v7 }
 0x9e8   : > { %v5018_v28 = vand.u32 2147483647, %v14604_v54  ;;  %v14614_v40 = vmul.f32 0.70710677, %v14607_v55  ;;  %vm5002_vm3 = vcmp.ge.f32.partialorder %v14604_v54, 0.0 }
 0x9e9   : > { %v5016_v60 = vand.u32 2147483647, %v14610_v32  ;;  %v14622_v48 = vmul.f32 0.70710677, %v14617_v56  ;;  %vm5000_vm4 = vcmp.ge.f32.partialorder %v14610_v32, 0.0 }
 0x9ea   : > { %v5026_v63 = vmul.f32 0.3275911, %v5018_v28  ;;  %v5019_v36 = vand.u32 2147483647, %v14614_v40  ;;  %v5130_v29 = vsub.f32 0.0, %v5018_v28  ;;  %vm5003_vm5 = vcmp.ge.f32.partialorder %v14614_v40, 0.0 }
 0x9eb   : > { %v5024_v26 = vmul.f32 0.3275911, %v5016_v60  ;;  %v5017_v33 = vand.u32 2147483647, %v14622_v48  ;;  %v5128_v43 = vsub.f32 0.0, %v5016_v60  ;;  %vm5001_vm6 = vcmp.ge.f32.partialorder %v14622_v48, 0.0 }
 0x9ec   : > { %v5034_v39 = vadd.f32 1.0, %v5026_v63  ;;  %v5027_v61 = vmul.f32 0.3275911, %v5019_v36  ;;  %v5138_v58 = vmul.f32 %v5130_v29, %v5018_v28  ;;  %v5131_v19 = vsub.f32 0.0, %v5019_v36 }
 0x9ed   : > { %v5032_v37 = vadd.f32 1.0, %v5024_v26  ;;  %v5025_v25 = vmul.f32 0.3275911, %v5017_v33  ;;  %v5136_v35 = vmul.f32 %v5128_v43, %v5016_v60  ;;  %v5129_v41 = vsub.f32 0.0, %v5017_v33 }
 0x9ee   : > { %12193 = vrcp.f32 %v5034_v39  ;;  %v5035_v44 = vadd.f32 1.0, %v5027_v61  ;;  %v5152_v52 = vmul.f32 1.442695, %v5138_v58  ;;  %v5139_v5 = vmul.f32 %v5131_v19, %v5019_v36 }
 0x9ef   : > { %12195 = vrcp.f32 %v5032_v37  ;;  %v5033_v51 = vadd.f32 1.0, %v5025_v25  ;;  %v5148_v34 = vmul.f32 1.442695, %v5136_v35  ;;  %v5137_v6 = vmul.f32 %v5129_v41, %v5017_v33 }
 0x9f0   : > { %12197 = vrcp.f32 %v5035_v44  ;;  %v5154_v2 = vmul.f32 1.442695, %v5139_v5  ;;  %v5010_v5 = vsel %vm5002_vm3, 1.0, %v16359_v8  ;;  %v4987_v40 = vmul.f32 0.5, %v14607_v55 }
 0x9f1   : > { %12199 = vrcp.f32 %v5033_v51  ;;  %v5150_v11 = vmul.f32 1.442695, %v5137_v6  ;;  %v4985_v48 = vmul.f32 0.5, %v14617_v56 }
 0x9f2   : > { %12201 = vpow2.f32 %v5152_v52 }
 0x9f3   : > { %12203 = vpow2.f32 %v5148_v34 }
 0x9f4   : > { %12205 = vpow2.f32 %v5154_v2  ;;  %v5009_v2 = vsel %vm5001_vm6, 1.0, %v16359_v8 }
 0x9f5   : > { %12207 = vpow2.f32 %v5150_v11 }
 0x9f8   : > { %v12194_v10 = vpop.eup %12193 }
 0x9f9   : > { %v12196_v23 = vpop.eup %12195  ;;  %v5058_v12 = vmul.f32 1.0614054, %v12194_v10 }
 0x9fa   : > { %v5056_v18 = vmul.f32 1.0614054, %v12196_v23  ;;  %v12198_v46 = vpop.eup %12197 }
 0x9fb   : > { %v5066_v1 = vadd.f32 -1.4531521, %v5058_v12  ;;  %v5059_v57 = vmul.f32 1.0614054, %v12198_v46  ;;  %v12200_v4 = vpop.eup %12199 }
 0x9fc   : > { %v5064_v3 = vadd.f32 -1.4531521, %v5056_v18  ;;  %v5057_v49 = vmul.f32 1.0614054, %v12200_v4  ;;  %v12202_v29 = vpop.eup %12201 }
 0x9fd   : > { %v5074_v50 = vmul.f32 %v12194_v10, %v5066_v1  ;;  %v5067_v38 = vadd.f32 -1.4531521, %v5059_v57  ;;  %v12204_v58 = vpop.eup %12203 }
 0x9fe   : > { %v5072_v53 = vmul.f32 %v12196_v23, %v5064_v3  ;;  %v5065_v47 = vadd.f32 -1.4531521, %v5057_v49  ;;  %v12206_v3 = vpop.eup %12205 }
 0x9ff   : > { %v5082_v14 = vadd.f32 1.4214138, %v5074_v50  ;;  %v5075_v31 = vmul.f32 %v12198_v46, %v5067_v38  ;;  %v5008_v50 = vsel %vm5000_vm4, 1.0, %v16359_v8  ;;  %v12208_v54 = vpop.eup %12207 }
 0xa00   : > { %v5080_v16 = vadd.f32 1.4214138, %v5072_v53  ;;  %v5073_v7 = vmul.f32 %v12200_v4, %v5065_v47  ;;  %v4986_v47 = vmul.f32 0.5, %v14598_v59 }
 0xa01   : > { %v5090_v0 = vmul.f32 %v12194_v10, %v5082_v14  ;;  %v5083_v20 = vadd.f32 1.4214138, %v5075_v31 }
 0xa02   : > { %v5088_v9 = vmul.f32 %v12196_v23, %v5080_v16  ;;  %v5081_v26 = vadd.f32 1.4214138, %v5073_v7 }
 0xa03   : > { %v5098_v30 = vadd.f32 -0.28449672, %v5090_v0  ;;  %v5091_v63 = vmul.f32 %v12198_v46, %v5083_v20  ;;  %v4984_v0 = vmul.f32 0.5, %v14601_v22 }
 0xa04   : > { %v5096_v28 = vadd.f32 -0.28449672, %v5088_v9  ;;  %v5089_v61 = vmul.f32 %v12200_v4, %v5081_v26 }
 0xa05   : > { %v5106_v60 = vmul.f32 %v12194_v10, %v5098_v30  ;;  %v5099_v37 = vadd.f32 -0.28449672, %v5091_v63 }
 0xa06   : > { %v5104_v36 = vmul.f32 %v12196_v23, %v5096_v28  ;;  %v5097_v51 = vadd.f32 -0.28449672, %v5089_v61 }
 0xa07   : > { %v5114_v39 = vadd.f32 0.2548296, %v5106_v60  ;;  %v5107_v25 = vmul.f32 %v12198_v46, %v5099_v37 }
 0xa08   : > { %v5112_v33 = vadd.f32 0.2548296, %v5104_v36  ;;  %v5105_v35 = vmul.f32 %v12200_v4, %v5097_v51 }
 0xa09   : > { %v5122_v44 = vmul.f32 %v12194_v10, %v5114_v39  ;;  %v5115_v12 = vadd.f32 0.2548296, %v5107_v25 }
 0xa0a   : > { %v5120_v43 = vmul.f32 %v12196_v23, %v5112_v33  ;;  %v5113_v52 = vadd.f32 0.2548296, %v5105_v35 }
 0xa0b   : > { %v5162_v19 = vmul.f32 %v12202_v29, %v5122_v44  ;;  %v5123_v1 = vmul.f32 %v12198_v46, %v5115_v12  ;;  %v5011_v46 = vsel %vm5003_vm5, 1.0, %v16359_v8 }
 0xa0c   : > { %v5160_v18 = vmul.f32 %v12204_v58, %v5120_v43  ;;  %v5121_v34 = vmul.f32 %v12200_v4, %v5113_v52 }
 0xa0d   : > { %v5170_v41 = vsub.f32 1.0, %v5162_v19  ;;  %v5163_v23 = vmul.f32 %v12206_v3, %v5123_v1 }
 0xa0e   : > { %v5168_v10 = vsub.f32 1.0, %v5160_v18  ;;  %v5161_v32 = vmul.f32 %v12208_v54, %v5121_v34 }
 0xa0f   : > { %v5178_v57 = vmul.f32 %v5170_v41, %v5010_v5  ;;  %v5171_v6 = vsub.f32 1.0, %v5163_v23 }
 0xa10   : > { %v5176_v53 = vmul.f32 %v5168_v10, %v5008_v50  ;;  %v5169_v49 = vsub.f32 1.0, %v5161_v32 }
 0xa11   : > { %v5179_v38 = vmul.f32 %v5171_v6, %v5011_v46  ;;  %v5186_v16 = vadd.f32 1.0, %v5178_v57 }
 0xa12   : > { %v5184_v14 = vadd.f32 1.0, %v5176_v53  ;;  %v5177_v31 = vmul.f32 %v5169_v49, %v5009_v2 }
 0xa13   : > { %v5187_v4 = vadd.f32 1.0, %v5179_v38  ;;  %v5194_v20 = vmul.f32 %v5186_v16, %v4986_v47 }
 0xa14   : > { %v5192_v9 = vmul.f32 %v5184_v14, %v4984_v0  ;;  %v5185_v30 = vadd.f32 1.0, %v5177_v31 }
 0xa15   : > { %v5195_v11 = vmul.f32 %v5187_v4, %v4987_v40  ;;  %v14647_v55 = vadd.f32 %v5194_v20, %v14510_v17 }
 0xa16   : > { %v5193_v7 = vmul.f32 %v5185_v30, %v4985_v48  ;;  %v14641_v60 = vadd.f32 %v5192_v9, %v14504_v21  ;;  %v14666_v21 = vld [vmem:[#allocation9 + $0x1] ss:$0 sm:$0xff] }
 0xa17   : > { %v14638_v28 = vadd.f32 %v5195_v11, %v14501_v27  ;;  %16367 = vst [vmem:[#allocation39_spill] sm:$0xff] %v14647_v55  ;;  %v14664_v27 = vld [vmem:[%s16368_s1] ss:$0 sm:$0xff]  ;;  %s10139_s1 = sshll.u32 %s597_s24, 4  ;;  %s16195_s1 = int_to_ptr.vmem [resolvable:$true] %s10139_s1 }
 0xa18   : > { %16365 = vst [vmem:[#allocation34_spill] sm:$0xff] %v14641_v60  ;;  %v14644_v22 = vadd.f32 %v5193_v7, %v14507_v45 }
 0xa19   : > { %16364 = vst [vmem:[#allocation30_spill] sm:$0xff] %v14638_v28  ;;  %v5211_v56 = vpack.c.bf16 %v14638_v28, %v14647_v55 }
 0xa1a   : > { %16366 = vst [vmem:[#allocation36_spill] sm:$0xff] %v14644_v22  ;;  %v5210_v59 = vpack.c.bf16 %v14644_v22, %v14641_v60 }
 0xa1c   : > { %11296 = vmatprep.mubr.msk.bf16.mxu0 %vm610_vm0, %v5210_v59  ;;  %11308 = vmatprep.mubr.msk.bf16.mxu1 %vm610_vm0, %v5210_v59 }
 0xa1d   : > { %11297 = vmatmul.mubr.msk.bf16.gmra.mrb[140].mxu0 %vm610_vm0, %v5211_v56  ;;  %11309 = vmatmul.mubr.msk.bf16.gmra.mrb[148].mxu1 %vm610_vm0, %v5211_v56 }
 0xa1e   : > { %11314 = vmatprep.mubr.msk.bf16.mxu0 %vm12695_vm10, %v16338_v15  ;;  %11320 = vmatprep.mubr.msk.bf16.mxu1 %vm12695_vm10, %v16338_v15 }
 0xab3   : > { %v11294_v45 = vpop.f32.mrb[136].mxu0  ;;  %v11306_v17 = vpop.f32.mrb[144].mxu1 }
 0xab4   : > { %v14669_v63 = vadd.f32 %v11294_v45, %v14664_v27  ;;  %v5277_v26 = vpop.f32.mrb[137].mxu0  ;;  %v5648_v36 = vpop.f32.mrb[145].mxu1  ;;  %v5657_v43 = vadd.f32 %v11306_v17, %v14666_v21 }
 0xab5   : > { %v14672_v39 = vadd.f32 %v14664_v27, %v5277_v26  ;;  %v5649_v37 = vadd.f32 %v14666_v21, %v5648_v36  ;;  %v11295_v61 = vpop.f32.mrb[138].mxu0  ;;  %v11307_v33 = vpop.f32.mrb[146].mxu1 }
 0xab6   : > { %v14676_v44 = vmul.f32 0.70710677, %v14669_v63  ;;  %v14679_v25 = vadd.f32 %v11295_v61, %v14664_v27  ;;  %v5280_v51 = vpop.f32.mrb[139].mxu0  ;;  %v5651_v29 = vpop.f32.mrb[147].mxu1  ;;  %v14694_v1 = vpack.c.bf16 %v5657_v43, %v5657_v43  ;;  %v5660_v53 = vadd.f32 %v11307_v33, %v14666_v21 }
 0xab7   : > { %v14683_v58 = vmul.f32 0.70710677, %v14672_v39  ;;  %v14685_v19 = vpack.c.bf16 %v5649_v37, %v5649_v37  ;;  %v14698_v10 = vadd.f32 %v14664_v27, %v5280_v51  ;;  %v5652_v50 = vadd.f32 %v14666_v21, %v5651_v29 }
 0xab8   : > { %v5342_v12 = vand.u32 2147483647, %v14676_v44  ;;  %v14689_v35 = vmul.f32 0.70710677, %v14679_v25  ;;  %v14717_v16 = vpack.c.bf16 %v5660_v53, %v5660_v53  ;;  %vm5326_vm7 = vcmp.ge.f32.partialorder %v14676_v44, 0.0 }
 0xab9   : > { %v5340_v18 = vand.u32 2147483647, %v14683_v58  ;;  %5703 = vrot.lane.b32.xlu0 %v14685_v19, %s12694_s27  ;;  %v14704_v54 = vmul.f32 0.70710677, %v14698_v10  ;;  %v14708_v32 = vpack.c.bf16 %v5652_v50, %v5652_v50  ;;  %v5757_v46 = vsel %vm1138_vm9, %v14685_v19, 0 }
 0xaba   : > { %v5350_v41 = vmul.f32 0.3275911, %v5342_v12  ;;  %v5343_v3 = vand.u32 2147483647, %v14689_v35  ;;  %11313 = vmatpush3.bf16.xpose.msra.mxu0 %v5757_v46  ;;  %v5454_v49 = vsub.f32 0.0, %v5342_v12  ;;  %vm5324_vm8 = vcmp.ge.f32.partialorder %v14683_v58, 0.0 }
 0xabb   : > { %v5348_v52 = vmul.f32 0.3275911, %v5340_v18  ;;  %v5341_v6 = vand.u32 2147483647, %v14704_v54  ;;  %5705 = vrot.lane.b32.xlu1 %v14708_v32, %s12694_s27  ;;  %v5805_v38 = vsel %vm1138_vm9, %v14708_v32, 0  ;;  %11324 = vmatprep.subr.bf16.mxu0 %v16338_v15  ;;  %v5452_v0 = vsub.f32 0.0, %v5340_v18 }
 0xabc   : > { %v5358_v5 = vadd.f32 1.0, %v5350_v41  ;;  %v5351_v34 = vmul.f32 0.3275911, %v5343_v3  ;;  %11319 = vmatpush3.bf16.xpose.msra.mxu1 %v5805_v38  ;;  %v5462_v4 = vmul.f32 %v5454_v49, %v5342_v12  ;;  %v5455_v31 = vsub.f32 0.0, %v5343_v3 }
 0xabd   : > { %v5356_v23 = vadd.f32 1.0, %v5348_v52  ;;  %5707 = vrot.lane.b32.xlu0 %v14694_v1, %s12694_s27  ;;  %v5349_v14 = vmul.f32 0.3275911, %v5341_v6  ;;  %11330 = vmatprep.subr.bf16.mxu1 %v16338_v15  ;;  %v5460_v11 = vmul.f32 %v5452_v0, %v5340_v18  ;;  %v5453_v45 = vsub.f32 0.0, %v5341_v6 }
 0xabe   : > { %12209 = vrcp.f32 %v5358_v5  ;;  %v5359_v57 = vadd.f32 1.0, %v5351_v34  ;;  %v5472_v7 = vmul.f32 1.442695, %v5462_v4  ;;  %v5463_v56 = vmul.f32 %v5455_v31, %v5343_v3 }
 0xabf   : > { %12211 = vrcp.f32 %v5356_v23  ;;  %v5357_v2 = vadd.f32 1.0, %v5349_v14  ;;  %5709 = vrot.lane.b32.xlu1 %v14717_v16, %s12694_s27  ;;  %v5468_v26 = vmul.f32 1.442695, %v5460_v11  ;;  %v5461_v12 = vmul.f32 %v5453_v45, %v5341_v6 }
 0xac0   : > { %12213 = vrcp.f32 %v5359_v57  ;;  %v5474_v43 = vmul.f32 1.442695, %v5463_v56  ;;  %vm5327_vm14 = vcmp.ge.f32.partialorder %v14689_v35, 0.0  ;;  %vm5325_vm15 = vcmp.ge.f32.partialorder %v14704_v54, 0.0 }
 0xac1   : > { %12215 = vrcp.f32 %v5357_v2  ;;  %v5470_v57 = vmul.f32 1.442695, %v5461_v12  ;;  %v5310_v58 = vmul.f32 0.5, %v14669_v63  ;;  %v5311_v35 = vmul.f32 0.5, %v14679_v25 }
 0xac2   : > { %12217 = vpow2.f32 %v5472_v7  ;;  %v5309_v54 = vmul.f32 0.5, %v14698_v10 }
 0xac3   : > { %12219 = vpow2.f32 %v5468_v26 }
 0xac4   : > { %12221 = vpow2.f32 %v5474_v43 }
 0xac5   : > { %12223 = vpow2.f32 %v5470_v57 }
 0xac8   : > { %v12210_v40 = vpop.eup %12209 }
 0xac9   : > { %v12212_v47 = vpop.eup %12211  ;;  %v5382_v9 = vmul.f32 1.0614054, %v12210_v40 }
 0xaca   : > { %v5380_v48 = vmul.f32 1.0614054, %v12212_v47  ;;  %v12214_v20 = vpop.eup %12213 }
 0xacb   : > { %v5390_v30 = vadd.f32 -1.4531521, %v5382_v9  ;;  %v5383_v36 = vmul.f32 1.0614054, %v12214_v20  ;;  %v12216_v51 = vpop.eup %12215 }
 0xacc   : > { %v5388_v59 = vadd.f32 -1.4531521, %v5380_v48  ;;  %v5381_v52 = vmul.f32 1.0614054, %v12216_v51  ;;  %v12218_v11 = vpop.eup %12217 }
 0xacd   : > { %v5398_v17 = vmul.f32 %v12210_v40, %v5390_v30  ;;  %v5391_v33 = vadd.f32 -1.4531521, %v5383_v36  ;;  %v12220_v30 = vpop.eup %12219 }
 0xace   : > { %v5396_v37 = vmul.f32 %v12212_v47, %v5388_v59  ;;  %v5389_v3 = vadd.f32 -1.4531521, %v5381_v52 }
 0xacf   : > { %v5406_v61 = vadd.f32 1.4214138, %v5398_v17  ;;  %v5399_v18 = vmul.f32 %v12214_v20, %v5391_v33 }
 0xad0   : > { %v5404_v29 = vadd.f32 1.4214138, %v5396_v37  ;;  %v5397_v14 = vmul.f32 %v12216_v51, %v5389_v3  ;;  %v12222_v37 = vpop.eup %12221 }
 0xad1   : > { %v5414_v41 = vmul.f32 %v12210_v40, %v5406_v61  ;;  %v5407_v23 = vadd.f32 1.4214138, %v5399_v18  ;;  %v5334_v61 = vsel %vm5326_vm7, 1.0, %v16359_v8  ;;  %v12224_v12 = vpop.eup %12223  ;;  %v5335_v18 = vsel %vm5327_vm14, 1.0, %v16359_v8 }
 0xad2   : > { %v5412_v5 = vmul.f32 %v12212_v47, %v5404_v29  ;;  %v5405_v0 = vadd.f32 1.4214138, %v5397_v14  ;;  %v5308_v14 = vmul.f32 0.5, %v14672_v39 }
 0xad3   : > { %v5422_v50 = vadd.f32 -0.28449672, %v5414_v41  ;;  %v5415_v46 = vmul.f32 %v12214_v20, %v5407_v23  ;;  %v5332_v41 = vsel %vm5324_vm8, 1.0, %v16359_v8 }
 0xad4   : > { %v5420_v34 = vadd.f32 -0.28449672, %v5412_v5  ;;  %v5413_v9 = vmul.f32 %v12216_v51, %v5405_v0 }
 0xad5   : > { %v5430_v53 = vmul.f32 %v12210_v40, %v5422_v50  ;;  %v5423_v2 = vadd.f32 -0.28449672, %v5415_v46 }
 0xad6   : > { %v5428_v38 = vmul.f32 %v12212_v47, %v5420_v34  ;;  %v5421_v56 = vadd.f32 -0.28449672, %v5413_v9  ;;  %v5333_v34 = vsel %vm5325_vm15, 1.0, %v16359_v8 }
 0xad7   : > { %v5438_v49 = vadd.f32 0.2548296, %v5430_v53  ;;  %v5431_v31 = vmul.f32 %v12214_v20, %v5423_v2 }
 0xad8   : > { %v5436_v4 = vadd.f32 0.2548296, %v5428_v38  ;;  %v5429_v36 = vmul.f32 %v12216_v51, %v5421_v56 }
 0xad9   : > { %v5446_v6 = vmul.f32 %v12210_v40, %v5438_v49  ;;  %v5439_v59 = vadd.f32 0.2548296, %v5431_v31 }
 0xada   : > { %v5444_v48 = vmul.f32 %v12212_v47, %v5436_v4  ;;  %v5437_v29 = vadd.f32 0.2548296, %v5429_v36 }
 0xadb   : > { %v5486_v7 = vmul.f32 %v12218_v11, %v5446_v6  ;;  %v5447_v26 = vmul.f32 %v12214_v20, %v5439_v59 }
 0xadc   : > { %v5484_v45 = vmul.f32 %v12220_v30, %v5444_v48  ;;  %v5445_v44 = vmul.f32 %v12216_v51, %v5437_v29 }
 0xadd   : > { %v5494_v17 = vsub.f32 1.0, %v5486_v7  ;;  %v5487_v47 = vmul.f32 %v12222_v37, %v5447_v26 }
 0xade   : > { %v5492_v33 = vsub.f32 1.0, %v5484_v45  ;;  %v5485_v50 = vmul.f32 %v12224_v12, %v5445_v44 }
 0xadf   : > { %v5502_v40 = vmul.f32 %v5494_v17, %v5334_v61  ;;  %v5495_v43 = vsub.f32 1.0, %v5487_v47 }
 0xae0   : > { %v5500_v52 = vmul.f32 %v5492_v33, %v5332_v41  ;;  %v5493_v3 = vsub.f32 1.0, %v5485_v50 }
 0xae1   : > { %v5510_v20 = vadd.f32 1.0, %v5502_v40  ;;  %v5503_v5 = vmul.f32 %v5495_v43, %v5335_v18 }
 0xae2   : > { %v5508_v57 = vadd.f32 1.0, %v5500_v52  ;;  %v5501_v46 = vmul.f32 %v5493_v3, %v5333_v34 }
 0xae3   : > { %v5511_v23 = vadd.f32 1.0, %v5503_v5  ;;  %v5518_v51 = vmul.f32 %v5510_v20, %v5310_v58 }
 0xae4   : > { %v5509_v49 = vadd.f32 1.0, %v5501_v46  ;;  %v5516_v2 = vmul.f32 %v5508_v57, %v5308_v14 }
 0xae5   : > { %v5519_v53 = vmul.f32 %v5511_v23, %v5311_v35 }
 0xae6   : > { %v5517_v0 = vmul.f32 %v5509_v49, %v5309_v54 }
 0xae7   : > { %v14733_v38 = vpack.c.bf16 %v5519_v53, %v5518_v51 }
 0xae8   : > { %v14736_v63 = vpack.c.bf16 %v5517_v0, %v5516_v2 }
 0xae9   : > { %16369 = vst [vmem:[#allocation31_spill] sm:$0xff] %v14733_v38 }
 0xaea   : > { %16370 = vst [vmem:[#allocation37_spill] sm:$0xff] %v14736_v63 }
 0xaf0   : > { %v11298_v25 = vpop.f32.mrb[140].mxu0  ;;  %v11310_v4 = vpop.f32.mrb[148].mxu1 }
 0xaf1   : > { %v14739_v6 = vadd.f32 %v11298_v25, %v14664_v27  ;;  %v5293_v31 = vpop.f32.mrb[141].mxu0  ;;  %v5664_v9 = vpop.f32.mrb[149].mxu1  ;;  %v5673_v45 = vadd.f32 %v11310_v4, %v14666_v21 }
 0xaf2   : > { %v14742_v11 = vadd.f32 %v14664_v27, %v5293_v31  ;;  %v5665_v39 = vadd.f32 %v14666_v21, %v5664_v9  ;;  %v11299_v48 = vpop.f32.mrb[142].mxu0  ;;  %v11311_v30 = vpop.f32.mrb[150].mxu1 }
 0xaf3   : > { %v14746_v10 = vmul.f32 0.70710677, %v14739_v6  ;;  %v14749_v7 = vadd.f32 %v11299_v48, %v14664_v27  ;;  %v5296_v59 = vpop.f32.mrb[143].mxu0  ;;  %v5667_v56 = vpop.f32.mrb[151].mxu1  ;;  %v14764_v33 = vpack.c.bf16 %v5673_v45, %v5673_v45  ;;  %v5676_v5 = vadd.f32 %v11311_v30, %v14666_v21 }
 0xaf4   : > { %v14753_v17 = vmul.f32 0.70710677, %v14742_v11  ;;  %v14755_v26 = vpack.c.bf16 %v5665_v39, %v5665_v39  ;;  %v14768_v44 = vadd.f32 %v14664_v27, %v5296_v59  ;;  %v5668_v12 = vadd.f32 %v14666_v21, %v5667_v56 }
 0xaf5   : > { %v5346_v36 = vand.u32 2147483647, %v14746_v10  ;;  %v14759_v37 = vmul.f32 0.70710677, %v14749_v7  ;;  %v14784_v23 = vpack.c.bf16 %v5676_v5, %v5676_v5  ;;  %vm5330_vm1 = vcmp.ge.f32.partialorder %v14746_v10, 0.0 }
 0xaf6   : > { %v5344_v61 = vand.u32 2147483647, %v14753_v17  ;;  %5711 = vrot.lane.b32.xlu0 %v14755_v26, %s12694_s27  ;;  %v14774_v20 = vmul.f32 0.70710677, %v14768_v44  ;;  %v14778_v58 = vpack.c.bf16 %v5668_v12, %v5668_v12  ;;  %vm5328_vm2 = vcmp.ge.f32.partialorder %v14753_v17, 0.0 }
 0xaf7   : > { %v5354_v40 = vmul.f32 0.3275911, %v5346_v36  ;;  %v5347_v29 = vand.u32 2147483647, %v14759_v37  ;;  %v5458_v35 = vsub.f32 0.0, %v5346_v36  ;;  %vm5331_vm3 = vcmp.ge.f32.partialorder %v14759_v37, 0.0 }
 0xaf8   : > { %v5352_v47 = vmul.f32 0.3275911, %v5344_v61  ;;  %v5345_v50 = vand.u32 2147483647, %v14774_v20  ;;  %5713 = vrot.lane.b32.xlu1 %v14778_v58, %s12694_s27  ;;  %v5456_v34 = vsub.f32 0.0, %v5344_v61  ;;  %vm5329_vm4 = vcmp.ge.f32.partialorder %v14774_v20, 0.0 }
 0xaf9   : > { %v5362_v43 = vadd.f32 1.0, %v5354_v40  ;;  %v5355_v18 = vmul.f32 0.3275911, %v5347_v29  ;;  %v5466_v51 = vmul.f32 %v5458_v35, %v5346_v36  ;;  %v5459_v57 = vsub.f32 0.0, %v5347_v29 }
 0xafa   : > { %v5360_v41 = vadd.f32 1.0, %v5352_v47  ;;  %5715 = vrot.lane.b32.xlu0 %v14764_v33, %s12694_s27  ;;  %v5353_v27 = vmul.f32 0.3275911, %v5345_v50  ;;  %v5464_v14 = vmul.f32 %v5456_v34, %v5344_v61  ;;  %v5457_v31 = vsub.f32 0.0, %v5345_v50 }
 0xafb   : > { %12225 = vrcp.f32 %v5362_v43  ;;  %v5363_v52 = vadd.f32 1.0, %v5355_v18  ;;  %v5480_v0 = vmul.f32 1.442695, %v5466_v51  ;;  %v5467_v4 = vmul.f32 %v5459_v57, %v5347_v29 }
 0xafc   : > { %12227 = vrcp.f32 %v5360_v41  ;;  %v5361_v3 = vadd.f32 1.0, %v5353_v27  ;;  %5717 = vrot.lane.b32.xlu1 %v14784_v23, %s12694_s27  ;;  %v5476_v39 = vmul.f32 1.442695, %v5464_v14  ;;  %v5465_v40 = vmul.f32 %v5457_v31, %v5345_v50  ;;  %s16397_s27 = smov 8  }
 0xafd   : > { %12229 = vrcp.f32 %v5363_v52  ;;  %v5482_v61 = vmul.f32 1.442695, %v5467_v4 }
 0xafe   : > { %5751 = vrot.lane.b32.xlu0 %v14685_v19, %s12696_s11  ;;  %12231 = vrcp.f32 %v5361_v3  ;;  %v5478_v27 = vmul.f32 1.442695, %v5465_v40 }
 0xaff   : > { %12233 = vpow2.f32 %v5480_v0 }
 0xb00   : > { %5799 = vrot.lane.b32.xlu1 %v14708_v32, %s12696_s11  ;;  %12235 = vpow2.f32 %v5476_v39 }
 0xb01   : > { %12237 = vpow2.f32 %v5482_v61  ;;  %v5338_v61 = vsel %vm5330_vm1, 1.0, %v16359_v8  ;;  %vm9955_vm1 = vcmask 7168  }
 0xb02   : > { %5719 = vrot.lane.b32.xlu0 %v14685_v19, %s12697_s12  ;;  %12239 = vpow2.f32 %v5478_v27  ;;  %v5315_v27 = vmul.f32 0.5, %v14749_v7 }
 0xb04   : > { %5721 = vrot.lane.b32.xlu1 %v14708_v32, %s12697_s12 }
 0xb05   : > { %v12226_v21 = vpop.eup %12225 }
 0xb06   : > { %v12228_v53 = vpop.eup %12227  ;;  %v5386_v46 = vmul.f32 1.0614054, %v12226_v21  ;;  %5847 = vrot.lane.b32.xlu0 %v14694_v1, %s12696_s11 }
 0xb07   : > { %v5384_v54 = vmul.f32 1.0614054, %v12228_v53  ;;  %v12230_v2 = vpop.eup %12229 }
 0xb08   : > { %v5394_v49 = vadd.f32 -1.4531521, %v5386_v46  ;;  %v5387_v48 = vmul.f32 1.0614054, %v12230_v2  ;;  %v12232_v45 = vpop.eup %12231  ;;  %5895 = vrot.lane.b32.xlu1 %v14717_v16, %s12696_s11 }
 0xb09   : > { %v5392_v25 = vadd.f32 -1.4531521, %v5384_v54  ;;  %v5385_v43 = vmul.f32 1.0614054, %v12232_v45 }
 0xb0a   : > { %v5402_v9 = vmul.f32 %v12226_v21, %v5394_v49  ;;  %5723 = vrot.lane.b32.xlu0 %v14694_v1, %s12697_s12  ;;  %v5395_v56 = vadd.f32 -1.4531521, %v5387_v48 }
 0xb0b   : > { %v5400_v30 = vmul.f32 %v12228_v53, %v5392_v25  ;;  %v5393_v52 = vadd.f32 -1.4531521, %v5385_v43  ;;  %v12234_v25 = vpop.eup %12233 }
 0xb0c   : > { %v5410_v59 = vadd.f32 1.4214138, %v5402_v9  ;;  %v5403_v29 = vmul.f32 %v12230_v2, %v5395_v56  ;;  %5725 = vrot.lane.b32.xlu1 %v14717_v16, %s12697_s12  ;;  %v12236_v31 = vpop.eup %12235 }
 0xb0d   : > { %v5408_v36 = vadd.f32 1.4214138, %v5400_v30  ;;  %v5401_v50 = vmul.f32 %v12232_v45, %v5393_v52 }
 0xb0e   : > { %v5418_v47 = vmul.f32 %v12226_v21, %v5410_v59  ;;  %5943 = vrot.lane.b32.xlu0 %v14755_v26, %s12696_s11  ;;  %v5411_v18 = vadd.f32 1.4214138, %v5403_v29 }
 0xb0f   : > { %v5416_v12 = vmul.f32 %v12228_v53, %v5408_v36  ;;  %v5409_v46 = vadd.f32 1.4214138, %v5401_v50  ;;  %v12238_v36 = vpop.eup %12237 }
 0xb10   : > { %v5426_v41 = vadd.f32 -0.28449672, %v5418_v47  ;;  %v5419_v3 = vmul.f32 %v12230_v2, %v5411_v18  ;;  %5991 = vrot.lane.b32.xlu1 %v14778_v58, %s12696_s11  ;;  %v12240_v43 = vpop.eup %12239 }
 0xb11   : > { %v5424_v5 = vadd.f32 -0.28449672, %v5416_v12  ;;  %v5417_v0 = vmul.f32 %v12232_v45, %v5409_v46  ;;  %v5336_v12 = vsel %vm5328_vm2, 1.0, %v16359_v8  ;;  %vm9973_vm2 = vcmask 1041409  }
 0xb12   : > { %v5434_v35 = vmul.f32 %v12226_v21, %v5426_v41  ;;  %5727 = vrot.lane.b32.xlu0 %v14755_v26, %s12697_s12  ;;  %v5427_v57 = vadd.f32 -0.28449672, %v5419_v3  ;;  %v5339_v41 = vsel %vm5331_vm3, 1.0, %v16359_v8  ;;  %v5337_v3 = vsel %vm5329_vm4, 1.0, %v16359_v8 }
 0xb13   : > { %v5432_v34 = vmul.f32 %v12228_v53, %v5424_v5  ;;  %v5425_v48 = vadd.f32 -0.28449672, %v5417_v0  ;;  %v5314_v5 = vmul.f32 0.5, %v14739_v6  ;;  %vm9976_vm3 = vcmask 1042434  }
 0xb14   : > { %v5442_v51 = vadd.f32 0.2548296, %v5434_v35  ;;  %v5435_v49 = vmul.f32 %v12230_v2, %v5427_v57  ;;  %5729 = vrot.lane.b32.xlu1 %v14778_v58, %s12697_s12  ;;  %v5312_v57 = vmul.f32 0.5, %v14742_v11  ;;  %vm9979_vm4 = vcmask 1043459  }
 0xb15   : > { %v5440_v14 = vadd.f32 0.2548296, %v5432_v34 }
 0xb16   : > { %v5450_v54 = vmul.f32 %v12226_v21, %v5442_v51  ;;  %6039 = vrot.lane.b32.xlu0 %v14764_v33, %s12696_s11  ;;  %v5443_v39 = vadd.f32 0.2548296, %v5435_v49  ;;  %v5433_v21 = vmul.f32 %v12232_v45, %v5425_v48 }
 0xb17   : > { %v5448_v4 = vmul.f32 %v12228_v53, %v5440_v14  ;;  %v5313_v14 = vmul.f32 0.5, %v14768_v44 }
 0xb18   : > { %v5490_v9 = vmul.f32 %v12234_v25, %v5450_v54  ;;  %v5451_v56 = vmul.f32 %v12230_v2, %v5443_v39  ;;  %v5441_v47 = vadd.f32 0.2548296, %v5433_v21  ;;  %6087 = vrot.lane.b32.xlu1 %v14784_v23, %s12696_s11 }
 0xb19   : > { %v5488_v30 = vmul.f32 %v12236_v31, %v5448_v4 }
 0xb1a   : > { %v5498_v59 = vsub.f32 1.0, %v5490_v9  ;;  %5731 = vrot.lane.b32.xlu0 %v14764_v33, %s12697_s12  ;;  %v5491_v40 = vmul.f32 %v12238_v36, %v5451_v56  ;;  %v5449_v2 = vmul.f32 %v12232_v45, %v5441_v47 }
 0xb1b   : > { %v5496_v53 = vsub.f32 1.0, %v5488_v30 }
 0xb1c   : > { %v5506_v10 = vmul.f32 %v5498_v59, %v5338_v61  ;;  %v5499_v29 = vsub.f32 1.0, %v5491_v40  ;;  %v5489_v52 = vmul.f32 %v12240_v43, %v5449_v2  ;;  %5733 = vrot.lane.b32.xlu1 %v14784_v23, %s12697_s12  ;;  %v5853_v61 = vsel %vm1138_vm9, %v14694_v1, 0  ;;  %s16399_s12 = smov 24  }
 0xb1d   : > { %v5504_v37 = vmul.f32 %v5496_v53, %v5336_v12  ;;  %v5949_v2 = vsel %vm1138_vm9, %v14755_v26, 0  ;;  %v5901_v12 = vsel %vm1138_vm9, %v14717_v16, 0 }
 0xb1e   : > { %v5514_v17 = vadd.f32 1.0, %v5506_v10  ;;  %v5507_v18 = vmul.f32 %v5499_v29, %v5339_v41  ;;  %v5497_v45 = vsub.f32 1.0, %v5489_v52 }
 0xb1f   : > { %v5512_v20 = vadd.f32 1.0, %v5504_v37 }
 0xb20   : > { %v5515_v35 = vadd.f32 1.0, %v5507_v18  ;;  %v5522_v50 = vmul.f32 %v5514_v17, %v5314_v5  ;;  %v5505_v51 = vmul.f32 %v5497_v45, %v5337_v3  ;;  %v5997_v45 = vsel %vm1138_vm9, %v14778_v58, 0 }
 0xb21   : > { %v5520_v54 = vmul.f32 %v5512_v20, %v5312_v57 }
 0xb22   : > { %v5523_v34 = vmul.f32 %v5515_v35, %v5315_v27  ;;  %v5513_v6 = vadd.f32 1.0, %v5505_v51  ;;  %v6045_v27 = vsel %vm1138_vm9, %v14764_v33, 0 }
 0xb24   : > { %v14829_v46 = vpack.c.bf16 %v5523_v34, %v5522_v50  ;;  %v5521_v7 = vmul.f32 %v5513_v6, %v5313_v14  ;;  %v6093_v6 = vsel %vm1138_vm9, %v14784_v23, 0 }
 0xb26   : > { %16371 = vst [vmem:[#allocation38_spill] sm:$0xff] %v14829_v46  ;;  %v14832_v49 = vpack.c.bf16 %v5521_v7, %v5520_v54 }
 0xb28   : > { %16372 = vst [vmem:[#allocation40_spill] sm:$0xff] %v14832_v49 }
 0xb2b   : > { %v14834_v0 = vpop.permute.xlu0 %5703 }
 0xb2c   : > { %v14838_v25 = vcombine.low %v14834_v0, %v14834_v0  ;;  %v6143_v14 = vsel %vm1138_vm9, %v14834_v0, 0 }
 0xb2d   : > { %v14846_v11 = vpop.permute.xlu1 %5705 }
 0xb2e   : > { %6137 = vrot.lane.b32.xlu0 %v14838_v25, %s12696_s11  ;;  %v14854_v31 = vcombine.low %v14846_v11, %v14846_v11 }
 0xb2f   : > { %v14842_v4 = vpop.permute.xlu0 %5707 }
 0xb30   : > { %v14850_v44 = vcombine.low %v14842_v4, %v14842_v4  ;;  %6187 = vrot.lane.b32.xlu1 %v14854_v31, %s12696_s11 }
 0xb31   : > { %v14860_v9 = vpop.permute.xlu1 %5709 }
 0xb32   : > { %5735 = vrot.lane.b32.xlu0 %v14685_v19, %s12698_s15  ;;  %v14868_v39 = vcombine.low %v14860_v9, %v14860_v9 }
 0xb34   : > { %5737 = vrot.lane.b32.xlu1 %v14708_v32, %s12698_s15 }
 0xb36   : > { %6237 = vrot.lane.b32.xlu0 %v14850_v44, %s12696_s11 }
 0xb38   : > { %6287 = vrot.lane.b32.xlu1 %v14868_v39, %s12696_s11 }
 0xb3a   : > { %5739 = vrot.lane.b32.xlu0 %v14694_v1, %s12698_s15 }
 0xb3c   : > { %5741 = vrot.lane.b32.xlu1 %v14717_v16, %s12698_s15 }
 0xb68   : > { %v14874_v48 = vpop.permute.xlu0 %5711 }
 0xb69   : > { %v14878_v30 = vcombine.low %v14874_v48, %v14874_v48 }
 0xb6a   : > { %v14886_v21 = vpop.permute.xlu1 %5713 }
 0xb6b   : > { %6337 = vrot.lane.b32.xlu0 %v14878_v30, %s12696_s11  ;;  %v14897_v10 = vcombine.low %v14886_v21, %v14886_v21 }
 0xb6c   : > { %v14882_v59 = vpop.permute.xlu0 %5715 }
 0xb6d   : > { %v14890_v36 = vcombine.low %v14882_v59, %v14882_v59  ;;  %6387 = vrot.lane.b32.xlu1 %v14897_v10, %s12696_s11 }
 0xb6e   : > { %v14908_v40 = vpop.permute.xlu1 %5717 }
 0xb6f   : > { %5743 = vrot.lane.b32.xlu0 %v14755_v26, %s12698_s15  ;;  %v14919_v43 = vcombine.low %v14908_v40, %v14908_v40 }
 0xb70   : > { %v5752_v56 = vpop.permute.xlu0 %5751 }
 0xb71   : > { %11315 = vmatmul.mubr.msk.bf16.vlgmr.msra.gmra.mrb[144].mxu0 %vm1138_vm9, %v5752_v56  ;;  %5745 = vrot.lane.b32.xlu1 %v14778_v58, %s12698_s15 }
 0xb72   : > { %11325 = vmatpush3.bf16.xpose.msra.mxu0 %v5853_v61  ;;  %11326 = vmatprep.mubr.msk.bf16.mxu0 %vm12695_vm10, %v16338_v15  ;;  %v5800_v29 = vpop.permute.xlu1 %5799 }
 0xb73   : > { %6437 = vrot.lane.b32.xlu0 %v14890_v36, %s12696_s11  ;;  %11336 = vmatprep.subr.bf16.mxu0 %v16338_v15 }
 0xb74   : > { %v14906_v53 = vpop.permute.xlu0 %5719  ;;  %11321 = vmatmul.mubr.msk.bf16.vlgmr.msra.gmra.mrb[152].mxu1 %vm1138_vm9, %v5800_v29 }
 0xb75   : > { %11331 = vmatpush3.bf16.xpose.msra.mxu1 %v5901_v12  ;;  %v14926_v41 = vcombine.low %v14906_v53, %v14906_v53  ;;  %11332 = vmatprep.mubr.msk.bf16.mxu1 %vm12695_vm10, %v16338_v15 }
 0xb76   : > { %6487 = vrot.lane.b32.xlu1 %v14919_v43, %s12696_s11  ;;  %11342 = vmatprep.subr.bf16.mxu1 %v16338_v15  ;;  %v14935_v37 = vpop.permute.xlu1 %5721 }
 0xb77   : > { %5747 = vrot.lane.b32.xlu0 %v14764_v33, %s12698_s15  ;;  %v14955_v35 = vcombine.low %v14935_v37, %v14935_v37 }
 0xb78   : > { %v5848_v47 = vpop.permute.xlu0 %5847 }
 0xb79   : > { %11327 = vmatmul.mubr.msk.bf16.vlgmr.msra.gmra.mrb[148].mxu0 %vm1138_vm9, %v5848_v47  ;;  %v6193_v47 = vsel %vm1138_vm9, %v14846_v11, 0  ;;  %v6243_v11 = vsel %vm1138_vm9, %v14842_v4, 0  ;;  %v6343_v4 = vsel %vm1138_vm9, %v14874_v48, 0 }
 0xb7a   : > { %11337 = vmatpush3.bf16.xpose.msra.mxu0 %v5949_v2  ;;  %11338 = vmatprep.mubr.msk.bf16.mxu0 %vm12695_vm10, %v16338_v15  ;;  %v5896_v5 = vpop.permute.xlu1 %5895 }
 0xb7b   : > { %6537 = vrot.lane.b32.xlu0 %v14926_v41, %s12696_s11  ;;  %11348 = vmatprep.subr.bf16.mxu0 %v16338_v15 }
 0xb7c   : > { %v14933_v17 = vpop.permute.xlu0 %5723  ;;  %5749 = vrot.lane.b32.xlu1 %v14784_v23, %s12698_s15  ;;  %11333 = vmatmul.mubr.msk.bf16.vlgmr.msra.gmra.mrb[156].mxu1 %vm1138_vm9, %v5896_v5 }
 0xb7d   : > { %v14941_v18 = vcombine.low %v14933_v17, %v14933_v17  ;;  %11343 = vmatpush3.bf16.xpose.msra.mxu1 %v5997_v45  ;;  %11344 = vmatprep.mubr.msk.bf16.mxu1 %vm12695_vm10, %v16338_v15 }
 0xb7e   : > { %11354 = vmatprep.subr.bf16.mxu1 %v16338_v15  ;;  %v14967_v50 = vpop.permute.xlu1 %5725 }
 0xb7f   : > { %6637 = vrot.lane.b32.xlu0 %v14941_v18, %s12696_s11  ;;  %v14978_v34 = vcombine.low %v14967_v50, %v14967_v50 }
 0xb80   : > { %v5944_v52 = vpop.permute.xlu0 %5943  ;;  %6587 = vrot.lane.b32.xlu1 %v14955_v35, %s12696_s11 }
 0xb81   : > { %11339 = vmatmul.mubr.msk.bf16.vlgmr.msra.gmra.mrb[152].mxu0 %vm1138_vm9, %v5944_v52 }
 0xb82   : > { %11349 = vmatpush3.bf16.xpose.msra.mxu0 %v6045_v27  ;;  %11350 = vmatprep.mubr.msk.bf16.mxu0 %vm12695_vm10, %v16338_v15  ;;  %v5992_v57 = vpop.permute.xlu1 %5991 }
 0xb83   : > { %11360 = vmatprep.subr.bf16.mxu0 %v16338_v15 }
 0xb84   : > { %v14965_v3 = vpop.permute.xlu0 %5727  ;;  %6687 = vrot.lane.b32.xlu1 %v14978_v34, %s12696_s11  ;;  %11345 = vmatmul.mubr.msk.bf16.vlgmr.msra.gmra.mrb[160].mxu1 %vm1138_vm9, %v5992_v57 }
 0xb85   : > { %v14971_v20 = vcombine.low %v14965_v3, %v14965_v3  ;;  %11355 = vmatpush3.bf16.xpose.msra.mxu1 %v6093_v6  ;;  %11356 = vmatprep.mubr.msk.bf16.mxu1 %vm12695_vm10, %v16338_v15 }
 0xb86   : > { %11366 = vmatprep.subr.bf16.mxu1 %v16338_v15  ;;  %v14997_v7 = vpop.permute.xlu1 %5729 }
 0xb87   : > { %6737 = vrot.lane.b32.xlu0 %v14971_v20, %s12696_s11  ;;  %v15006_v56 = vcombine.low %v14997_v7, %v14997_v7 }
 0xb88   : > { %v6040_v51 = vpop.permute.xlu0 %6039 }
 0xb89   : > { %11351 = vmatmul.mubr.msk.bf16.vlgmr.msra.gmra.mrb[156].mxu0 %vm1138_vm9, %v6040_v51  ;;  %6787 = vrot.lane.b32.xlu1 %v15006_v56, %s12696_s11  ;;  %v6293_v51 = vsel %vm1138_vm9, %v14860_v9, 0 }
 0xb8a   : > { %11361 = vmatpush3.bf16.xpose.msra.mxu0 %v6143_v14  ;;  %11362 = vmatprep.mubr.msk.bf16.mxu0 %vm12695_vm10, %v16338_v15  ;;  %v6088_v61 = vpop.permute.xlu1 %6087 }
 0xb8b   : > { %11372 = vmatprep.subr.bf16.mxu0 %v16338_v15 }
 0xb8c   : > { %v14993_v54 = vpop.permute.xlu0 %5731  ;;  %11357 = vmatmul.mubr.msk.bf16.vlgmr.msra.gmra.mrb[164].mxu1 %vm1138_vm9, %v6088_v61  ;;  %v6393_v61 = vsel %vm1138_vm9, %v14886_v21, 0  ;;  %v6443_v21 = vsel %vm1138_vm9, %v14882_v59, 0  ;;  %v6543_v59 = vsel %vm1138_vm9, %v14906_v53, 0 }
 0xb8d   : > { %v15001_v0 = vcombine.low %v14993_v54, %v14993_v54  ;;  %11367 = vmatpush3.bf16.xpose.msra.mxu1 %v6193_v47  ;;  %11368 = vmatprep.mubr.msk.bf16.mxu1 %vm12695_vm10, %v16338_v15 }
 0xb8e   : > { %11378 = vmatprep.subr.bf16.mxu1 %v16338_v15  ;;  %v15018_v29 = vpop.permute.xlu1 %5733 }
 0xb8f   : > { %6837 = vrot.lane.b32.xlu0 %v15001_v0, %s12696_s11  ;;  %v15022_v2 = vcombine.low %v15018_v29, %v15018_v29 }
 0xb91   : > { %6887 = vrot.lane.b32.xlu1 %v15022_v2, %s12696_s11 }
 0xba0   : > { %v6138_v12 = vpop.permute.xlu0 %6137 }
 0xba1   : > { %11363 = vmatmul.mubr.msk.bf16.vlgmr.msra.gmra.mrb[160].mxu0 %vm1138_vm9, %v6138_v12 }
 0xba2   : > { %11373 = vmatpush3.bf16.xpose.msra.mxu0 %v6243_v11  ;;  %11374 = vmatprep.mubr.msk.bf16.mxu0 %vm12695_vm10, %v16338_v15  ;;  %v6188_v45 = vpop.permute.xlu1 %6187 }
 0xba3   : > { %11384 = vmatprep.subr.bf16.mxu0 %v16338_v15  ;;  %11369 = vmatmul.mubr.msk.bf16.vlgmr.msra.gmra.mrb[168].mxu1 %vm1138_vm9, %v6188_v45 }
 0xba4   : > { %v15032_v52 = vpop.permute.xlu0 %5735  ;;  %11379 = vmatpush3.bf16.xpose.msra.mxu1 %v6293_v51  ;;  %11380 = vmatprep.mubr.msk.bf16.mxu1 %vm12695_vm10, %v16338_v15 }
 0xba5   : > { %v15036_v5 = vcombine.low %v15032_v52, %v15032_v52  ;;  %11390 = vmatprep.subr.bf16.mxu1 %v16338_v15 }
 0xba6   : > { %v15053_v14 = vpop.permute.xlu1 %5737 }
 0xba7   : > { %6937 = vrot.lane.b32.xlu0 %v15036_v5, %s12696_s11  ;;  %v15062_v9 = vcombine.low %v15053_v14, %v15053_v14 }
 0xba8   : > { %v6238_v27 = vpop.permute.xlu0 %6237 }
 0xba9   : > { %11375 = vmatmul.mubr.msk.bf16.vlgmr.msra.gmra.mrb[164].mxu0 %vm1138_vm9, %v6238_v27  ;;  %6987 = vrot.lane.b32.xlu1 %v15062_v9, %s12696_s11 }
 0xbaa   : > { %11385 = vmatpush3.bf16.xpose.msra.mxu0 %v6343_v4  ;;  %11386 = vmatprep.mubr.msk.bf16.mxu0 %vm12695_vm10, %v16338_v15  ;;  %v6288_v6 = vpop.permute.xlu1 %6287 }
 0xbab   : > { %11396 = vmatprep.subr.bf16.mxu0 %v16338_v15  ;;  %11381 = vmatmul.mubr.msk.bf16.vlgmr.msra.gmra.mrb[172].mxu1 %vm1138_vm9, %v6288_v6  ;;  %v6493_v6 = vsel %vm1138_vm9, %v14908_v40, 0 }
 0xbac   : > { %v15049_v57 = vpop.permute.xlu0 %5739  ;;  %11391 = vmatpush3.bf16.xpose.msra.mxu1 %v6393_v61  ;;  %11392 = vmatprep.mubr.msk.bf16.mxu1 %vm12695_vm10, %v16338_v15 }
 0xbad   : > { %v15057_v48 = vcombine.low %v15049_v57, %v15049_v57  ;;  %11402 = vmatprep.subr.bf16.mxu1 %v16338_v15 }
 0xbae   : > { %v15074_v47 = vpop.permute.xlu1 %5741 }
 0xbaf   : > { %7037 = vrot.lane.b32.xlu0 %v15057_v48, %s12696_s11  ;;  %v15078_v12 = vcombine.low %v15074_v47, %v15074_v47 }
 0xbb1   : > { %7087 = vrot.lane.b32.xlu1 %v15078_v12, %s12696_s11 }
 0xbdd   : > { %v6338_v11 = vpop.permute.xlu0 %6337 }
 0xbde   : > { %11387 = vmatmul.mubr.msk.bf16.vlgmr.msra.gmra.mrb[168].mxu0 %vm1138_vm9, %v6338_v11 }
 0xbdf   : > { %11397 = vmatpush3.bf16.xpose.msra.mxu0 %v6443_v21  ;;  %11398 = vmatprep.mubr.msk.bf16.mxu0 %vm12695_vm10, %v16338_v15  ;;  %v6388_v51 = vpop.permute.xlu1 %6387 }
 0xbe0   : > { %11408 = vmatprep.subr.bf16.mxu0 %v16338_v15  ;;  %11393 = vmatmul.mubr.msk.bf16.vlgmr.msra.gmra.mrb[176].mxu1 %vm1138_vm9, %v6388_v51 }
 0xbe1   : > { %v15088_v27 = vpop.permute.xlu0 %5743  ;;  %11403 = vmatpush3.bf16.xpose.msra.mxu1 %v6493_v6  ;;  %11404 = vmatprep.mubr.msk.bf16.mxu1 %vm12695_vm10, %v16338_v15 }
 0xbe2   : > { %v15092_v45 = vcombine.low %v15088_v27, %v15088_v27  ;;  %11414 = vmatprep.subr.bf16.mxu1 %v16338_v15 }
 0xbe3   : > { %v15109_v11 = vpop.permute.xlu1 %5745 }
 0xbe4   : > { %7137 = vrot.lane.b32.xlu0 %v15092_v45, %s12696_s11  ;;  %v15118_v40 = vcombine.low %v15109_v11, %v15109_v11 }
 0xbe5   : > { %v6438_v4 = vpop.permute.xlu0 %6437 }
 0xbe6   : > { %11399 = vmatmul.mubr.msk.bf16.vlgmr.msra.gmra.mrb[172].mxu0 %vm1138_vm9, %v6438_v4  ;;  %7187 = vrot.lane.b32.xlu1 %v15118_v40, %s12696_s11  ;;  %v6593_v4 = vsel %vm1138_vm9, %v14935_v37, 0 }
 0xbe7   : > { %11409 = vmatpush3.bf16.xpose.msra.mxu0 %v6543_v59  ;;  %11410 = vmatprep.mubr.msk.bf16.mxu0 %vm12695_vm10, %v16338_v15  ;;  %v6643_v59 = vsel %vm1138_vm9, %v14933_v17, 0 }
 0xbe8   : > { %11420 = vmatprep.subr.bf16.mxu0 %v16338_v15  ;;  %v6488_v21 = vpop.permute.xlu1 %6487 }
 0xbe9   : > { %v15105_v61 = vpop.permute.xlu0 %5747  ;;  %11405 = vmatmul.mubr.msk.bf16.vlgmr.msra.gmra.mrb[180].mxu1 %vm1138_vm9, %v6488_v21 }
 0xbea   : > { %v15113_v53 = vcombine.low %v15105_v61, %v15105_v61  ;;  %11415 = vmatpush3.bf16.xpose.msra.mxu1 %v6593_v4  ;;  %11416 = vmatprep.mubr.msk.bf16.mxu1 %vm12695_vm10, %v16338_v15  ;;  %v6743_v4 = vsel %vm1138_vm9, %v14965_v3, 0 }
 0xbeb   : > { %11426 = vmatprep.subr.bf16.mxu1 %v16338_v15 }
 0xbec   : > { %16373 = vst [vmem:[#allocation24_spill] sm:$0xff] %v15113_v53  ;;  %7237 = vrot.lane.b32.xlu0 %v15113_v53, %s12696_s11 }
 0xbed   : > { %v6538_v51 = vpop.permute.xlu0 %6537 }
 0xbee   : > { %11411 = vmatmul.mubr.msk.bf16.vlgmr.msra.gmra.mrb[176].mxu0 %vm1138_vm9, %v6538_v51  ;;  %v15132_v6 = vpop.permute.xlu1 %5749 }
 0xbef   : > { %11421 = vmatpush3.bf16.xpose.msra.mxu0 %v6643_v59  ;;  %v15139_v37 = vcombine.low %v15132_v6, %v15132_v6  ;;  %11422 = vmatprep.mubr.msk.bf16.mxu0 %vm12695_vm10, %v16338_v15 }
 0xbf0   : > { %7719 = vrot.lane.b32.xlu0 %v14685_v19, %s12699_s4  ;;  %11432 = vmatprep.subr.bf16.mxu0 %v16338_v15  ;;  %v6693_v19 = vsel %vm1138_vm9, %v14967_v50, 0 }
 0xbf1   : > { %16374 = vst [vmem:[#allocation21_spill] sm:$0xff] %v15139_v37  ;;  %7287 = vrot.lane.b32.xlu1 %v15139_v37, %s12696_s11  ;;  %v6638_v21 = vpop.permute.xlu0 %6637  ;;  %s16398_s11 = smov 16  }
 0xbf2   : > { %v6588_v17 = vpop.permute.xlu1 %6587 }
 0xbf3   : > { %11417 = vmatmul.mubr.msk.bf16.vlgmr.msra.gmra.mrb[184].mxu1 %vm1138_vm9, %v6588_v17 }
 0xbf4   : > { %7815 = vrot.lane.b32.xlu0 %v14694_v1, %s12699_s4  ;;  %11427 = vmatpush3.bf16.xpose.msra.mxu1 %v6693_v19 }
 0xbf5   : > { %7767 = vrot.lane.b32.xlu1 %v14708_v32, %s12699_s4  ;;  %11428 = vmatprep.mubr.msk.bf16.mxu1 %vm12695_vm10, %v16338_v15  ;;  %v6793_v32 = vsel %vm1138_vm9, %v14997_v7, 0 }
 0xbf6   : > { %11423 = vmatmul.mubr.msk.bf16.vlgmr.msra.gmra.mrb[180].mxu0 %vm1138_vm9, %v6638_v21  ;;  %11438 = vmatprep.subr.bf16.mxu1 %v16338_v15  ;;  %v6688_v1 = vpop.permute.xlu1 %6687 }
 0xbf7   : > { %11433 = vmatpush3.bf16.xpose.msra.mxu0 %v6743_v4  ;;  %11434 = vmatprep.mubr.msk.bf16.mxu0 %vm12695_vm10, %v16338_v15 }
 0xbf8   : > { %7911 = vrot.lane.b32.xlu0 %v14755_v26, %s12699_s4  ;;  %11444 = vmatprep.subr.bf16.mxu0 %v16338_v15  ;;  %v6843_v26 = vsel %vm1138_vm9, %v14993_v54, 0 }
 0xbf9   : > { %7863 = vrot.lane.b32.xlu1 %v14717_v16, %s12699_s4  ;;  %v6738_v3 = vpop.permute.xlu0 %6737 }
 0xbfb   : > { %11429 = vmatmul.mubr.msk.bf16.vlgmr.msra.gmra.mrb[188].mxu1 %vm1138_vm9, %v6688_v1  ;;  %v6788_v16 = vpop.permute.xlu1 %6787 }
 0xbfc   : > { %8007 = vrot.lane.b32.xlu0 %v14764_v33, %s12699_s4  ;;  %11439 = vmatpush3.bf16.xpose.msra.mxu1 %v6793_v32  ;;  %v6893_v33 = vsel %vm1138_vm9, %v15018_v29, 0  ;;  %v7243_v32 = vsel %vm1138_vm9, %v15105_v61, 0 }
 0xbfd   : > { %7959 = vrot.lane.b32.xlu1 %v14778_v58, %s12699_s4  ;;  %11440 = vmatprep.mubr.msk.bf16.mxu1 %vm12695_vm10, %v16338_v15 }
 0xbfe   : > { %11435 = vmatmul.mubr.msk.bf16.vlgmr.msra.gmra.mrb[184].mxu0 %vm1138_vm9, %v6738_v3  ;;  %11450 = vmatprep.subr.bf16.mxu1 %v16338_v15 }
 0xbff   : > { %11445 = vmatpush3.bf16.xpose.msra.mxu0 %v6843_v26  ;;  %11446 = vmatprep.mubr.msk.bf16.mxu0 %vm12695_vm10, %v16338_v15 }
 0xc00   : > { %8103 = vrot.lane.b32.xlu0 %v14838_v25, %s12699_s4  ;;  %11456 = vmatprep.subr.bf16.mxu0 %v16338_v15  ;;  %v6943_v25 = vsel %vm1138_vm9, %v15032_v52, 0 }
 0xc01   : > { %8055 = vrot.lane.b32.xlu1 %v14784_v23, %s12699_s4  ;;  %v6838_v58 = vpop.permute.xlu0 %6837 }
 0xc03   : > { %11441 = vmatmul.mubr.msk.bf16.vlgmr.msra.gmra.mrb[192].mxu1 %vm1138_vm9, %v6788_v16  ;;  %v6888_v23 = vpop.permute.xlu1 %6887 }
 0xc04   : > { %8199 = vrot.lane.b32.xlu0 %v14850_v44, %s12699_s4  ;;  %11451 = vmatpush3.bf16.xpose.msra.mxu1 %v6893_v33  ;;  %v6993_v44 = vsel %vm1138_vm9, %v15053_v14, 0 }
 0xc05   : > { %8151 = vrot.lane.b32.xlu1 %v14854_v31, %s12699_s4  ;;  %11452 = vmatprep.mubr.msk.bf16.mxu1 %vm12695_vm10, %v16338_v15 }
 0xc06   : > { %11447 = vmatmul.mubr.msk.bf16.vlgmr.msra.gmra.mrb[188].mxu0 %vm1138_vm9, %v6838_v58  ;;  %11462 = vmatprep.subr.bf16.mxu1 %v16338_v15 }
 0xc07   : > { %11457 = vmatpush3.bf16.xpose.msra.mxu0 %v6943_v25  ;;  %11458 = vmatprep.mubr.msk.bf16.mxu0 %vm12695_vm10, %v16338_v15 }
 0xc08   : > { %8295 = vrot.lane.b32.xlu0 %v14878_v30, %s12699_s4  ;;  %11468 = vmatprep.subr.bf16.mxu0 %v16338_v15 }
 0xc09   : > { %8247 = vrot.lane.b32.xlu1 %v14868_v39, %s12699_s4  ;;  %v7043_v39 = vsel %vm1138_vm9, %v15049_v57, 0 }
 0xc0b   : > { %11453 = vmatmul.mubr.msk.bf16.vlgmr.msra.gmra.mrb[196].mxu1 %vm1138_vm9, %v6888_v23 }
 0xc0c   : > { %8391 = vrot.lane.b32.xlu0 %v14890_v36, %s12699_s4  ;;  %11463 = vmatpush3.bf16.xpose.msra.mxu1 %v6993_v44 }
 0xc0d   : > { %11464 = vmatprep.mubr.msk.bf16.mxu1 %vm12695_vm10, %v16338_v15  ;;  %8439 = vrot.lane.b32.xlu1 %v14919_v43, %s12699_s4  ;;  %v7143_v43 = vsel %vm1138_vm9, %v15088_v27, 0 }
 0xc0e   : > { %11474 = vmatprep.subr.bf16.mxu1 %v16338_v15 }
 0xc10   : > { %8487 = vrot.lane.b32.xlu0 %v14926_v41, %s12699_s4  ;;  %v7093_v41 = vsel %vm1138_vm9, %v15074_v47, 0 }
 0xc11   : > { %8535 = vrot.lane.b32.xlu1 %v14955_v35, %s12699_s4 }
 0xc14   : > { %8583 = vrot.lane.b32.xlu0 %v14941_v18, %s12699_s4  ;;  %v7193_v18 = vsel %vm1138_vm9, %v15109_v11, 0 }
 0xc15   : > { %8631 = vrot.lane.b32.xlu1 %v14978_v34, %s12699_s4 }
 0xc18   : > { %8679 = vrot.lane.b32.xlu0 %v14971_v20, %s12699_s4 }
 0xc19   : > { %v6938_v31 = vpop.permute.xlu0 %6937  ;;  %8823 = vrot.lane.b32.xlu1 %v15022_v2, %s12699_s4 }
 0xc1a   : > { %11459 = vmatmul.mubr.msk.bf16.vlgmr.msra.gmra.mrb[192].mxu0 %vm1138_vm9, %v6938_v31 }
 0xc1b   : > { %11469 = vmatpush3.bf16.xpose.msra.mxu0 %v7043_v39  ;;  %11470 = vmatprep.mubr.msk.bf16.mxu0 %vm12695_vm10, %v16338_v15  ;;  %v6988_v36 = vpop.permute.xlu1 %6987 }
 0xc1c   : > { %11480 = vmatprep.subr.bf16.mxu0 %v16338_v15  ;;  %8775 = vrot.lane.b32.xlu0 %v15001_v0, %s12699_s4 }
 0xc1d   : > { %8343 = vrot.lane.b32.xlu1 %v14897_v10, %s12699_s4  ;;  %11465 = vmatmul.mubr.msk.bf16.vlgmr.msra.gmra.mrb[200].mxu1 %vm1138_vm9, %v6988_v36 }
 0xc1e   : > { %11475 = vmatpush3.bf16.xpose.msra.mxu1 %v7093_v41  ;;  %11476 = vmatprep.mubr.msk.bf16.mxu1 %vm12695_vm10, %v16338_v15 }
 0xc1f   : > { %11486 = vmatprep.subr.bf16.mxu1 %v16338_v15 }
 0xc21   : > { %v7038_v30 = vpop.permute.xlu0 %7037  ;;  %8727 = vrot.lane.b32.xlu1 %v15006_v56, %s12699_s4 }
 0xc22   : > { %11471 = vmatmul.mubr.msk.bf16.vlgmr.msra.gmra.mrb[196].mxu0 %vm1138_vm9, %v7038_v30 }
 0xc23   : > { %11481 = vmatpush3.bf16.xpose.msra.mxu0 %v7143_v43  ;;  %11482 = vmatprep.mubr.msk.bf16.mxu0 %vm12695_vm10, %v16338_v15  ;;  %v7088_v10 = vpop.permute.xlu1 %7087  ;;  %v7293_v43 = vsel %vm1138_vm9, %v15132_v6, 0 }
 0xc24   : > { %11492 = vmatprep.subr.bf16.mxu0 %v16338_v15 }
 0xc25   : > { %11477 = vmatmul.mubr.msk.bf16.vlgmr.msra.gmra.mrb[204].mxu1 %vm1138_vm9, %v7088_v10 }
 0xc26   : > { %11487 = vmatpush3.bf16.xpose.msra.mxu1 %v7193_v18  ;;  %11488 = vmatprep.mubr.msk.bf16.mxu1 %vm12695_vm10, %v16338_v15 }
 0xc27   : > { %11498 = vmatprep.subr.bf16.mxu1 %v16338_v15 }
 0xc44   : > { %v15258_v35 = vpop.f32.mrb[144].mxu0 }
 0xc45   : > { %v11316_v50 = vpop.f32.mrb[145].mxu0  ;;  %v7335_v20 = vsel %vm1138_vm9, %v15258_v35, -inf }
 0xc46   : > { %7336 = vmax.xlane.f32.xlu0 %v7335_v20  ;;  %v5796_v34 = vpop.f32.mrb[146].mxu0 }
 0xc47   : > { %v11317_v54 = vpop.f32.mrb[147].mxu0  ;;  %v15264_v0 = vpop.f32.mrb[152].mxu1 }
 0xc48   : > { %v11322_v2 = vpop.f32.mrb[153].mxu1  ;;  %v7338_v52 = vsel %vm1138_vm9, %v15264_v0, -inf }
 0xc49   : > { %7339 = vmax.xlane.f32.xlu1 %v7338_v52  ;;  %v5844_v14 = vpop.f32.mrb[154].mxu1 }
 0xc4a   : > { %v11323_v27 = vpop.f32.mrb[155].mxu1 }
 0xc4c   : > { %v15262_v7 = vpop.f32.mrb[148].mxu0 }
 0xc4d   : > { %v11328_v56 = vpop.f32.mrb[149].mxu0  ;;  %v7341_v29 = vsel %vm1138_vm9, %v15262_v7, -inf }
 0xc4e   : > { %7342 = vmax.xlane.f32.xlu0 %v7341_v29  ;;  %v5892_v57 = vpop.f32.mrb[150].mxu0 }
 0xc4f   : > { %v11329_v47 = vpop.f32.mrb[151].mxu0  ;;  %v15272_v51 = vpop.f32.mrb[156].mxu1 }
 0xc50   : > { %v11334_v17 = vpop.f32.mrb[157].mxu1  ;;  %v7344_v19 = vsel %vm1138_vm9, %v15272_v51, -inf }
 0xc51   : > { %v5940_v4 = vpop.f32.mrb[158].mxu1 }
 0xc52   : > { %7345 = vmax.xlane.f32.xlu0 %v7344_v19  ;;  %v11335_v3 = vpop.f32.mrb[159].mxu1 }
 0xc54   : > { %v15270_v11 = vpop.f32.mrb[152].mxu0 }
 0xc55   : > { %v11340_v59 = vpop.f32.mrb[153].mxu0  ;;  %v7347_v26 = vsel %vm1138_vm9, %v15270_v11, -inf }
 0xc56   : > { %v7138_v21 = vpop.permute.xlu0 %7137  ;;  %v5988_v1 = vpop.f32.mrb[154].mxu0  ;;  %7348 = vmax.xlane.f32.xlu0 %v7347_v26 }
 0xc57   : > { %11483 = vmatmul.mubr.msk.bf16.vlgmr.msra.gmra.mrb[200].mxu0 %vm1138_vm9, %v7138_v21  ;;  %v11341_v16 = vpop.f32.mrb[155].mxu0  ;;  %v15286_v58 = vpop.f32.mrb[160].mxu1 }
 0xc58   : > { %11493 = vmatpush3.bf16.xpose.msra.mxu0 %v7243_v32  ;;  %11494 = vmatprep.mubr.msk.bf16.mxu0 %vm12695_vm10, %v16338_v15  ;;  %v11346_v23 = vpop.f32.mrb[161].mxu1  ;;  %v7350_v44 = vsel %vm1138_vm9, %v15286_v58, -inf  ;;  %v7188_v39 = vpop.permute.xlu1 %7187 }
 0xc59   : > { %11504 = vmatprep.subr.bf16.mxu0 %v16338_v15  ;;  %7351 = vmax.xlane.f32.xlu1 %v7350_v44  ;;  %v6036_v30 = vpop.f32.mrb[162].mxu1 }
 0xc5a   : > { %v11347_v36 = vpop.f32.mrb[163].mxu1  ;;  %11489 = vmatmul.mubr.msk.bf16.vlgmr.msra.gmra.mrb[208].mxu1 %vm1138_vm9, %v7188_v39 }
 0xc5b   : > { %11499 = vmatpush3.bf16.xpose.msra.mxu1 %v7293_v43  ;;  %11500 = vmatprep.mubr.msk.bf16.mxu1 %vm12695_vm10, %v16338_v15 }
 0xc5c   : > { %v15284_v33 = vpop.f32.mrb[156].mxu0  ;;  %11510 = vmatprep.subr.bf16.mxu1 %v16338_v15 }
 0xc5d   : > { %v11352_v25 = vpop.f32.mrb[157].mxu0  ;;  %v7353_v61 = vsel %vm1138_vm9, %v15284_v33, -inf }
 0xc5e   : > { %v7238_v31 = vpop.permute.xlu0 %7237  ;;  %7354 = vmax.xlane.f32.xlu0 %v7353_v61  ;;  %v6084_v41 = vpop.f32.mrb[158].mxu0 }
 0xc5f   : > { %11495 = vmatmul.mubr.msk.bf16.vlgmr.msra.gmra.mrb[204].mxu0 %vm1138_vm9, %v7238_v31  ;;  %v11353_v10 = vpop.f32.mrb[159].mxu0  ;;  %v15301_v50 = vpop.f32.mrb[164].mxu1 }
 0xc60   : > { %11506 = vmatprep.mubr.msk.bf16.mxu0 %vm12695_vm10, %v16338_v15  ;;  %v11358_v34 = vpop.f32.mrb[165].mxu1  ;;  %v7356_v6 = vsel %vm1138_vm9, %v15301_v50, -inf }
 0xc61   : > { %7357 = vmax.xlane.f32.xlu1 %v7356_v6  ;;  %v6132_v56 = vpop.f32.mrb[166].mxu1 }
 0xc62   : > { %v7720_v18 = vpop.permute.xlu0 %7719  ;;  %v11359_v29 = vpop.f32.mrb[167].mxu1 }
 0xc63   : > { %v7725_v20 = vsel %vm3110_vm11, %v7720_v18, 0  ;;  %v7288_v54 = vpop.permute.xlu1 %7287 }
 0xc64   : > { %11505 = vmatpush3.bf16.msra.mxu0 %v7725_v20  ;;  %11501 = vmatmul.mubr.msk.bf16.vlgmr.msra.gmra.mrb[212].mxu1 %vm1138_vm9, %v7288_v54 }
 0xc65   : > { %11516 = vmatprep.subr.bf16.mxu0 %v16338_v15  ;;  %11512 = vmatprep.mubr.msk.bf16.mxu1 %vm12695_vm10, %v16338_v15 }
 0xc66   : > { %v15328_v30 = vpop.permute.xlu0 %7815 }
 0xc67   : > { %v7768_v2 = vpop.permute.xlu1 %7767 }
 0xc68   : > { %v7773_v52 = vsel %vm3110_vm11, %v7768_v2, 0 }
 0xc69   : > { %11511 = vmatpush3.bf16.msra.mxu1 %v7773_v52 }
 0xc6a   : > { %11522 = vmatprep.subr.bf16.mxu1 %v16338_v15  ;;  %v15330_v36 = vpop.permute.xlu0 %7911 }
 0xc6b   : > { %v15334_v41 = vpop.permute.xlu1 %7863 }
 0xc6e   : > { %v15332_v43 = vpop.permute.xlu0 %8007 }
 0xc6f   : > { %v15338_v18 = vpop.permute.xlu1 %7959 }
 0xc72   : > { %v15336_v10 = vpop.permute.xlu0 %8103 }
 0xc73   : > { %v15344_v6 = vpop.permute.xlu1 %8055 }
 0xc74   : > { %v15312_v57 = vpop.f32.mrb[160].mxu0 }
 0xc75   : > { %v11364_v14 = vpop.f32.mrb[161].mxu0  ;;  %v7359_v47 = vsel %vm1138_vm9, %v15312_v57, -inf }
 0xc76   : > { %7360 = vmax.xlane.f32.xlu0 %v7359_v47  ;;  %v6182_v27 = vpop.f32.mrb[162].mxu0  ;;  %v15318_v19 = vpop.f32.mrb[168].mxu1 }
 0xc77   : > { %v11365_v59 = vpop.f32.mrb[163].mxu0  ;;  %v11370_v4 = vpop.f32.mrb[169].mxu1  ;;  %v7362_v1 = vsel %vm1138_vm9, %v15318_v19, -inf }
 0xc78   : > { %7363 = vmax.xlane.f32.xlu1 %v7362_v1  ;;  %v6232_v3 = vpop.f32.mrb[170].mxu1  ;;  %v15340_v20 = vpop.permute.xlu0 %8199 }
 0xc79   : > { %v11371_v26 = vpop.f32.mrb[171].mxu1  ;;  %v15350_v14 = vpop.permute.xlu1 %8151 }
 0xc7c   : > { %v15316_v17 = vpop.f32.mrb[164].mxu0  ;;  %v15348_v29 = vpop.permute.xlu0 %8295 }
 0xc7d   : > { %v7365_v21 = vsel %vm1138_vm9, %v15316_v17, -inf  ;;  %v11376_v32 = vpop.f32.mrb[165].mxu0 }
 0xc7e   : > { %7366 = vmax.xlane.f32.xlu0 %v7365_v21  ;;  %v6282_v16 = vpop.f32.mrb[166].mxu0  ;;  %v15324_v61 = vpop.f32.mrb[172].mxu1 }
 0xc7f   : > { %v11377_v25 = vpop.f32.mrb[167].mxu0  ;;  %v11382_v23 = vpop.f32.mrb[173].mxu1  ;;  %v7368_v44 = vsel %vm1138_vm9, %v15324_v61, -inf }
 0xc80   : > { %7369 = vmax.xlane.f32.xlu1 %v7368_v44  ;;  %v6332_v31 = vpop.f32.mrb[174].mxu1  ;;  %v15352_v47 = vpop.permute.xlu0 %8391 }
 0xc81   : > { %v11383_v39 = vpop.f32.mrb[175].mxu1  ;;  %v15362_v23 = vpop.permute.xlu1 %8247 }
 0xc84   : > { %v15364_v44 = vpop.permute.xlu0 %8487 }
 0xcb1   : > { %v15342_v34 = vpop.f32.mrb[168].mxu0 }
 0xcb2   : > { %v11388_v54 = vpop.f32.mrb[169].mxu0  ;;  %v7371_v56 = vsel %vm1138_vm9, %v15342_v34, -inf }
 0xcb3   : > { %7372 = vmax.xlane.f32.xlu0 %v7371_v56  ;;  %v6382_v2 = vpop.f32.mrb[170].mxu0  ;;  %v15356_v59 = vpop.f32.mrb[176].mxu1 }
 0xcb4   : > { %v11389_v52 = vpop.f32.mrb[171].mxu0  ;;  %v11394_v1 = vpop.f32.mrb[177].mxu1  ;;  %v7374_v32 = vsel %vm1138_vm9, %v15356_v59, -inf }
 0xcb5   : > { %7375 = vmax.xlane.f32.xlu1 %v7374_v32  ;;  %v6432_v26 = vpop.f32.mrb[178].mxu1  ;;  %v15372_v32 = vpop.permute.xlu0 %8583 }
 0xcb6   : > { %v11395_v25 = vpop.f32.mrb[179].mxu1  ;;  %16375 = vst [vmem:[#allocation22_spill] sm:$0xff] %v15372_v32 }
 0xcb9   : > { %v15354_v27 = vpop.f32.mrb[172].mxu0 }
 0xcba   : > { %v11400_v21 = vpop.f32.mrb[173].mxu0  ;;  %v7377_v4 = vsel %vm1138_vm9, %v15354_v27, -inf }
 0xcbb   : > { %7378 = vmax.xlane.f32.xlu0 %v7377_v4  ;;  %v6482_v3 = vpop.f32.mrb[174].mxu0  ;;  %v15370_v4 = vpop.permute.xlu1 %8439 }
 0xcbc   : > { %v11401_v16 = vpop.f32.mrb[175].mxu0  ;;  %v15366_v31 = vpop.f32.mrb[180].mxu1 }
 0xcbd   : > { %v11406_v39 = vpop.f32.mrb[181].mxu1 }
 0xcbe   : > { %v6532_v56 = vpop.f32.mrb[182].mxu1 }
 0xcbf   : > { %v11407_v52 = vpop.f32.mrb[183].mxu1 }
 0xcc0   : > { %v15380_v52 = vpop.permute.xlu1 %8535 }
 0xcc1   : > { %v15368_v54 = vpop.f32.mrb[176].mxu0  ;;  %16376 = vst [vmem:[#allocation23_spill] sm:$0xff] %v15380_v52 }
 0xcc2   : > { %v11412_v2 = vpop.f32.mrb[177].mxu0 }
 0xcc3   : > { %v6582_v21 = vpop.f32.mrb[178].mxu0 }
 0xcc4   : > { %v11413_v1 = vpop.f32.mrb[179].mxu0  ;;  %v15386_v21 = vpop.permute.xlu0 %8679 }
 0xcc5   : > { %16377 = vst [vmem:[#allocation28_spill] sm:$0xff] %v15386_v21 }
 0xcc6   : > { %v15374_v3 = vpop.f32.mrb[184].mxu1  ;;  %8919 = vrot.lane.b32.xlu1 %v15062_v9, %s12699_s4 }
 0xcc7   : > { %v11418_v26 = vpop.f32.mrb[185].mxu1 }
 0xcc8   : > { %v6632_v25 = vpop.f32.mrb[186].mxu1  ;;  %v15396_v55 = vpop.permute.xlu0 %8775 }
 0xcc9   : > { %v15376_v16 = vpop.f32.mrb[180].mxu0  ;;  %v11419_v39 = vpop.f32.mrb[187].mxu1  ;;  %16379 = vst [vmem:[#allocation26_spill] sm:$0xff] %v15396_v55 }
 0xcca   : > { %v11424_v8 = vpop.f32.mrb[181].mxu0  ;;  %8967 = vrot.lane.b32.xlu1 %v15057_v48, %s12699_s4 }
 0xccb   : > { %v6682_v56 = vpop.f32.mrb[182].mxu0 }
 0xccc   : > { %v11425_v2 = vpop.f32.mrb[183].mxu0  ;;  %v15394_v56 = vpop.permute.xlu1 %8631 }
 0xccd   : > { %16378 = vst [vmem:[#allocation25_spill] sm:$0xff] %v15394_v56 }
 0xcce   : > { %v15388_v1 = vpop.f32.mrb[188].mxu1  ;;  %9015 = vrot.lane.b32.xlu1 %v15078_v12, %s12699_s4 }
 0xccf   : > { %v11430_v26 = vpop.f32.mrb[189].mxu1 }
 0xcd0   : > { %v6732_v25 = vpop.f32.mrb[190].mxu1  ;;  %v15402_v26 = vpop.permute.xlu1 %8823 }
 0xcd1   : > { %8871 = vrot.lane.b32.xlu0 %v15036_v5, %s12699_s4  ;;  %v15390_v8 = vpop.f32.mrb[184].mxu0  ;;  %v11431_v39 = vpop.f32.mrb[191].mxu1  ;;  %16380 = vst [vmem:[#allocation27_spill] sm:$0xff] %v15402_v26 }
 0xcd2   : > { %v11436_v9 = vpop.f32.mrb[185].mxu0 }
 0xcd3   : > { %v6782_v2 = vpop.f32.mrb[186].mxu0  ;;  %v7337_v24 = vpop.xlane.xlu0 %7336 }
 0xcd4   : > { %v11437_v48 = vpop.f32.mrb[187].mxu0  ;;  %v15404_v12 = vpop.permute.xlu1 %8343  ;;  %v7431_v2 = vsub.f32 %v15258_v35, %v7337_v24 }
 0xcd6   : > { %v15398_v5 = vpop.f32.mrb[192].mxu1  ;;  %v7463_v49 = vmul.f32 1.442695, %v7431_v2 }
 0xcd7   : > { %v11442_v22 = vpop.f32.mrb[193].mxu1 }
 0xcd8   : > { %v6832_v28 = vpop.f32.mrb[194].mxu1  ;;  %v15409_v38 = vpop.permute.xlu1 %8727  ;;  %12241 = vpow2.f32 %v7463_v49 }
 0xcd9   : > { %v15400_v60 = vpop.f32.mrb[188].mxu0  ;;  %v11443_v25 = vpop.f32.mrb[195].mxu1  ;;  %16381 = vst [vmem:[#allocation41_spill] sm:$0xff] %v15409_v38 }
 0xcda   : > { %v11448_v9 = vpop.f32.mrb[189].mxu0 }
 0xcdb   : > { %v6882_v39 = vpop.f32.mrb[190].mxu0  ;;  %v7343_v62 = vpop.xlane.xlu0 %7342 }
 0xcdc   : > { %v11449_v13 = vpop.f32.mrb[191].mxu0  ;;  %v7433_v28 = vsub.f32 %v15262_v7, %v7343_v62  ;;  %v7340_v25 = vpop.xlane.xlu1 %7339  ;;  %v7389_v62 = vsel %vm1138_vm9, %v15376_v16, -inf }
 0xcdd   : > { %v7432_v24 = vsub.f32 %v15264_v0, %v7340_v25 }
 0xcde   : > { %v15407_v48 = vpop.f32.mrb[196].mxu1  ;;  %v7467_v13 = vmul.f32 1.442695, %v7433_v28 }
 0xcdf   : > { %v11454_v42 = vpop.f32.mrb[197].mxu1  ;;  %v7346_v63 = vpop.xlane.xlu0 %7345  ;;  %v7465_v49 = vmul.f32 1.442695, %v7432_v24 }
 0xce0   : > { %v6932_v46 = vpop.f32.mrb[198].mxu1  ;;  %v7383_v42 = vsel %vm1138_vm9, %v15368_v54, -inf  ;;  %12243 = vpow2.f32 %v7467_v13 }
 0xce1   : > { %v11455_v22 = vpop.f32.mrb[199].mxu1  ;;  %12245 = vpow2.f32 %v7465_v49 }
 0xce2   : > { %v15420_v7 = vpop.eup %12241 }
 0xce3   : > { %v7349_v35 = vpop.xlane.xlu0 %7348 }
 0xce4   : > { %v7435_v2 = vsub.f32 %v15270_v11, %v7349_v35  ;;  %v7527_v11 = vsel %vm1138_vm9, %v15420_v7, 0.0  ;;  %v7380_v35 = vsel %vm1138_vm9, %v15366_v31, -inf }
 0xce6   : > { %v7471_v0 = vmul.f32 1.442695, %v7435_v2  ;;  %v7352_v49 = vpop.xlane.xlu1 %7351 }
 0xce8   : > { %12247 = vpow2.f32 %v7471_v0  ;;  %v7436_v0 = vsub.f32 %v15286_v58, %v7352_v49 }
 0xceb   : > { %v7355_v22 = vpop.xlane.xlu0 %7354 }
 0xcec   : > { %v7437_v2 = vsub.f32 %v15284_v33, %v7355_v22 }
 0xced   : > { %v15412_v9 = vpop.f32.mrb[192].mxu0 }
 0xcee   : > { %v11460_v39 = vpop.f32.mrb[193].mxu0  ;;  %v7358_v58 = vpop.xlane.xlu1 %7357 }
 0xcef   : > { %v6982_v26 = vpop.f32.mrb[194].mxu0  ;;  %v7434_v39 = vsub.f32 %v15272_v51, %v7346_v63  ;;  %v7395_v63 = vsel %vm1138_vm9, %v15390_v8, -inf  ;;  %v15434_v51 = vpop.eup %12243  ;;  %v7438_v49 = vsub.f32 %v15301_v50, %v7358_v58 }
 0xcf0   : > { %7384 = vmax.xlane.f32.xlu0 %v7383_v42  ;;  %v11461_v46 = vpop.f32.mrb[195].mxu0  ;;  %v15424_v26 = vpop.f32.mrb[200].mxu1  ;;  %v7533_v33 = vsel %vm1138_vm9, %v15434_v51, 0.0 }
 0xcf1   : > { %v11466_v13 = vpop.f32.mrb[201].mxu1 }
 0xcf2   : > { %v7032_v24 = vpop.f32.mrb[202].mxu1  ;;  %7381 = vmax.xlane.f32.xlu1 %v7380_v35  ;;  %v7386_v13 = vsel %vm1138_vm9, %v15374_v3, -inf  ;;  %v15445_v35 = vpop.eup %12245 }
 0xcf4   : > { %7390 = vmax.xlane.f32.xlu0 %v7389_v62  ;;  %v11467_v62 = vpop.f32.mrb[203].mxu1 }
 0xcf5   : > { %v15422_v28 = vpop.f32.mrb[196].mxu0  ;;  %v7473_v62 = vmul.f32 1.442695, %v7436_v0 }
 0xcf6   : > { %v11472_v25 = vpop.f32.mrb[197].mxu0  ;;  %7387 = vmax.xlane.f32.xlu1 %v7386_v13 }
 0xcf7   : > { %v7082_v42 = vpop.f32.mrb[198].mxu0  ;;  %v7469_v25 = vmul.f32 1.442695, %v7434_v39  ;;  %v7392_v39 = vsel %vm1138_vm9, %v15388_v1, -inf }
 0xcf8   : > { %7528 = vadd.xlane.f32.xlu0 %v7527_v11  ;;  %v11473_v46 = vpop.f32.mrb[199].mxu0  ;;  %v7475_v42 = vmul.f32 1.442695, %v7437_v2  ;;  %v15438_v11 = vpop.f32.mrb[204].mxu1  ;;  %v7401_v2 = vsel %vm1138_vm9, %v15400_v60, -inf }
 0xcf9   : > { %12249 = vpow2.f32 %v7469_v25  ;;  %v11478_v24 = vpop.f32.mrb[205].mxu1  ;;  %v15449_v25 = vpop.eup %12247 }
 0xcfa   : > { %v7132_v22 = vpop.f32.mrb[206].mxu1  ;;  %7393 = vmax.xlane.f32.xlu1 %v7392_v39  ;;  %12251 = vpow2.f32 %v7475_v42  ;;  %v7539_v13 = vsel %vm1138_vm9, %v15449_v25, 0.0  ;;  %v7398_v42 = vsel %vm1138_vm9, %v15398_v5, -inf  ;;  %v7477_v24 = vmul.f32 1.442695, %v7438_v49 }
 0xcfb   : > { %v11479_v46 = vpop.f32.mrb[207].mxu1  ;;  %12253 = vpow2.f32 %v7473_v62 }
 0xcfc   : > { %7396 = vmax.xlane.f32.xlu0 %v7395_v63  ;;  %v7530_v63 = vsel %vm1138_vm9, %v15445_v35, 0.0  ;;  %12255 = vpow2.f32 %v7477_v24  ;;  %v7404_v46 = vsel %vm1138_vm9, %v15407_v48, -inf }
 0xcfe   : > { %7531 = vadd.xlane.f32.xlu1 %v7530_v63  ;;  %v7410_v63 = vsel %vm1138_vm9, %v15424_v26, -inf }
 0xd00   : > { %7534 = vadd.xlane.f32.xlu0 %v7533_v33  ;;  %v7407_v33 = vsel %vm1138_vm9, %v15412_v9, -inf }
 0xd02   : > { %7399 = vmax.xlane.f32.xlu1 %v7398_v42  ;;  %v7416_v42 = vsel %vm1138_vm9, %v15438_v11, -inf }
 0xd03   : > { %v15458_v0 = vpop.eup %12249  ;;  %v7361_v24 = vpop.xlane.xlu0 %7360 }
 0xd04   : > { %7402 = vmax.xlane.f32.xlu0 %v7401_v2  ;;  %v15462_v22 = vpop.eup %12251  ;;  %v7536_v39 = vsel %vm1138_vm9, %v15458_v0, 0.0  ;;  %v7413_v2 = vsel %vm1138_vm9, %v15422_v28, -inf }
 0xd05   : > { %v7545_v50 = vsel %vm1138_vm9, %v15462_v22, 0.0  ;;  %v15470_v62 = vpop.eup %12253 }
 0xd06   : > { %7537 = vadd.xlane.f32.xlu1 %v7536_v39  ;;  %v7542_v58 = vsel %vm1138_vm9, %v15470_v62, 0.0  ;;  %v15478_v49 = vpop.eup %12255 }
 0xd08   : > { %7540 = vadd.xlane.f32.xlu0 %v7539_v13  ;;  %v7548_v13 = vsel %vm1138_vm9, %v15478_v49, 0.0 }
 0xd0a   : > { %7405 = vmax.xlane.f32.xlu1 %v7404_v46  ;;  %v7439_v46 = vsub.f32 %v15312_v57, %v7361_v24 }
 0xd0c   : > { %7408 = vmax.xlane.f32.xlu0 %v7407_v33  ;;  %v7364_v33 = vpop.xlane.xlu1 %7363  ;;  %v7479_v52 = vmul.f32 1.442695, %v7439_v46 }
 0xd0d   : > { %v7440_v39 = vsub.f32 %v15318_v19, %v7364_v33 }
 0xd0e   : > { %7543 = vadd.xlane.f32.xlu1 %v7542_v58 }
 0xd0f   : > { %v7481_v58 = vmul.f32 1.442695, %v7440_v39 }
 0xd10   : > { %7546 = vadd.xlane.f32.xlu0 %v7545_v50  ;;  %v7367_v50 = vpop.xlane.xlu0 %7366  ;;  %v7370_v56 = vpop.xlane.xlu1 %7369 }
 0xd11   : > { %12257 = vpow2.f32 %v7481_v58  ;;  %v7442_v19 = vsub.f32 %v15324_v61, %v7370_v56 }
 0xd12   : > { %7411 = vmax.xlane.f32.xlu1 %v7410_v63  ;;  %v7441_v63 = vsub.f32 %v15316_v17, %v7367_v50  ;;  %12259 = vpow2.f32 %v7479_v52 }
 0xd13   : > { %v7485_v57 = vmul.f32 1.442695, %v7442_v19 }
 0xd14   : > { %7414 = vmax.xlane.f32.xlu0 %v7413_v2  ;;  %v7483_v21 = vmul.f32 1.442695, %v7441_v63 }
 0xd16   : > { %7549 = vadd.xlane.f32.xlu1 %v7548_v13  ;;  %12261 = vpow2.f32 %v7483_v21 }
 0xd17   : > { %12263 = vpow2.f32 %v7485_v57 }
 0xd1a   : > { %7417 = vmax.xlane.f32.xlu1 %v7416_v42 }
 0xd1b   : > { %v15500_v52 = vpop.eup %12257 }
 0xd1c   : > { %v15504_v56 = vpop.eup %12259 }
 0xd20   : > { %v15510_v19 = vpop.eup %12261 }
 0xd2a   : > { %v15486_v2 = vpop.f32.mrb[200].mxu0 }
 0xd2b   : > { %v11484_v38 = vpop.f32.mrb[201].mxu0  ;;  %v7419_v13 = vsel %vm1138_vm9, %v15486_v2, -inf }
 0xd2c   : > { %7420 = vmax.xlane.f32.xlu0 %v7419_v13  ;;  %v7182_v55 = vpop.f32.mrb[202].mxu0 }
 0xd2d   : > { %v11485_v42 = vpop.f32.mrb[203].mxu0  ;;  %v15492_v24 = vpop.f32.mrb[208].mxu1 }
 0xd2e   : > { %v11490_v38 = vpop.f32.mrb[209].mxu1  ;;  %v7422_v17 = vsel %vm1138_vm9, %v15492_v24, -inf  ;;  %v7554_v42 = vsel %vm1138_vm9, %v15500_v52, 0.0 }
 0xd2f   : > { %v7232_v50 = vpop.f32.mrb[210].mxu1  ;;  %7423 = vmax.xlane.f32.xlu1 %v7422_v17  ;;  %v7551_v17 = vsel %vm1138_vm9, %v15504_v56, 0.0 }
 0xd30   : > { %v11491_v46 = vpop.f32.mrb[211].mxu1 }
 0xd32   : > { %v15494_v33 = vpop.f32.mrb[204].mxu0 }
 0xd33   : > { %v11496_v39 = vpop.f32.mrb[205].mxu0  ;;  %v7425_v58 = vsel %vm1138_vm9, %v15494_v33, -inf }
 0xd34   : > { %v7282_v55 = vpop.f32.mrb[206].mxu0  ;;  %7426 = vmax.xlane.f32.xlu1 %v7425_v58  ;;  %v7557_v39 = vsel %vm1138_vm9, %v15510_v19, 0.0 }
 0xd35   : > { %v11497_v61 = vpop.f32.mrb[207].mxu0  ;;  %v15516_v55 = vpop.eup %12263 }
 0xd36   : > { %v7560_v61 = vsel %vm1138_vm9, %v15516_v55, 0.0 }
 0xd37   : > { %v15502_v21 = vpop.f32.mrb[212].mxu1 }
 0xd38   : > { %v11502_v63 = vpop.f32.mrb[213].mxu1  ;;  %v7428_v13 = vsel %vm1138_vm9, %v15502_v21, -inf  ;;  %7555 = vadd.xlane.f32.xlu1 %v7554_v42 }
 0xd39   : > { %v7332_v38 = vpop.f32.mrb[214].mxu1  ;;  %7429 = vmax.xlane.f32.xlu0 %v7428_v13 }
 0xd3a   : > { %v11503_v57 = vpop.f32.mrb[215].mxu1 }
 0xd3c   : > { %7558 = vadd.xlane.f32.xlu1 %v7557_v39 }
 0xd3d   : > { %7552 = vadd.xlane.f32.xlu0 %v7551_v17 }
 0xd40   : > { %v7373_v50 = vpop.xlane.xlu0 %7372 }
 0xd41   : > { %v7443_v46 = vsub.f32 %v15342_v34, %v7373_v50  ;;  %7561 = vadd.xlane.f32.xlu0 %v7560_v61 }
 0xd42   : > { %v7376_v13 = vpop.xlane.xlu1 %7375 }
 0xd43   : > { %v7487_v58 = vmul.f32 1.442695, %v7443_v46  ;;  %v7444_v38 = vsub.f32 %v15356_v59, %v7376_v13 }
 0xd45   : > { %12265 = vpow2.f32 %v7487_v58  ;;  %v7489_v32 = vmul.f32 1.442695, %v7444_v38 }
 0xd46   : > { %v15535_v59 = vpop.permute.xlu1 %8919 }
 0xd47   : > { %16382 = vst [vmem:[#allocation42_spill] sm:$0xff] %v15535_v59 }
 0xd48   : > { %v7379_v63 = vpop.xlane.xlu0 %7378 }
 0xd49   : > { %v7445_v42 = vsub.f32 %v15354_v27, %v7379_v63 }
 0xd4a   : > { %v15539_v58 = vpop.permute.xlu1 %8967 }
 0xd4b   : > { %v7491_v57 = vmul.f32 1.442695, %v7445_v42  ;;  %16384 = vst [vmem:[#allocation44_spill] sm:$0xff] %v15539_v58 }
 0xd4d   : > { %12267 = vpow2.f32 %v7491_v57 }
 0xd4e   : > { %12269 = vpow2.f32 %v7489_v32  ;;  %v15537_v32 = vpop.permute.xlu0 %8871  ;;  %v15542_v38 = vpop.permute.xlu1 %9015 }
 0xd4f   : > { %v15523_v17 = vpop.eup %12265  ;;  %16383 = vst [vmem:[#allocation43_spill] sm:$0xff] %v15537_v32 }
 0xd50   : > { %v7563_v34 = vsel %vm1138_vm9, %v15523_v17, 0.0 }
 0xd51   : > { %7564 = vadd.xlane.f32.xlu1 %v7563_v34 }
 0xd57   : > { %v15527_v39 = vpop.eup %12267 }
 0xd58   : > { %v15529_v50 = vpop.eup %12269  ;;  %v7569_v46 = vsel %vm1138_vm9, %v15527_v39, 0.0 }
 0xd59   : > { %v7566_v27 = vsel %vm1138_vm9, %v15529_v50, 0.0  ;;  %7570 = vadd.xlane.f32.xlu1 %v7569_v46 }
 0xd5a   : > { %7567 = vadd.xlane.f32.xlu0 %v7566_v27 }
 0xd7d   : > { %v7385_v61 = vpop.xlane.xlu0 %7384 }
 0xd7e   : > { %v7447_v63 = vsub.f32 %v15368_v54, %v7385_v61 }
 0xd7f   : > { %v7382_v46 = vpop.xlane.xlu1 %7381 }
 0xd80   : > { %v7495_v13 = vmul.f32 1.442695, %v7447_v63  ;;  %v7446_v27 = vsub.f32 %v15366_v31, %v7382_v46 }
 0xd81   : > { %v7391_v42 = vpop.xlane.xlu0 %7390 }
 0xd82   : > { %12271 = vpow2.f32 %v7495_v13  ;;  %v7449_v57 = vsub.f32 %v15376_v16, %v7391_v42  ;;  %v7493_v59 = vmul.f32 1.442695, %v7446_v27 }
 0xd83   : > { %v7388_v58 = vpop.xlane.xlu1 %7387 }
 0xd84   : > { %v7499_v34 = vmul.f32 1.442695, %v7449_v57  ;;  %v7448_v54 = vsub.f32 %v15374_v3, %v7388_v58 }
 0xd85   : > { %v7529_v53 = vpop.xlane.xlu0 %7528 }
 0xd86   : > { %12273 = vpow2.f32 %v7499_v34  ;;  %v7497_v13 = vmul.f32 1.442695, %v7448_v54 }
 0xd87   : > { %12275 = vrcp.f32 %v7529_v53  ;;  %v7394_v57 = vpop.xlane.xlu1 %7393 }
 0xd88   : > { %12277 = vpow2.f32 %v7493_v59  ;;  %v7450_v53 = vsub.f32 %v15388_v1, %v7394_v57 }
 0xd89   : > { %v7397_v32 = vpop.xlane.xlu0 %7396 }
 0xd8a   : > { %v7451_v37 = vsub.f32 %v15390_v8, %v7397_v32  ;;  %v7501_v59 = vmul.f32 1.442695, %v7450_v53 }
 0xd8b   : > { %v7532_v58 = vpop.xlane.xlu1 %7531 }
 0xd8c   : > { %v15548_v61 = vpop.eup %12271  ;;  %v7503_v63 = vmul.f32 1.442695, %v7451_v37 }
 0xd8d   : > { %v7535_v16 = vpop.xlane.xlu0 %7534  ;;  %v7575_v42 = vsel %vm1138_vm9, %v15548_v61, 0.0 }
 0xd8e   : > { %12279 = vpow2.f32 %v7503_v63  ;;  %7576 = vadd.xlane.f32.xlu1 %v7575_v42  ;;  %v7821_v63 = vsel %vm3110_vm11, %v15328_v30, 0 }
 0xd8f   : > { %12281 = vpow2.f32 %v7497_v13  ;;  %v7400_v13 = vpop.xlane.xlu1 %7399 }
 0xd90   : > { %v15553_v31 = vpop.eup %12273  ;;  %12283 = vrcp.f32 %v7535_v16 }
 0xd91   : > { %v12276_v8 = vpop.eup %12275  ;;  %v7403_v3 = vpop.xlane.xlu0 %7402  ;;  %v7581_v37 = vsel %vm1138_vm9, %v15553_v31, 0.0  ;;  %12285 = vpow2.f32 %v7501_v59 }
 0xd92   : > { %v7655_v32 = vmul.f32 %v12276_v8, %v15420_v7  ;;  %v7453_v34 = vsub.f32 %v15400_v60, %v7403_v3  ;;  %7582 = vadd.xlane.f32.xlu1 %v7581_v37  ;;  %12287 = vrcp.f32 %v7532_v58  ;;  %v15559_v1 = vpop.eup %12277  ;;  %v7452_v60 = vsub.f32 %v15398_v5, %v7400_v13 }
 0xd93   : > { %v7572_v16 = vsel %vm1138_vm9, %v15559_v1, 0.0  ;;  %v7538_v59 = vpop.xlane.xlu1 %7537 }
 0xd94   : > { %v7507_v46 = vmul.f32 1.442695, %v7453_v34  ;;  %v7687_v27 = vpack.c.bf16 %v7655_v32, %v7655_v32  ;;  %7573 = vadd.xlane.f32.xlu0 %v7572_v16  ;;  %v7505_v42 = vmul.f32 1.442695, %v7452_v60 }
 0xd95   : > { %v7541_v54 = vpop.xlane.xlu0 %7540 }
 0xd96   : > { %12289 = vpow2.f32 %v7507_v46  ;;  %11507 = vmatmul.mubr.msk.bf16.vlgmr.msra.gmra.mrb[208].mxu0 %vm1138_vm9, %v7687_v27 }
 0xd97   : > { %11517 = vmatpush3.bf16.msra.mxu0 %v7821_v63  ;;  %12291 = vrcp.f32 %v7541_v54  ;;  %11518 = vmatprep.mubr.msk.bf16.mxu0 %vm12695_vm10, %v16338_v15  ;;  %v7406_v54 = vpop.xlane.xlu1 %7405 }
 0xd98   : > { %v15567_v7 = vpop.eup %12279  ;;  %11528 = vmatprep.subr.bf16.mxu0 %v16338_v15  ;;  %12293 = vpow2.f32 %v7505_v42 }
 0xd99   : > { %v15572_v30 = vpop.eup %12281  ;;  %v7409_v57 = vpop.xlane.xlu0 %7408  ;;  %v7587_v53 = vsel %vm1138_vm9, %v15567_v7, 0.0  ;;  %12295 = vrcp.f32 %v7538_v59  ;;  %v7869_v59 = vsel %vm3110_vm11, %v15334_v41, 0  ;;  %v8013_v41 = vsel %vm3110_vm11, %v15332_v43, 0 }
 0xd9a   : > { %v12284_v8 = vpop.eup %12283  ;;  %v7578_v5 = vsel %vm1138_vm9, %v15572_v30, 0.0  ;;  %v7455_v3 = vsub.f32 %v15412_v9, %v7409_v57  ;;  %7588 = vadd.xlane.f32.xlu1 %v7587_v53  ;;  %v7917_v9 = vsel %vm3110_vm11, %v15330_v36, 0 }
 0xd9b   : > { %v7657_v37 = vmul.f32 %v12284_v8, %v15434_v51  ;;  %7579 = vadd.xlane.f32.xlu0 %v7578_v5  ;;  %v15580_v58 = vpop.eup %12285  ;;  %v7454_v51 = vsub.f32 %v15407_v48, %v7406_v54 }
 0xd9c   : > { %v7511_v32 = vmul.f32 1.442695, %v7455_v3  ;;  %v12288_v27 = vpop.eup %12287  ;;  %v7584_v63 = vsel %vm1138_vm9, %v15580_v58, 0.0 }
 0xd9d   : > { %v7689_v34 = vpack.c.bf16 %v7657_v37, %v7657_v37  ;;  %v7547_v46 = vpop.xlane.xlu0 %7546  ;;  %v7656_v13 = vmul.f32 %v12288_v27, %v15445_v35  ;;  %v7509_v42 = vmul.f32 1.442695, %v7454_v51  ;;  %v7544_v35 = vpop.xlane.xlu1 %7543 }
 0xd9e   : > { %12297 = vpow2.f32 %v7511_v32 }
 0xd9f   : > { %7585 = vadd.xlane.f32.xlu0 %v7584_v63  ;;  %11519 = vmatmul.mubr.msk.bf16.vlgmr.msra.gmra.mrb[212].mxu0 %vm1138_vm9, %v7689_v34  ;;  %12299 = vrcp.f32 %v7547_v46  ;;  %v7688_v57 = vpack.c.bf16 %v7656_v13, %v7656_v13 }
 0xda0   : > { %v15589_v16 = vpop.eup %12289  ;;  %11529 = vmatpush3.bf16.msra.mxu0 %v7917_v9  ;;  %11530 = vmatprep.mubr.msk.bf16.mxu0 %vm12695_vm10, %v16338_v15  ;;  %12301 = vpow2.f32 %v7509_v42 }
 0xda1   : > { %v12292_v60 = vpop.eup %12291  ;;  %v7415_v53 = vpop.xlane.xlu0 %7414  ;;  %v7593_v36 = vsel %vm1138_vm9, %v15589_v16, 0.0  ;;  %11540 = vmatprep.subr.bf16.mxu0 %v16338_v15  ;;  %11513 = vmatmul.mubr.msk.bf16.vlgmr.msra.gmra.mrb[216].mxu1 %vm1138_vm9, %v7688_v57  ;;  %12303 = vrcp.f32 %v7544_v35 }
 0xda2   : > { %v7659_v48 = vmul.f32 %v12292_v60, %v15449_v25  ;;  %v7457_v8 = vsub.f32 %v15422_v28, %v7415_v53  ;;  %7594 = vadd.xlane.f32.xlu1 %v7593_v36  ;;  %11523 = vmatpush3.bf16.msra.mxu1 %v7869_v59  ;;  %v15603_v37 = vpop.eup %12293  ;;  %v7412_v28 = vpop.xlane.xlu1 %7411 }
 0xda3   : > { %11524 = vmatprep.mubr.msk.bf16.mxu1 %vm12695_vm10, %v16338_v15  ;;  %11534 = vmatprep.subr.bf16.mxu1 %v16338_v15  ;;  %v12296_v25 = vpop.eup %12295  ;;  %v7590_v32 = vsel %vm1138_vm9, %v15603_v37, 0.0  ;;  %v7456_v46 = vsub.f32 %v15424_v26, %v7412_v28 }
 0xda4   : > { %v7515_v5 = vmul.f32 1.442695, %v7457_v8  ;;  %v7691_v3 = vpack.c.bf16 %v7659_v48, %v7659_v48  ;;  %v7658_v34 = vmul.f32 %v12296_v25, %v15458_v0  ;;  %7591 = vadd.xlane.f32.xlu0 %v7590_v32  ;;  %v7965_v0 = vsel %vm3110_vm11, %v15338_v18, 0 }
 0xda5   : > { %v7513_v63 = vmul.f32 1.442695, %v7456_v46  ;;  %v8109_v18 = vsel %vm3110_vm11, %v15336_v10, 0  ;;  %v8061_v10 = vsel %vm3110_vm11, %v15344_v6, 0  ;;  %v8157_v6 = vsel %vm3110_vm11, %v15350_v14, 0 }
 0xda6   : > { %12305 = vpow2.f32 %v7515_v5  ;;  %v7690_v9 = vpack.c.bf16 %v7658_v34, %v7658_v34  ;;  %v7550_v26 = vpop.xlane.xlu1 %7549 }
 0xda7   : > { %11531 = vmatmul.mubr.msk.bf16.vlgmr.msra.gmra.mrb[216].mxu0 %vm1138_vm9, %v7691_v3  ;;  %12307 = vpow2.f32 %v7513_v63 }
 0xda8   : > { %v15613_v27 = vpop.eup %12297  ;;  %11541 = vmatpush3.bf16.msra.mxu0 %v8013_v41  ;;  %11542 = vmatprep.mubr.msk.bf16.mxu0 %vm12695_vm10, %v16338_v15  ;;  %12309 = vrcp.f32 %v7550_v26 }
 0xda9   : > { %v12300_v54 = vpop.eup %12299  ;;  %v7599_v13 = vsel %vm1138_vm9, %v15613_v27, 0.0  ;;  %11552 = vmatprep.subr.bf16.mxu0 %v16338_v15  ;;  %11525 = vmatmul.mubr.msk.bf16.vlgmr.msra.gmra.mrb[220].mxu1 %vm1138_vm9, %v7690_v9 }
 0xdaa   : > { %v7661_v43 = vmul.f32 %v12300_v54, %v15462_v22  ;;  %7600 = vadd.xlane.f32.xlu1 %v7599_v13  ;;  %11535 = vmatpush3.bf16.msra.mxu1 %v7965_v0  ;;  %v15626_v60 = vpop.eup %12301  ;;  %v7418_v22 = vpop.xlane.xlu1 %7417 }
 0xdab   : > { %11536 = vmatprep.mubr.msk.bf16.mxu1 %vm12695_vm10, %v16338_v15  ;;  %11546 = vmatprep.subr.bf16.mxu1 %v16338_v15  ;;  %v12304_v42 = vpop.eup %12303  ;;  %v7596_v57 = vsel %vm1138_vm9, %v15626_v60, 0.0  ;;  %v7458_v36 = vsub.f32 %v15438_v11, %v7418_v22 }
 0xdac   : > { %v7693_v51 = vpack.c.bf16 %v7661_v43, %v7661_v43  ;;  %v7660_v53 = vmul.f32 %v12304_v42, %v15470_v62  ;;  %7597 = vadd.xlane.f32.xlu0 %v7596_v57 }
 0xdad   : > { %v7517_v35 = vmul.f32 1.442695, %v7458_v36 }
 0xdae   : > { %v7692_v8 = vpack.c.bf16 %v7660_v53, %v7660_v53 }
 0xdaf   : > { %11543 = vmatmul.mubr.msk.bf16.vlgmr.msra.gmra.mrb[220].mxu0 %vm1138_vm9, %v7693_v51  ;;  %12311 = vpow2.f32 %v7517_v35 }
 0xdb0   : > { %v15636_v48 = vpop.eup %12305  ;;  %11553 = vmatpush3.bf16.msra.mxu0 %v8109_v18  ;;  %11554 = vmatprep.mubr.msk.bf16.mxu0 %vm12695_vm10, %v16338_v15 }
 0xdb1   : > { %v7605_v59 = vsel %vm1138_vm9, %v15636_v48, 0.0  ;;  %11564 = vmatprep.subr.bf16.mxu0 %v16338_v15  ;;  %11537 = vmatmul.mubr.msk.bf16.vlgmr.msra.gmra.mrb[224].mxu1 %vm1138_vm9, %v7692_v8  ;;  %v15648_v11 = vpop.eup %12307 }
 0xdb2   : > { %7606 = vadd.xlane.f32.xlu1 %v7605_v59  ;;  %11547 = vmatpush3.bf16.msra.mxu1 %v8061_v10  ;;  %v12310_v62 = vpop.eup %12309  ;;  %v7602_v5 = vsel %vm1138_vm9, %v15648_v11, 0.0 }
 0xdb3   : > { %11548 = vmatprep.mubr.msk.bf16.mxu1 %vm12695_vm10, %v16338_v15  ;;  %11558 = vmatprep.subr.bf16.mxu1 %v16338_v15  ;;  %v7662_v3 = vmul.f32 %v12310_v62, %v15478_v49 }
 0xdb4   : > { %7603 = vadd.xlane.f32.xlu0 %v7602_v5 }
 0xdb5   : > { %v7694_v25 = vpack.c.bf16 %v7662_v3, %v7662_v3 }
 0xdb9   : > { %11549 = vmatmul.mubr.msk.bf16.vlgmr.msra.gmra.mrb[228].mxu1 %vm1138_vm9, %v7694_v25  ;;  %v15659_v28 = vpop.eup %12311  ;;  %v7421_v41 = vpop.xlane.xlu0 %7420 }
 0xdba   : > { %11559 = vmatpush3.bf16.msra.mxu1 %v8157_v6  ;;  %11560 = vmatprep.mubr.msk.bf16.mxu1 %vm12695_vm10, %v16338_v15  ;;  %v7608_v32 = vsel %vm1138_vm9, %v15659_v28, 0.0  ;;  %v7459_v63 = vsub.f32 %v15486_v2, %v7421_v41  ;;  %v8253_v2 = vsel %vm3110_vm11, %v15362_v23, 0  ;;  %v8205_v23 = vsel %vm3110_vm11, %v15340_v20, 0 }
 0xdbb   : > { %11570 = vmatprep.subr.bf16.mxu1 %v16338_v15  ;;  %7609 = vadd.xlane.f32.xlu0 %v7608_v32  ;;  %v8349_v20 = vsel %vm3110_vm11, %v15404_v12, 0  ;;  %v8301_v12 = vsel %vm3110_vm11, %v15348_v29, 0  ;;  %v8397_v32 = vsel %vm3110_vm11, %v15352_v47, 0 }
 0xdbc   : > { %v7424_v49 = vpop.xlane.xlu1 %7423  ;;  %v7519_v43 = vmul.f32 1.442695, %v7459_v63 }
 0xdbd   : > { %v7460_v18 = vsub.f32 %v15492_v24, %v7424_v49 }
 0xdbf   : > { %v7521_v8 = vmul.f32 1.442695, %v7460_v18 }
 0xdc1   : > { %v7427_v14 = vpop.xlane.xlu1 %7426 }
 0xdc2   : > { %v7461_v26 = vsub.f32 %v15494_v33, %v7427_v14 }
 0xdc3   : > { %9111 = vrot.lane.b32.xlu1 %v15118_v40, %s12699_s4 }
 0xdc4   : > { %v7523_v51 = vmul.f32 1.442695, %v7461_v26 }
 0xdc5   : > { %v7556_v46 = vpop.xlane.xlu1 %7555 }
 0xdc6   : > { %v7430_v34 = vpop.xlane.xlu0 %7429  ;;  %12313 = vrcp.f32 %v7556_v46 }
 0xdc7   : > { %v7462_v24 = vsub.f32 %v15502_v21, %v7430_v34 }
 0xdc9   : > { %v7559_v9 = vpop.xlane.xlu1 %7558 }
 0xdca   : > { %v7553_v54 = vpop.xlane.xlu0 %7552 }
 0xdcb   : > { %12315 = vrcp.f32 %v7553_v54 }
 0xdce   : > { %v7562_v13 = vpop.xlane.xlu0 %7561 }
 0xdcf   : > { %12317 = vrcp.f32 %v7562_v13 }
 0xdd0   : > { %12319 = vrcp.f32 %v7559_v9  ;;  %v12314_v40 = vpop.eup %12313  ;;  %v8445_v9 = vsel %vm3110_vm11, %v15370_v4, 0  ;;  %v16385_v4 = vld [vmem:[#allocation21_spill] sm:$0xff] }
 0xdd1   : > { %9063 = vrot.lane.b32.xlu0 %v15092_v45, %s12699_s4  ;;  %v7664_v0 = vmul.f32 %v12314_v40, %v15500_v52  ;;  %12321 = vpow2.f32 %v7519_v43 }
 0xdd2   : > { %12323 = vpow2.f32 %v7523_v51 }
 0xdd3   : > { %v7696_v42 = vpack.c.bf16 %v7664_v0, %v7664_v0 }
 0xdd5   : > { %v12316_v22 = vpop.eup %12315  ;;  %11561 = vmatmul.mubr.msk.bf16.vlgmr.msra.gmra.mrb[232].mxu1 %vm1138_vm9, %v7696_v42 }
 0xdd6   : > { %v7663_v57 = vmul.f32 %v12316_v22, %v15504_v56  ;;  %11571 = vmatpush3.bf16.msra.mxu1 %v8253_v2  ;;  %11572 = vmatprep.mubr.msk.bf16.mxu1 %vm12695_vm10, %v16338_v15 }
 0xdd7   : > { %11582 = vmatprep.subr.bf16.mxu1 %v16338_v15 }
 0xdd8   : > { %v7695_v45 = vpack.c.bf16 %v7663_v57, %v7663_v57  ;;  %v16387_v57 = vld [vmem:[#allocation22_spill] sm:$0xff] }
 0xdd9   : > { %v12318_v33 = vpop.eup %12317 }
 0xdda   : > { %v12320_v52 = vpop.eup %12319  ;;  %v7666_v53 = vmul.f32 %v12318_v33, %v15516_v55  ;;  %11555 = vmatmul.mubr.msk.bf16.vlgmr.msra.gmra.mrb[224].mxu0 %vm1138_vm9, %v7695_v45  ;;  %v8589_v33 = vsel %vm3110_vm11, %v16387_v57, 0 }
 0xddb   : > { %11565 = vmatpush3.bf16.msra.mxu0 %v8205_v23  ;;  %11566 = vmatprep.mubr.msk.bf16.mxu0 %vm12695_vm10, %v16338_v15  ;;  %v7665_v56 = vmul.f32 %v12320_v52, %v15510_v19  ;;  %v15688_v55 = vpop.eup %12321  ;;  %v7525_v19 = vmul.f32 1.442695, %v7462_v24 }
 0xddc   : > { %v7698_v35 = vpack.c.bf16 %v7666_v53, %v7666_v53  ;;  %11576 = vmatprep.subr.bf16.mxu0 %v16338_v15  ;;  %v7611_v21 = vsel %vm1138_vm9, %v15688_v55, 0.0  ;;  %v15698_v62 = vpop.eup %12323 }
 0xddd   : > { %v7697_v59 = vpack.c.bf16 %v7665_v56, %v7665_v56  ;;  %v7617_v6 = vsel %vm1138_vm9, %v15698_v62, 0.0 }
 0xdde   : > { %v7565_v36 = vpop.xlane.xlu1 %7564  ;;  %11573 = vmatmul.mubr.msk.bf16.vlgmr.msra.gmra.mrb[236].mxu1 %vm1138_vm9, %v7698_v35 }
 0xddf   : > { %12325 = vrcp.f32 %v7565_v36  ;;  %11583 = vmatpush3.bf16.msra.mxu1 %v8349_v20  ;;  %11584 = vmatprep.mubr.msk.bf16.mxu1 %vm12695_vm10, %v16338_v15  ;;  %v16389_v20 = vld [vmem:[#allocation23_spill] sm:$0xff] }
 0xde0   : > { %11594 = vmatprep.subr.bf16.mxu1 %v16338_v15  ;;  %12327 = vpow2.f32 %v7521_v8  ;;  %v16388_v8 = vld [vmem:[#allocation28_spill] sm:$0xff] }
 0xde1   : > { %v8685_v24 = vsel %vm3110_vm11, %v16388_v8, 0 }
 0xde2   : > { %11567 = vmatmul.mubr.msk.bf16.vlgmr.msra.gmra.mrb[228].mxu0 %vm1138_vm9, %v7697_v59 }
 0xde3   : > { %11577 = vmatpush3.bf16.msra.mxu0 %v8301_v12  ;;  %11578 = vmatprep.mubr.msk.bf16.mxu0 %vm12695_vm10, %v16338_v15 }
 0xde4   : > { %11588 = vmatprep.subr.bf16.mxu0 %v16338_v15 }
 0xde6   : > { %v7571_v10 = vpop.xlane.xlu1 %7570 }
 0xde7   : > { %v7568_v5 = vpop.xlane.xlu0 %7567  ;;  %12329 = vrcp.f32 %v7571_v10  ;;  %7612 = vadd.xlane.f32.xlu1 %v7611_v21 }
 0xde8   : > { %12331 = vrcp.f32 %v7568_v5 }
 0xde9   : > { %v12326_v3 = vpop.eup %12325  ;;  %12333 = vpow2.f32 %v7525_v19 }
 0xdea   : > { %v7667_v25 = vmul.f32 %v12326_v3, %v15523_v17  ;;  %v15712_v49 = vpop.eup %12327  ;;  %v16390_v3 = vld [vmem:[#allocation26_spill] sm:$0xff] }
 0xdeb   : > { %7618 = vadd.xlane.f32.xlu1 %v7617_v6  ;;  %v7614_v46 = vsel %vm1138_vm9, %v15712_v49, 0.0 }
 0xdec   : > { %v7699_v29 = vpack.c.bf16 %v7667_v25, %v7667_v25  ;;  %v8781_v25 = vsel %vm3110_vm11, %v16390_v3, 0 }
 0xdee   : > { %11579 = vmatmul.mubr.msk.bf16.vlgmr.msra.gmra.mrb[232].mxu0 %vm1138_vm9, %v7699_v29 }
 0xdef   : > { %11589 = vmatpush3.bf16.msra.mxu0 %v8397_v32  ;;  %11590 = vmatprep.mubr.msk.bf16.mxu0 %vm12695_vm10, %v16338_v15 }
 0xdf0   : > { %11600 = vmatprep.subr.bf16.mxu0 %v16338_v15  ;;  %7615 = vadd.xlane.f32.xlu0 %v7614_v46 }
 0xdf1   : > { %v12330_v41 = vpop.eup %12329 }
 0xdf2   : > { %v12332_v17 = vpop.eup %12331  ;;  %v7669_v14 = vmul.f32 %v12330_v41, %v15527_v39  ;;  %v8493_v39 = vsel %vm3110_vm11, %v15364_v44, 0 }
 0xdf3   : > { %v7668_v34 = vmul.f32 %v12332_v17, %v15529_v50  ;;  %v15721_v47 = vpop.eup %12333  ;;  %v16386_v50 = vld [vmem:[#allocation24_spill] sm:$0xff] }
 0xdf4   : > { %v7701_v54 = vpack.c.bf16 %v7669_v14, %v7669_v14  ;;  %v7620_v13 = vsel %vm1138_vm9, %v15721_v47, 0.0 }
 0xdf5   : > { %v7700_v63 = vpack.c.bf16 %v7668_v34, %v7668_v34  ;;  %7621 = vadd.xlane.f32.xlu0 %v7620_v13 }
 0xdf6   : > { %11591 = vmatmul.mubr.msk.bf16.vlgmr.msra.gmra.mrb[236].mxu0 %vm1138_vm9, %v7701_v54  ;;  %v16392_v54 = vld [vmem:[#allocation43_spill] sm:$0xff] }
 0xdf7   : > { %11585 = vmatmul.mubr.msk.bf16.vlgmr.msra.gmra.mrb[240].mxu1 %vm1138_vm9, %v7700_v63  ;;  %11601 = vmatpush3.bf16.msra.mxu0 %v8493_v39  ;;  %v8877_v63 = vsel %vm3110_vm11, %v16392_v54, 0 }
 0xdf8   : > { %11595 = vmatpush3.bf16.msra.mxu1 %v8445_v9  ;;  %11602 = vmatprep.mubr.msk.bf16.mxu0 %vm12695_vm10, %v16338_v15 }
 0xdf9   : > { %11612 = vmatprep.subr.bf16.mxu0 %v16338_v15  ;;  %11596 = vmatprep.mubr.msk.bf16.mxu1 %vm12695_vm10, %v16338_v15 }
 0xdfa   : > { %11606 = vmatprep.subr.bf16.mxu1 %v16338_v15 }
 0xdfc   : > { %9207 = vrot.lane.b32.xlu1 %v16385_v4, %s12699_s4 }
 0xe0b   : > { %9159 = vrot.lane.b32.xlu0 %v16386_v50, %s12699_s4 }
 0xe1b   : > { %v7577_v44 = vpop.xlane.xlu1 %7576 }
 0xe1c   : > { %12335 = vrcp.f32 %v7577_v44 }
 0xe1f   : > { %v7583_v43 = vpop.xlane.xlu1 %7582 }
 0xe20   : > { %12337 = vrcp.f32 %v7583_v43 }
 0xe21   : > { %v7574_v26 = vpop.xlane.xlu0 %7573 }
 0xe22   : > { %12339 = vrcp.f32 %v7574_v26 }
 0xe26   : > { %v12336_v40 = vpop.eup %12335 }
 0xe27   : > { %v7671_v0 = vmul.f32 %v12336_v40, %v15548_v61  ;;  %v7589_v51 = vpop.xlane.xlu1 %7588 }
 0xe28   : > { %v7580_v42 = vpop.xlane.xlu0 %7579  ;;  %12341 = vrcp.f32 %v7589_v51 }
 0xe29   : > { %12343 = vrcp.f32 %v7580_v42  ;;  %v7703_v22 = vpack.c.bf16 %v7671_v0, %v7671_v0  ;;  %v16395_v0 = vld [vmem:[#allocation27_spill] sm:$0xff] }
 0xe2a   : > { %v12338_v2 = vpop.eup %12337 }
 0xe2b   : > { %11603 = vmatmul.mubr.msk.bf16.vlgmr.msra.gmra.mrb[240].mxu0 %vm1138_vm9, %v7703_v22  ;;  %v7673_v45 = vmul.f32 %v12338_v2, %v15553_v31  ;;  %v8541_v31 = vsel %vm3110_vm11, %v16389_v20, 0 }
 0xe2c   : > { %11613 = vmatpush3.bf16.msra.mxu0 %v8589_v33  ;;  %11614 = vmatprep.mubr.msk.bf16.mxu0 %vm12695_vm10, %v16338_v15  ;;  %v7586_v61 = vpop.xlane.xlu0 %7585  ;;  %v12340_v52 = vpop.eup %12339 }
 0xe2d   : > { %11624 = vmatprep.subr.bf16.mxu0 %v16338_v15  ;;  %v7670_v53 = vmul.f32 %v12340_v52, %v15559_v1  ;;  %v7705_v36 = vpack.c.bf16 %v7673_v45, %v7673_v45 }
 0xe2f   : > { %v7595_v18 = vpop.xlane.xlu1 %7594  ;;  %v7702_v56 = vpack.c.bf16 %v7670_v53, %v7670_v53 }
 0xe30   : > { %12345 = vrcp.f32 %v7595_v18 }
 0xe31   : > { %12347 = vrcp.f32 %v7586_v61  ;;  %11597 = vmatmul.mubr.msk.bf16.vlgmr.msra.gmra.mrb[244].mxu1 %vm1138_vm9, %v7702_v56  ;;  %v7592_v19 = vpop.xlane.xlu0 %7591  ;;  %v16396_v61 = vld [vmem:[#allocation42_spill] sm:$0xff] }
 0xe32   : > { %v12342_v23 = vpop.eup %12341  ;;  %11607 = vmatpush3.bf16.msra.mxu1 %v8541_v31  ;;  %11608 = vmatprep.mubr.msk.bf16.mxu1 %vm12695_vm10, %v16338_v15  ;;  %v8925_v52 = vsel %vm3110_vm11, %v16396_v61, 0 }
 0xe33   : > { %v12344_v35 = vpop.eup %12343  ;;  %11615 = vmatmul.mubr.msk.bf16.vlgmr.msra.gmra.mrb[244].mxu0 %vm1138_vm9, %v7705_v36  ;;  %v7675_v59 = vmul.f32 %v12342_v23, %v15567_v7  ;;  %11618 = vmatprep.subr.bf16.mxu1 %v16338_v15  ;;  %v9021_v36 = vsel %vm3110_vm11, %v15542_v38, 0 }
 0xe34   : > { %11625 = vmatpush3.bf16.msra.mxu0 %v8685_v24  ;;  %v7672_v1 = vmul.f32 %v12344_v35, %v15572_v30  ;;  %11626 = vmatprep.mubr.msk.bf16.mxu0 %vm12695_vm10, %v16338_v15  ;;  %v16391_v30 = vld [vmem:[#allocation25_spill] sm:$0xff] }
 0xe35   : > { %11636 = vmatprep.subr.bf16.mxu0 %v16338_v15  ;;  %v7707_v21 = vpack.c.bf16 %v7675_v59, %v7675_v59  ;;  %v8637_v6 = vsel %vm3110_vm11, %v16391_v30, 0 }
 0xe36   : > { %v7704_v7 = vpack.c.bf16 %v7672_v1, %v7672_v1 }
 0xe37   : > { %v7601_v10 = vpop.xlane.xlu1 %7600 }
 0xe38   : > { %12349 = vrcp.f32 %v7601_v10 }
 0xe39   : > { %12351 = vrcp.f32 %v7592_v19  ;;  %11609 = vmatmul.mubr.msk.bf16.vlgmr.msra.gmra.mrb[248].mxu1 %vm1138_vm9, %v7704_v7  ;;  %v7598_v41 = vpop.xlane.xlu0 %7597 }
 0xe3a   : > { %v12346_v12 = vpop.eup %12345  ;;  %11619 = vmatpush3.bf16.msra.mxu1 %v8637_v6  ;;  %11620 = vmatprep.mubr.msk.bf16.mxu1 %vm12695_vm10, %v16338_v15 }
 0xe3b   : > { %v12348_v5 = vpop.eup %12347  ;;  %11627 = vmatmul.mubr.msk.bf16.vlgmr.msra.gmra.mrb[248].mxu0 %vm1138_vm9, %v7707_v21  ;;  %v7677_v29 = vmul.f32 %v12346_v12, %v15589_v16  ;;  %11630 = vmatprep.subr.bf16.mxu1 %v16338_v15 }
 0xe3c   : > { %11637 = vmatpush3.bf16.msra.mxu0 %v8781_v25  ;;  %v7674_v32 = vmul.f32 %v12348_v5, %v15580_v58  ;;  %11638 = vmatprep.mubr.msk.bf16.mxu0 %vm12695_vm10, %v16338_v15  ;;  %v16393_v58 = vld [vmem:[#allocation41_spill] sm:$0xff] }
 0xe3d   : > { %11648 = vmatprep.subr.bf16.mxu0 %v16338_v15  ;;  %v7709_v14 = vpack.c.bf16 %v7677_v29, %v7677_v29  ;;  %v8733_v9 = vsel %vm3110_vm11, %v16393_v58, 0 }
 0xe3e   : > { %v7706_v16 = vpack.c.bf16 %v7674_v32, %v7674_v32 }
 0xe3f   : > { %v7607_v17 = vpop.xlane.xlu1 %7606 }
 0xe40   : > { %12353 = vrcp.f32 %v7607_v17 }
 0xe41   : > { %12355 = vrcp.f32 %v7598_v41  ;;  %11621 = vmatmul.mubr.msk.bf16.vlgmr.msra.gmra.mrb[252].mxu1 %vm1138_vm9, %v7706_v16  ;;  %v7604_v4 = vpop.xlane.xlu0 %7603 }
 0xe42   : > { %v12350_v34 = vpop.eup %12349  ;;  %11631 = vmatpush3.bf16.msra.mxu1 %v8733_v9  ;;  %11632 = vmatprep.mubr.msk.bf16.mxu1 %vm12695_vm10, %v16338_v15  ;;  %12357 = vrcp.f32 %v7604_v4 }
 0xe43   : > { %v12352_v46 = vpop.eup %12351  ;;  %11639 = vmatmul.mubr.msk.bf16.vlgmr.msra.gmra.mrb[252].mxu0 %vm1138_vm9, %v7709_v14  ;;  %v7679_v13 = vmul.f32 %v12350_v34, %v15613_v27  ;;  %11642 = vmatprep.subr.bf16.mxu1 %v16338_v15  ;;  %v16394_v27 = vld [vmem:[#allocation44_spill] sm:$0xff]  ;;  %v9112_v23 = vpop.permute.xlu1 %9111 }
 0xe44   : > { %11649 = vmatpush3.bf16.msra.mxu0 %v8877_v63  ;;  %v7676_v39 = vmul.f32 %v12352_v46, %v15603_v37  ;;  %11650 = vmatprep.mubr.msk.bf16.mxu0 %vm12695_vm10, %v16338_v15  ;;  %v8973_v40 = vsel %vm3110_vm11, %v16394_v27, 0  ;;  %v8829_v37 = vsel %vm3110_vm11, %v16395_v0, 0  ;;  %v9117_v35 = vsel %vm3110_vm11, %v9112_v23, 0 }
 0xe45   : > { %11660 = vmatprep.subr.bf16.mxu0 %v16338_v15  ;;  %v7711_v50 = vpack.c.bf16 %v7679_v13, %v7679_v13 }
 0xe46   : > { %v7708_v43 = vpack.c.bf16 %v7676_v39, %v7676_v39 }
 0xe48   : > { %v7610_v51 = vpop.xlane.xlu0 %7609 }
 0xe49   : > { %11633 = vmatmul.mubr.msk.bf16.vlgmr.msra.gmra.mrb[0].mxu1 %vm1138_vm9, %v7708_v43  ;;  %12359 = vrcp.f32 %v7610_v51 }
 0xe4a   : > { %v12354_v44 = vpop.eup %12353  ;;  %11643 = vmatpush3.bf16.msra.mxu1 %v8829_v37  ;;  %11644 = vmatprep.mubr.msk.bf16.mxu1 %vm12695_vm10, %v16338_v15 }
 0xe4b   : > { %v12356_v26 = vpop.eup %12355  ;;  %11651 = vmatmul.mubr.msk.bf16.vlgmr.msra.gmra.mrb[0].mxu0 %vm1138_vm9, %v7711_v50  ;;  %v7681_v42 = vmul.f32 %v12354_v44, %v15636_v48  ;;  %11654 = vmatprep.subr.bf16.mxu1 %v16338_v15 }
 0xe4c   : > { %11661 = vmatpush3.bf16.msra.mxu0 %v8973_v40  ;;  %v7678_v22 = vmul.f32 %v12356_v26, %v15626_v60  ;;  %11662 = vmatprep.mubr.msk.bf16.mxu0 %vm12695_vm10, %v16338_v15  ;;  %v9064_v2 = vpop.permute.xlu0 %9063  ;;  %v12358_v45 = vpop.eup %12357 }
 0xe4d   : > { %11672 = vmatprep.subr.bf16.mxu0 %v16338_v15  ;;  %v7713_v57 = vpack.c.bf16 %v7681_v42, %v7681_v42  ;;  %v9069_v48 = vsel %vm3110_vm11, %v9064_v2, 0  ;;  %v7680_v60 = vmul.f32 %v12358_v45, %v15648_v11 }
 0xe4e   : > { %v7710_v33 = vpack.c.bf16 %v7678_v22, %v7678_v22 }
 0xe4f   : > { %v7712_v18 = vpack.c.bf16 %v7680_v60, %v7680_v60 }
 0xe51   : > { %11645 = vmatmul.mubr.msk.bf16.vlgmr.msra.gmra.mrb[4].mxu1 %vm1138_vm9, %v7710_v33 }
 0xe52   : > { %11655 = vmatpush3.bf16.msra.mxu1 %v8925_v52  ;;  %11656 = vmatprep.mubr.msk.bf16.mxu1 %vm12695_vm10, %v16338_v15 }
 0xe53   : > { %11663 = vmatmul.mubr.msk.bf16.vlgmr.msra.gmra.mrb[4].mxu0 %vm1138_vm9, %v7713_v57  ;;  %11666 = vmatprep.subr.bf16.mxu1 %v16338_v15  ;;  %v12360_v53 = vpop.eup %12359 }
 0xe54   : > { %11673 = vmatpush3.bf16.msra.mxu0 %v9069_v48  ;;  %11674 = vmatprep.mubr.msk.bf16.mxu0 %vm12695_vm10, %v16338_v15  ;;  %v7682_v11 = vmul.f32 %v12360_v53, %v15659_v28 }
 0xe55   : > { %11684 = vmatprep.subr.bf16.mxu0 %v16338_v15 }
 0xe56   : > { %v7714_v56 = vpack.c.bf16 %v7682_v11, %v7682_v11 }
 0xe59   : > { %11657 = vmatmul.mubr.msk.bf16.vlgmr.msra.gmra.mrb[8].mxu1 %vm1138_vm9, %v7712_v18 }
 0xe5a   : > { %11667 = vmatpush3.bf16.msra.mxu1 %v9021_v36  ;;  %11668 = vmatprep.mubr.msk.bf16.mxu1 %vm12695_vm10, %v16338_v15 }
 0xe5b   : > { %11678 = vmatprep.subr.bf16.mxu1 %v16338_v15 }
 0xe61   : > { %11669 = vmatmul.mubr.msk.bf16.vlgmr.msra.gmra.mrb[12].mxu1 %vm1138_vm9, %v7714_v56 }
 0xe62   : > { %11679 = vmatpush3.bf16.msra.mxu1 %v9117_v35  ;;  %11680 = vmatprep.mubr.msk.bf16.mxu1 %vm12695_vm10, %v16338_v15 }
 0xe63   : > { %11690 = vmatprep.subr.bf16.mxu1 %v16338_v15 }
 0xe69   : > { %v15830_v38 = vpop.f32.mrb[208].mxu0 }
 0xe6a   : > { %v11508_v8 = vpop.f32.mrb[209].mxu0 }
 0xe6b   : > { %v7764_v24 = vpop.f32.mrb[210].mxu0 }
 0xe6c   : > { %v11509_v20 = vpop.f32.mrb[211].mxu0 }
 0xe72   : > { %v15832_v28 = vpop.f32.mrb[212].mxu0 }
 0xe73   : > { %v11520_v31 = vpop.f32.mrb[213].mxu0 }
 0xe74   : > { %v7860_v59 = vpop.f32.mrb[214].mxu0  ;;  %v7613_v1 = vpop.xlane.xlu1 %7612 }
 0xe75   : > { %v11521_v19 = vpop.f32.mrb[215].mxu0  ;;  %12361 = vrcp.f32 %v7613_v1  ;;  %v15834_v10 = vpop.f32.mrb[216].mxu1 }
 0xe76   : > { %v11514_v21 = vpop.f32.mrb[217].mxu1 }
 0xe77   : > { %v7812_v12 = vpop.f32.mrb[218].mxu1 }
 0xe78   : > { %v7619_v7 = vpop.xlane.xlu1 %7618  ;;  %v11515_v5 = vpop.f32.mrb[219].mxu1 }
 0xe79   : > { %12363 = vrcp.f32 %v7619_v7 }
 0xe7a   : > { %v15836_v3 = vpop.f32.mrb[216].mxu0 }
 0xe7b   : > { %v11532_v25 = vpop.f32.mrb[217].mxu0 }
 0xe7c   : > { %v7956_v30 = vpop.f32.mrb[218].mxu0  ;;  %v15838_v29 = vpop.f32.mrb[220].mxu1 }
 0xe7d   : > { %v11533_v6 = vpop.f32.mrb[219].mxu0  ;;  %v11526_v41 = vpop.f32.mrb[221].mxu1 }
 0xe7e   : > { %v7908_v14 = vpop.f32.mrb[222].mxu1  ;;  %v7616_v16 = vpop.xlane.xlu0 %7615 }
 0xe7f   : > { %v12362_v32 = vpop.eup %12361  ;;  %v11527_v34 = vpop.f32.mrb[223].mxu1  ;;  %12365 = vrcp.f32 %v7616_v16 }
 0xe80   : > { %v7683_v17 = vmul.f32 %v12362_v32, %v15688_v55  ;;  %v9208_v51 = vpop.permute.xlu1 %9207 }
 0xe82   : > { %v7715_v46 = vpack.c.bf16 %v7683_v17, %v7683_v17  ;;  %v15841_v54 = vpop.f32.mrb[220].mxu0  ;;  %v7622_v13 = vpop.xlane.xlu0 %7621 }
 0xe83   : > { %v11544_v63 = vpop.f32.mrb[221].mxu0  ;;  %v12364_v9 = vpop.eup %12363  ;;  %12367 = vrcp.f32 %v7622_v13 }
 0xe84   : > { %v8052_v58 = vpop.f32.mrb[222].mxu0  ;;  %11675 = vmatmul.mubr.msk.bf16.vlgmr.msra.gmra.mrb[8].mxu0 %vm1138_vm9, %v7715_v46  ;;  %v15846_v4 = vpop.f32.mrb[224].mxu1  ;;  %v7685_v50 = vmul.f32 %v12364_v9, %v15698_v62  ;;  %v9213_v62 = vsel %vm3110_vm11, %v9208_v51, 0 }
 0xe85   : > { %v11545_v39 = vpop.f32.mrb[223].mxu0  ;;  %11686 = vmatprep.mubr.msk.bf16.mxu0 %vm12695_vm10, %v16338_v15  ;;  %v11538_v55 = vpop.f32.mrb[225].mxu1 }
 0xe86   : > { %v8004_v44 = vpop.f32.mrb[226].mxu1  ;;  %v9160_v26 = vpop.permute.xlu0 %9159  ;;  %v7717_v0 = vpack.c.bf16 %v7685_v50, %v7685_v50 }
 0xe87   : > { %v11539_v43 = vpop.f32.mrb[227].mxu1  ;;  %v9165_v27 = vsel %vm3110_vm11, %v9160_v26, 0 }
 0xe88   : > { %11685 = vmatpush3.bf16.msra.mxu0 %v9165_v27 }
 0xe89   : > { %v12366_v40 = vpop.eup %12365 }
 0xe8a   : > { %v7684_v37 = vmul.f32 %v12366_v40, %v15712_v49 }
 0xe8c   : > { %v15851_v42 = vpop.f32.mrb[228].mxu1  ;;  %11687 = vmatmul.mubr.msk.bf16.vlgmr.msra.gmra.mrb[12].mxu0 %vm1138_vm9, %v7717_v0  ;;  %v7716_v22 = vpack.c.bf16 %v7684_v37, %v7684_v37 }
 0xe8d   : > { %v11550_v2 = vpop.f32.mrb[229].mxu1  ;;  %v12368_v57 = vpop.eup %12367 }
 0xe8e   : > { %v8100_v33 = vpop.f32.mrb[230].mxu1  ;;  %11681 = vmatmul.mubr.msk.bf16.vlgmr.msra.gmra.mrb[16].mxu1 %vm1138_vm9, %v7716_v22  ;;  %v7686_v49 = vmul.f32 %v12368_v57, %v15721_v47 }
 0xe8f   : > { %v11551_v45 = vpop.f32.mrb[231].mxu1  ;;  %11691 = vmatpush3.bf16.msra.mxu1 %v9213_v62  ;;  %11692 = vmatprep.mubr.msk.bf16.mxu1 %vm12695_vm10, %v16338_v15 }
 0xe90   : > { %v7718_v48 = vpack.c.bf16 %v7686_v49, %v7686_v49 }
 0xe96   : > { %11693 = vmatmul.mubr.msk.bf16.vlgmr.msra.gmra.mrb[20].mxu1 %vm1138_vm9, %v7718_v48 }
 0xea8   : > { %v8193_v61 = vpop.f32.mrb[232].mxu1 }
 0xea9   : > { %v11562_v52 = vpop.f32.mrb[233].mxu1 }
 0xeaa   : > { %v8196_v60 = vpop.f32.mrb[234].mxu1 }
 0xeab   : > { %v11563_v18 = vpop.f32.mrb[235].mxu1 }
 0xead   : > { %v8145_v53 = vpop.f32.mrb[224].mxu0 }
 0xeae   : > { %v11925_v36 = vpack.i.bf16 %v8193_v61, %v8145_v53  ;;  %v11556_v11 = vpop.f32.mrb[225].mxu0 }
 0xeaf   : > { %v8148_v23 = vpop.f32.mrb[226].mxu0 }
 0xeb0   : > { %11926 = vrot.lane.b32.xlu0 %v11925_v36, %s16397_s27  ;;  %v11557_v56 = vpop.f32.mrb[227].mxu0 }
 0xeb1   : > { %v8289_v35 = vpop.f32.mrb[236].mxu1 }
 0xeb2   : > { %v11574_v8 = vpop.f32.mrb[237].mxu1 }
 0xeb3   : > { %v8292_v24 = vpop.f32.mrb[238].mxu1 }
 0xeb4   : > { %v11575_v15 = vpop.f32.mrb[239].mxu1 }
 0xeb5   : > { %v8241_v20 = vpop.f32.mrb[228].mxu0 }
 0xeb6   : > { %v11930_v47 = vpack.i.bf16 %v8289_v35, %v8241_v20  ;;  %v11568_v31 = vpop.f32.mrb[229].mxu0 }
 0xeb7   : > { %v8244_v59 = vpop.f32.mrb[230].mxu0 }
 0xeb8   : > { %11931 = vrot.lane.b32.xlu1 %v11930_v47, %s16397_s27  ;;  %v11569_v1 = vpop.f32.mrb[231].mxu0 }
 0xec1   : > { %v8337_v19 = vpop.f32.mrb[232].mxu0 }
 0xec2   : > { %v11580_v21 = vpop.f32.mrb[233].mxu0 }
 0xec3   : > { %v8340_v12 = vpop.f32.mrb[234].mxu0 }
 0xec4   : > { %v11581_v7 = vpop.f32.mrb[235].mxu0 }
 0xec9   : > { %v8433_v25 = vpop.f32.mrb[236].mxu0 }
 0xeca   : > { %v8385_v5 = vpop.f32.mrb[240].mxu1  ;;  %v11592_v32 = vpop.f32.mrb[237].mxu0 }
 0xecb   : > { %v11935_v30 = vpack.i.bf16 %v8385_v5, %v8337_v19  ;;  %v11586_v6 = vpop.f32.mrb[241].mxu1  ;;  %v8436_v17 = vpop.f32.mrb[238].mxu0 }
 0xecc   : > { %v8388_v41 = vpop.f32.mrb[242].mxu1  ;;  %v11593_v34 = vpop.f32.mrb[239].mxu0  ;;  %v11996_v17 = vld [vmem:[#allocation11 + $0x18] sm:$0xff]  }
 0xecd   : > { %v11587_v14 = vpop.f32.mrb[243].mxu1  ;;  %11936 = vrot.lane.b32.xlu0 %v11935_v30, %s16397_s27  ;;  %v11995_v30 = vld [vmem:[#allocation11 + $0x10] sm:$0xff]  }
 0xece   : > { %11696 = vmatprep.subr.bf16.mxu0 %v11995_v30 }
 0xecf   : > { %11697 = vmatpush3.bf16.msra.mxu0 %v11995_v30 }
 0xed0   : > { %11698 = vmatprep.subr.bf16.mxu0 %v11996_v17 }
 0xed3   : > { %11699 = vmatpush3.bf16.msra.mxu0 %v11996_v17 }
 0xefe   : > { %v8529_v16 = vpop.f32.mrb[240].mxu0 }
 0xeff   : > { %v11604_v46 = vpop.f32.mrb[241].mxu0 }
 0xf00   : > { %v8532_v63 = vpop.f32.mrb[242].mxu0 }
 0xf01   : > { %v11605_v58 = vpop.f32.mrb[243].mxu0 }
 0xf04   : > { %v8481_v13 = vpop.f32.mrb[244].mxu1 }
 0xf05   : > { %v11940_v55 = vpack.i.bf16 %v8481_v13, %v8433_v25  ;;  %v11598_v50 = vpop.f32.mrb[245].mxu1 }
 0xf06   : > { %v8625_v9 = vpop.f32.mrb[244].mxu0  ;;  %v8484_v43 = vpop.f32.mrb[246].mxu1 }
 0xf07   : > { %v11616_v39 = vpop.f32.mrb[245].mxu0  ;;  %v11599_v27 = vpop.f32.mrb[247].mxu1  ;;  %11941 = vrot.lane.b32.xlu1 %v11940_v55, %s16397_s27 }
 0xf08   : > { %v8628_v44 = vpop.f32.mrb[246].mxu0 }
 0xf09   : > { %v11617_v26 = vpop.f32.mrb[247].mxu0 }
 0xf0c   : > { %v8577_v0 = vpop.f32.mrb[248].mxu1 }
 0xf0d   : > { %v11945_v51 = vpack.i.bf16 %v8577_v0, %v8529_v16  ;;  %v11610_v22 = vpop.f32.mrb[249].mxu1 }
 0xf0e   : > { %v8721_v40 = vpop.f32.mrb[248].mxu0  ;;  %v8580_v57 = vpop.f32.mrb[250].mxu1 }
 0xf0f   : > { %v11628_v37 = vpop.f32.mrb[249].mxu0  ;;  %v11611_v62 = vpop.f32.mrb[251].mxu1  ;;  %11946 = vrot.lane.b32.xlu0 %v11945_v51, %s16398_s11 }
 0xf10   : > { %v8724_v2 = vpop.f32.mrb[250].mxu0 }
 0xf11   : > { %v11629_v33 = vpop.f32.mrb[251].mxu0 }
 0xf14   : > { %v8673_v49 = vpop.f32.mrb[252].mxu1 }
 0xf15   : > { %v11950_v61 = vpack.i.bf16 %v8673_v49, %v8625_v9  ;;  %v11622_v52 = vpop.f32.mrb[253].mxu1  ;;  %v5538_v49 = vlaneseq }
 0xf16   : > { %v8817_v45 = vpop.f32.mrb[252].mxu0  ;;  %v8676_v18 = vpop.f32.mrb[254].mxu1 }
 0xf17   : > { %v11640_v48 = vpop.f32.mrb[253].mxu0  ;;  %v11623_v36 = vpop.f32.mrb[255].mxu1  ;;  %11951 = vrot.lane.b32.xlu1 %v11950_v61, %s16398_s11  ;;  %v5536_v61 = vld [vmem:[%s16400_s19] sm:$0x1]  ;;  %s16415_s19 = sld [smem:[#allocation50_spill]] }
 0xf18   : > { %v8820_v60 = vpop.f32.mrb[254].mxu0  ;;  %v5539_v48 = vshrl.u32 %v5538_v49, 7  ;;  %v5537_v52 = vunpack.c.l.bf16 %v5536_v61  ;;  %v16401_v18 = vld [vmem:[#allocation37_spill] sm:$0xff] }
 0xf19   : > { %v11641_v53 = vpop.f32.mrb[255].mxu0 }
 0xf1a   : > { %v5540_v60 = vsub.s32 0, %v5539_v48  ;;  %v5528_v53 = vunpack.c.l.bf16 %v16401_v18 }
 0xf1c   : > { %v8769_v23 = vpop.f32.mrb[0].mxu1  ;;  %v5541_v36 = vrot.slane %v5537_v52, %v5540_v60 }
 0xf1d   : > { %v11960_v35 = vpack.i.bf16 %v8769_v23, %v8721_v40  ;;  %v11634_v8 = vpop.f32.mrb[1].mxu1  ;;  %v16402_v23 = vld [vmem:[#allocation31_spill] sm:$0xff] }
 0xf1e   : > { %v8913_v11 = vpop.f32.mrb[0].mxu0  ;;  %v8772_v15 = vpop.f32.mrb[2].mxu1 }
 0xf1f   : > { %v11652_v56 = vpop.f32.mrb[1].mxu0  ;;  %v11635_v47 = vpop.f32.mrb[3].mxu1 }
 0xf20   : > { %v8916_v24 = vpop.f32.mrb[2].mxu0  ;;  %v5530_v56 = vunpack.c.l.bf16 %v16402_v23  ;;  %v16403_v47 = vld [vmem:[#allocation40_spill] sm:$0xff] }
 0xf21   : > { %v11653_v20 = vpop.f32.mrb[3].mxu0  ;;  %v5531_v24 = vunpack.c.h.bf16 %v16402_v23 }
 0xf22   : > { %v5544_v8 = vmul.f32 %v5541_v36, %v5530_v56 }
 0xf23   : > { %v5545_v20 = vmul.f32 %v5541_v36, %v5531_v24 }
 0xf24   : > { %v8865_v59 = vpop.f32.mrb[4].mxu1  ;;  %v5556_v15 = vsel %vm610_vm0, %v5544_v8, 0.0 }
 0xf25   : > { %v11970_v1 = vpack.i.bf16 %v8865_v59, %v8817_v45  ;;  %v11646_v19 = vpop.f32.mrb[5].mxu1  ;;  %v5529_v59 = vunpack.c.h.bf16 %v16401_v18 }
 0xf26   : > { %v9009_v31 = vpop.f32.mrb[4].mxu0  ;;  %v8868_v12 = vpop.f32.mrb[6].mxu1 }
 0xf27   : > { %v11664_v21 = vpop.f32.mrb[5].mxu0  ;;  %v11647_v5 = vpop.f32.mrb[7].mxu1 }
 0xf28   : > { %v9012_v7 = vpop.f32.mrb[6].mxu0  ;;  %v16404_v21 = vld [vmem:[#allocation38_spill] sm:$0xff]  ;;  %v5533_v5 = vunpack.c.h.bf16 %v16403_v47 }
 0xf29   : > { %v11665_v25 = vpop.f32.mrb[7].mxu0  ;;  %v5534_v12 = vunpack.c.l.bf16 %v16404_v21  ;;  %v5543_v7 = vmul.f32 %v5541_v36, %v5529_v59 }
 0xf2b   : > { %v5548_v30 = vmul.f32 %v5541_v36, %v5534_v12 }
 0xf2c   : > { %v8961_v6 = vpop.f32.mrb[8].mxu1 }
 0xf2d   : > { %v11955_v32 = vpack.i.bf16 %v8961_v6, %v8913_v11  ;;  %v11658_v41 = vpop.f32.mrb[9].mxu1  ;;  %v5542_v11 = vmul.f32 %v5541_v36, %v5528_v53  ;;  %v5553_v6 = vsel %vm610_vm0, %v5543_v7, 0.0  ;;  %v5568_v17 = vsel %vm610_vm0, %v5548_v30, 0.0 }
 0xf2e   : > { %v8964_v14 = vpop.f32.mrb[10].mxu1  ;;  %v5535_v41 = vunpack.c.h.bf16 %v16404_v21 }
 0xf2f   : > { %v11659_v34 = vpop.f32.mrb[11].mxu1  ;;  %11956 = vrot.lane.b32.xlu0 %v11955_v32, %s16399_s12  ;;  %v5547_v32 = vmul.f32 %v5541_v36, %v5533_v5 }
 0xf30   : > { %v5549_v34 = vmul.f32 %v5541_v36, %v5535_v41 }
 0xf31   : > { %v5565_v14 = vsel %vm610_vm0, %v5547_v32, 0.0 }
 0xf33   : > { %11961 = vrot.lane.b32.xlu0 %v11960_v35, %s16398_s11  ;;  %v5550_v35 = vsel %vm610_vm0, %v5542_v11, 0.0 }
 0xf34   : > { %v9057_v16 = vpop.f32.mrb[12].mxu1 }
 0xf35   : > { %v11965_v46 = vpack.i.bf16 %v9057_v16, %v9009_v31  ;;  %v11670_v63 = vpop.f32.mrb[13].mxu1  ;;  %v5532_v31 = vunpack.c.l.bf16 %v16403_v47  ;;  %v11927_v16 = vpop.permute.xlu0 %11926 }
 0xf36   : > { %v9060_v58 = vpop.f32.mrb[14].mxu1 }
 0xf37   : > { %v11671_v9 = vpop.f32.mrb[15].mxu1  ;;  %11966 = vrot.lane.b32.xlu1 %v11965_v46, %s16399_s12  ;;  %v5546_v19 = vmul.f32 %v5541_v36, %v5532_v31  ;;  %v5571_v46 = vsel %vm610_vm0, %v5549_v34, 0.0  ;;  %v11932_v58 = vpop.permute.xlu1 %11931 }
 0xf39   : > { %v5562_v25 = vsel %vm610_vm0, %v5546_v19, 0.0 }
 0xf3b   : > { %11971 = vrot.lane.b32.xlu1 %v11970_v1, %s16398_s11  ;;  %v5559_v1 = vsel %vm610_vm0, %v5545_v20, 0.0 }
 0xf3f   : > { %v11937_v63 = vpop.permute.xlu0 %11936 }
 0xf40   : > { %v11938_v8 = vunpack.i.l.bf16 %v11937_v63 }
 0xf42   : > { %v9355_v20 = vsel %vm1138_vm9, %v15836_v3, %v11938_v8 }
 0xf57   : > { %v9105_v13 = vpop.f32.mrb[8].mxu0 }
 0xf58   : > { %v11676_v39 = vpop.f32.mrb[9].mxu0 }
 0xf59   : > { %v9108_v55 = vpop.f32.mrb[10].mxu0  ;;  %v11928_v39 = vunpack.i.l.bf16 %v11927_v16 }
 0xf5a   : > { %v11677_v50 = vpop.f32.mrb[11].mxu0 }
 0xf5f   : > { %v9201_v44 = vpop.f32.mrb[12].mxu0 }
 0xf60   : > { %v11688_v43 = vpop.f32.mrb[13].mxu0 }
 0xf61   : > { %v9204_v26 = vpop.f32.mrb[14].mxu0  ;;  %v9153_v27 = vpop.f32.mrb[16].mxu1 }
 0xf62   : > { %v11689_v40 = vpop.f32.mrb[15].mxu0  ;;  %v11975_v0 = vpack.i.bf16 %v9153_v27, %v9105_v13  ;;  %v11682_v37 = vpop.f32.mrb[17].mxu1  ;;  %v11929_v13 = vunpack.i.h.bf16 %v11927_v16  ;;  %v9351_v27 = vsel %vm1138_vm9, %v15830_v38, %v11928_v39 }
 0xf63   : > { %v9156_v51 = vpop.f32.mrb[18].mxu1 }
 0xf64   : > { %v11683_v22 = vpop.f32.mrb[19].mxu1  ;;  %11976 = vrot.lane.b32.xlu0 %v11975_v0, %s16399_s12  ;;  %v9352_v26 = vsel %vm1138_vm9, %v15834_v10, %v11929_v13 }
 0xf69   : > { %v9249_v2 = vpop.f32.mrb[20].mxu1 }
 0xf6a   : > { %v11980_v57 = vpack.i.bf16 %v9249_v2, %v9201_v44  ;;  %v11694_v33 = vpop.f32.mrb[21].mxu1 }
 0xf6b   : > { %v9252_v62 = vpop.f32.mrb[22].mxu1 }
 0xf6c   : > { %v11695_v45 = vpop.f32.mrb[23].mxu1  ;;  %11981 = vrot.lane.b32.xlu1 %v11980_v57, %s16399_s12  ;;  %v11934_v62 = vunpack.i.h.bf16 %v11932_v58 }
 0xf6d   : > { %v11933_v45 = vunpack.i.l.bf16 %v11932_v58  ;;  %v11997_v58 = vld [vmem:[#allocation14 + $0x10] sm:$0xff]  }
 0xf6e   : > { %v9354_v38 = vsel %vm1138_vm9, %v15838_v29, %v11934_v62  ;;  %11708 = vmatprep.subr.bf16.mxu1 %v11997_v58 }
 0xf6f   : > { %v9353_v61 = vsel %vm1138_vm9, %v15832_v28, %v11933_v45  ;;  %11709 = vmatpush3.bf16.msra.mxu1 %v11997_v58 }
 0xf79   : > { %v11942_v44 = vpop.permute.xlu1 %11941 }
 0xf7a   : > { %v11944_v5 = vunpack.i.h.bf16 %v11942_v44 }
 0xf7c   : > { %v9358_v3 = vsel %vm1138_vm9, %v15851_v42, %v11944_v5 }
 0xf81   : > { %v11947_v9 = vpop.permute.xlu0 %11946 }
 0xf82   : > { %v11949_v55 = vunpack.i.h.bf16 %v11947_v9  ;;  %v11948_v50 = vunpack.i.l.bf16 %v11947_v9  ;;  %v11998_v9 = vld [vmem:[#allocation14 + $0x18] sm:$0xff]  }
 0xf83   : > { %5551 = vadd.xlane.f32.xlu0 %v5550_v35  ;;  %v11939_v35 = vunpack.i.h.bf16 %v11937_v63  ;;  %11710 = vmatprep.subr.bf16.mxu1 %v11998_v9 }
 0xf84   : > { %v9360_v37 = vsel %vm4746_vm12, %v9352_v26, %v11949_v55  ;;  %v9359_v51 = vsel %vm4746_vm12, %v9351_v27, %v11948_v50  ;;  %11711 = vmatpush3.bf16.msra.mxu1 %v11998_v9  ;;  %v16405_v27 = vld [vmem:[#allocation29_spill] sm:$0xff] }
 0xf85   : > { %v9356_v28 = vsel %vm1138_vm9, %v15846_v4, %v11939_v35  ;;  %v16412_v35 = vld [vmem:[#allocation39_spill] sm:$0xff] }
 0xf87   : > { %5557 = vadd.xlane.f32.xlu0 %v5556_v15 }
 0xf89   : > { %v11952_v22 = vpop.permute.xlu1 %11951 }
 0xf8a   : > { %v11954_v49 = vunpack.i.h.bf16 %v11952_v22  ;;  %v11953_v48 = vunpack.i.l.bf16 %v11952_v22 }
 0xf8b   : > { %5560 = vadd.xlane.f32.xlu0 %v5559_v1 }
 0xf8c   : > { %v9362_v18 = vsel %vm4746_vm12, %v9354_v38, %v11954_v49  ;;  %v9361_v53 = vsel %vm4746_vm12, %v9353_v61, %v11953_v48 }
 0xf8f   : > { %5563 = vadd.xlane.f32.xlu0 %v5562_v25  ;;  %v11943_v25 = vunpack.i.l.bf16 %v11942_v44 }
 0xf90   : > { %5554 = vadd.xlane.f32.xlu1 %v5553_v6 }
 0xf91   : > { %v9357_v32 = vsel %vm1138_vm9, %v15841_v54, %v11943_v25  ;;  %v10521_v54 = vld [vmem:[#allocation12 + $0x1] ss:$0 sm:$0xff] }
 0xf93   : > { %5569 = vadd.xlane.f32.xlu0 %v5568_v17 }
 0xf94   : > { %5566 = vadd.xlane.f32.xlu1 %v5565_v14 }
 0xf98   : > { %5572 = vadd.xlane.f32.xlu1 %v5571_v46 }
 0xfa1   : > { %v11957_v43 = vpop.permute.xlu0 %11956 }
 0xfa2   : > { %v11959_v40 = vunpack.i.h.bf16 %v11957_v43  ;;  %v11958_v0 = vunpack.i.l.bf16 %v11957_v43 }
 0xfa4   : > { %v9368_v2 = vsel %vm4755_vm13, %v9360_v37, %v11959_v40  ;;  %v9367_v57 = vsel %vm4755_vm13, %v9359_v51, %v11958_v0  ;;  %v16406_v0 = vld [vmem:[#allocation32_spill] sm:$0xff]  ;;  %v16407_v51 = vld [vmem:[#allocation35_spill] sm:$0xff] }
 0xfa5   : > { %v9380_v33 = vpack.c.bf16 %v9368_v2, %v9367_v57  ;;  %v11962_v56 = vpop.permute.xlu0 %11961  ;;  %v16408_v2 = vld [vmem:[#allocation33_spill] sm:$0xff] }
 0xfa6   : > { %v11964_v29 = vunpack.i.h.bf16 %v11962_v56  ;;  %v11963_v24 = vunpack.i.l.bf16 %v11962_v56 }
 0xfa7   : > { %11700 = vmatprep.mubr.msk.bf16.mxu0 %vm610_vm0, %v9380_v33 }
 0xfa8   : > { %v9364_v59 = vsel %vm4746_vm12, %v9356_v28, %v11964_v29  ;;  %v9363_v1 = vsel %vm4746_vm12, %v9355_v20, %v11963_v24  ;;  %v12000_v28 = vld [vmem:[%s16413_s28 + $0x8] sm:$0xff]   ;;  %v15972_v20 = vld [vmem:[%s16246_s8 + $0x1] ss:$0 sm:$0xff] }
 0xfa9   : > { %v11967_v10 = vpop.permute.xlu1 %11966 }
 0xfaa   : > { %v11969_v52 = vunpack.i.h.bf16 %v11967_v10  ;;  %v11968_v60 = vunpack.i.l.bf16 %v11967_v10 }
 0xfac   : > { %v9370_v36 = vsel %vm4755_vm13, %v9362_v18, %v11969_v52  ;;  %v9369_v11 = vsel %vm4755_vm13, %v9361_v53, %v11968_v60  ;;  %v16409_v18 = vld [vmem:[#allocation30_spill] sm:$0xff] }
 0xfad   : > { %v9381_v23 = vpack.c.bf16 %v9370_v36, %v9369_v11  ;;  %v11972_v19 = vpop.permute.xlu1 %11971  ;;  %v16410_v36 = vld [vmem:[#allocation34_spill] sm:$0xff] }
 0xfae   : > { %v11974_v30 = vunpack.i.h.bf16 %v11972_v19  ;;  %v11973_v6 = vunpack.i.l.bf16 %v11972_v19 }
 0xfaf   : > { %11701 = vmatmul.mubr.msk.bf16.vlgmr.msra.gmra.mrb[16].mxu0 %vm610_vm0, %v9381_v23  ;;  %v16411_v23 = vld [vmem:[#allocation36_spill] sm:$0xff] }
 0xfb0   : > { %v9366_v14 = vsel %vm4746_vm12, %v9358_v3, %v11974_v30  ;;  %v9365_v34 = vsel %vm4746_vm12, %v9357_v32, %v11973_v6 }
 0xfd6   : > { %v11977_v15 = vpop.permute.xlu0 %11976 }
 0xfd7   : > { %v11979_v47 = vunpack.i.h.bf16 %v11977_v15  ;;  %v11978_v31 = vunpack.i.l.bf16 %v11977_v15  ;;  %v11999_v15 = vld [vmem:[%s16413_s28] sm:$0xff]  }
 0xfd8   : > { %11720 = vmatprep.subr.bf16.mxu0 %v11999_v15 }
 0xfd9   : > { %v9372_v21 = vsel %vm4755_vm13, %v9364_v59, %v11979_v47  ;;  %v9371_v12 = vsel %vm4755_vm13, %v9363_v1, %v11978_v31  ;;  %11721 = vmatpush3.bf16.msra.mxu0 %v11999_v15 }
 0xfda   : > { %v9382_v7 = vpack.c.bf16 %v9372_v21, %v9371_v12  ;;  %11722 = vmatprep.subr.bf16.mxu0 %v12000_v28 }
 0xfdc   : > { %11704 = vmatprep.mubr.msk.bf16.mxu0 %vm610_vm0, %v9382_v7 }
 0xfdd   : > { %11723 = vmatpush3.bf16.msra.mxu0 %v12000_v28 }
 0xfde   : > { %v11982_v4 = vpop.permute.xlu1 %11981 }
 0xfdf   : > { %v11984_v41 = vunpack.i.h.bf16 %v11982_v4  ;;  %v11983_v17 = vunpack.i.l.bf16 %v11982_v4 }
 0xfe1   : > { %v9374_v16 = vsel %vm4755_vm13, %v9366_v14, %v11984_v41  ;;  %v9373_v46 = vsel %vm4755_vm13, %v9365_v34, %v11983_v17 }
 0xfe2   : > { %v9383_v63 = vpack.c.bf16 %v9374_v16, %v9373_v46 }
 0xfe4   : > { %11705 = vmatmul.mubr.msk.bf16.gmra.mrb[20].mxu0 %vm610_vm0, %v9383_v63 }
0x1082   : > { %v11702_v42 = vpop.f32.mrb[16].mxu0 }
0x1083   : > { %v9450_v13 = vpop.f32.mrb[17].mxu0  ;;  %v9459_v50 = vadd.f32 %v11702_v42, %v10521_v54 }
0x1084   : > { %v9451_v39 = vadd.f32 %v10521_v54, %v9450_v13  ;;  %v11703_v55 = vpop.f32.mrb[18].mxu0 }
0x1085   : > { %v9462_v44 = vadd.f32 %v11703_v55, %v10521_v54  ;;  %v9453_v43 = vpop.f32.mrb[19].mxu0  ;;  %v15937_v57 = vadd.f32 %v9459_v50, %v16408_v2 }
0x1086   : > { %v9454_v26 = vadd.f32 %v10521_v54, %v9453_v43  ;;  %v15931_v37 = vadd.f32 %v9451_v39, %v16406_v0 }
0x1087   : > { %v15928_v40 = vadd.f32 %v9462_v44, %v16405_v27 }
0x1088   : > { %v15934_v22 = vadd.f32 %v9454_v26, %v16407_v51 }
0x1089   : > { %v9495_v62 = vpack.c.bf16 %v15928_v40, %v15937_v57 }
0x108a   : > { %v9494_v33 = vpack.c.bf16 %v15934_v22, %v15931_v37 }
0x108c   : > { %11712 = vmatprep.mubr.msk.bf16.mxu1 %vm610_vm0, %v9494_v33 }
0x108d   : > { %11713 = vmatmul.mubr.msk.bf16.vlgmr.msra.gmra.mrb[24].mxu1 %vm610_vm0, %v9495_v62 }
0x10b7   : > { %v11706_v45 = vpop.f32.mrb[20].mxu0 }
0x10b8   : > { %v9466_v49 = vpop.f32.mrb[21].mxu0  ;;  %v9475_v38 = vadd.f32 %v11706_v45, %v10521_v54 }
0x10b9   : > { %v9467_v48 = vadd.f32 %v10521_v54, %v9466_v49  ;;  %v11707_v10 = vpop.f32.mrb[22].mxu0 }
0x10ba   : > { %v9478_v61 = vadd.f32 %v11707_v10, %v10521_v54  ;;  %v9469_v52 = vpop.f32.mrb[23].mxu0  ;;  %v15955_v8 = vadd.f32 %v9475_v38, %v16412_v35 }
0x10bb   : > { %v9470_v60 = vadd.f32 %v10521_v54, %v9469_v52  ;;  %v15949_v11 = vadd.f32 %v9467_v48, %v16410_v36 }
0x10bc   : > { %v15946_v53 = vadd.f32 %v9478_v61, %v16409_v18 }
0x10bd   : > { %v15952_v56 = vadd.f32 %v9470_v60, %v16411_v23 }
0x10be   : > { %v9497_v24 = vpack.c.bf16 %v15946_v53, %v15955_v8 }
0x10bf   : > { %v9496_v29 = vpack.c.bf16 %v15952_v56, %v15949_v11 }
0x10c1   : > { %11716 = vmatprep.mubr.msk.bf16.mxu1 %vm610_vm0, %v9496_v29 }
0x10c2   : > { %11717 = vmatmul.mubr.msk.bf16.gmra.mrb[28].mxu1 %vm610_vm0, %v9497_v24 }
0x1160   : > { %v11714_v47 = vpop.f32.mrb[24].mxu1 }
0x1161   : > { %v15975_v31 = vadd.f32 %v11714_v47, %v15972_v20  ;;  %v9564_v59 = vpop.f32.mrb[25].mxu1 }
0x1162   : > { %v15978_v1 = vadd.f32 %v15972_v20, %v9564_v59  ;;  %v11715_v19 = vpop.f32.mrb[26].mxu1 }
0x1163   : > { %v15981_v21 = vmul.f32 0.70710677, %v15975_v31  ;;  %v15984_v12 = vadd.f32 %v11715_v19, %v15972_v20  ;;  %v9567_v7 = vpop.f32.mrb[27].mxu1 }
0x1164   : > { %v15987_v5 = vmul.f32 0.70710677, %v15978_v1  ;;  %v15994_v6 = vadd.f32 %v15972_v20, %v9567_v7 }
0x1165   : > { %v9629_v25 = vand.u32 2147483647, %v15981_v21  ;;  %v15991_v30 = vmul.f32 0.70710677, %v15984_v12  ;;  %vm9613_vm10 = vcmp.ge.f32.partialorder %v15981_v21, 0.0 }
0x1166   : > { %v9627_v4 = vand.u32 2147483647, %v15987_v5  ;;  %v15999_v14 = vmul.f32 0.70710677, %v15994_v6  ;;  %vm9611_vm11 = vcmp.ge.f32.partialorder %v15987_v5, 0.0 }
0x1167   : > { %v9637_v3 = vmul.f32 0.3275911, %v9629_v25  ;;  %v9630_v41 = vand.u32 2147483647, %v15991_v30  ;;  %v9741_v54 = vsub.f32 0.0, %v9629_v25  ;;  %vm9614_vm5 = vcmp.ge.f32.partialorder %v15991_v30, 0.0 }
0x1168   : > { %v9635_v32 = vmul.f32 0.3275911, %v9627_v4  ;;  %v9628_v46 = vand.u32 2147483647, %v15999_v14  ;;  %v9739_v42 = vsub.f32 0.0, %v9627_v4  ;;  %vm9612_vm6 = vcmp.ge.f32.partialorder %v15999_v14, 0.0 }
0x1169   : > { %v9645_v17 = vadd.f32 1.0, %v9637_v3  ;;  %v9638_v16 = vmul.f32 0.3275911, %v9630_v41  ;;  %v9749_v39 = vmul.f32 %v9741_v54, %v9629_v25  ;;  %v9742_v55 = vsub.f32 0.0, %v9630_v41 }
0x116a   : > { %v9643_v34 = vadd.f32 1.0, %v9635_v32  ;;  %v9636_v58 = vmul.f32 0.3275911, %v9628_v46  ;;  %v9747_v43 = vmul.f32 %v9739_v42, %v9627_v4  ;;  %v9740_v27 = vsub.f32 0.0, %v9628_v46 }
0x116b   : > { %12369 = vrcp.f32 %v9645_v17  ;;  %v9646_v63 = vadd.f32 1.0, %v9638_v16  ;;  %v9759_v2 = vmul.f32 1.442695, %v9749_v39  ;;  %v9750_v62 = vmul.f32 %v9742_v55, %v9630_v41 }
0x116c   : > { %12371 = vrcp.f32 %v9643_v34  ;;  %v9644_v9 = vadd.f32 1.0, %v9636_v58  ;;  %v9755_v49 = vmul.f32 1.442695, %v9747_v43  ;;  %v9748_v61 = vmul.f32 %v9740_v27, %v9628_v46 }
0x116d   : > { %12373 = vrcp.f32 %v9646_v63  ;;  %v9761_v23 = vmul.f32 1.442695, %v9750_v62  ;;  %v9596_v14 = vmul.f32 0.5, %v15994_v6 }
0x116e   : > { %12375 = vrcp.f32 %v9644_v9  ;;  %v9757_v28 = vmul.f32 1.442695, %v9748_v61 }
0x116f   : > { %12377 = vpow2.f32 %v9759_v2 }
0x1170   : > { %12379 = vpow2.f32 %v9755_v49 }
0x1171   : > { %12381 = vpow2.f32 %v9761_v23 }
0x1172   : > { %12383 = vpow2.f32 %v9757_v28 }
0x1175   : > { %v12370_v13 = vpop.eup %12369 }
0x1176   : > { %v12372_v50 = vpop.eup %12371  ;;  %v9669_v44 = vmul.f32 1.0614054, %v12370_v13 }
0x1177   : > { %v9667_v26 = vmul.f32 1.0614054, %v12372_v50  ;;  %v12374_v51 = vpop.eup %12373 }
0x1178   : > { %v9677_v0 = vadd.f32 -1.4531521, %v9669_v44  ;;  %v9670_v48 = vmul.f32 1.0614054, %v12374_v51  ;;  %v12376_v10 = vpop.eup %12375 }
0x1179   : > { %v9675_v33 = vadd.f32 -1.4531521, %v9667_v26  ;;  %v9668_v18 = vmul.f32 1.0614054, %v12376_v10  ;;  %v12378_v9 = vpop.eup %12377 }
0x117a   : > { %v9685_v45 = vmul.f32 %v12370_v13, %v9677_v0  ;;  %v9678_v60 = vadd.f32 -1.4531521, %v9670_v48  ;;  %v12380_v42 = vpop.eup %12379 }
0x117b   : > { %v9683_v38 = vmul.f32 %v12372_v50, %v9675_v33  ;;  %v9676_v24 = vadd.f32 -1.4531521, %v9668_v18  ;;  %v12382_v2 = vpop.eup %12381  ;;  %v16414_v33 = vmov -1.0  }
0x117c   : > { %v9693_v52 = vadd.f32 1.4214138, %v9685_v45  ;;  %v9686_v29 = vmul.f32 %v12374_v51, %v9678_v60  ;;  %v9621_v62 = vsel %vm9613_vm10, 1.0, %v16414_v33  ;;  %v12384_v48 = vpop.eup %12383  ;;  %v9597_v60 = vmul.f32 0.5, %v15975_v31 }
0x117d   : > { %v9691_v36 = vadd.f32 1.4214138, %v9683_v38  ;;  %v9684_v19 = vmul.f32 %v12376_v10, %v9676_v24  ;;  %v9620_v30 = vsel %vm9612_vm6, 1.0, %v16414_v33  ;;  %vm9982_vm10 = vcmask 1044484  }
0x117e   : > { %v9701_v35 = vmul.f32 %v12370_v13, %v9693_v52  ;;  %v9694_v59 = vadd.f32 1.4214138, %v9686_v29  ;;  %vm9991_vm6 = vcmask 1047559  }
0x117f   : > { %v9699_v15 = vmul.f32 %v12372_v50, %v9691_v36  ;;  %v9692_v3 = vadd.f32 1.4214138, %v9684_v19 }
0x1180   : > { %v9709_v47 = vadd.f32 -0.28449672, %v9701_v35  ;;  %v9702_v4 = vmul.f32 %v12374_v51, %v9694_v59  ;;  %v9595_v35 = vmul.f32 0.5, %v15978_v1 }
0x1181   : > { %v9707_v7 = vadd.f32 -0.28449672, %v9699_v15  ;;  %v9700_v34 = vmul.f32 %v12376_v10, %v9692_v3 }
0x1182   : > { %v9717_v25 = vmul.f32 %v12370_v13, %v9709_v47  ;;  %v9710_v17 = vadd.f32 -0.28449672, %v9702_v4 }
0x1183   : > { %v9715_v32 = vmul.f32 %v12372_v50, %v9707_v7  ;;  %v9708_v58 = vadd.f32 -0.28449672, %v9700_v34 }
0x1184   : > { %v9725_v41 = vadd.f32 0.2548296, %v9717_v25  ;;  %v9718_v63 = vmul.f32 %v12374_v51, %v9710_v17 }
0x1185   : > { %v9723_v16 = vadd.f32 0.2548296, %v9715_v32  ;;  %v9716_v44 = vmul.f32 %v12376_v10, %v9708_v58 }
0x1186   : > { %v9733_v46 = vmul.f32 %v12370_v13, %v9725_v41  ;;  %v9726_v55 = vadd.f32 0.2548296, %v9718_v63  ;;  %v9619_v13 = vsel %vm9611_vm11, 1.0, %v16414_v33  ;;  %vm9985_vm11 = vcmask 1045509  }
0x1187   : > { %v9731_v54 = vmul.f32 %v12372_v50, %v9723_v16  ;;  %v9724_v0 = vadd.f32 0.2548296, %v9716_v44 }
0x1188   : > { %v9773_v39 = vmul.f32 %v12378_v9, %v9733_v46  ;;  %v9734_v27 = vmul.f32 %v12374_v51, %v9726_v55  ;;  %v9622_v51 = vsel %vm9614_vm5, 1.0, %v16414_v33  ;;  %vm9988_vm5 = vcmask 1046534  }
0x1189   : > { %v9771_v43 = vmul.f32 %v12380_v42, %v9731_v54  ;;  %v9732_v50 = vmul.f32 %v12376_v10, %v9724_v0  ;;  %v9598_v10 = vmul.f32 0.5, %v15984_v12 }
0x118a   : > { %v9781_v26 = vsub.f32 1.0, %v9773_v39  ;;  %v9774_v21 = vmul.f32 %v12382_v2, %v9734_v27 }
0x118b   : > { %v9779_v45 = vsub.f32 1.0, %v9771_v43  ;;  %v9772_v52 = vmul.f32 %v12384_v48, %v9732_v50 }
0x118c   : > { %v9789_v49 = vmul.f32 %v9781_v26, %v9621_v62  ;;  %v9782_v61 = vsub.f32 1.0, %v9774_v21 }
0x118d   : > { %v9787_v38 = vmul.f32 %v9779_v45, %v9619_v13  ;;  %v9780_v23 = vsub.f32 1.0, %v9772_v52 }
0x118e   : > { %v9797_v5 = vadd.f32 1.0, %v9789_v49  ;;  %v9790_v36 = vmul.f32 %v9782_v61, %v9622_v51 }
0x118f   : > { %v9795_v18 = vadd.f32 1.0, %v9787_v38  ;;  %v9788_v15 = vmul.f32 %v9780_v23, %v9620_v30 }
0x1190   : > { %v9805_v29 = vmul.f32 %v9797_v5, %v9597_v60  ;;  %v9798_v24 = vadd.f32 1.0, %v9790_v36 }
0x1191   : > { %v9803_v28 = vmul.f32 %v9795_v18, %v9595_v35  ;;  %v9796_v59 = vadd.f32 1.0, %v9788_v15 }
0x1192   : > { %v9806_v47 = vmul.f32 %v9798_v24, %v9598_v10  ;;  %v9813_v31 = vadd.f32 %v9805_v29, %v15937_v57 }
0x1193   : > { %v9804_v25 = vmul.f32 %v9796_v59, %v9596_v14  ;;  %v9811_v32 = vadd.f32 %v9803_v28, %v15931_v37 }
0x1194   : > { %v9814_v7 = vadd.f32 %v9806_v47, %v15928_v40 }
0x1195   : > { %v11718_v19 = vpop.f32.mrb[28].mxu1  ;;  %v9812_v6 = vadd.f32 %v9804_v25, %v15934_v22 }
0x1196   : > { %v16017_v1 = vadd.f32 %v11718_v19, %v15972_v20  ;;  %v9580_v4 = vpop.f32.mrb[29].mxu1  ;;  %v9824_v41 = vpack.c.bf16 %v9814_v7, %v9813_v31 }
0x1197   : > { %v16020_v3 = vadd.f32 %v15972_v20, %v9580_v4  ;;  %v11719_v12 = vpop.f32.mrb[30].mxu1  ;;  %v9823_v63 = vpack.c.bf16 %v9812_v6, %v9811_v32 }
0x1198   : > { %v16025_v17 = vmul.f32 0.70710677, %v16017_v1  ;;  %v9583_v57 = vpop.f32.mrb[31].mxu1  ;;  %v16031_v34 = vadd.f32 %v11719_v12, %v15972_v20 }
0x1199   : > { %v16028_v40 = vmul.f32 0.70710677, %v16020_v3  ;;  %v16034_v16 = vadd.f32 %v15972_v20, %v9583_v57  ;;  %11724 = vmatprep.mubr.msk.bf16.mxu0 %vm610_vm0, %v9823_v63 }
0x119a   : > { %v9633_v46 = vand.u32 2147483647, %v16025_v17  ;;  %v16039_v22 = vmul.f32 0.70710677, %v16031_v34  ;;  %11725 = vmatmul.mubr.msk.bf16.vlgmr.msra.gmra.mrb[24].mxu0 %vm610_vm0, %v9824_v41  ;;  %vm9617_vm7 = vcmp.ge.f32.partialorder %v16025_v17, 0.0 }
0x119b   : > { %v9631_v37 = vand.u32 2147483647, %v16028_v40  ;;  %v16043_v54 = vmul.f32 0.70710677, %v16034_v16  ;;  %vm9615_vm8 = vcmp.ge.f32.partialorder %v16028_v40, 0.0 }
0x119c   : > { %v9641_v58 = vmul.f32 0.3275911, %v9633_v46  ;;  %v9634_v20 = vand.u32 2147483647, %v16039_v22  ;;  %v9745_v0 = vsub.f32 0.0, %v9633_v46  ;;  %vm9618_vm14 = vcmp.ge.f32.partialorder %v16039_v22, 0.0 }
0x119d   : > { %v9639_v9 = vmul.f32 0.3275911, %v9631_v37  ;;  %v9632_v44 = vand.u32 2147483647, %v16043_v54  ;;  %v9743_v2 = vsub.f32 0.0, %v9631_v37  ;;  %vm9616_vm15 = vcmp.ge.f32.partialorder %v16043_v54, 0.0 }
0x119e   : > { %v9649_v42 = vadd.f32 1.0, %v9641_v58  ;;  %v9642_v55 = vmul.f32 0.3275911, %v9634_v20  ;;  %v9753_v13 = vmul.f32 %v9745_v0, %v9633_v46  ;;  %v9746_v45 = vsub.f32 0.0, %v9634_v20 }
0x119f   : > { %v9647_v39 = vadd.f32 1.0, %v9639_v9  ;;  %v9640_v26 = vmul.f32 0.3275911, %v9632_v44  ;;  %v9751_v50 = vmul.f32 %v9743_v2, %v9631_v37  ;;  %v9744_v5 = vsub.f32 0.0, %v9632_v44 }
0x11a0   : > { %12385 = vrcp.f32 %v9649_v42  ;;  %v9650_v43 = vadd.f32 1.0, %v9642_v55  ;;  %v9767_v52 = vmul.f32 1.442695, %v9753_v13  ;;  %v9754_v60 = vmul.f32 %v9746_v45, %v9634_v20 }
0x11a1   : > { %12387 = vrcp.f32 %v9647_v39  ;;  %v9648_v27 = vadd.f32 1.0, %v9640_v26  ;;  %v9763_v36 = vmul.f32 1.442695, %v9751_v50  ;;  %v9752_v24 = vmul.f32 %v9744_v5, %v9632_v44 }
0x11a2   : > { %12389 = vrcp.f32 %v9650_v43  ;;  %v9769_v28 = vmul.f32 1.442695, %v9754_v60  ;;  %v9625_v50 = vsel %vm9617_vm7, 1.0, %v16414_v33  ;;  %vm10113_vm7 = vcmask 31744  }
0x11a3   : > { %12391 = vrcp.f32 %v9648_v27  ;;  %v9765_v4 = vmul.f32 1.442695, %v9752_v24  ;;  %v9602_v24 = vmul.f32 0.5, %v16031_v34 }
0x11a4   : > { %12393 = vpow2.f32 %v9767_v52 }
0x11a5   : > { %12395 = vpow2.f32 %v9763_v36  ;;  %v9601_v36 = vmul.f32 0.5, %v16017_v1 }
0x11a6   : > { %12397 = vpow2.f32 %v9769_v28 }
0x11a7   : > { %12399 = vpow2.f32 %v9765_v4 }
0x11aa   : > { %v12386_v62 = vpop.eup %12385 }
0x11ab   : > { %v12388_v49 = vpop.eup %12387  ;;  %v9673_v21 = vmul.f32 1.0614054, %v12386_v62 }
0x11ac   : > { %v9671_v48 = vmul.f32 1.0614054, %v12388_v49  ;;  %v12390_v61 = vpop.eup %12389 }
0x11ad   : > { %v9681_v38 = vadd.f32 -1.4531521, %v9673_v21  ;;  %v9674_v23 = vmul.f32 1.0614054, %v12390_v61  ;;  %v12392_v30 = vpop.eup %12391 }
0x11ae   : > { %v9679_v51 = vadd.f32 -1.4531521, %v9671_v48  ;;  %v9672_v47 = vmul.f32 1.0614054, %v12392_v30  ;;  %v12394_v39 = vpop.eup %12393 }
0x11af   : > { %v9689_v18 = vmul.f32 %v12386_v62, %v9681_v38  ;;  %v9682_v10 = vadd.f32 -1.4531521, %v9674_v23  ;;  %v12396_v43 = vpop.eup %12395 }
0x11b0   : > { %v9687_v35 = vmul.f32 %v12388_v49, %v9679_v51  ;;  %v9680_v31 = vadd.f32 -1.4531521, %v9672_v47  ;;  %v12398_v21 = vpop.eup %12397 }
0x11b1   : > { %v9697_v29 = vadd.f32 1.4214138, %v9689_v18  ;;  %v9690_v59 = vmul.f32 %v12390_v61, %v9682_v10  ;;  %v12400_v51 = vpop.eup %12399  ;;  %v9626_v18 = vsel %vm9618_vm14, 1.0, %v16414_v33  ;;  %vm10119_vm14 = vcmask 162816  }
0x11b2   : > { %v9695_v15 = vadd.f32 1.4214138, %v9687_v35  ;;  %v9688_v32 = vmul.f32 %v12392_v30, %v9680_v31 }
0x11b3   : > { %v9705_v14 = vmul.f32 %v12386_v62, %v9697_v29  ;;  %v9698_v25 = vadd.f32 1.4214138, %v9690_v59  ;;  %v9600_v59 = vmul.f32 0.5, %v16034_v16 }
0x11b4   : > { %v9703_v19 = vmul.f32 %v12388_v49, %v9695_v15  ;;  %v9696_v46 = vadd.f32 1.4214138, %v9688_v32  ;;  %v9624_v15 = vsel %vm9616_vm15, 1.0, %v16414_v33  ;;  %vm10122_vm15 = vcmask 228352  }
0x11b5   : > { %v9713_v7 = vadd.f32 -0.28449672, %v9705_v14  ;;  %v9706_v6 = vmul.f32 %v12390_v61, %v9698_v25 }
0x11b6   : > { %v9711_v12 = vadd.f32 -0.28449672, %v9703_v19  ;;  %v9704_v9 = vmul.f32 %v12392_v30, %v9696_v46 }
0x11b7   : > { %v9721_v41 = vmul.f32 %v12386_v62, %v9713_v7  ;;  %v9714_v37 = vadd.f32 -0.28449672, %v9706_v6 }
0x11b8   : > { %v9719_v57 = vmul.f32 %v12388_v49, %v9711_v12  ;;  %v9712_v44 = vadd.f32 -0.28449672, %v9704_v9 }
0x11b9   : > { %v9729_v63 = vadd.f32 0.2548296, %v9721_v41  ;;  %v9722_v20 = vmul.f32 %v12390_v61, %v9714_v37 }
0x11ba   : > { %v9727_v58 = vadd.f32 0.2548296, %v9719_v57  ;;  %v9720_v2 = vmul.f32 %v12392_v30, %v9712_v44 }
0x11bb   : > { %v9737_v42 = vmul.f32 %v12386_v62, %v9729_v63  ;;  %v9730_v27 = vadd.f32 0.2548296, %v9722_v20  ;;  %v5555_v20 = vpop.xlane.xlu1 %5554 }
0x11bc   : > { %v9735_v55 = vmul.f32 %v12388_v49, %v9727_v58  ;;  %v9728_v62 = vadd.f32 0.2548296, %v9720_v2  ;;  %v9623_v49 = vsel %vm9615_vm8, 1.0, %v16414_v33  ;;  %v10536_v33 = vld [vmem:[%s16415_s19] ss:$0 sm:$0xff]  ;;  %vm10116_vm8 = vcmask 97280  }
0x11bd   : > { %v9777_v26 = vmul.f32 %v12394_v39, %v9737_v42  ;;  %v9738_v45 = vmul.f32 %v12390_v61, %v9730_v27  ;;  %v5552_v42 = vpop.xlane.xlu0 %5551  ;;  %v10413_v2 = vld [vmem:[#allocation2] ss:$0 sm:$0xff]  ;;  %s16416_s19 = sld [smem:[#allocation51_spill]] }
0x11be   : > { %v9775_v0 = vmul.f32 %v12396_v43, %v9735_v55  ;;  %v9736_v52 = vmul.f32 %v12392_v30, %v9728_v62  ;;  %v9599_v30 = vmul.f32 0.5, %v16020_v3 }
0x11bf   : > { %v9785_v13 = vsub.f32 1.0, %v9777_v26  ;;  %v9778_v5 = vmul.f32 %v12398_v21, %v9738_v45  ;;  %v5567_v55 = vpop.xlane.xlu1 %5566 }
0x11c0   : > { %v9783_v48 = vsub.f32 1.0, %v9775_v0  ;;  %v9776_v61 = vmul.f32 %v12400_v51, %v9736_v52 }
0x11c1   : > { %v9793_v38 = vmul.f32 %v9785_v13, %v9625_v50  ;;  %v9786_v40 = vsub.f32 1.0, %v9778_v5  ;;  %v5558_v39 = vpop.xlane.xlu0 %5557  ;;  %v5582_v13 = vadd.f32 %v10413_v2, %v5555_v20 }
0x11c2   : > { %v9791_v17 = vmul.f32 %v9783_v48, %v9623_v49  ;;  %v9784_v29 = vsub.f32 1.0, %v9776_v61  ;;  %v5583_v48 = vadd.f32 %v10413_v2, %v5558_v39 }
0x11c3   : > { %v9801_v60 = vadd.f32 1.0, %v9793_v38  ;;  %v9794_v23 = vmul.f32 %v9786_v40, %v9626_v18  ;;  %v5573_v43 = vpop.xlane.xlu1 %5572 }
0x11c4   : > { %v9799_v35 = vadd.f32 1.0, %v9791_v17  ;;  %v9792_v28 = vmul.f32 %v9784_v29, %v9624_v15  ;;  %v5581_v17 = vadd.f32 %v10413_v2, %v5552_v42  ;;  %v5586_v29 = vadd.f32 %v10413_v2, %v5567_v55 }
0x11c5   : > { %v9809_v10 = vmul.f32 %v9801_v60, %v9601_v36  ;;  %v9802_v22 = vadd.f32 1.0, %v9794_v23  ;;  %v5561_v44 = vpop.xlane.xlu0 %5560 }
0x11c6   : > { %v9807_v14 = vmul.f32 %v9799_v35, %v9599_v30  ;;  %v9800_v54 = vadd.f32 1.0, %v9792_v28  ;;  %v5584_v62 = vadd.f32 %v10413_v2, %v5561_v44 }
0x11c7   : > { %v9810_v47 = vmul.f32 %v9802_v22, %v9602_v24  ;;  %v9817_v19 = vadd.f32 %v9809_v10, %v15955_v8  ;;  %v16086_v10 = vadd.f32 %v10413_v2, %v5573_v43 }
0x11c8   : > { %v9808_v31 = vmul.f32 %v9800_v54, %v9600_v59  ;;  %v9815_v25 = vadd.f32 %v9807_v14, %v15949_v11 }
0x11c9   : > { %v9818_v1 = vadd.f32 %v9810_v47, %v15946_v53  ;;  %v5564_v27 = vpop.xlane.xlu0 %5563 }
0x11ca   : > { %v9816_v34 = vadd.f32 %v9808_v31, %v15952_v56  ;;  %v5585_v23 = vadd.f32 %v10413_v2, %v5564_v27 }
0x11cb   : > { %v9826_v7 = vpack.c.bf16 %v9818_v1, %v9817_v19 }
0x11cc   : > { %v9825_v4 = vpack.c.bf16 %v9816_v34, %v9815_v25 }
0x11cd   : > { %v5570_v45 = vpop.xlane.xlu0 %5569 }
0x11ce   : > { %11728 = vmatprep.mubr.msk.bf16.mxu0 %vm610_vm0, %v9825_v4  ;;  %v16084_v35 = vadd.f32 %v10413_v2, %v5570_v45 }
0x11cf   : > { %11729 = vmatmul.mubr.msk.bf16.gmra.mrb[28].mxu0 %vm610_vm0, %v9826_v7 }
0x126d   : > { %v11726_v3 = vpop.f32.mrb[24].mxu0 }
0x126e   : > { %v9901_v16 = vadd.f32 %v11726_v3, %v10536_v33  ;;  %v9892_v8 = vpop.f32.mrb[25].mxu0 }
0x126f   : > { %v9893_v12 = vadd.f32 %v10536_v33, %v9892_v8  ;;  %v11727_v53 = vpop.f32.mrb[26].mxu0 }
0x1270   : > { %v9895_v32 = vpop.f32.mrb[27].mxu0  ;;  %9935 = vrot.lane.b32.xlu1 %v9901_v16, %s12703_s30  ;;  %v9904_v11 = vadd.f32 %v11727_v53, %v10536_v33 }
0x1271   : > { %9931 = vrot.lane.b32.xlu0 %v9893_v12, %s12703_s30  ;;  %v9896_v56 = vadd.f32 %v10536_v33, %v9895_v32 }
0x1274   : > { %9937 = vrot.lane.b32.xlu1 %v9904_v11, %s12703_s30 }
0x1278   : > { %9933 = vrot.lane.b32.xlu1 %v9896_v56, %s12703_s30 }
0x12a2   : > { %v11730_v41 = vpop.f32.mrb[28].mxu0 }
0x12a3   : > { %v9908_v6 = vpop.f32.mrb[29].mxu0  ;;  %v9917_v58 = vadd.f32 %v11730_v41, %v10536_v33 }
0x12a4   : > { %v9909_v57 = vadd.f32 %v10536_v33, %v9908_v6  ;;  %v11731_v46 = vpop.f32.mrb[30].mxu0 }
0x12a5   : > { %v9911_v63 = vpop.f32.mrb[31].mxu0  ;;  %v9920_v9 = vadd.f32 %v11731_v46, %v10536_v33 }
0x12a6   : > { %v9912_v37 = vadd.f32 %v10536_v33, %v9911_v63  ;;  %9939 = vrot.lane.b32.xlu0 %v9909_v57, %s12703_s30 }
0x12a8   : > { %9941 = vrot.lane.b32.xlu1 %v9912_v37, %s12703_s30 }
0x12aa   : > { %9943 = vrot.lane.b32.xlu0 %v9917_v58, %s12703_s30 }
0x12ac   : > { %9945 = vrot.lane.b32.xlu1 %v9920_v9, %s12703_s30 }
0x12e2   : > { %v9936_v26 = vpop.permute.xlu1 %9935 }
0x12e3   : > { %v16071_v38 = vsel %vm9955_vm1, %v5583_v48, %v9936_v26  ;;  %v9932_v49 = vpop.permute.xlu0 %9931 }
0x12e4   : > { %v9975_v51 = vrot.slane %v16071_v38, 6  ;;  %v9956_v60 = vsel %vm9955_vm1, %v5581_v17, %v9932_v49  ;;  %v9996_v30 = vrot.slane %v16071_v38, 7  ;;  %v10031_v28 = vrot.slane %v16071_v38, 1 }
0x12e5   : > { %v9994_v59 = vrot.slane %v9956_v60, 1  ;;  %v10011_v54 = vrot.slane %v9956_v60, 2  ;;  %v10045_v19 = vrot.slane %v9956_v60, 4  ;;  %v10062_v1 = vrot.slane %v9956_v60, 5 }
0x12e6   : > { %v9938_v0 = vpop.permute.xlu1 %9937  ;;  %v10048_v31 = vrot.slane %v16071_v38, 2  ;;  %v10028_v7 = vrot.slane %v9956_v60, 3  ;;  %v10079_v25 = vrot.slane %v9956_v60, 6  ;;  %v10065_v8 = vrot.slane %v16071_v38, 3 }
0x12e7   : > { %v16074_v52 = vsel %vm9955_vm1, %v5584_v62, %v9938_v0  ;;  %v10082_v12 = vrot.slane %v16071_v38, 4  ;;  %v10096_v11 = vrot.slane %v9956_v60, 7  ;;  %v10099_v39 = vrot.slane %v16071_v38, 5 }
0x12e8   : > { %v9978_v18 = vrot.slane %v16074_v52, 5  ;;  %v10067_v56 = vrot.slane %v16074_v52, 2  ;;  %v10015_v41 = vrot.slane %v16074_v52, 7  ;;  %v10050_v6 = vrot.slane %v16074_v52, 1 }
0x12e9   : > { %v9998_v58 = vrot.slane %v16074_v52, 6  ;;  %v10084_v55 = vrot.slane %v16074_v52, 3  ;;  %v10101_v44 = vrot.slane %v16074_v52, 4 }
0x12ea   : > { %v9934_v21 = vpop.permute.xlu1 %9933 }
0x12eb   : > { %v9957_v50 = vsel %vm9955_vm1, %v5582_v13, %v9934_v21 }
0x12ec   : > { %v9972_v5 = vrot.slane %v9957_v50, 7  ;;  %v10012_v24 = vrot.slane %v9957_v50, 1  ;;  %v10046_v22 = vrot.slane %v9957_v50, 3  ;;  %v10063_v15 = vrot.slane %v9957_v50, 4 }
0x12ed   : > { %v10029_v47 = vrot.slane %v9957_v50, 2  ;;  %v10080_v14 = vrot.slane %v9957_v50, 5  ;;  %v10097_v34 = vrot.slane %v9957_v50, 6  ;;  %v9995_v16 = vsel %vm9973_vm2, %v9957_v50, %v9994_v59 }
0x12ee   : > { %v9974_v40 = vsel %vm9973_vm2, %v9972_v5, %v9956_v60  ;;  %v10064_v4 = vsel %vm9973_vm2, %v10063_v15, %v10062_v1  ;;  %v10013_v33 = vsel %vm9973_vm2, %v10012_v24, %v10011_v54  ;;  %v10047_v3 = vsel %vm9973_vm2, %v10046_v22, %v10045_v19 }
0x12ef   : > { %v9977_v61 = vsel %vm9976_vm3, %v9975_v51, %v9974_v40  ;;  %v10081_v53 = vsel %vm9973_vm2, %v10080_v14, %v10079_v25  ;;  %v10030_v32 = vsel %vm9973_vm2, %v10029_v47, %v10028_v7  ;;  %v10066_v57 = vsel %vm9976_vm3, %v10065_v8, %v10064_v4 }
0x12f0   : > { %v16082_v36 = vsel %vm9979_vm4, %v9978_v18, %v9977_v61  ;;  %v10014_v46 = vsel %vm9976_vm3, %v16071_v38, %v10013_v33  ;;  %v10049_v63 = vsel %vm9976_vm3, %v10048_v31, %v10047_v3  ;;  %v9997_v37 = vsel %vm9976_vm3, %v9996_v30, %v9995_v16 }
0x12f1   : > { %v10083_v9 = vsel %vm9976_vm3, %v10082_v12, %v10081_v53  ;;  %v10032_v42 = vsel %vm9976_vm3, %v10031_v28, %v10030_v32  ;;  %v10098_v20 = vsel %vm9973_vm2, %v10097_v34, %v10096_v11  ;;  %v10068_v26 = vsel %vm9979_vm4, %v10067_v56, %v10066_v57 }
0x12f2   : > { %v10016_v27 = vsel %vm9979_vm4, %v10015_v41, %v10014_v46  ;;  %v10051_v0 = vsel %vm9979_vm4, %v10050_v6, %v10049_v63  ;;  %v9999_v2 = vsel %vm9979_vm4, %v9998_v58, %v9997_v37  ;;  %v10085_v45 = vsel %vm9979_vm4, %v10084_v55, %v10083_v9 }
0x12f3   : > { %v10033_v21 = vsel %vm9979_vm4, %v16074_v52, %v10032_v42  ;;  %v10100_v50 = vsel %vm9976_vm3, %v10099_v39, %v10098_v20 }
0x12f4   : > { %v10102_v56 = vsel %vm9979_vm4, %v10101_v44, %v10100_v50 }
0x1318   : > { %v9940_v43 = vpop.permute.xlu0 %9939 }
0x1319   : > { %v16119_v13 = vsel %vm9955_vm1, %v5585_v23, %v9940_v43 }
0x131a   : > { %v9942_v48 = vpop.permute.xlu1 %9941  ;;  %v10069_v62 = vrot.slane %v16119_v13, 1  ;;  %v10017_v38 = vrot.slane %v16119_v13, 6  ;;  %v10052_v49 = vsel %vm9982_vm10, %v16119_v13, %v10051_v0  ;;  %v10000_v5 = vrot.slane %v16119_v13, 5 }
0x131b   : > { %v16131_v17 = vsel %vm9955_vm1, %v5586_v29, %v9942_v48  ;;  %v10086_v51 = vrot.slane %v16119_v13, 2  ;;  %v10034_v60 = vrot.slane %v16119_v13, 7  ;;  %v10103_v52 = vrot.slane %v16119_v13, 3 }
0x131c   : > { %v9944_v40 = vpop.permute.xlu0 %9943  ;;  %v10070_v18 = vsel %vm9982_vm10, %v10069_v62, %v10068_v26  ;;  %v10018_v61 = vsel %vm9982_vm10, %v10017_v38, %v10016_v27  ;;  %v10019_v23 = vrot.slane %v16131_v17, 5  ;;  %v10053_v24 = vrot.slane %v16131_v17, 7 }
0x131d   : > { %v9962_v22 = vsel %vm9955_vm1, %v16084_v35, %v9944_v40  ;;  %v10071_v29 = vsel %vm9985_vm11, %v16131_v17, %v10070_v18  ;;  %v10001_v15 = vsel %vm9982_vm10, %v10000_v5, %v9999_v2  ;;  %v10002_v30 = vrot.slane %v16131_v17, 4 }
0x131e   : > { %v9946_v28 = vpop.permute.xlu1 %9945  ;;  %v10072_v47 = vrot.slane %v9962_v22, 7  ;;  %v10020_v14 = vsel %vm9985_vm11, %v10019_v23, %v10018_v61  ;;  %v10021_v59 = vrot.slane %v9962_v22, 4  ;;  %v10054_v54 = vsel %vm9985_vm11, %v10053_v24, %v10052_v49 }
0x131f   : > { %v9963_v19 = vsel %vm9955_vm1, %v16086_v10, %v9946_v28  ;;  %v10055_v1 = vrot.slane %v9962_v22, 6  ;;  %v10003_v35 = vsel %vm9985_vm11, %v10002_v30, %v10001_v15  ;;  %v10004_v31 = vrot.slane %v9962_v22, 3 }
0x1320   : > { %v10073_v7 = vsel %vm9988_vm5, %v10072_v47, %v10071_v29  ;;  %v10074_v25 = vrot.slane %v9963_v19, 6  ;;  %v10022_v34 = vsel %vm9988_vm5, %v10021_v59, %v10020_v14  ;;  %v10023_v4 = vrot.slane %v9963_v19, 3 }
0x1321   : > { %v10056_v33 = vsel %vm9988_vm5, %v10055_v1, %v10054_v54  ;;  %v10057_v3 = vrot.slane %v9963_v19, 5  ;;  %v10005_v16 = vsel %vm9988_vm5, %v10004_v31, %v10003_v35  ;;  %v10006_v8 = vrot.slane %v9963_v19, 2 }
0x1322   : > { %v10075_v12 = vsel %vm9991_vm6, %v10074_v25, %v10073_v7  ;;  %v10024_v10 = vsel %vm9991_vm6, %v10023_v4, %v10022_v34  ;;  %v10087_v53 = vsel %vm9982_vm10, %v10086_v51, %v10085_v45  ;;  %v10088_v32 = vrot.slane %v16131_v17, 1 }
0x1323   : > { %10076 = vrot.lane.b32.xlu0 %v10075_v12, %s12704_s16  ;;  %10025 = vrot.lane.b32.xlu1 %v10024_v10, %s16397_s27  ;;  %v10035_v11 = vsel %vm9982_vm10, %v10034_v60, %v10033_v21  ;;  %v10058_v41 = vsel %vm9991_vm6, %v10057_v3, %v10056_v33  ;;  %v10007_v6 = vsel %vm9991_vm6, %v10006_v8, %v10005_v16  ;;  %v10036_v57 = vrot.slane %v16131_v17, 6  ;;  %s12705_s27 = smov 4   ;;  %s12599_s16 = scalar_lea.vmem %s16195_s1, 128 }
0x1324   : > { %v10038_v46 = vrot.slane %v9962_v22, 5  ;;  %v10089_v63 = vsel %vm9985_vm11, %v10088_v32, %v10087_v53  ;;  %v10091_v37 = vrot.slane %v9963_v19, 7  ;;  %v10104_v58 = vsel %vm9982_vm10, %v10103_v52, %v10102_v56  ;;  %p12600_p6 = scmp.ne.s32.totalorder %s16195_s1, %s12599_s16 }
0x1325   : > { %v10105_v9 = vrot.slane %v16131_v17, 2  ;;  %v10037_v42 = vsel %vm9985_vm11, %v10036_v57, %v10035_v11  ;;  %v10040_v20 = vrot.slane %v9963_v19, 4  ;;  %v9981_v39 = vrot.slane %v16119_v13, 4 }
0x1326   : > { %v9984_v55 = vrot.slane %v16131_v17, 3  ;;  %v10039_v44 = vsel %vm9988_vm5, %v10038_v46, %v10037_v42  ;;  %v10107_v43 = vrot.slane %v9962_v22, 1  ;;  %v9990_v26 = vrot.slane %v9963_v19, 1  ;;  %p12601_p4 = pnand %p12600_p6, %p16417_p9 }
0x1327   : > { %10059 = vrot.lane.b32.xlu1 %v10058_v41, %s16398_s11  ;;  %10008 = vrot.lane.b32.xlu0 %v10007_v6, %s12705_s27  ;;  %v9987_v27 = vrot.slane %v9962_v22, 2  ;;  %v10106_v0 = vsel %vm9985_vm11, %v10105_v9, %v10104_v58  ;;  %v9983_v2 = vsel %vm9982_vm10, %v9981_v39, %v16082_v36  ;;  %v10090_v45 = vsel %vm9988_vm5, %v9962_v22, %v10089_v63  ;;  %s12706_s11 = smov 12   ;;  %s12708_s27 = smov [#allocation15]  }
0x1328   : > { %v9986_v13 = vsel %vm9985_vm11, %v9984_v55, %v9983_v2  ;;  %v10092_v21 = vsel %vm9991_vm6, %v10091_v37, %v10090_v45  ;;  %v10041_v50 = vsel %vm9991_vm6, %v10040_v20, %v10039_v44  ;;  %v10108_v62 = vsel %vm9988_vm5, %v10107_v43, %v10106_v0  ;;  %p12602_p13 = pneg %p12601_p4 }
0x1329   : > { %v9989_v48 = vsel %vm9988_vm5, %v9987_v27, %v9986_v13  ;;  %v10109_v36 = vsel %vm9991_vm6, %v9963_v19, %v10108_v62 }
0x132a   : > { %v9992_v38 = vsel %vm9991_vm6, %v9990_v26, %v9989_v48 }
0x132b   : > { %10093 = vrot.lane.b32.xlu1 %v10092_v21, %s16399_s12  ;;  %10042 = vrot.lane.b32.xlu0 %v10041_v50, %s12706_s11  ;;  %s10544_s12 = sshll.u32 %s12813_s25, 7  ;;  %s10126_s25 = scalar_lea.sflag [#allocation5], %s13048_s17 }
0x132c   : > { %s16193_s30 = scalar_lea.hbm %s16416_s19, %s10544_s12  ;;  %s12603_s11 = sshll.u32 %s12708_s27, 4  ;;  %s12604_s11 = int_to_ptr.vmem [resolvable:$false] %s12603_s11 }
0x132d   : > { %p12606_p1 = scmp.lt.s32.totalorder %s16195_s1, %s12604_s11 }
0x132f   : > { %10110 = vrot.lane.b32.xlu0 %v10109_v36, %s12707_s26  ;;  %s12605_s26 = scalar_lea.vmem %s12604_s11, 256 }
0x1330   : > { %p12607_p3 = scmp.lt.s32.totalorder %s12605_s26, %s12599_s16 }
0x1332   : > { %p12608_p2 = por %p12607_p3, %p12606_p1 }
0x1334   : > { %p12609_p8 = pnand %p12608_p2, %p12602_p13 }
0x1395   : > { %v10077_v49 = vpop.permute.xlu0 %10076  ;;  %v10026_v5 = vpop.permute.xlu1 %10025 }
0x1399   : > { %v10009_v17 = vpop.permute.xlu0 %10008  ;;  %v10060_v51 = vpop.permute.xlu1 %10059 }
0x139a   : > { %v10114_v60 = vsel %vm10113_vm7, %v9992_v38, %v10009_v17 }
0x139b   : > { %v10115_v40 = vsel %vm1138_vm9, %v10114_v60, %v10026_v5 }
0x139d   : > { %v10043_v52 = vpop.permute.xlu0 %10042  ;;  %v10094_v23 = vpop.permute.xlu1 %10093 }
0x139e   : > { %v10117_v18 = vsel %vm10116_vm8, %v10115_v40, %v10043_v52 }
0x139f   : > { %v10118_v61 = vsel %vm4746_vm12, %v10117_v18, %v10060_v51 }
0x13a0   : > { %v10120_v24 = vsel %vm10119_vm14, %v10118_v61, %v10077_v49 }
0x13a1   : > { %v10111_v22 = vpop.permute.xlu0 %10110  ;;  %v10121_v29 = vsel %vm4755_vm13, %v10120_v24, %v10094_v23 }
0x13a2   : > { %v10123_v15 = vsel %vm10122_vm15, %v10121_v29, %v10111_v22 }
0x13a3   : > { %10124 = vst.msk [vmem:[%s597_s24] sm:$0xff] %vm610_vm0, %v10123_v15 }
0x13a4   : > { %12612 = shalt.err (!%p12609_p8)
}
0x13a5   : > { %s12613_s17 = scalar_lea.hbm %s16193_s30, 128  ;;  %s12617_s24 = scalar_lea.hbm %s16416_s19, 256 }
0x13a6   : > { %p12614_p10 = scmp.ne.s32.totalorder %s16193_s30, %s12613_s17  ;;  %p12618_p0 = scmp.lt.u32.totalorder %s16193_s30, %s16416_s19 }
0x13a7   : > { %p12619_p5 = scmp.lt.u32.totalorder %s12617_s24, %s12613_s17  ;;  %p12621_p6 = scmp.lt.u32.totalorder %s12613_s17, %s16193_s30 }
0x13a8   : > { %p12615_p11 = pnand %p12614_p10, %p16417_p9 }
0x13a9   : > { %p12620_p7 = por %p12619_p5, %p12618_p0 }
0x13aa   : > { %p12616_p12 = pneg %p12615_p11 }
0x13ab   : > { %p12622_p4 = por %p12621_p6, %p12620_p7 }
0x13ad   : > { %p12623_p13 = pnand %p12622_p4, %p12616_p12 }
0x13af   : > { %12626 = shalt.err (!%p12623_p13)
}
0x13b0   : > { %11762 = dma.vmem_to_hbm [thread:$0]  (%p16417_p9), %s16195_s1, 128, %s16193_s30, %s10126_s25  }
0x13b1 PF: > { %s10151_s16 = sand.u32 1, %s12665_s20   ;;  %p16418_p1 = scmp.ne.s32.totalorder %s16309_s18, 0 }
0x13b2   : > { %p16419_p3 = scmp.ge.s32.totalorder %s12677_s23, 2  ;;  %s10152_s27 = scalar_lea.sflag [#allocation5], %s10151_s16 }
0x13b4   : > { %p11788_p2 = pnand %p16419_p3, %p16418_p1 }
0x13b6   : > { %12660 = dma.done.wait (!%p11788_p2), %s10152_s27, 128  }
0x13b7   : > { %12662 = vsyncadd (!%p11788_p2), %s10152_s27, 4294967168  ;;  %p33_p8 = scmp.ge.s32.totalorder %s12969_s29, 4   ;;  %s16420_s20 = smov %s12669_s21 }
0x13b8   : > { %s16421_s21 = smov %s12673_s22  ;;  %s16422_s22 = smov %s12980_s10 }
0x13b9   : > { %s16423_s23 = smov %s12969_s29  ;;  %35 = sbr.rel (!%p33_p8) target bundleno = 16 (0x10), region = 155 }
0x13c0   :  { %10157 = vsyncpa [#allocation4], 1 }
0x13c1   :  { %10159 = vsyncpa [#allocation4 + $0x1], 1 }
0x13c2   :  { %10160 = vsyncpa [#allocation7], 1 }
0x13c3   :  { %10161 = vsyncpa [#allocation10], 1 }
0x13c4   :  { %10162 = vsyncpa [#allocation13], 1 }
0x13c5   :  { %10163 = vsyncpa [#allocation5], 1 }
0x13c6   :  { %10165 = vsyncpa [#allocation5 + $0x1], 1 }

</bundles_post_ra>
